<compile_context>
chip_gen: v6e
topology: v6e:2x2x1
jax: 0.10.0
libtpu: 0.0.40
codegen_flags: <defaults>
</compile_context>

<pallas_src>
import jax
import jax.numpy as jnp
from jax import lax
from jax.experimental import pallas as pl
from jax.experimental.pallas import tpu as pltpu


# ----------------------------- Pallas kernel ------------------------------ #
def _fused_local_lstm_kernel(x_ref, h0_ref, c0_ref, wih_ref, whh_ref, b_ref,
                             wlin_ref, blin_ref, out_ref, zw_ref):
    """Whole autoregressive rollout in one kernel.

    x_ref   : (T, B, 1)      observed window (time-major)
    h0/c0   : (B, Hp)        initial state, gate-padded (lanes >= H are zero)
    wih_ref : (1, 4*Hp)      input->gates weights, gate order [i, f, o, g]
    whh_ref : (Hp, 4*Hp)     hidden->gates weights, padded rows/columns
    b_ref   : (1, 4*Hp)      combined LSTM bias (b_ih + b_hh), gate-padded
    wlin_ref: (1, Hp)        linear head weights as a row (num_out == 1)
    blin_ref: (1, 1)         linear head bias
    out_ref : (L, B, 1)      one prediction per autoregressive step
    zw_ref  : (T+L, B, 4*Hp) VMEM scratch: projected-input stream
    """
    T = x_ref.shape[0]
    L = out_ref.shape[0]
    Hp = h0_ref.shape[-1]
    H3 = 3 * Hp

    # Input projection + bias for the whole observed window, hoisted off the
    # serial recurrence (num_inputs == 1 -> VPU broadcast-mul, not a matmul).
    zw_ref[0:T, :, :] = x_ref[...] * wih_ref[...] + b_ref[...]   # (T, B, 4*Hp)

    def _sigmoid(x):
        # One EUP tanh push per element; never lowers to exp + reciprocal.
        return 0.5 * jnp.tanh(0.5 * x) + 0.5

    def make_cell(base):
        def cell(t, hc):
            h, c = hc
            # Only  h @ W_hh  sits on the serial critical path.  whh is read
            # from its VMEM ref right at the dot (a hoisted 256 KiB value
            # would match the whole vreg file and spill h/c/pre/gates).
            pre = zw_ref[base + t] + jnp.dot(
                h, whh_ref[...], preferred_element_type=jnp.float32)  # (B, 4Hp)
            # Gate layout [i, f, o, g]: one fused sigmoid over the first three
            # gate groups, one tanh over the last -> 2 EUP chains per step.
            # Slices are 128-lane-group aligned: no XLU lane shuffles here.
            sg = _sigmoid(pre[:, :H3])
            i_g = sg[:, 0 * Hp:1 * Hp]
            f_g = sg[:, 1 * Hp:2 * Hp]
            o_g = sg[:, 2 * Hp:3 * Hp]
            g_g = jnp.tanh(pre[:, H3:])
            c = f_g * c + i_g * g_g
            h = o_g * jnp.tanh(c)
            return h, c
        return cell

    def outer(j, hc):
        # Full LSTM pass over the length-T window starting at stream offset j.
        h, c = lax.fori_loop(0, T, make_cell(j), hc, unroll=min(T, 8))
        # num_out == 1 head: VPU mul + cross-lane sum instead of an
        # (M=B, K=Hp, N=1) MXU matmul -> no systolic fill/drain per step, and
        # it overlaps with window j+1's first cell once the outer loop is
        # unrolled (it only depends on h, already available).
        pred = (jnp.sum(h * wlin_ref[...], axis=-1, keepdims=True)
                + blin_ref[...])                                      # (B, 1)
        out_ref[j] = pred
        # Feed the prediction back into the stream (newest element of the next
        # window).  Slot T + j always exists (stream length T + L); the final
        # write (j == L - 1) is simply never read.
        zw_ref[T + j] = pred * wih_ref[...] + b_ref[...]
        return (h, c)

    # Outer rollout fully unrolled (L is a small static constant): lets the
    # LLO scheduler interleave step-j epilogue work with window j+1.
    # Final (h, c) is not returned by the module's forward -> stays in VMEM.
    lax.fori_loop(0, L, outer, (h0_ref[...], c0_ref[...]), unroll=True)


# --------------------------- module forward pass -------------------------- #
def local_lstm_forward(X, H, c, target_seq_len, params):
    """Mirrors local_LSTM.forward.  X:(B,T,1)  H,c:(1,B,Hd)  -> (B,L,1)."""
    B, T, I = X.shape
    Hd = params["w_hh"].shape[0]
    O = params["w_lin"].shape[-1]
    assert I == 1 and O == 1, (
        "torch.cat([Z[:,1:], pred.unsqueeze(-1)], 1) semantics require "
        "num_inputs == num_out == 1")

    # Each gate padded to its own 128-lane group (gate k occupies lanes
    # [k*Hp, k*Hp+Hd)); padded weight/bias/state lanes are zero, which keeps
    # padded h/c lanes exactly 0 through the whole rollout (sigmoid(0)=0.5
    # multiplies a zero c / zero g, so nothing leaks).
    # TODO(synk): for Hd <= 32, evaluate packing all 4 gates into one 128-lane
    # group (recurrence matmul N=512 -> 128, whh 256 KiB -> 16 KiB) with
    # static pltpu.roll alignment + lane-masked selects — biggest win on
    # v5e's 128-wide MXUs and keeps the padded-whh footprint flat on v7x's
    # smaller (64 MiB) VMEM; must re-verify the padded-lane invariant.
    Hp = ((Hd + 127) // 128) * 128
    G = 4 * Hp
    L = int(target_seq_len)
    S = T + L                               # projected-input stream length
    pad_h = Hp - Hd

    def regroup(w):
        # (..., 4*Hd) -> (..., 4*Hp), reordered from torch's [i, f, g, o] to
        # [i, f, o, g] so the three sigmoid gates are contiguous in lanes.
        order = (0, 1, 3, 2)
        parts = [w[..., k * Hd:(k + 1) * Hd] for k in order]
        parts = [jnp.pad(p, [(0, 0)] * (w.ndim - 1) + [(0, pad_h)]) for p in parts]
        return jnp.concatenate(parts, axis=-1)

    wih_p = regroup(params["w_ih"])                                   # (1, G)
    whh_p = jnp.pad(regroup(params["w_hh"]), ((0, pad_h), (0, 0)))    # (Hp, G)
    b_p = regroup(params["b"])                                        # (1, G)
    wlin_row = jnp.pad(params["w_lin"].T, ((0, 0), (0, pad_h)))       # (1, Hp)
    blin = params["b_lin"]                                            # (1, 1)

    h0 = jnp.pad(H[0], ((0, 0), (0, pad_h)))                          # (B, Hp)
    c0 = jnp.pad(c[0], ((0, 0), (0, pad_h)))                          # (B, Hp)
    x_t = jnp.transpose(X, (1, 0, 2))                                 # (T, B, 1)

    vmem = pl.BlockSpec(memory_space=pltpu.MemorySpace.VMEM)
    preds = pl.pallas_call(
        _fused_local_lstm_kernel,
        out_shape=jax.ShapeDtypeStruct((L, B, O), jnp.float32),
        in_specs=[vmem] * 8,
        out_specs=vmem,
        scratch_shapes=[pltpu.VMEM((S, B, G), jnp.float32)],
    )(x_t, h0, c0, wih_p, whh_p, b_p, wlin_row, blin)

    # NOTE: the rollout is serial-latency-bound; do NOT shard B=2 across
    # v7x's two TensorCores (no critical-path win, only grid/cross-core
    # overhead).  Only add a "parallel" batch grid axis once B needs
    # multiple M tiles (B >> 8).
    return jnp.transpose(preds, (1, 0, 2))                            # (B, L, O)


# ----------------------------- pure-JAX reference ------------------------- #
def _ref_forward(X, H, c, target_seq_len, params):
    def step(Z, h, cc):
        Hd = h.shape[-1]
        for t in range(Z.shape[1]):
            pre = Z[:, t, :] @ params["w_ih"] + h @ params["w_hh"] + params["b"]
            i_g = jax.nn.sigmoid(pre[:, 0 * Hd:1 * Hd])
            f_g = jax.nn.sigmoid(pre[:, 1 * Hd:2 * Hd])
            g_g = jnp.tanh(pre[:, 2 * Hd:3 * Hd])
            o_g = jax.nn.sigmoid(pre[:, 3 * Hd:4 * Hd])
            cc = f_g * cc + i_g * g_g
            h = o_g * jnp.tanh(cc)
        return h @ params["w_lin"] + params["b_lin"], h, cc

    h, cc, Z = H[0], c[0], X
    preds = []
    pred, h, cc = step(Z, h, cc)
    preds.append(pred)
    for _ in range(1, target_seq_len):
        Z = jnp.concatenate([Z[:, 1:], pred[:, :, None]], axis=1)
        pred, h, cc = step(Z, h, cc)
        preds.append(pred)
    return jnp.stack(preds, axis=1)


# --------------------------------- params --------------------------------- #
def init_params(key, num_inputs, num_hiddens, num_out):
    k = 1.0 / jnp.sqrt(jnp.float32(num_hiddens))
    ks = jax.random.split(key, 6)
    u = lambda kk, shape: jax.random.uniform(kk, shape, jnp.float32, -k, k)
    w_ih = u(ks[0], (num_inputs, 4 * num_hiddens))
    w_hh = u(ks[1], (num_hiddens, 4 * num_hiddens))
    b = u(ks[2], (1, 4 * num_hiddens)) + u(ks[3], (1, 4 * num_hiddens))
    w_lin = u(ks[4], (num_hiddens, num_out))
    b_lin = u(ks[5], (1, num_out))
    return {"w_ih": w_ih, "w_hh": w_hh, "b": b, "w_lin": w_lin, "b_lin": b_lin}


if __name__ == "__main__":
    B, T = 2, 8
    num_inputs, num_hiddens, num_out = 1, 32, 1   # cat semantics require I == O == 1
    target_seq_len = 4

    key = jax.random.PRNGKey(0)
    kp, kx, kh, kc = jax.random.split(key, 4)
    params = init_params(kp, num_inputs, num_hiddens, num_out)

    X = jax.random.normal(kx, (B, T, num_inputs), jnp.float32)
    H = jax.random.normal(kh, (1, B, num_hiddens), jnp.float32)
    c = jax.random.normal(kc, (1, B, num_hiddens), jnp.float32)

    fwd = jax.jit(local_lstm_forward, static_argnums=(3,))
    out = fwd(X, H, c, target_seq_len, params)
    out = jax.block_until_ready(out)

    ref = _ref_forward(X, H, c, target_seq_len, params)
    assert out.shape == (B, target_seq_len, num_out)
    assert jnp.allclose(out, ref, atol=1e-4, rtol=1e-4), (
        float(jnp.max(jnp.abs(out - ref))))

    print("KERNEL_OK")
</pallas_src>

<mosaic_0001>
module attributes {stable_mosaic.version = 11 : i64} {
  func.func @_fused_local_lstm_kernel(%arg0: memref<8x2x1xf32, #tpu.memory_space<vmem>>, %arg1: memref<2x128xf32, #tpu.memory_space<vmem>>, %arg2: memref<2x128xf32, #tpu.memory_space<vmem>>, %arg3: memref<1x512xf32, #tpu.memory_space<vmem>>, %arg4: memref<128x512xf32, #tpu.memory_space<vmem>>, %arg5: memref<1x512xf32, #tpu.memory_space<vmem>>, %arg6: memref<1x128xf32, #tpu.memory_space<vmem>>, %arg7: memref<1x1xf32, #tpu.memory_space<vmem>>, %arg8: memref<4x2x1xf32, #tpu.memory_space<vmem>>, %arg9: memref<12x2x512xf32, #tpu.memory_space<vmem>>) attributes {dimension_semantics = [], scalar_prefetch = 0 : i64, scratch_operands = 1 : i64, tpu.core_type = #tpu.core_type<tc>} {
    %c0 = arith.constant 0 : index
    %c0_0 = arith.constant 0 : index
    %c0_1 = arith.constant 0 : index
    %0 = vector.load %arg0[%c0, %c0_0, %c0_1] : memref<8x2x1xf32, #tpu.memory_space<vmem>>, vector<8x2x1xf32>
    %c0_2 = arith.constant 0 : index
    %c0_3 = arith.constant 0 : index
    %1 = vector.load %arg3[%c0_2, %c0_3] : memref<1x512xf32, #tpu.memory_space<vmem>>, vector<1x512xf32>
    %2 = vector.shape_cast %1 : vector<1x512xf32> to vector<1x1x512xf32>
    %3 = vector.broadcast %0 : vector<8x2x1xf32> to vector<8x2x512xf32>
    %4 = vector.broadcast %2 : vector<1x1x512xf32> to vector<8x2x512xf32>
    %5 = arith.mulf %3, %4 : vector<8x2x512xf32>
    %c0_4 = arith.constant 0 : index
    %c0_5 = arith.constant 0 : index
    %6 = vector.load %arg5[%c0_4, %c0_5] : memref<1x512xf32, #tpu.memory_space<vmem>>, vector<1x512xf32>
    %7 = vector.shape_cast %6 : vector<1x512xf32> to vector<1x1x512xf32>
    %8 = vector.broadcast %7 : vector<1x1x512xf32> to vector<8x2x512xf32>
    %9 = arith.addf %5, %8 : vector<8x2x512xf32>
    %c0_6 = arith.constant 0 : index
    %c0_7 = arith.constant 0 : index
    %c0_8 = arith.constant 0 : index
    %10 = vector.load %arg9[%c0_6, %c0_7, %c0_8] : memref<12x2x512xf32, #tpu.memory_space<vmem>>, vector<8x2x512xf32>
    tpu.vector_store %arg9[%c0_6, %c0_7, %c0_8], %9 {strides = array<i32>} : memref<12x2x512xf32, #tpu.memory_space<vmem>>, vector<8x2x512xf32>,
    %c0_9 = arith.constant 0 : index
    %c0_10 = arith.constant 0 : index
    %11 = vector.load %arg1[%c0_9, %c0_10] : memref<2x128xf32, #tpu.memory_space<vmem>>, vector<2x128xf32>
    %c0_11 = arith.constant 0 : index
    %c0_12 = arith.constant 0 : index
    %12 = vector.load %arg2[%c0_11, %c0_12] : memref<2x128xf32, #tpu.memory_space<vmem>>, vector<2x128xf32>
    %c0_i32 = arith.constant 0 : i32
    %c0_i32_13 = arith.constant 0 : i32
    %13 = arith.addi %c0_i32, %c0_i32_13 : i32
    %14 = arith.index_cast %13 : i32 to index
    %c0_14 = arith.constant 0 : index
    %c0_15 = arith.constant 0 : index
    %15 = vector.load %arg9[%14, %c0_14, %c0_15] : memref<12x2x512xf32, #tpu.memory_space<vmem>>, vector<1x2x512xf32>
    %16 = vector.shape_cast %15 : vector<1x2x512xf32> to vector<2x512xf32>
    %c0_16 = arith.constant 0 : index
    %c0_17 = arith.constant 0 : index
    %17 = vector.load %arg4[%c0_16, %c0_17] : memref<128x512xf32, #tpu.memory_space<vmem>>, vector<128x512xf32>
    %cst = arith.constant dense<0.000000e+00> : vector<2x512xf32>
    %18 = tpu.matmul %11, %17, %cst {dimension_numbers = #tpu.dot_dimension_numbers<[1], [0], [0], [1], [0, 0, 1, 1], [], []>} : vector<2x128xf32>, vector<128x512xf32>, vector<2x512xf32> -> vector<2x512xf32>
    %19 = arith.addf %16, %18 : vector<2x512xf32>
    %20 = vector.extract_strided_slice %19 {offsets = [0, 0], sizes = [2, 384], strides = [1, 1]} : vector<2x512xf32> to vector<2x384xf32>
    %cst_18 = arith.constant 5.000000e-01 : f32
    %21 = vector.broadcast %cst_18 : f32 to vector<2x384xf32>
    %22 = arith.mulf %21, %20 : vector<2x384xf32>
    %23 = math.tanh %22 : vector<2x384xf32>
    %cst_19 = arith.constant 5.000000e-01 : f32
    %24 = vector.broadcast %cst_19 : f32 to vector<2x384xf32>
    %25 = arith.mulf %24, %23 : vector<2x384xf32>
    %cst_20 = arith.constant 5.000000e-01 : f32
    %26 = vector.broadcast %cst_20 : f32 to vector<2x384xf32>
    %27 = arith.addf %25, %26 : vector<2x384xf32>
    %28 = vector.extract_strided_slice %27 {offsets = [0, 0], sizes = [2, 128], strides = [1, 1]} : vector<2x384xf32> to vector<2x128xf32>
    %29 = vector.extract_strided_slice %27 {offsets = [0, 128], sizes = [2, 128], strides = [1, 1]} : vector<2x384xf32> to vector<2x128xf32>
    %30 = vector.extract_strided_slice %27 {offsets = [0, 256], sizes = [2, 128], strides = [1, 1]} : vector<2x384xf32> to vector<2x128xf32>
    %31 = vector.extract_strided_slice %19 {offsets = [0, 384], sizes = [2, 128], strides = [1, 1]} : vector<2x512xf32> to vector<2x128xf32>
    %32 = math.tanh %31 : vector<2x128xf32>
    %33 = arith.mulf %29, %12 : vector<2x128xf32>
    %34 = arith.mulf %28, %32 : vector<2x128xf32>
    %35 = arith.addf %33, %34 : vector<2x128xf32>
    %36 = math.tanh %35 : vector<2x128xf32>
    %37 = arith.mulf %30, %36 : vector<2x128xf32>
    %c1_i32 = arith.constant 1 : i32
    %38 = arith.addi %c0_i32, %c1_i32 : i32
    %39 = arith.index_cast %38 : i32 to index
    %c0_21 = arith.constant 0 : index
    %c0_22 = arith.constant 0 : index
    %40 = vector.load %arg9[%39, %c0_21, %c0_22] : memref<12x2x512xf32, #tpu.memory_space<vmem>>, vector<1x2x512xf32>
    %41 = vector.shape_cast %40 : vector<1x2x512xf32> to vector<2x512xf32>
    %c0_23 = arith.constant 0 : index
    %c0_24 = arith.constant 0 : index
    %42 = vector.load %arg4[%c0_23, %c0_24] : memref<128x512xf32, #tpu.memory_space<vmem>>, vector<128x512xf32>
    %cst_25 = arith.constant dense<0.000000e+00> : vector<2x512xf32>
    %43 = tpu.matmul %37, %42, %cst_25 {dimension_numbers = #tpu.dot_dimension_numbers<[1], [0], [0], [1], [0, 0, 1, 1], [], []>} : vector<2x128xf32>, vector<128x512xf32>, vector<2x512xf32> -> vector<2x512xf32>
    %44 = arith.addf %41, %43 : vector<2x512xf32>
    %45 = vector.extract_strided_slice %44 {offsets = [0, 0], sizes = [2, 384], strides = [1, 1]} : vector<2x512xf32> to vector<2x384xf32>
    %cst_26 = arith.constant 5.000000e-01 : f32
    %46 = vector.broadcast %cst_26 : f32 to vector<2x384xf32>
    %47 = arith.mulf %46, %45 : vector<2x384xf32>
    %48 = math.tanh %47 : vector<2x384xf32>
    %cst_27 = arith.constant 5.000000e-01 : f32
    %49 = vector.broadcast %cst_27 : f32 to vector<2x384xf32>
    %50 = arith.mulf %49, %48 : vector<2x384xf32>
    %cst_28 = arith.constant 5.000000e-01 : f32
    %51 = vector.broadcast %cst_28 : f32 to vector<2x384xf32>
    %52 = arith.addf %50, %51 : vector<2x384xf32>
    %53 = vector.extract_strided_slice %52 {offsets = [0, 0], sizes = [2, 128], strides = [1, 1]} : vector<2x384xf32> to vector<2x128xf32>
    %54 = vector.extract_strided_slice %52 {offsets = [0, 128], sizes = [2, 128], strides = [1, 1]} : vector<2x384xf32> to vector<2x128xf32>
    %55 = vector.extract_strided_slice %52 {offsets = [0, 256], sizes = [2, 128], strides = [1, 1]} : vector<2x384xf32> to vector<2x128xf32>
    %56 = vector.extract_strided_slice %44 {offsets = [0, 384], sizes = [2, 128], strides = [1, 1]} : vector<2x512xf32> to vector<2x128xf32>
    %57 = math.tanh %56 : vector<2x128xf32>
    %58 = arith.mulf %54, %35 : vector<2x128xf32>
    %59 = arith.mulf %53, %57 : vector<2x128xf32>
    %60 = arith.addf %58, %59 : vector<2x128xf32>
    %61 = math.tanh %60 : vector<2x128xf32>
    %62 = arith.mulf %55, %61 : vector<2x128xf32>
    %c2_i32 = arith.constant 2 : i32
    %63 = arith.addi %c0_i32, %c2_i32 : i32
    %64 = arith.index_cast %63 : i32 to index
    %c0_29 = arith.constant 0 : index
    %c0_30 = arith.constant 0 : index
    %65 = vector.load %arg9[%64, %c0_29, %c0_30] : memref<12x2x512xf32, #tpu.memory_space<vmem>>, vector<1x2x512xf32>
    %66 = vector.shape_cast %65 : vector<1x2x512xf32> to vector<2x512xf32>
    %c0_31 = arith.constant 0 : index
    %c0_32 = arith.constant 0 : index
    %67 = vector.load %arg4[%c0_31, %c0_32] : memref<128x512xf32, #tpu.memory_space<vmem>>, vector<128x512xf32>
    %cst_33 = arith.constant dense<0.000000e+00> : vector<2x512xf32>
    %68 = tpu.matmul %62, %67, %cst_33 {dimension_numbers = #tpu.dot_dimension_numbers<[1], [0], [0], [1], [0, 0, 1, 1], [], []>} : vector<2x128xf32>, vector<128x512xf32>, vector<2x512xf32> -> vector<2x512xf32>
    %69 = arith.addf %66, %68 : vector<2x512xf32>
    %70 = vector.extract_strided_slice %69 {offsets = [0, 0], sizes = [2, 384], strides = [1, 1]} : vector<2x512xf32> to vector<2x384xf32>
    %cst_34 = arith.constant 5.000000e-01 : f32
    %71 = vector.broadcast %cst_34 : f32 to vector<2x384xf32>
    %72 = arith.mulf %71, %70 : vector<2x384xf32>
    %73 = math.tanh %72 : vector<2x384xf32>
    %cst_35 = arith.constant 5.000000e-01 : f32
    %74 = vector.broadcast %cst_35 : f32 to vector<2x384xf32>
    %75 = arith.mulf %74, %73 : vector<2x384xf32>
    %cst_36 = arith.constant 5.000000e-01 : f32
    %76 = vector.broadcast %cst_36 : f32 to vector<2x384xf32>
    %77 = arith.addf %75, %76 : vector<2x384xf32>
    %78 = vector.extract_strided_slice %77 {offsets = [0, 0], sizes = [2, 128], strides = [1, 1]} : vector<2x384xf32> to vector<2x128xf32>
    %79 = vector.extract_strided_slice %77 {offsets = [0, 128], sizes = [2, 128], strides = [1, 1]} : vector<2x384xf32> to vector<2x128xf32>
    %80 = vector.extract_strided_slice %77 {offsets = [0, 256], sizes = [2, 128], strides = [1, 1]} : vector<2x384xf32> to vector<2x128xf32>
    %81 = vector.extract_strided_slice %69 {offsets = [0, 384], sizes = [2, 128], strides = [1, 1]} : vector<2x512xf32> to vector<2x128xf32>
    %82 = math.tanh %81 : vector<2x128xf32>
    %83 = arith.mulf %79, %60 : vector<2x128xf32>
    %84 = arith.mulf %78, %82 : vector<2x128xf32>
    %85 = arith.addf %83, %84 : vector<2x128xf32>
    %86 = math.tanh %85 : vector<2x128xf32>
    %87 = arith.mulf %80, %86 : vector<2x128xf32>
    %c3_i32 = arith.constant 3 : i32
    %88 = arith.addi %c0_i32, %c3_i32 : i32
    %89 = arith.index_cast %88 : i32 to index
    %c0_37 = arith.constant 0 : index
    %c0_38 = arith.constant 0 : index
    %90 = vector.load %arg9[%89, %c0_37, %c0_38] : memref<12x2x512xf32, #tpu.memory_space<vmem>>, vector<1x2x512xf32>
    %91 = vector.shape_cast %90 : vector<1x2x512xf32> to vector<2x512xf32>
    %c0_39 = arith.constant 0 : index
    %c0_40 = arith.constant 0 : index
    %92 = vector.load %arg4[%c0_39, %c0_40] : memref<128x512xf32, #tpu.memory_space<vmem>>, vector<128x512xf32>
    %cst_41 = arith.constant dense<0.000000e+00> : vector<2x512xf32>
    %93 = tpu.matmul %87, %92, %cst_41 {dimension_numbers = #tpu.dot_dimension_numbers<[1], [0], [0], [1], [0, 0, 1, 1], [], []>} : vector<2x128xf32>, vector<128x512xf32>, vector<2x512xf32> -> vector<2x512xf32>
    %94 = arith.addf %91, %93 : vector<2x512xf32>
    %95 = vector.extract_strided_slice %94 {offsets = [0, 0], sizes = [2, 384], strides = [1, 1]} : vector<2x512xf32> to vector<2x384xf32>
    %cst_42 = arith.constant 5.000000e-01 : f32
    %96 = vector.broadcast %cst_42 : f32 to vector<2x384xf32>
    %97 = arith.mulf %96, %95 : vector<2x384xf32>
    %98 = math.tanh %97 : vector<2x384xf32>
    %cst_43 = arith.constant 5.000000e-01 : f32
    %99 = vector.broadcast %cst_43 : f32 to vector<2x384xf32>
    %100 = arith.mulf %99, %98 : vector<2x384xf32>
    %cst_44 = arith.constant 5.000000e-01 : f32
    %101 = vector.broadcast %cst_44 : f32 to vector<2x384xf32>
    %102 = arith.addf %100, %101 : vector<2x384xf32>
    %103 = vector.extract_strided_slice %102 {offsets = [0, 0], sizes = [2, 128], strides = [1, 1]} : vector<2x384xf32> to vector<2x128xf32>
    %104 = vector.extract_strided_slice %102 {offsets = [0, 128], sizes = [2, 128], strides = [1, 1]} : vector<2x384xf32> to vector<2x128xf32>
    %105 = vector.extract_strided_slice %102 {offsets = [0, 256], sizes = [2, 128], strides = [1, 1]} : vector<2x384xf32> to vector<2x128xf32>
    %106 = vector.extract_strided_slice %94 {offsets = [0, 384], sizes = [2, 128], strides = [1, 1]} : vector<2x512xf32> to vector<2x128xf32>
    %107 = math.tanh %106 : vector<2x128xf32>
    %108 = arith.mulf %104, %85 : vector<2x128xf32>
    %109 = arith.mulf %103, %107 : vector<2x128xf32>
    %110 = arith.addf %108, %109 : vector<2x128xf32>
    %111 = math.tanh %110 : vector<2x128xf32>
    %112 = arith.mulf %105, %111 : vector<2x128xf32>
    %c4_i32 = arith.constant 4 : i32
    %113 = arith.addi %c0_i32, %c4_i32 : i32
    %114 = arith.index_cast %113 : i32 to index
    %c0_45 = arith.constant 0 : index
    %c0_46 = arith.constant 0 : index
    %115 = vector.load %arg9[%114, %c0_45, %c0_46] : memref<12x2x512xf32, #tpu.memory_space<vmem>>, vector<1x2x512xf32>
    %116 = vector.shape_cast %115 : vector<1x2x512xf32> to vector<2x512xf32>
    %c0_47 = arith.constant 0 : index
    %c0_48 = arith.constant 0 : index
    %117 = vector.load %arg4[%c0_47, %c0_48] : memref<128x512xf32, #tpu.memory_space<vmem>>, vector<128x512xf32>
    %cst_49 = arith.constant dense<0.000000e+00> : vector<2x512xf32>
    %118 = tpu.matmul %112, %117, %cst_49 {dimension_numbers = #tpu.dot_dimension_numbers<[1], [0], [0], [1], [0, 0, 1, 1], [], []>} : vector<2x128xf32>, vector<128x512xf32>, vector<2x512xf32> -> vector<2x512xf32>
    %119 = arith.addf %116, %118 : vector<2x512xf32>
    %120 = vector.extract_strided_slice %119 {offsets = [0, 0], sizes = [2, 384], strides = [1, 1]} : vector<2x512xf32> to vector<2x384xf32>
    %cst_50 = arith.constant 5.000000e-01 : f32
    %121 = vector.broadcast %cst_50 : f32 to vector<2x384xf32>
    %122 = arith.mulf %121, %120 : vector<2x384xf32>
    %123 = math.tanh %122 : vector<2x384xf32>
    %cst_51 = arith.constant 5.000000e-01 : f32
    %124 = vector.broadcast %cst_51 : f32 to vector<2x384xf32>
    %125 = arith.mulf %124, %123 : vector<2x384xf32>
    %cst_52 = arith.constant 5.000000e-01 : f32
    %126 = vector.broadcast %cst_52 : f32 to vector<2x384xf32>
    %127 = arith.addf %125, %126 : vector<2x384xf32>
    %128 = vector.extract_strided_slice %127 {offsets = [0, 0], sizes = [2, 128], strides = [1, 1]} : vector<2x384xf32> to vector<2x128xf32>
    %129 = vector.extract_strided_slice %127 {offsets = [0, 128], sizes = [2, 128], strides = [1, 1]} : vector<2x384xf32> to vector<2x128xf32>
    %130 = vector.extract_strided_slice %127 {offsets = [0, 256], sizes = [2, 128], strides = [1, 1]} : vector<2x384xf32> to vector<2x128xf32>
    %131 = vector.extract_strided_slice %119 {offsets = [0, 384], sizes = [2, 128], strides = [1, 1]} : vector<2x512xf32> to vector<2x128xf32>
    %132 = math.tanh %131 : vector<2x128xf32>
    %133 = arith.mulf %129, %110 : vector<2x128xf32>
    %134 = arith.mulf %128, %132 : vector<2x128xf32>
    %135 = arith.addf %133, %134 : vector<2x128xf32>
    %136 = math.tanh %135 : vector<2x128xf32>
    %137 = arith.mulf %130, %136 : vector<2x128xf32>
    %c5_i32 = arith.constant 5 : i32
    %138 = arith.addi %c0_i32, %c5_i32 : i32
    %139 = arith.index_cast %138 : i32 to index
    %c0_53 = arith.constant 0 : index
    %c0_54 = arith.constant 0 : index
    %140 = vector.load %arg9[%139, %c0_53, %c0_54] : memref<12x2x512xf32, #tpu.memory_space<vmem>>, vector<1x2x512xf32>
    %141 = vector.shape_cast %140 : vector<1x2x512xf32> to vector<2x512xf32>
    %c0_55 = arith.constant 0 : index
    %c0_56 = arith.constant 0 : index
    %142 = vector.load %arg4[%c0_55, %c0_56] : memref<128x512xf32, #tpu.memory_space<vmem>>, vector<128x512xf32>
    %cst_57 = arith.constant dense<0.000000e+00> : vector<2x512xf32>
    %143 = tpu.matmul %137, %142, %cst_57 {dimension_numbers = #tpu.dot_dimension_numbers<[1], [0], [0], [1], [0, 0, 1, 1], [], []>} : vector<2x128xf32>, vector<128x512xf32>, vector<2x512xf32> -> vector<2x512xf32>
    %144 = arith.addf %141, %143 : vector<2x512xf32>
    %145 = vector.extract_strided_slice %144 {offsets = [0, 0], sizes = [2, 384], strides = [1, 1]} : vector<2x512xf32> to vector<2x384xf32>
    %cst_58 = arith.constant 5.000000e-01 : f32
    %146 = vector.broadcast %cst_58 : f32 to vector<2x384xf32>
    %147 = arith.mulf %146, %145 : vector<2x384xf32>
    %148 = math.tanh %147 : vector<2x384xf32>
    %cst_59 = arith.constant 5.000000e-01 : f32
    %149 = vector.broadcast %cst_59 : f32 to vector<2x384xf32>
    %150 = arith.mulf %149, %148 : vector<2x384xf32>
    %cst_60 = arith.constant 5.000000e-01 : f32
    %151 = vector.broadcast %cst_60 : f32 to vector<2x384xf32>
    %152 = arith.addf %150, %151 : vector<2x384xf32>
    %153 = vector.extract_strided_slice %152 {offsets = [0, 0], sizes = [2, 128], strides = [1, 1]} : vector<2x384xf32> to vector<2x128xf32>
    %154 = vector.extract_strided_slice %152 {offsets = [0, 128], sizes = [2, 128], strides = [1, 1]} : vector<2x384xf32> to vector<2x128xf32>
    %155 = vector.extract_strided_slice %152 {offsets = [0, 256], sizes = [2, 128], strides = [1, 1]} : vector<2x384xf32> to vector<2x128xf32>
    %156 = vector.extract_strided_slice %144 {offsets = [0, 384], sizes = [2, 128], strides = [1, 1]} : vector<2x512xf32> to vector<2x128xf32>
    %157 = math.tanh %156 : vector<2x128xf32>
    %158 = arith.mulf %154, %135 : vector<2x128xf32>
    %159 = arith.mulf %153, %157 : vector<2x128xf32>
    %160 = arith.addf %158, %159 : vector<2x128xf32>
    %161 = math.tanh %160 : vector<2x128xf32>
    %162 = arith.mulf %155, %161 : vector<2x128xf32>
    %c6_i32 = arith.constant 6 : i32
    %163 = arith.addi %c0_i32, %c6_i32 : i32
    %164 = arith.index_cast %163 : i32 to index
    %c0_61 = arith.constant 0 : index
    %c0_62 = arith.constant 0 : index
    %165 = vector.load %arg9[%164, %c0_61, %c0_62] : memref<12x2x512xf32, #tpu.memory_space<vmem>>, vector<1x2x512xf32>
    %166 = vector.shape_cast %165 : vector<1x2x512xf32> to vector<2x512xf32>
    %c0_63 = arith.constant 0 : index
    %c0_64 = arith.constant 0 : index
    %167 = vector.load %arg4[%c0_63, %c0_64] : memref<128x512xf32, #tpu.memory_space<vmem>>, vector<128x512xf32>
    %cst_65 = arith.constant dense<0.000000e+00> : vector<2x512xf32>
    %168 = tpu.matmul %162, %167, %cst_65 {dimension_numbers = #tpu.dot_dimension_numbers<[1], [0], [0], [1], [0, 0, 1, 1], [], []>} : vector<2x128xf32>, vector<128x512xf32>, vector<2x512xf32> -> vector<2x512xf32>
    %169 = arith.addf %166, %168 : vector<2x512xf32>
    %170 = vector.extract_strided_slice %169 {offsets = [0, 0], sizes = [2, 384], strides = [1, 1]} : vector<2x512xf32> to vector<2x384xf32>
    %cst_66 = arith.constant 5.000000e-01 : f32
    %171 = vector.broadcast %cst_66 : f32 to vector<2x384xf32>
    %172 = arith.mulf %171, %170 : vector<2x384xf32>
    %173 = math.tanh %172 : vector<2x384xf32>
    %cst_67 = arith.constant 5.000000e-01 : f32
    %174 = vector.broadcast %cst_67 : f32 to vector<2x384xf32>
    %175 = arith.mulf %174, %173 : vector<2x384xf32>
    %cst_68 = arith.constant 5.000000e-01 : f32
    %176 = vector.broadcast %cst_68 : f32 to vector<2x384xf32>
    %177 = arith.addf %175, %176 : vector<2x384xf32>
    %178 = vector.extract_strided_slice %177 {offsets = [0, 0], sizes = [2, 128], strides = [1, 1]} : vector<2x384xf32> to vector<2x128xf32>
    %179 = vector.extract_strided_slice %177 {offsets = [0, 128], sizes = [2, 128], strides = [1, 1]} : vector<2x384xf32> to vector<2x128xf32>
    %180 = vector.extract_strided_slice %177 {offsets = [0, 256], sizes = [2, 128], strides = [1, 1]} : vector<2x384xf32> to vector<2x128xf32>
    %181 = vector.extract_strided_slice %169 {offsets = [0, 384], sizes = [2, 128], strides = [1, 1]} : vector<2x512xf32> to vector<2x128xf32>
    %182 = math.tanh %181 : vector<2x128xf32>
    %183 = arith.mulf %179, %160 : vector<2x128xf32>
    %184 = arith.mulf %178, %182 : vector<2x128xf32>
    %185 = arith.addf %183, %184 : vector<2x128xf32>
    %186 = math.tanh %185 : vector<2x128xf32>
    %187 = arith.mulf %180, %186 : vector<2x128xf32>
    %c7_i32 = arith.constant 7 : i32
    %188 = arith.addi %c0_i32, %c7_i32 : i32
    %189 = arith.index_cast %188 : i32 to index
    %c0_69 = arith.constant 0 : index
    %c0_70 = arith.constant 0 : index
    %190 = vector.load %arg9[%189, %c0_69, %c0_70] : memref<12x2x512xf32, #tpu.memory_space<vmem>>, vector<1x2x512xf32>
    %191 = vector.shape_cast %190 : vector<1x2x512xf32> to vector<2x512xf32>
    %c0_71 = arith.constant 0 : index
    %c0_72 = arith.constant 0 : index
    %192 = vector.load %arg4[%c0_71, %c0_72] : memref<128x512xf32, #tpu.memory_space<vmem>>, vector<128x512xf32>
    %cst_73 = arith.constant dense<0.000000e+00> : vector<2x512xf32>
    %193 = tpu.matmul %187, %192, %cst_73 {dimension_numbers = #tpu.dot_dimension_numbers<[1], [0], [0], [1], [0, 0, 1, 1], [], []>} : vector<2x128xf32>, vector<128x512xf32>, vector<2x512xf32> -> vector<2x512xf32>
    %194 = arith.addf %191, %193 : vector<2x512xf32>
    %195 = vector.extract_strided_slice %194 {offsets = [0, 0], sizes = [2, 384], strides = [1, 1]} : vector<2x512xf32> to vector<2x384xf32>
    %cst_74 = arith.constant 5.000000e-01 : f32
    %196 = vector.broadcast %cst_74 : f32 to vector<2x384xf32>
    %197 = arith.mulf %196, %195 : vector<2x384xf32>
    %198 = math.tanh %197 : vector<2x384xf32>
    %cst_75 = arith.constant 5.000000e-01 : f32
    %199 = vector.broadcast %cst_75 : f32 to vector<2x384xf32>
    %200 = arith.mulf %199, %198 : vector<2x384xf32>
    %cst_76 = arith.constant 5.000000e-01 : f32
    %201 = vector.broadcast %cst_76 : f32 to vector<2x384xf32>
    %202 = arith.addf %200, %201 : vector<2x384xf32>
    %203 = vector.extract_strided_slice %202 {offsets = [0, 0], sizes = [2, 128], strides = [1, 1]} : vector<2x384xf32> to vector<2x128xf32>
    %204 = vector.extract_strided_slice %202 {offsets = [0, 128], sizes = [2, 128], strides = [1, 1]} : vector<2x384xf32> to vector<2x128xf32>
    %205 = vector.extract_strided_slice %202 {offsets = [0, 256], sizes = [2, 128], strides = [1, 1]} : vector<2x384xf32> to vector<2x128xf32>
    %206 = vector.extract_strided_slice %194 {offsets = [0, 384], sizes = [2, 128], strides = [1, 1]} : vector<2x512xf32> to vector<2x128xf32>
    %207 = math.tanh %206 : vector<2x128xf32>
    %208 = arith.mulf %204, %185 : vector<2x128xf32>
    %209 = arith.mulf %203, %207 : vector<2x128xf32>
    %210 = arith.addf %208, %209 : vector<2x128xf32>
    %211 = math.tanh %210 : vector<2x128xf32>
    %212 = arith.mulf %205, %211 : vector<2x128xf32>
    %c8_i32 = arith.constant 8 : i32
    %c0_77 = arith.constant 0 : index
    %c0_78 = arith.constant 0 : index
    %213 = vector.load %arg6[%c0_77, %c0_78] : memref<1x128xf32, #tpu.memory_space<vmem>>, vector<1x128xf32>
    %214 = vector.broadcast %213 : vector<1x128xf32> to vector<2x128xf32>
    %215 = arith.mulf %212, %214 : vector<2x128xf32>
    %cst_79 = arith.constant dense<0.000000e+00> : vector<2xf32>
    %216 = vector.multi_reduction <add>, %215, %cst_79 [1] : vector<2x128xf32> to vector<2xf32>
    %217 = vector.shape_cast %216 : vector<2xf32> to vector<2x1xf32>
    %c0_80 = arith.constant 0 : index
    %c0_81 = arith.constant 0 : index
    %218 = vector.load %arg7[%c0_80, %c0_81] : memref<1x1xf32, #tpu.memory_space<vmem>>, vector<1x1xf32>
    %219 = vector.broadcast %218 : vector<1x1xf32> to vector<2x1xf32>
    %220 = arith.addf %217, %219 : vector<2x1xf32>
    %221 = arith.index_cast %c0_i32 : i32 to index
    %c0_82 = arith.constant 0 : index
    %c0_83 = arith.constant 0 : index
    %222 = vector.load %arg8[%221, %c0_82, %c0_83] : memref<4x2x1xf32, #tpu.memory_space<vmem>>, vector<1x2x1xf32>
    %223 = vector.shape_cast %222 : vector<1x2x1xf32> to vector<2x1xf32>
    %224 = vector.shape_cast %220 : vector<2x1xf32> to vector<1x2x1xf32>
    tpu.vector_store %arg8[%221, %c0_82, %c0_83], %224 {strides = array<i32>} : memref<4x2x1xf32, #tpu.memory_space<vmem>>, vector<1x2x1xf32>,
    %c0_84 = arith.constant 0 : index
    %c0_85 = arith.constant 0 : index
    %225 = vector.load %arg3[%c0_84, %c0_85] : memref<1x512xf32, #tpu.memory_space<vmem>>, vector<1x512xf32>
    %226 = vector.broadcast %220 : vector<2x1xf32> to vector<2x512xf32>
    %227 = vector.broadcast %225 : vector<1x512xf32> to vector<2x512xf32>
    %228 = arith.mulf %226, %227 : vector<2x512xf32>
    %c0_86 = arith.constant 0 : index
    %c0_87 = arith.constant 0 : index
    %229 = vector.load %arg5[%c0_86, %c0_87] : memref<1x512xf32, #tpu.memory_space<vmem>>, vector<1x512xf32>
    %230 = vector.broadcast %229 : vector<1x512xf32> to vector<2x512xf32>
    %231 = arith.addf %228, %230 : vector<2x512xf32>
    %c8_i32_88 = arith.constant 8 : i32
    %232 = arith.addi %c8_i32_88, %c0_i32 : i32
    %233 = arith.index_cast %232 : i32 to index
    %c0_89 = arith.constant 0 : index
    %c0_90 = arith.constant 0 : index
    %234 = vector.load %arg9[%233, %c0_89, %c0_90] : memref<12x2x512xf32, #tpu.memory_space<vmem>>, vector<1x2x512xf32>
    %235 = vector.shape_cast %234 : vector<1x2x512xf32> to vector<2x512xf32>
    %236 = vector.shape_cast %231 : vector<2x512xf32> to vector<1x2x512xf32>
    tpu.vector_store %arg9[%233, %c0_89, %c0_90], %236 {strides = array<i32>} : memref<12x2x512xf32, #tpu.memory_space<vmem>>, vector<1x2x512xf32>,
    %c1_i32_91 = arith.constant 1 : i32
    %c0_i32_92 = arith.constant 0 : i32
    %237 = arith.addi %c1_i32_91, %c0_i32_92 : i32
    %238 = arith.index_cast %237 : i32 to index
    %c0_93 = arith.constant 0 : index
    %c0_94 = arith.constant 0 : index
    %239 = vector.load %arg9[%238, %c0_93, %c0_94] : memref<12x2x512xf32, #tpu.memory_space<vmem>>, vector<1x2x512xf32>
    %240 = vector.shape_cast %239 : vector<1x2x512xf32> to vector<2x512xf32>
    %c0_95 = arith.constant 0 : index
    %c0_96 = arith.constant 0 : index
    %241 = vector.load %arg4[%c0_95, %c0_96] : memref<128x512xf32, #tpu.memory_space<vmem>>, vector<128x512xf32>
    %cst_97 = arith.constant dense<0.000000e+00> : vector<2x512xf32>
    %242 = tpu.matmul %212, %241, %cst_97 {dimension_numbers = #tpu.dot_dimension_numbers<[1], [0], [0], [1], [0, 0, 1, 1], [], []>} : vector<2x128xf32>, vector<128x512xf32>, vector<2x512xf32> -> vector<2x512xf32>
    %243 = arith.addf %240, %242 : vector<2x512xf32>
    %244 = vector.extract_strided_slice %243 {offsets = [0, 0], sizes = [2, 384], strides = [1, 1]} : vector<2x512xf32> to vector<2x384xf32>
    %cst_98 = arith.constant 5.000000e-01 : f32
    %245 = vector.broadcast %cst_98 : f32 to vector<2x384xf32>
    %246 = arith.mulf %245, %244 : vector<2x384xf32>
    %247 = math.tanh %246 : vector<2x384xf32>
    %cst_99 = arith.constant 5.000000e-01 : f32
    %248 = vector.broadcast %cst_99 : f32 to vector<2x384xf32>
    %249 = arith.mulf %248, %247 : vector<2x384xf32>
    %cst_100 = arith.constant 5.000000e-01 : f32
    %250 = vector.broadcast %cst_100 : f32 to vector<2x384xf32>
    %251 = arith.addf %249, %250 : vector<2x384xf32>
    %252 = vector.extract_strided_slice %251 {offsets = [0, 0], sizes = [2, 128], strides = [1, 1]} : vector<2x384xf32> to vector<2x128xf32>
    %253 = vector.extract_strided_slice %251 {offsets = [0, 128], sizes = [2, 128], strides = [1, 1]} : vector<2x384xf32> to vector<2x128xf32>
    %254 = vector.extract_strided_slice %251 {offsets = [0, 256], sizes = [2, 128], strides = [1, 1]} : vector<2x384xf32> to vector<2x128xf32>
    %255 = vector.extract_strided_slice %243 {offsets = [0, 384], sizes = [2, 128], strides = [1, 1]} : vector<2x512xf32> to vector<2x128xf32>
    %256 = math.tanh %255 : vector<2x128xf32>
    %257 = arith.mulf %253, %210 : vector<2x128xf32>
    %258 = arith.mulf %252, %256 : vector<2x128xf32>
    %259 = arith.addf %257, %258 : vector<2x128xf32>
    %260 = math.tanh %259 : vector<2x128xf32>
    %261 = arith.mulf %254, %260 : vector<2x128xf32>
    %c1_i32_101 = arith.constant 1 : i32
    %262 = arith.addi %c1_i32_91, %c1_i32_101 : i32
    %263 = arith.index_cast %262 : i32 to index
    %c0_102 = arith.constant 0 : index
    %c0_103 = arith.constant 0 : index
    %264 = vector.load %arg9[%263, %c0_102, %c0_103] : memref<12x2x512xf32, #tpu.memory_space<vmem>>, vector<1x2x512xf32>
    %265 = vector.shape_cast %264 : vector<1x2x512xf32> to vector<2x512xf32>
    %c0_104 = arith.constant 0 : index
    %c0_105 = arith.constant 0 : index
    %266 = vector.load %arg4[%c0_104, %c0_105] : memref<128x512xf32, #tpu.memory_space<vmem>>, vector<128x512xf32>
    %cst_106 = arith.constant dense<0.000000e+00> : vector<2x512xf32>
    %267 = tpu.matmul %261, %266, %cst_106 {dimension_numbers = #tpu.dot_dimension_numbers<[1], [0], [0], [1], [0, 0, 1, 1], [], []>} : vector<2x128xf32>, vector<128x512xf32>, vector<2x512xf32> -> vector<2x512xf32>
    %268 = arith.addf %265, %267 : vector<2x512xf32>
    %269 = vector.extract_strided_slice %268 {offsets = [0, 0], sizes = [2, 384], strides = [1, 1]} : vector<2x512xf32> to vector<2x384xf32>
    %cst_107 = arith.constant 5.000000e-01 : f32
    %270 = vector.broadcast %cst_107 : f32 to vector<2x384xf32>
    %271 = arith.mulf %270, %269 : vector<2x384xf32>
    %272 = math.tanh %271 : vector<2x384xf32>
    %cst_108 = arith.constant 5.000000e-01 : f32
    %273 = vector.broadcast %cst_108 : f32 to vector<2x384xf32>
    %274 = arith.mulf %273, %272 : vector<2x384xf32>
    %cst_109 = arith.constant 5.000000e-01 : f32
    %275 = vector.broadcast %cst_109 : f32 to vector<2x384xf32>
    %276 = arith.addf %274, %275 : vector<2x384xf32>
    %277 = vector.extract_strided_slice %276 {offsets = [0, 0], sizes = [2, 128], strides = [1, 1]} : vector<2x384xf32> to vector<2x128xf32>
    %278 = vector.extract_strided_slice %276 {offsets = [0, 128], sizes = [2, 128], strides = [1, 1]} : vector<2x384xf32> to vector<2x128xf32>
    %279 = vector.extract_strided_slice %276 {offsets = [0, 256], sizes = [2, 128], strides = [1, 1]} : vector<2x384xf32> to vector<2x128xf32>
    %280 = vector.extract_strided_slice %268 {offsets = [0, 384], sizes = [2, 128], strides = [1, 1]} : vector<2x512xf32> to vector<2x128xf32>
    %281 = math.tanh %280 : vector<2x128xf32>
    %282 = arith.mulf %278, %259 : vector<2x128xf32>
    %283 = arith.mulf %277, %281 : vector<2x128xf32>
    %284 = arith.addf %282, %283 : vector<2x128xf32>
    %285 = math.tanh %284 : vector<2x128xf32>
    %286 = arith.mulf %279, %285 : vector<2x128xf32>
    %c2_i32_110 = arith.constant 2 : i32
    %287 = arith.addi %c1_i32_91, %c2_i32_110 : i32
    %288 = arith.index_cast %287 : i32 to index
    %c0_111 = arith.constant 0 : index
    %c0_112 = arith.constant 0 : index
    %289 = vector.load %arg9[%288, %c0_111, %c0_112] : memref<12x2x512xf32, #tpu.memory_space<vmem>>, vector<1x2x512xf32>
    %290 = vector.shape_cast %289 : vector<1x2x512xf32> to vector<2x512xf32>
    %c0_113 = arith.constant 0 : index
    %c0_114 = arith.constant 0 : index
    %291 = vector.load %arg4[%c0_113, %c0_114] : memref<128x512xf32, #tpu.memory_space<vmem>>, vector<128x512xf32>
    %cst_115 = arith.constant dense<0.000000e+00> : vector<2x512xf32>
    %292 = tpu.matmul %286, %291, %cst_115 {dimension_numbers = #tpu.dot_dimension_numbers<[1], [0], [0], [1], [0, 0, 1, 1], [], []>} : vector<2x128xf32>, vector<128x512xf32>, vector<2x512xf32> -> vector<2x512xf32>
    %293 = arith.addf %290, %292 : vector<2x512xf32>
    %294 = vector.extract_strided_slice %293 {offsets = [0, 0], sizes = [2, 384], strides = [1, 1]} : vector<2x512xf32> to vector<2x384xf32>
    %cst_116 = arith.constant 5.000000e-01 : f32
    %295 = vector.broadcast %cst_116 : f32 to vector<2x384xf32>
    %296 = arith.mulf %295, %294 : vector<2x384xf32>
    %297 = math.tanh %296 : vector<2x384xf32>
    %cst_117 = arith.constant 5.000000e-01 : f32
    %298 = vector.broadcast %cst_117 : f32 to vector<2x384xf32>
    %299 = arith.mulf %298, %297 : vector<2x384xf32>
    %cst_118 = arith.constant 5.000000e-01 : f32
    %300 = vector.broadcast %cst_118 : f32 to vector<2x384xf32>
    %301 = arith.addf %299, %300 : vector<2x384xf32>
    %302 = vector.extract_strided_slice %301 {offsets = [0, 0], sizes = [2, 128], strides = [1, 1]} : vector<2x384xf32> to vector<2x128xf32>
    %303 = vector.extract_strided_slice %301 {offsets = [0, 128], sizes = [2, 128], strides = [1, 1]} : vector<2x384xf32> to vector<2x128xf32>
    %304 = vector.extract_strided_slice %301 {offsets = [0, 256], sizes = [2, 128], strides = [1, 1]} : vector<2x384xf32> to vector<2x128xf32>
    %305 = vector.extract_strided_slice %293 {offsets = [0, 384], sizes = [2, 128], strides = [1, 1]} : vector<2x512xf32> to vector<2x128xf32>
    %306 = math.tanh %305 : vector<2x128xf32>
    %307 = arith.mulf %303, %284 : vector<2x128xf32>
    %308 = arith.mulf %302, %306 : vector<2x128xf32>
    %309 = arith.addf %307, %308 : vector<2x128xf32>
    %310 = math.tanh %309 : vector<2x128xf32>
    %311 = arith.mulf %304, %310 : vector<2x128xf32>
    %c3_i32_119 = arith.constant 3 : i32
    %312 = arith.addi %c1_i32_91, %c3_i32_119 : i32
    %313 = arith.index_cast %312 : i32 to index
    %c0_120 = arith.constant 0 : index
    %c0_121 = arith.constant 0 : index
    %314 = vector.load %arg9[%313, %c0_120, %c0_121] : memref<12x2x512xf32, #tpu.memory_space<vmem>>, vector<1x2x512xf32>
    %315 = vector.shape_cast %314 : vector<1x2x512xf32> to vector<2x512xf32>
    %c0_122 = arith.constant 0 : index
    %c0_123 = arith.constant 0 : index
    %316 = vector.load %arg4[%c0_122, %c0_123] : memref<128x512xf32, #tpu.memory_space<vmem>>, vector<128x512xf32>
    %cst_124 = arith.constant dense<0.000000e+00> : vector<2x512xf32>
    %317 = tpu.matmul %311, %316, %cst_124 {dimension_numbers = #tpu.dot_dimension_numbers<[1], [0], [0], [1], [0, 0, 1, 1], [], []>} : vector<2x128xf32>, vector<128x512xf32>, vector<2x512xf32> -> vector<2x512xf32>
    %318 = arith.addf %315, %317 : vector<2x512xf32>
    %319 = vector.extract_strided_slice %318 {offsets = [0, 0], sizes = [2, 384], strides = [1, 1]} : vector<2x512xf32> to vector<2x384xf32>
    %cst_125 = arith.constant 5.000000e-01 : f32
    %320 = vector.broadcast %cst_125 : f32 to vector<2x384xf32>
    %321 = arith.mulf %320, %319 : vector<2x384xf32>
    %322 = math.tanh %321 : vector<2x384xf32>
    %cst_126 = arith.constant 5.000000e-01 : f32
    %323 = vector.broadcast %cst_126 : f32 to vector<2x384xf32>
    %324 = arith.mulf %323, %322 : vector<2x384xf32>
    %cst_127 = arith.constant 5.000000e-01 : f32
    %325 = vector.broadcast %cst_127 : f32 to vector<2x384xf32>
    %326 = arith.addf %324, %325 : vector<2x384xf32>
    %327 = vector.extract_strided_slice %326 {offsets = [0, 0], sizes = [2, 128], strides = [1, 1]} : vector<2x384xf32> to vector<2x128xf32>
    %328 = vector.extract_strided_slice %326 {offsets = [0, 128], sizes = [2, 128], strides = [1, 1]} : vector<2x384xf32> to vector<2x128xf32>
    %329 = vector.extract_strided_slice %326 {offsets = [0, 256], sizes = [2, 128], strides = [1, 1]} : vector<2x384xf32> to vector<2x128xf32>
    %330 = vector.extract_strided_slice %318 {offsets = [0, 384], sizes = [2, 128], strides = [1, 1]} : vector<2x512xf32> to vector<2x128xf32>
    %331 = math.tanh %330 : vector<2x128xf32>
    %332 = arith.mulf %328, %309 : vector<2x128xf32>
    %333 = arith.mulf %327, %331 : vector<2x128xf32>
    %334 = arith.addf %332, %333 : vector<2x128xf32>
    %335 = math.tanh %334 : vector<2x128xf32>
    %336 = arith.mulf %329, %335 : vector<2x128xf32>
    %c4_i32_128 = arith.constant 4 : i32
    %337 = arith.addi %c1_i32_91, %c4_i32_128 : i32
    %338 = arith.index_cast %337 : i32 to index
    %c0_129 = arith.constant 0 : index
    %c0_130 = arith.constant 0 : index
    %339 = vector.load %arg9[%338, %c0_129, %c0_130] : memref<12x2x512xf32, #tpu.memory_space<vmem>>, vector<1x2x512xf32>
    %340 = vector.shape_cast %339 : vector<1x2x512xf32> to vector<2x512xf32>
    %c0_131 = arith.constant 0 : index
    %c0_132 = arith.constant 0 : index
    %341 = vector.load %arg4[%c0_131, %c0_132] : memref<128x512xf32, #tpu.memory_space<vmem>>, vector<128x512xf32>
    %cst_133 = arith.constant dense<0.000000e+00> : vector<2x512xf32>
    %342 = tpu.matmul %336, %341, %cst_133 {dimension_numbers = #tpu.dot_dimension_numbers<[1], [0], [0], [1], [0, 0, 1, 1], [], []>} : vector<2x128xf32>, vector<128x512xf32>, vector<2x512xf32> -> vector<2x512xf32>
    %343 = arith.addf %340, %342 : vector<2x512xf32>
    %344 = vector.extract_strided_slice %343 {offsets = [0, 0], sizes = [2, 384], strides = [1, 1]} : vector<2x512xf32> to vector<2x384xf32>
    %cst_134 = arith.constant 5.000000e-01 : f32
    %345 = vector.broadcast %cst_134 : f32 to vector<2x384xf32>
    %346 = arith.mulf %345, %344 : vector<2x384xf32>
    %347 = math.tanh %346 : vector<2x384xf32>
    %cst_135 = arith.constant 5.000000e-01 : f32
    %348 = vector.broadcast %cst_135 : f32 to vector<2x384xf32>
    %349 = arith.mulf %348, %347 : vector<2x384xf32>
    %cst_136 = arith.constant 5.000000e-01 : f32
    %350 = vector.broadcast %cst_136 : f32 to vector<2x384xf32>
    %351 = arith.addf %349, %350 : vector<2x384xf32>
    %352 = vector.extract_strided_slice %351 {offsets = [0, 0], sizes = [2, 128], strides = [1, 1]} : vector<2x384xf32> to vector<2x128xf32>
    %353 = vector.extract_strided_slice %351 {offsets = [0, 128], sizes = [2, 128], strides = [1, 1]} : vector<2x384xf32> to vector<2x128xf32>
    %354 = vector.extract_strided_slice %351 {offsets = [0, 256], sizes = [2, 128], strides = [1, 1]} : vector<2x384xf32> to vector<2x128xf32>
    %355 = vector.extract_strided_slice %343 {offsets = [0, 384], sizes = [2, 128], strides = [1, 1]} : vector<2x512xf32> to vector<2x128xf32>
    %356 = math.tanh %355 : vector<2x128xf32>
    %357 = arith.mulf %353, %334 : vector<2x128xf32>
    %358 = arith.mulf %352, %356 : vector<2x128xf32>
    %359 = arith.addf %357, %358 : vector<2x128xf32>
    %360 = math.tanh %359 : vector<2x128xf32>
    %361 = arith.mulf %354, %360 : vector<2x128xf32>
    %c5_i32_137 = arith.constant 5 : i32
    %362 = arith.addi %c1_i32_91, %c5_i32_137 : i32
    %363 = arith.index_cast %362 : i32 to index
    %c0_138 = arith.constant 0 : index
    %c0_139 = arith.constant 0 : index
    %364 = vector.load %arg9[%363, %c0_138, %c0_139] : memref<12x2x512xf32, #tpu.memory_space<vmem>>, vector<1x2x512xf32>
    %365 = vector.shape_cast %364 : vector<1x2x512xf32> to vector<2x512xf32>
    %c0_140 = arith.constant 0 : index
    %c0_141 = arith.constant 0 : index
    %366 = vector.load %arg4[%c0_140, %c0_141] : memref<128x512xf32, #tpu.memory_space<vmem>>, vector<128x512xf32>
    %cst_142 = arith.constant dense<0.000000e+00> : vector<2x512xf32>
    %367 = tpu.matmul %361, %366, %cst_142 {dimension_numbers = #tpu.dot_dimension_numbers<[1], [0], [0], [1], [0, 0, 1, 1], [], []>} : vector<2x128xf32>, vector<128x512xf32>, vector<2x512xf32> -> vector<2x512xf32>
    %368 = arith.addf %365, %367 : vector<2x512xf32>
    %369 = vector.extract_strided_slice %368 {offsets = [0, 0], sizes = [2, 384], strides = [1, 1]} : vector<2x512xf32> to vector<2x384xf32>
    %cst_143 = arith.constant 5.000000e-01 : f32
    %370 = vector.broadcast %cst_143 : f32 to vector<2x384xf32>
    %371 = arith.mulf %370, %369 : vector<2x384xf32>
    %372 = math.tanh %371 : vector<2x384xf32>
    %cst_144 = arith.constant 5.000000e-01 : f32
    %373 = vector.broadcast %cst_144 : f32 to vector<2x384xf32>
    %374 = arith.mulf %373, %372 : vector<2x384xf32>
    %cst_145 = arith.constant 5.000000e-01 : f32
    %375 = vector.broadcast %cst_145 : f32 to vector<2x384xf32>
    %376 = arith.addf %374, %375 : vector<2x384xf32>
    %377 = vector.extract_strided_slice %376 {offsets = [0, 0], sizes = [2, 128], strides = [1, 1]} : vector<2x384xf32> to vector<2x128xf32>
    %378 = vector.extract_strided_slice %376 {offsets = [0, 128], sizes = [2, 128], strides = [1, 1]} : vector<2x384xf32> to vector<2x128xf32>
    %379 = vector.extract_strided_slice %376 {offsets = [0, 256], sizes = [2, 128], strides = [1, 1]} : vector<2x384xf32> to vector<2x128xf32>
    %380 = vector.extract_strided_slice %368 {offsets = [0, 384], sizes = [2, 128], strides = [1, 1]} : vector<2x512xf32> to vector<2x128xf32>
    %381 = math.tanh %380 : vector<2x128xf32>
    %382 = arith.mulf %378, %359 : vector<2x128xf32>
    %383 = arith.mulf %377, %381 : vector<2x128xf32>
    %384 = arith.addf %382, %383 : vector<2x128xf32>
    %385 = math.tanh %384 : vector<2x128xf32>
    %386 = arith.mulf %379, %385 : vector<2x128xf32>
    %c6_i32_146 = arith.constant 6 : i32
    %387 = arith.addi %c1_i32_91, %c6_i32_146 : i32
    %388 = arith.index_cast %387 : i32 to index
    %c0_147 = arith.constant 0 : index
    %c0_148 = arith.constant 0 : index
    %389 = vector.load %arg9[%388, %c0_147, %c0_148] : memref<12x2x512xf32, #tpu.memory_space<vmem>>, vector<1x2x512xf32>
    %390 = vector.shape_cast %389 : vector<1x2x512xf32> to vector<2x512xf32>
    %c0_149 = arith.constant 0 : index
    %c0_150 = arith.constant 0 : index
    %391 = vector.load %arg4[%c0_149, %c0_150] : memref<128x512xf32, #tpu.memory_space<vmem>>, vector<128x512xf32>
    %cst_151 = arith.constant dense<0.000000e+00> : vector<2x512xf32>
    %392 = tpu.matmul %386, %391, %cst_151 {dimension_numbers = #tpu.dot_dimension_numbers<[1], [0], [0], [1], [0, 0, 1, 1], [], []>} : vector<2x128xf32>, vector<128x512xf32>, vector<2x512xf32> -> vector<2x512xf32>
    %393 = arith.addf %390, %392 : vector<2x512xf32>
    %394 = vector.extract_strided_slice %393 {offsets = [0, 0], sizes = [2, 384], strides = [1, 1]} : vector<2x512xf32> to vector<2x384xf32>
    %cst_152 = arith.constant 5.000000e-01 : f32
    %395 = vector.broadcast %cst_152 : f32 to vector<2x384xf32>
    %396 = arith.mulf %395, %394 : vector<2x384xf32>
    %397 = math.tanh %396 : vector<2x384xf32>
    %cst_153 = arith.constant 5.000000e-01 : f32
    %398 = vector.broadcast %cst_153 : f32 to vector<2x384xf32>
    %399 = arith.mulf %398, %397 : vector<2x384xf32>
    %cst_154 = arith.constant 5.000000e-01 : f32
    %400 = vector.broadcast %cst_154 : f32 to vector<2x384xf32>
    %401 = arith.addf %399, %400 : vector<2x384xf32>
    %402 = vector.extract_strided_slice %401 {offsets = [0, 0], sizes = [2, 128], strides = [1, 1]} : vector<2x384xf32> to vector<2x128xf32>
    %403 = vector.extract_strided_slice %401 {offsets = [0, 128], sizes = [2, 128], strides = [1, 1]} : vector<2x384xf32> to vector<2x128xf32>
    %404 = vector.extract_strided_slice %401 {offsets = [0, 256], sizes = [2, 128], strides = [1, 1]} : vector<2x384xf32> to vector<2x128xf32>
    %405 = vector.extract_strided_slice %393 {offsets = [0, 384], sizes = [2, 128], strides = [1, 1]} : vector<2x512xf32> to vector<2x128xf32>
    %406 = math.tanh %405 : vector<2x128xf32>
    %407 = arith.mulf %403, %384 : vector<2x128xf32>
    %408 = arith.mulf %402, %406 : vector<2x128xf32>
    %409 = arith.addf %407, %408 : vector<2x128xf32>
    %410 = math.tanh %409 : vector<2x128xf32>
    %411 = arith.mulf %404, %410 : vector<2x128xf32>
    %c7_i32_155 = arith.constant 7 : i32
    %412 = arith.addi %c1_i32_91, %c7_i32_155 : i32
    %413 = arith.index_cast %412 : i32 to index
    %c0_156 = arith.constant 0 : index
    %c0_157 = arith.constant 0 : index
    %414 = vector.load %arg9[%413, %c0_156, %c0_157] : memref<12x2x512xf32, #tpu.memory_space<vmem>>, vector<1x2x512xf32>
    %415 = vector.shape_cast %414 : vector<1x2x512xf32> to vector<2x512xf32>
    %c0_158 = arith.constant 0 : index
    %c0_159 = arith.constant 0 : index
    %416 = vector.load %arg4[%c0_158, %c0_159] : memref<128x512xf32, #tpu.memory_space<vmem>>, vector<128x512xf32>
    %cst_160 = arith.constant dense<0.000000e+00> : vector<2x512xf32>
    %417 = tpu.matmul %411, %416, %cst_160 {dimension_numbers = #tpu.dot_dimension_numbers<[1], [0], [0], [1], [0, 0, 1, 1], [], []>} : vector<2x128xf32>, vector<128x512xf32>, vector<2x512xf32> -> vector<2x512xf32>
    %418 = arith.addf %415, %417 : vector<2x512xf32>
    %419 = vector.extract_strided_slice %418 {offsets = [0, 0], sizes = [2, 384], strides = [1, 1]} : vector<2x512xf32> to vector<2x384xf32>
    %cst_161 = arith.constant 5.000000e-01 : f32
    %420 = vector.broadcast %cst_161 : f32 to vector<2x384xf32>
    %421 = arith.mulf %420, %419 : vector<2x384xf32>
    %422 = math.tanh %421 : vector<2x384xf32>
    %cst_162 = arith.constant 5.000000e-01 : f32
    %423 = vector.broadcast %cst_162 : f32 to vector<2x384xf32>
    %424 = arith.mulf %423, %422 : vector<2x384xf32>
    %cst_163 = arith.constant 5.000000e-01 : f32
    %425 = vector.broadcast %cst_163 : f32 to vector<2x384xf32>
    %426 = arith.addf %424, %425 : vector<2x384xf32>
    %427 = vector.extract_strided_slice %426 {offsets = [0, 0], sizes = [2, 128], strides = [1, 1]} : vector<2x384xf32> to vector<2x128xf32>
    %428 = vector.extract_strided_slice %426 {offsets = [0, 128], sizes = [2, 128], strides = [1, 1]} : vector<2x384xf32> to vector<2x128xf32>
    %429 = vector.extract_strided_slice %426 {offsets = [0, 256], sizes = [2, 128], strides = [1, 1]} : vector<2x384xf32> to vector<2x128xf32>
    %430 = vector.extract_strided_slice %418 {offsets = [0, 384], sizes = [2, 128], strides = [1, 1]} : vector<2x512xf32> to vector<2x128xf32>
    %431 = math.tanh %430 : vector<2x128xf32>
    %432 = arith.mulf %428, %409 : vector<2x128xf32>
    %433 = arith.mulf %427, %431 : vector<2x128xf32>
    %434 = arith.addf %432, %433 : vector<2x128xf32>
    %435 = math.tanh %434 : vector<2x128xf32>
    %436 = arith.mulf %429, %435 : vector<2x128xf32>
    %c8_i32_164 = arith.constant 8 : i32
    %c0_165 = arith.constant 0 : index
    %c0_166 = arith.constant 0 : index
    %437 = vector.load %arg6[%c0_165, %c0_166] : memref<1x128xf32, #tpu.memory_space<vmem>>, vector<1x128xf32>
    %438 = vector.broadcast %437 : vector<1x128xf32> to vector<2x128xf32>
    %439 = arith.mulf %436, %438 : vector<2x128xf32>
    %cst_167 = arith.constant dense<0.000000e+00> : vector<2xf32>
    %440 = vector.multi_reduction <add>, %439, %cst_167 [1] : vector<2x128xf32> to vector<2xf32>
    %441 = vector.shape_cast %440 : vector<2xf32> to vector<2x1xf32>
    %c0_168 = arith.constant 0 : index
    %c0_169 = arith.constant 0 : index
    %442 = vector.load %arg7[%c0_168, %c0_169] : memref<1x1xf32, #tpu.memory_space<vmem>>, vector<1x1xf32>
    %443 = vector.broadcast %442 : vector<1x1xf32> to vector<2x1xf32>
    %444 = arith.addf %441, %443 : vector<2x1xf32>
    %445 = arith.index_cast %c1_i32_91 : i32 to index
    %c0_170 = arith.constant 0 : index
    %c0_171 = arith.constant 0 : index
    %446 = vector.load %arg8[%445, %c0_170, %c0_171] : memref<4x2x1xf32, #tpu.memory_space<vmem>>, vector<1x2x1xf32>
    %447 = vector.shape_cast %446 : vector<1x2x1xf32> to vector<2x1xf32>
    %448 = vector.shape_cast %444 : vector<2x1xf32> to vector<1x2x1xf32>
    tpu.vector_store %arg8[%445, %c0_170, %c0_171], %448 {strides = array<i32>} : memref<4x2x1xf32, #tpu.memory_space<vmem>>, vector<1x2x1xf32>,
    %c0_172 = arith.constant 0 : index
    %c0_173 = arith.constant 0 : index
    %449 = vector.load %arg3[%c0_172, %c0_173] : memref<1x512xf32, #tpu.memory_space<vmem>>, vector<1x512xf32>
    %450 = vector.broadcast %444 : vector<2x1xf32> to vector<2x512xf32>
    %451 = vector.broadcast %449 : vector<1x512xf32> to vector<2x512xf32>
    %452 = arith.mulf %450, %451 : vector<2x512xf32>
    %c0_174 = arith.constant 0 : index
    %c0_175 = arith.constant 0 : index
    %453 = vector.load %arg5[%c0_174, %c0_175] : memref<1x512xf32, #tpu.memory_space<vmem>>, vector<1x512xf32>
    %454 = vector.broadcast %453 : vector<1x512xf32> to vector<2x512xf32>
    %455 = arith.addf %452, %454 : vector<2x512xf32>
    %c8_i32_176 = arith.constant 8 : i32
    %456 = arith.addi %c8_i32_176, %c1_i32_91 : i32
    %457 = arith.index_cast %456 : i32 to index
    %c0_177 = arith.constant 0 : index
    %c0_178 = arith.constant 0 : index
    %458 = vector.load %arg9[%457, %c0_177, %c0_178] : memref<12x2x512xf32, #tpu.memory_space<vmem>>, vector<1x2x512xf32>
    %459 = vector.shape_cast %458 : vector<1x2x512xf32> to vector<2x512xf32>
    %460 = vector.shape_cast %455 : vector<2x512xf32> to vector<1x2x512xf32>
    tpu.vector_store %arg9[%457, %c0_177, %c0_178], %460 {strides = array<i32>} : memref<12x2x512xf32, #tpu.memory_space<vmem>>, vector<1x2x512xf32>,
    %c2_i32_179 = arith.constant 2 : i32
    %c0_i32_180 = arith.constant 0 : i32
    %461 = arith.addi %c2_i32_179, %c0_i32_180 : i32
    %462 = arith.index_cast %461 : i32 to index
    %c0_181 = arith.constant 0 : index
    %c0_182 = arith.constant 0 : index
    %463 = vector.load %arg9[%462, %c0_181, %c0_182] : memref<12x2x512xf32, #tpu.memory_space<vmem>>, vector<1x2x512xf32>
    %464 = vector.shape_cast %463 : vector<1x2x512xf32> to vector<2x512xf32>
    %c0_183 = arith.constant 0 : index
    %c0_184 = arith.constant 0 : index
    %465 = vector.load %arg4[%c0_183, %c0_184] : memref<128x512xf32, #tpu.memory_space<vmem>>, vector<128x512xf32>
    %cst_185 = arith.constant dense<0.000000e+00> : vector<2x512xf32>
    %466 = tpu.matmul %436, %465, %cst_185 {dimension_numbers = #tpu.dot_dimension_numbers<[1], [0], [0], [1], [0, 0, 1, 1], [], []>} : vector<2x128xf32>, vector<128x512xf32>, vector<2x512xf32> -> vector<2x512xf32>
    %467 = arith.addf %464, %466 : vector<2x512xf32>
    %468 = vector.extract_strided_slice %467 {offsets = [0, 0], sizes = [2, 384], strides = [1, 1]} : vector<2x512xf32> to vector<2x384xf32>
    %cst_186 = arith.constant 5.000000e-01 : f32
    %469 = vector.broadcast %cst_186 : f32 to vector<2x384xf32>
    %470 = arith.mulf %469, %468 : vector<2x384xf32>
    %471 = math.tanh %470 : vector<2x384xf32>
    %cst_187 = arith.constant 5.000000e-01 : f32
    %472 = vector.broadcast %cst_187 : f32 to vector<2x384xf32>
    %473 = arith.mulf %472, %471 : vector<2x384xf32>
    %cst_188 = arith.constant 5.000000e-01 : f32
    %474 = vector.broadcast %cst_188 : f32 to vector<2x384xf32>
    %475 = arith.addf %473, %474 : vector<2x384xf32>
    %476 = vector.extract_strided_slice %475 {offsets = [0, 0], sizes = [2, 128], strides = [1, 1]} : vector<2x384xf32> to vector<2x128xf32>
    %477 = vector.extract_strided_slice %475 {offsets = [0, 128], sizes = [2, 128], strides = [1, 1]} : vector<2x384xf32> to vector<2x128xf32>
    %478 = vector.extract_strided_slice %475 {offsets = [0, 256], sizes = [2, 128], strides = [1, 1]} : vector<2x384xf32> to vector<2x128xf32>
    %479 = vector.extract_strided_slice %467 {offsets = [0, 384], sizes = [2, 128], strides = [1, 1]} : vector<2x512xf32> to vector<2x128xf32>
    %480 = math.tanh %479 : vector<2x128xf32>
    %481 = arith.mulf %477, %434 : vector<2x128xf32>
    %482 = arith.mulf %476, %480 : vector<2x128xf32>
    %483 = arith.addf %481, %482 : vector<2x128xf32>
    %484 = math.tanh %483 : vector<2x128xf32>
    %485 = arith.mulf %478, %484 : vector<2x128xf32>
    %c1_i32_189 = arith.constant 1 : i32
    %486 = arith.addi %c2_i32_179, %c1_i32_189 : i32
    %487 = arith.index_cast %486 : i32 to index
    %c0_190 = arith.constant 0 : index
    %c0_191 = arith.constant 0 : index
    %488 = vector.load %arg9[%487, %c0_190, %c0_191] : memref<12x2x512xf32, #tpu.memory_space<vmem>>, vector<1x2x512xf32>
    %489 = vector.shape_cast %488 : vector<1x2x512xf32> to vector<2x512xf32>
    %c0_192 = arith.constant 0 : index
    %c0_193 = arith.constant 0 : index
    %490 = vector.load %arg4[%c0_192, %c0_193] : memref<128x512xf32, #tpu.memory_space<vmem>>, vector<128x512xf32>
    %cst_194 = arith.constant dense<0.000000e+00> : vector<2x512xf32>
    %491 = tpu.matmul %485, %490, %cst_194 {dimension_numbers = #tpu.dot_dimension_numbers<[1], [0], [0], [1], [0, 0, 1, 1], [], []>} : vector<2x128xf32>, vector<128x512xf32>, vector<2x512xf32> -> vector<2x512xf32>
    %492 = arith.addf %489, %491 : vector<2x512xf32>
    %493 = vector.extract_strided_slice %492 {offsets = [0, 0], sizes = [2, 384], strides = [1, 1]} : vector<2x512xf32> to vector<2x384xf32>
    %cst_195 = arith.constant 5.000000e-01 : f32
    %494 = vector.broadcast %cst_195 : f32 to vector<2x384xf32>
    %495 = arith.mulf %494, %493 : vector<2x384xf32>
    %496 = math.tanh %495 : vector<2x384xf32>
    %cst_196 = arith.constant 5.000000e-01 : f32
    %497 = vector.broadcast %cst_196 : f32 to vector<2x384xf32>
    %498 = arith.mulf %497, %496 : vector<2x384xf32>
    %cst_197 = arith.constant 5.000000e-01 : f32
    %499 = vector.broadcast %cst_197 : f32 to vector<2x384xf32>
    %500 = arith.addf %498, %499 : vector<2x384xf32>
    %501 = vector.extract_strided_slice %500 {offsets = [0, 0], sizes = [2, 128], strides = [1, 1]} : vector<2x384xf32> to vector<2x128xf32>
    %502 = vector.extract_strided_slice %500 {offsets = [0, 128], sizes = [2, 128], strides = [1, 1]} : vector<2x384xf32> to vector<2x128xf32>
    %503 = vector.extract_strided_slice %500 {offsets = [0, 256], sizes = [2, 128], strides = [1, 1]} : vector<2x384xf32> to vector<2x128xf32>
    %504 = vector.extract_strided_slice %492 {offsets = [0, 384], sizes = [2, 128], strides = [1, 1]} : vector<2x512xf32> to vector<2x128xf32>
    %505 = math.tanh %504 : vector<2x128xf32>
    %506 = arith.mulf %502, %483 : vector<2x128xf32>
    %507 = arith.mulf %501, %505 : vector<2x128xf32>
    %508 = arith.addf %506, %507 : vector<2x128xf32>
    %509 = math.tanh %508 : vector<2x128xf32>
    %510 = arith.mulf %503, %509 : vector<2x128xf32>
    %c2_i32_198 = arith.constant 2 : i32
    %511 = arith.addi %c2_i32_179, %c2_i32_198 : i32
    %512 = arith.index_cast %511 : i32 to index
    %c0_199 = arith.constant 0 : index
    %c0_200 = arith.constant 0 : index
    %513 = vector.load %arg9[%512, %c0_199, %c0_200] : memref<12x2x512xf32, #tpu.memory_space<vmem>>, vector<1x2x512xf32>
    %514 = vector.shape_cast %513 : vector<1x2x512xf32> to vector<2x512xf32>
    %c0_201 = arith.constant 0 : index
    %c0_202 = arith.constant 0 : index
    %515 = vector.load %arg4[%c0_201, %c0_202] : memref<128x512xf32, #tpu.memory_space<vmem>>, vector<128x512xf32>
    %cst_203 = arith.constant dense<0.000000e+00> : vector<2x512xf32>
    %516 = tpu.matmul %510, %515, %cst_203 {dimension_numbers = #tpu.dot_dimension_numbers<[1], [0], [0], [1], [0, 0, 1, 1], [], []>} : vector<2x128xf32>, vector<128x512xf32>, vector<2x512xf32> -> vector<2x512xf32>
    %517 = arith.addf %514, %516 : vector<2x512xf32>
    %518 = vector.extract_strided_slice %517 {offsets = [0, 0], sizes = [2, 384], strides = [1, 1]} : vector<2x512xf32> to vector<2x384xf32>
    %cst_204 = arith.constant 5.000000e-01 : f32
    %519 = vector.broadcast %cst_204 : f32 to vector<2x384xf32>
    %520 = arith.mulf %519, %518 : vector<2x384xf32>
    %521 = math.tanh %520 : vector<2x384xf32>
    %cst_205 = arith.constant 5.000000e-01 : f32
    %522 = vector.broadcast %cst_205 : f32 to vector<2x384xf32>
    %523 = arith.mulf %522, %521 : vector<2x384xf32>
    %cst_206 = arith.constant 5.000000e-01 : f32
    %524 = vector.broadcast %cst_206 : f32 to vector<2x384xf32>
    %525 = arith.addf %523, %524 : vector<2x384xf32>
    %526 = vector.extract_strided_slice %525 {offsets = [0, 0], sizes = [2, 128], strides = [1, 1]} : vector<2x384xf32> to vector<2x128xf32>
    %527 = vector.extract_strided_slice %525 {offsets = [0, 128], sizes = [2, 128], strides = [1, 1]} : vector<2x384xf32> to vector<2x128xf32>
    %528 = vector.extract_strided_slice %525 {offsets = [0, 256], sizes = [2, 128], strides = [1, 1]} : vector<2x384xf32> to vector<2x128xf32>
    %529 = vector.extract_strided_slice %517 {offsets = [0, 384], sizes = [2, 128], strides = [1, 1]} : vector<2x512xf32> to vector<2x128xf32>
    %530 = math.tanh %529 : vector<2x128xf32>
    %531 = arith.mulf %527, %508 : vector<2x128xf32>
    %532 = arith.mulf %526, %530 : vector<2x128xf32>
    %533 = arith.addf %531, %532 : vector<2x128xf32>
    %534 = math.tanh %533 : vector<2x128xf32>
    %535 = arith.mulf %528, %534 : vector<2x128xf32>
    %c3_i32_207 = arith.constant 3 : i32
    %536 = arith.addi %c2_i32_179, %c3_i32_207 : i32
    %537 = arith.index_cast %536 : i32 to index
    %c0_208 = arith.constant 0 : index
    %c0_209 = arith.constant 0 : index
    %538 = vector.load %arg9[%537, %c0_208, %c0_209] : memref<12x2x512xf32, #tpu.memory_space<vmem>>, vector<1x2x512xf32>
    %539 = vector.shape_cast %538 : vector<1x2x512xf32> to vector<2x512xf32>
    %c0_210 = arith.constant 0 : index
    %c0_211 = arith.constant 0 : index
    %540 = vector.load %arg4[%c0_210, %c0_211] : memref<128x512xf32, #tpu.memory_space<vmem>>, vector<128x512xf32>
    %cst_212 = arith.constant dense<0.000000e+00> : vector<2x512xf32>
    %541 = tpu.matmul %535, %540, %cst_212 {dimension_numbers = #tpu.dot_dimension_numbers<[1], [0], [0], [1], [0, 0, 1, 1], [], []>} : vector<2x128xf32>, vector<128x512xf32>, vector<2x512xf32> -> vector<2x512xf32>
    %542 = arith.addf %539, %541 : vector<2x512xf32>
    %543 = vector.extract_strided_slice %542 {offsets = [0, 0], sizes = [2, 384], strides = [1, 1]} : vector<2x512xf32> to vector<2x384xf32>
    %cst_213 = arith.constant 5.000000e-01 : f32
    %544 = vector.broadcast %cst_213 : f32 to vector<2x384xf32>
    %545 = arith.mulf %544, %543 : vector<2x384xf32>
    %546 = math.tanh %545 : vector<2x384xf32>
    %cst_214 = arith.constant 5.000000e-01 : f32
    %547 = vector.broadcast %cst_214 : f32 to vector<2x384xf32>
    %548 = arith.mulf %547, %546 : vector<2x384xf32>
    %cst_215 = arith.constant 5.000000e-01 : f32
    %549 = vector.broadcast %cst_215 : f32 to vector<2x384xf32>
    %550 = arith.addf %548, %549 : vector<2x384xf32>
    %551 = vector.extract_strided_slice %550 {offsets = [0, 0], sizes = [2, 128], strides = [1, 1]} : vector<2x384xf32> to vector<2x128xf32>
    %552 = vector.extract_strided_slice %550 {offsets = [0, 128], sizes = [2, 128], strides = [1, 1]} : vector<2x384xf32> to vector<2x128xf32>
    %553 = vector.extract_strided_slice %550 {offsets = [0, 256], sizes = [2, 128], strides = [1, 1]} : vector<2x384xf32> to vector<2x128xf32>
    %554 = vector.extract_strided_slice %542 {offsets = [0, 384], sizes = [2, 128], strides = [1, 1]} : vector<2x512xf32> to vector<2x128xf32>
    %555 = math.tanh %554 : vector<2x128xf32>
    %556 = arith.mulf %552, %533 : vector<2x128xf32>
    %557 = arith.mulf %551, %555 : vector<2x128xf32>
    %558 = arith.addf %556, %557 : vector<2x128xf32>
    %559 = math.tanh %558 : vector<2x128xf32>
    %560 = arith.mulf %553, %559 : vector<2x128xf32>
    %c4_i32_216 = arith.constant 4 : i32
    %561 = arith.addi %c2_i32_179, %c4_i32_216 : i32
    %562 = arith.index_cast %561 : i32 to index
    %c0_217 = arith.constant 0 : index
    %c0_218 = arith.constant 0 : index
    %563 = vector.load %arg9[%562, %c0_217, %c0_218] : memref<12x2x512xf32, #tpu.memory_space<vmem>>, vector<1x2x512xf32>
    %564 = vector.shape_cast %563 : vector<1x2x512xf32> to vector<2x512xf32>
    %c0_219 = arith.constant 0 : index
    %c0_220 = arith.constant 0 : index
    %565 = vector.load %arg4[%c0_219, %c0_220] : memref<128x512xf32, #tpu.memory_space<vmem>>, vector<128x512xf32>
    %cst_221 = arith.constant dense<0.000000e+00> : vector<2x512xf32>
    %566 = tpu.matmul %560, %565, %cst_221 {dimension_numbers = #tpu.dot_dimension_numbers<[1], [0], [0], [1], [0, 0, 1, 1], [], []>} : vector<2x128xf32>, vector<128x512xf32>, vector<2x512xf32> -> vector<2x512xf32>
    %567 = arith.addf %564, %566 : vector<2x512xf32>
    %568 = vector.extract_strided_slice %567 {offsets = [0, 0], sizes = [2, 384], strides = [1, 1]} : vector<2x512xf32> to vector<2x384xf32>
    %cst_222 = arith.constant 5.000000e-01 : f32
    %569 = vector.broadcast %cst_222 : f32 to vector<2x384xf32>
    %570 = arith.mulf %569, %568 : vector<2x384xf32>
    %571 = math.tanh %570 : vector<2x384xf32>
    %cst_223 = arith.constant 5.000000e-01 : f32
    %572 = vector.broadcast %cst_223 : f32 to vector<2x384xf32>
    %573 = arith.mulf %572, %571 : vector<2x384xf32>
    %cst_224 = arith.constant 5.000000e-01 : f32
    %574 = vector.broadcast %cst_224 : f32 to vector<2x384xf32>
    %575 = arith.addf %573, %574 : vector<2x384xf32>
    %576 = vector.extract_strided_slice %575 {offsets = [0, 0], sizes = [2, 128], strides = [1, 1]} : vector<2x384xf32> to vector<2x128xf32>
    %577 = vector.extract_strided_slice %575 {offsets = [0, 128], sizes = [2, 128], strides = [1, 1]} : vector<2x384xf32> to vector<2x128xf32>
    %578 = vector.extract_strided_slice %575 {offsets = [0, 256], sizes = [2, 128], strides = [1, 1]} : vector<2x384xf32> to vector<2x128xf32>
    %579 = vector.extract_strided_slice %567 {offsets = [0, 384], sizes = [2, 128], strides = [1, 1]} : vector<2x512xf32> to vector<2x128xf32>
    %580 = math.tanh %579 : vector<2x128xf32>
    %581 = arith.mulf %577, %558 : vector<2x128xf32>
    %582 = arith.mulf %576, %580 : vector<2x128xf32>
    %583 = arith.addf %581, %582 : vector<2x128xf32>
    %584 = math.tanh %583 : vector<2x128xf32>
    %585 = arith.mulf %578, %584 : vector<2x128xf32>
    %c5_i32_225 = arith.constant 5 : i32
    %586 = arith.addi %c2_i32_179, %c5_i32_225 : i32
    %587 = arith.index_cast %586 : i32 to index
    %c0_226 = arith.constant 0 : index
    %c0_227 = arith.constant 0 : index
    %588 = vector.load %arg9[%587, %c0_226, %c0_227] : memref<12x2x512xf32, #tpu.memory_space<vmem>>, vector<1x2x512xf32>
    %589 = vector.shape_cast %588 : vector<1x2x512xf32> to vector<2x512xf32>
    %c0_228 = arith.constant 0 : index
    %c0_229 = arith.constant 0 : index
    %590 = vector.load %arg4[%c0_228, %c0_229] : memref<128x512xf32, #tpu.memory_space<vmem>>, vector<128x512xf32>
    %cst_230 = arith.constant dense<0.000000e+00> : vector<2x512xf32>
    %591 = tpu.matmul %585, %590, %cst_230 {dimension_numbers = #tpu.dot_dimension_numbers<[1], [0], [0], [1], [0, 0, 1, 1], [], []>} : vector<2x128xf32>, vector<128x512xf32>, vector<2x512xf32> -> vector<2x512xf32>
    %592 = arith.addf %589, %591 : vector<2x512xf32>
    %593 = vector.extract_strided_slice %592 {offsets = [0, 0], sizes = [2, 384], strides = [1, 1]} : vector<2x512xf32> to vector<2x384xf32>
    %cst_231 = arith.constant 5.000000e-01 : f32
    %594 = vector.broadcast %cst_231 : f32 to vector<2x384xf32>
    %595 = arith.mulf %594, %593 : vector<2x384xf32>
    %596 = math.tanh %595 : vector<2x384xf32>
    %cst_232 = arith.constant 5.000000e-01 : f32
    %597 = vector.broadcast %cst_232 : f32 to vector<2x384xf32>
    %598 = arith.mulf %597, %596 : vector<2x384xf32>
    %cst_233 = arith.constant 5.000000e-01 : f32
    %599 = vector.broadcast %cst_233 : f32 to vector<2x384xf32>
    %600 = arith.addf %598, %599 : vector<2x384xf32>
    %601 = vector.extract_strided_slice %600 {offsets = [0, 0], sizes = [2, 128], strides = [1, 1]} : vector<2x384xf32> to vector<2x128xf32>
    %602 = vector.extract_strided_slice %600 {offsets = [0, 128], sizes = [2, 128], strides = [1, 1]} : vector<2x384xf32> to vector<2x128xf32>
    %603 = vector.extract_strided_slice %600 {offsets = [0, 256], sizes = [2, 128], strides = [1, 1]} : vector<2x384xf32> to vector<2x128xf32>
    %604 = vector.extract_strided_slice %592 {offsets = [0, 384], sizes = [2, 128], strides = [1, 1]} : vector<2x512xf32> to vector<2x128xf32>
    %605 = math.tanh %604 : vector<2x128xf32>
    %606 = arith.mulf %602, %583 : vector<2x128xf32>
    %607 = arith.mulf %601, %605 : vector<2x128xf32>
    %608 = arith.addf %606, %607 : vector<2x128xf32>
    %609 = math.tanh %608 : vector<2x128xf32>
    %610 = arith.mulf %603, %609 : vector<2x128xf32>
    %c6_i32_234 = arith.constant 6 : i32
    %611 = arith.addi %c2_i32_179, %c6_i32_234 : i32
    %612 = arith.index_cast %611 : i32 to index
    %c0_235 = arith.constant 0 : index
    %c0_236 = arith.constant 0 : index
    %613 = vector.load %arg9[%612, %c0_235, %c0_236] : memref<12x2x512xf32, #tpu.memory_space<vmem>>, vector<1x2x512xf32>
    %614 = vector.shape_cast %613 : vector<1x2x512xf32> to vector<2x512xf32>
    %c0_237 = arith.constant 0 : index
    %c0_238 = arith.constant 0 : index
    %615 = vector.load %arg4[%c0_237, %c0_238] : memref<128x512xf32, #tpu.memory_space<vmem>>, vector<128x512xf32>
    %cst_239 = arith.constant dense<0.000000e+00> : vector<2x512xf32>
    %616 = tpu.matmul %610, %615, %cst_239 {dimension_numbers = #tpu.dot_dimension_numbers<[1], [0], [0], [1], [0, 0, 1, 1], [], []>} : vector<2x128xf32>, vector<128x512xf32>, vector<2x512xf32> -> vector<2x512xf32>
    %617 = arith.addf %614, %616 : vector<2x512xf32>
    %618 = vector.extract_strided_slice %617 {offsets = [0, 0], sizes = [2, 384], strides = [1, 1]} : vector<2x512xf32> to vector<2x384xf32>
    %cst_240 = arith.constant 5.000000e-01 : f32
    %619 = vector.broadcast %cst_240 : f32 to vector<2x384xf32>
    %620 = arith.mulf %619, %618 : vector<2x384xf32>
    %621 = math.tanh %620 : vector<2x384xf32>
    %cst_241 = arith.constant 5.000000e-01 : f32
    %622 = vector.broadcast %cst_241 : f32 to vector<2x384xf32>
    %623 = arith.mulf %622, %621 : vector<2x384xf32>
    %cst_242 = arith.constant 5.000000e-01 : f32
    %624 = vector.broadcast %cst_242 : f32 to vector<2x384xf32>
    %625 = arith.addf %623, %624 : vector<2x384xf32>
    %626 = vector.extract_strided_slice %625 {offsets = [0, 0], sizes = [2, 128], strides = [1, 1]} : vector<2x384xf32> to vector<2x128xf32>
    %627 = vector.extract_strided_slice %625 {offsets = [0, 128], sizes = [2, 128], strides = [1, 1]} : vector<2x384xf32> to vector<2x128xf32>
    %628 = vector.extract_strided_slice %625 {offsets = [0, 256], sizes = [2, 128], strides = [1, 1]} : vector<2x384xf32> to vector<2x128xf32>
    %629 = vector.extract_strided_slice %617 {offsets = [0, 384], sizes = [2, 128], strides = [1, 1]} : vector<2x512xf32> to vector<2x128xf32>
    %630 = math.tanh %629 : vector<2x128xf32>
    %631 = arith.mulf %627, %608 : vector<2x128xf32>
    %632 = arith.mulf %626, %630 : vector<2x128xf32>
    %633 = arith.addf %631, %632 : vector<2x128xf32>
    %634 = math.tanh %633 : vector<2x128xf32>
    %635 = arith.mulf %628, %634 : vector<2x128xf32>
    %c7_i32_243 = arith.constant 7 : i32
    %636 = arith.addi %c2_i32_179, %c7_i32_243 : i32
    %637 = arith.index_cast %636 : i32 to index
    %c0_244 = arith.constant 0 : index
    %c0_245 = arith.constant 0 : index
    %638 = vector.load %arg9[%637, %c0_244, %c0_245] : memref<12x2x512xf32, #tpu.memory_space<vmem>>, vector<1x2x512xf32>
    %639 = vector.shape_cast %638 : vector<1x2x512xf32> to vector<2x512xf32>
    %c0_246 = arith.constant 0 : index
    %c0_247 = arith.constant 0 : index
    %640 = vector.load %arg4[%c0_246, %c0_247] : memref<128x512xf32, #tpu.memory_space<vmem>>, vector<128x512xf32>
    %cst_248 = arith.constant dense<0.000000e+00> : vector<2x512xf32>
    %641 = tpu.matmul %635, %640, %cst_248 {dimension_numbers = #tpu.dot_dimension_numbers<[1], [0], [0], [1], [0, 0, 1, 1], [], []>} : vector<2x128xf32>, vector<128x512xf32>, vector<2x512xf32> -> vector<2x512xf32>
    %642 = arith.addf %639, %641 : vector<2x512xf32>
    %643 = vector.extract_strided_slice %642 {offsets = [0, 0], sizes = [2, 384], strides = [1, 1]} : vector<2x512xf32> to vector<2x384xf32>
    %cst_249 = arith.constant 5.000000e-01 : f32
    %644 = vector.broadcast %cst_249 : f32 to vector<2x384xf32>
    %645 = arith.mulf %644, %643 : vector<2x384xf32>
    %646 = math.tanh %645 : vector<2x384xf32>
    %cst_250 = arith.constant 5.000000e-01 : f32
    %647 = vector.broadcast %cst_250 : f32 to vector<2x384xf32>
    %648 = arith.mulf %647, %646 : vector<2x384xf32>
    %cst_251 = arith.constant 5.000000e-01 : f32
    %649 = vector.broadcast %cst_251 : f32 to vector<2x384xf32>
    %650 = arith.addf %648, %649 : vector<2x384xf32>
    %651 = vector.extract_strided_slice %650 {offsets = [0, 0], sizes = [2, 128], strides = [1, 1]} : vector<2x384xf32> to vector<2x128xf32>
    %652 = vector.extract_strided_slice %650 {offsets = [0, 128], sizes = [2, 128], strides = [1, 1]} : vector<2x384xf32> to vector<2x128xf32>
    %653 = vector.extract_strided_slice %650 {offsets = [0, 256], sizes = [2, 128], strides = [1, 1]} : vector<2x384xf32> to vector<2x128xf32>
    %654 = vector.extract_strided_slice %642 {offsets = [0, 384], sizes = [2, 128], strides = [1, 1]} : vector<2x512xf32> to vector<2x128xf32>
    %655 = math.tanh %654 : vector<2x128xf32>
    %656 = arith.mulf %652, %633 : vector<2x128xf32>
    %657 = arith.mulf %651, %655 : vector<2x128xf32>
    %658 = arith.addf %656, %657 : vector<2x128xf32>
    %659 = math.tanh %658 : vector<2x128xf32>
    %660 = arith.mulf %653, %659 : vector<2x128xf32>
    %c8_i32_252 = arith.constant 8 : i32
    %c0_253 = arith.constant 0 : index
    %c0_254 = arith.constant 0 : index
    %661 = vector.load %arg6[%c0_253, %c0_254] : memref<1x128xf32, #tpu.memory_space<vmem>>, vector<1x128xf32>
    %662 = vector.broadcast %661 : vector<1x128xf32> to vector<2x128xf32>
    %663 = arith.mulf %660, %662 : vector<2x128xf32>
    %cst_255 = arith.constant dense<0.000000e+00> : vector<2xf32>
    %664 = vector.multi_reduction <add>, %663, %cst_255 [1] : vector<2x128xf32> to vector<2xf32>
    %665 = vector.shape_cast %664 : vector<2xf32> to vector<2x1xf32>
    %c0_256 = arith.constant 0 : index
    %c0_257 = arith.constant 0 : index
    %666 = vector.load %arg7[%c0_256, %c0_257] : memref<1x1xf32, #tpu.memory_space<vmem>>, vector<1x1xf32>
    %667 = vector.broadcast %666 : vector<1x1xf32> to vector<2x1xf32>
    %668 = arith.addf %665, %667 : vector<2x1xf32>
    %669 = arith.index_cast %c2_i32_179 : i32 to index
    %c0_258 = arith.constant 0 : index
    %c0_259 = arith.constant 0 : index
    %670 = vector.load %arg8[%669, %c0_258, %c0_259] : memref<4x2x1xf32, #tpu.memory_space<vmem>>, vector<1x2x1xf32>
    %671 = vector.shape_cast %670 : vector<1x2x1xf32> to vector<2x1xf32>
    %672 = vector.shape_cast %668 : vector<2x1xf32> to vector<1x2x1xf32>
    tpu.vector_store %arg8[%669, %c0_258, %c0_259], %672 {strides = array<i32>} : memref<4x2x1xf32, #tpu.memory_space<vmem>>, vector<1x2x1xf32>,
    %c0_260 = arith.constant 0 : index
    %c0_261 = arith.constant 0 : index
    %673 = vector.load %arg3[%c0_260, %c0_261] : memref<1x512xf32, #tpu.memory_space<vmem>>, vector<1x512xf32>
    %674 = vector.broadcast %668 : vector<2x1xf32> to vector<2x512xf32>
    %675 = vector.broadcast %673 : vector<1x512xf32> to vector<2x512xf32>
    %676 = arith.mulf %674, %675 : vector<2x512xf32>
    %c0_262 = arith.constant 0 : index
    %c0_263 = arith.constant 0 : index
    %677 = vector.load %arg5[%c0_262, %c0_263] : memref<1x512xf32, #tpu.memory_space<vmem>>, vector<1x512xf32>
    %678 = vector.broadcast %677 : vector<1x512xf32> to vector<2x512xf32>
    %679 = arith.addf %676, %678 : vector<2x512xf32>
    %c8_i32_264 = arith.constant 8 : i32
    %680 = arith.addi %c8_i32_264, %c2_i32_179 : i32
    %681 = arith.index_cast %680 : i32 to index
    %c0_265 = arith.constant 0 : index
    %c0_266 = arith.constant 0 : index
    %682 = vector.load %arg9[%681, %c0_265, %c0_266] : memref<12x2x512xf32, #tpu.memory_space<vmem>>, vector<1x2x512xf32>
    %683 = vector.shape_cast %682 : vector<1x2x512xf32> to vector<2x512xf32>
    %684 = vector.shape_cast %679 : vector<2x512xf32> to vector<1x2x512xf32>
    tpu.vector_store %arg9[%681, %c0_265, %c0_266], %684 {strides = array<i32>} : memref<12x2x512xf32, #tpu.memory_space<vmem>>, vector<1x2x512xf32>,
    %c3_i32_267 = arith.constant 3 : i32
    %c0_i32_268 = arith.constant 0 : i32
    %685 = arith.addi %c3_i32_267, %c0_i32_268 : i32
    %686 = arith.index_cast %685 : i32 to index
    %c0_269 = arith.constant 0 : index
    %c0_270 = arith.constant 0 : index
    %687 = vector.load %arg9[%686, %c0_269, %c0_270] : memref<12x2x512xf32, #tpu.memory_space<vmem>>, vector<1x2x512xf32>
    %688 = vector.shape_cast %687 : vector<1x2x512xf32> to vector<2x512xf32>
    %c0_271 = arith.constant 0 : index
    %c0_272 = arith.constant 0 : index
    %689 = vector.load %arg4[%c0_271, %c0_272] : memref<128x512xf32, #tpu.memory_space<vmem>>, vector<128x512xf32>
    %cst_273 = arith.constant dense<0.000000e+00> : vector<2x512xf32>
    %690 = tpu.matmul %660, %689, %cst_273 {dimension_numbers = #tpu.dot_dimension_numbers<[1], [0], [0], [1], [0, 0, 1, 1], [], []>} : vector<2x128xf32>, vector<128x512xf32>, vector<2x512xf32> -> vector<2x512xf32>
    %691 = arith.addf %688, %690 : vector<2x512xf32>
    %692 = vector.extract_strided_slice %691 {offsets = [0, 0], sizes = [2, 384], strides = [1, 1]} : vector<2x512xf32> to vector<2x384xf32>
    %cst_274 = arith.constant 5.000000e-01 : f32
    %693 = vector.broadcast %cst_274 : f32 to vector<2x384xf32>
    %694 = arith.mulf %693, %692 : vector<2x384xf32>
    %695 = math.tanh %694 : vector<2x384xf32>
    %cst_275 = arith.constant 5.000000e-01 : f32
    %696 = vector.broadcast %cst_275 : f32 to vector<2x384xf32>
    %697 = arith.mulf %696, %695 : vector<2x384xf32>
    %cst_276 = arith.constant 5.000000e-01 : f32
    %698 = vector.broadcast %cst_276 : f32 to vector<2x384xf32>
    %699 = arith.addf %697, %698 : vector<2x384xf32>
    %700 = vector.extract_strided_slice %699 {offsets = [0, 0], sizes = [2, 128], strides = [1, 1]} : vector<2x384xf32> to vector<2x128xf32>
    %701 = vector.extract_strided_slice %699 {offsets = [0, 128], sizes = [2, 128], strides = [1, 1]} : vector<2x384xf32> to vector<2x128xf32>
    %702 = vector.extract_strided_slice %699 {offsets = [0, 256], sizes = [2, 128], strides = [1, 1]} : vector<2x384xf32> to vector<2x128xf32>
    %703 = vector.extract_strided_slice %691 {offsets = [0, 384], sizes = [2, 128], strides = [1, 1]} : vector<2x512xf32> to vector<2x128xf32>
    %704 = math.tanh %703 : vector<2x128xf32>
    %705 = arith.mulf %701, %658 : vector<2x128xf32>
    %706 = arith.mulf %700, %704 : vector<2x128xf32>
    %707 = arith.addf %705, %706 : vector<2x128xf32>
    %708 = math.tanh %707 : vector<2x128xf32>
    %709 = arith.mulf %702, %708 : vector<2x128xf32>
    %c1_i32_277 = arith.constant 1 : i32
    %710 = arith.addi %c3_i32_267, %c1_i32_277 : i32
    %711 = arith.index_cast %710 : i32 to index
    %c0_278 = arith.constant 0 : index
    %c0_279 = arith.constant 0 : index
    %712 = vector.load %arg9[%711, %c0_278, %c0_279] : memref<12x2x512xf32, #tpu.memory_space<vmem>>, vector<1x2x512xf32>
    %713 = vector.shape_cast %712 : vector<1x2x512xf32> to vector<2x512xf32>
    %c0_280 = arith.constant 0 : index
    %c0_281 = arith.constant 0 : index
    %714 = vector.load %arg4[%c0_280, %c0_281] : memref<128x512xf32, #tpu.memory_space<vmem>>, vector<128x512xf32>
    %cst_282 = arith.constant dense<0.000000e+00> : vector<2x512xf32>
    %715 = tpu.matmul %709, %714, %cst_282 {dimension_numbers = #tpu.dot_dimension_numbers<[1], [0], [0], [1], [0, 0, 1, 1], [], []>} : vector<2x128xf32>, vector<128x512xf32>, vector<2x512xf32> -> vector<2x512xf32>
    %716 = arith.addf %713, %715 : vector<2x512xf32>
    %717 = vector.extract_strided_slice %716 {offsets = [0, 0], sizes = [2, 384], strides = [1, 1]} : vector<2x512xf32> to vector<2x384xf32>
    %cst_283 = arith.constant 5.000000e-01 : f32
    %718 = vector.broadcast %cst_283 : f32 to vector<2x384xf32>
    %719 = arith.mulf %718, %717 : vector<2x384xf32>
    %720 = math.tanh %719 : vector<2x384xf32>
    %cst_284 = arith.constant 5.000000e-01 : f32
    %721 = vector.broadcast %cst_284 : f32 to vector<2x384xf32>
    %722 = arith.mulf %721, %720 : vector<2x384xf32>
    %cst_285 = arith.constant 5.000000e-01 : f32
    %723 = vector.broadcast %cst_285 : f32 to vector<2x384xf32>
    %724 = arith.addf %722, %723 : vector<2x384xf32>
    %725 = vector.extract_strided_slice %724 {offsets = [0, 0], sizes = [2, 128], strides = [1, 1]} : vector<2x384xf32> to vector<2x128xf32>
    %726 = vector.extract_strided_slice %724 {offsets = [0, 128], sizes = [2, 128], strides = [1, 1]} : vector<2x384xf32> to vector<2x128xf32>
    %727 = vector.extract_strided_slice %724 {offsets = [0, 256], sizes = [2, 128], strides = [1, 1]} : vector<2x384xf32> to vector<2x128xf32>
    %728 = vector.extract_strided_slice %716 {offsets = [0, 384], sizes = [2, 128], strides = [1, 1]} : vector<2x512xf32> to vector<2x128xf32>
    %729 = math.tanh %728 : vector<2x128xf32>
    %730 = arith.mulf %726, %707 : vector<2x128xf32>
    %731 = arith.mulf %725, %729 : vector<2x128xf32>
    %732 = arith.addf %730, %731 : vector<2x128xf32>
    %733 = math.tanh %732 : vector<2x128xf32>
    %734 = arith.mulf %727, %733 : vector<2x128xf32>
    %c2_i32_286 = arith.constant 2 : i32
    %735 = arith.addi %c3_i32_267, %c2_i32_286 : i32
    %736 = arith.index_cast %735 : i32 to index
    %c0_287 = arith.constant 0 : index
    %c0_288 = arith.constant 0 : index
    %737 = vector.load %arg9[%736, %c0_287, %c0_288] : memref<12x2x512xf32, #tpu.memory_space<vmem>>, vector<1x2x512xf32>
    %738 = vector.shape_cast %737 : vector<1x2x512xf32> to vector<2x512xf32>
    %c0_289 = arith.constant 0 : index
    %c0_290 = arith.constant 0 : index
    %739 = vector.load %arg4[%c0_289, %c0_290] : memref<128x512xf32, #tpu.memory_space<vmem>>, vector<128x512xf32>
    %cst_291 = arith.constant dense<0.000000e+00> : vector<2x512xf32>
    %740 = tpu.matmul %734, %739, %cst_291 {dimension_numbers = #tpu.dot_dimension_numbers<[1], [0], [0], [1], [0, 0, 1, 1], [], []>} : vector<2x128xf32>, vector<128x512xf32>, vector<2x512xf32> -> vector<2x512xf32>
    %741 = arith.addf %738, %740 : vector<2x512xf32>
    %742 = vector.extract_strided_slice %741 {offsets = [0, 0], sizes = [2, 384], strides = [1, 1]} : vector<2x512xf32> to vector<2x384xf32>
    %cst_292 = arith.constant 5.000000e-01 : f32
    %743 = vector.broadcast %cst_292 : f32 to vector<2x384xf32>
    %744 = arith.mulf %743, %742 : vector<2x384xf32>
    %745 = math.tanh %744 : vector<2x384xf32>
    %cst_293 = arith.constant 5.000000e-01 : f32
    %746 = vector.broadcast %cst_293 : f32 to vector<2x384xf32>
    %747 = arith.mulf %746, %745 : vector<2x384xf32>
    %cst_294 = arith.constant 5.000000e-01 : f32
    %748 = vector.broadcast %cst_294 : f32 to vector<2x384xf32>
    %749 = arith.addf %747, %748 : vector<2x384xf32>
    %750 = vector.extract_strided_slice %749 {offsets = [0, 0], sizes = [2, 128], strides = [1, 1]} : vector<2x384xf32> to vector<2x128xf32>
    %751 = vector.extract_strided_slice %749 {offsets = [0, 128], sizes = [2, 128], strides = [1, 1]} : vector<2x384xf32> to vector<2x128xf32>
    %752 = vector.extract_strided_slice %749 {offsets = [0, 256], sizes = [2, 128], strides = [1, 1]} : vector<2x384xf32> to vector<2x128xf32>
    %753 = vector.extract_strided_slice %741 {offsets = [0, 384], sizes = [2, 128], strides = [1, 1]} : vector<2x512xf32> to vector<2x128xf32>
    %754 = math.tanh %753 : vector<2x128xf32>
    %755 = arith.mulf %751, %732 : vector<2x128xf32>
    %756 = arith.mulf %750, %754 : vector<2x128xf32>
    %757 = arith.addf %755, %756 : vector<2x128xf32>
    %758 = math.tanh %757 : vector<2x128xf32>
    %759 = arith.mulf %752, %758 : vector<2x128xf32>
    %c3_i32_295 = arith.constant 3 : i32
    %760 = arith.addi %c3_i32_267, %c3_i32_295 : i32
    %761 = arith.index_cast %760 : i32 to index
    %c0_296 = arith.constant 0 : index
    %c0_297 = arith.constant 0 : index
    %762 = vector.load %arg9[%761, %c0_296, %c0_297] : memref<12x2x512xf32, #tpu.memory_space<vmem>>, vector<1x2x512xf32>
    %763 = vector.shape_cast %762 : vector<1x2x512xf32> to vector<2x512xf32>
    %c0_298 = arith.constant 0 : index
    %c0_299 = arith.constant 0 : index
    %764 = vector.load %arg4[%c0_298, %c0_299] : memref<128x512xf32, #tpu.memory_space<vmem>>, vector<128x512xf32>
    %cst_300 = arith.constant dense<0.000000e+00> : vector<2x512xf32>
    %765 = tpu.matmul %759, %764, %cst_300 {dimension_numbers = #tpu.dot_dimension_numbers<[1], [0], [0], [1], [0, 0, 1, 1], [], []>} : vector<2x128xf32>, vector<128x512xf32>, vector<2x512xf32> -> vector<2x512xf32>
    %766 = arith.addf %763, %765 : vector<2x512xf32>
    %767 = vector.extract_strided_slice %766 {offsets = [0, 0], sizes = [2, 384], strides = [1, 1]} : vector<2x512xf32> to vector<2x384xf32>
    %cst_301 = arith.constant 5.000000e-01 : f32
    %768 = vector.broadcast %cst_301 : f32 to vector<2x384xf32>
    %769 = arith.mulf %768, %767 : vector<2x384xf32>
    %770 = math.tanh %769 : vector<2x384xf32>
    %cst_302 = arith.constant 5.000000e-01 : f32
    %771 = vector.broadcast %cst_302 : f32 to vector<2x384xf32>
    %772 = arith.mulf %771, %770 : vector<2x384xf32>
    %cst_303 = arith.constant 5.000000e-01 : f32
    %773 = vector.broadcast %cst_303 : f32 to vector<2x384xf32>
    %774 = arith.addf %772, %773 : vector<2x384xf32>
    %775 = vector.extract_strided_slice %774 {offsets = [0, 0], sizes = [2, 128], strides = [1, 1]} : vector<2x384xf32> to vector<2x128xf32>
    %776 = vector.extract_strided_slice %774 {offsets = [0, 128], sizes = [2, 128], strides = [1, 1]} : vector<2x384xf32> to vector<2x128xf32>
    %777 = vector.extract_strided_slice %774 {offsets = [0, 256], sizes = [2, 128], strides = [1, 1]} : vector<2x384xf32> to vector<2x128xf32>
    %778 = vector.extract_strided_slice %766 {offsets = [0, 384], sizes = [2, 128], strides = [1, 1]} : vector<2x512xf32> to vector<2x128xf32>
    %779 = math.tanh %778 : vector<2x128xf32>
    %780 = arith.mulf %776, %757 : vector<2x128xf32>
    %781 = arith.mulf %775, %779 : vector<2x128xf32>
    %782 = arith.addf %780, %781 : vector<2x128xf32>
    %783 = math.tanh %782 : vector<2x128xf32>
    %784 = arith.mulf %777, %783 : vector<2x128xf32>
    %c4_i32_304 = arith.constant 4 : i32
    %785 = arith.addi %c3_i32_267, %c4_i32_304 : i32
    %786 = arith.index_cast %785 : i32 to index
    %c0_305 = arith.constant 0 : index
    %c0_306 = arith.constant 0 : index
    %787 = vector.load %arg9[%786, %c0_305, %c0_306] : memref<12x2x512xf32, #tpu.memory_space<vmem>>, vector<1x2x512xf32>
    %788 = vector.shape_cast %787 : vector<1x2x512xf32> to vector<2x512xf32>
    %c0_307 = arith.constant 0 : index
    %c0_308 = arith.constant 0 : index
    %789 = vector.load %arg4[%c0_307, %c0_308] : memref<128x512xf32, #tpu.memory_space<vmem>>, vector<128x512xf32>
    %cst_309 = arith.constant dense<0.000000e+00> : vector<2x512xf32>
    %790 = tpu.matmul %784, %789, %cst_309 {dimension_numbers = #tpu.dot_dimension_numbers<[1], [0], [0], [1], [0, 0, 1, 1], [], []>} : vector<2x128xf32>, vector<128x512xf32>, vector<2x512xf32> -> vector<2x512xf32>
    %791 = arith.addf %788, %790 : vector<2x512xf32>
    %792 = vector.extract_strided_slice %791 {offsets = [0, 0], sizes = [2, 384], strides = [1, 1]} : vector<2x512xf32> to vector<2x384xf32>
    %cst_310 = arith.constant 5.000000e-01 : f32
    %793 = vector.broadcast %cst_310 : f32 to vector<2x384xf32>
    %794 = arith.mulf %793, %792 : vector<2x384xf32>
    %795 = math.tanh %794 : vector<2x384xf32>
    %cst_311 = arith.constant 5.000000e-01 : f32
    %796 = vector.broadcast %cst_311 : f32 to vector<2x384xf32>
    %797 = arith.mulf %796, %795 : vector<2x384xf32>
    %cst_312 = arith.constant 5.000000e-01 : f32
    %798 = vector.broadcast %cst_312 : f32 to vector<2x384xf32>
    %799 = arith.addf %797, %798 : vector<2x384xf32>
    %800 = vector.extract_strided_slice %799 {offsets = [0, 0], sizes = [2, 128], strides = [1, 1]} : vector<2x384xf32> to vector<2x128xf32>
    %801 = vector.extract_strided_slice %799 {offsets = [0, 128], sizes = [2, 128], strides = [1, 1]} : vector<2x384xf32> to vector<2x128xf32>
    %802 = vector.extract_strided_slice %799 {offsets = [0, 256], sizes = [2, 128], strides = [1, 1]} : vector<2x384xf32> to vector<2x128xf32>
    %803 = vector.extract_strided_slice %791 {offsets = [0, 384], sizes = [2, 128], strides = [1, 1]} : vector<2x512xf32> to vector<2x128xf32>
    %804 = math.tanh %803 : vector<2x128xf32>
    %805 = arith.mulf %801, %782 : vector<2x128xf32>
    %806 = arith.mulf %800, %804 : vector<2x128xf32>
    %807 = arith.addf %805, %806 : vector<2x128xf32>
    %808 = math.tanh %807 : vector<2x128xf32>
    %809 = arith.mulf %802, %808 : vector<2x128xf32>
    %c5_i32_313 = arith.constant 5 : i32
    %810 = arith.addi %c3_i32_267, %c5_i32_313 : i32
    %811 = arith.index_cast %810 : i32 to index
    %c0_314 = arith.constant 0 : index
    %c0_315 = arith.constant 0 : index
    %812 = vector.load %arg9[%811, %c0_314, %c0_315] : memref<12x2x512xf32, #tpu.memory_space<vmem>>, vector<1x2x512xf32>
    %813 = vector.shape_cast %812 : vector<1x2x512xf32> to vector<2x512xf32>
    %c0_316 = arith.constant 0 : index
    %c0_317 = arith.constant 0 : index
    %814 = vector.load %arg4[%c0_316, %c0_317] : memref<128x512xf32, #tpu.memory_space<vmem>>, vector<128x512xf32>
    %cst_318 = arith.constant dense<0.000000e+00> : vector<2x512xf32>
    %815 = tpu.matmul %809, %814, %cst_318 {dimension_numbers = #tpu.dot_dimension_numbers<[1], [0], [0], [1], [0, 0, 1, 1], [], []>} : vector<2x128xf32>, vector<128x512xf32>, vector<2x512xf32> -> vector<2x512xf32>
    %816 = arith.addf %813, %815 : vector<2x512xf32>
    %817 = vector.extract_strided_slice %816 {offsets = [0, 0], sizes = [2, 384], strides = [1, 1]} : vector<2x512xf32> to vector<2x384xf32>
    %cst_319 = arith.constant 5.000000e-01 : f32
    %818 = vector.broadcast %cst_319 : f32 to vector<2x384xf32>
    %819 = arith.mulf %818, %817 : vector<2x384xf32>
    %820 = math.tanh %819 : vector<2x384xf32>
    %cst_320 = arith.constant 5.000000e-01 : f32
    %821 = vector.broadcast %cst_320 : f32 to vector<2x384xf32>
    %822 = arith.mulf %821, %820 : vector<2x384xf32>
    %cst_321 = arith.constant 5.000000e-01 : f32
    %823 = vector.broadcast %cst_321 : f32 to vector<2x384xf32>
    %824 = arith.addf %822, %823 : vector<2x384xf32>
    %825 = vector.extract_strided_slice %824 {offsets = [0, 0], sizes = [2, 128], strides = [1, 1]} : vector<2x384xf32> to vector<2x128xf32>
    %826 = vector.extract_strided_slice %824 {offsets = [0, 128], sizes = [2, 128], strides = [1, 1]} : vector<2x384xf32> to vector<2x128xf32>
    %827 = vector.extract_strided_slice %824 {offsets = [0, 256], sizes = [2, 128], strides = [1, 1]} : vector<2x384xf32> to vector<2x128xf32>
    %828 = vector.extract_strided_slice %816 {offsets = [0, 384], sizes = [2, 128], strides = [1, 1]} : vector<2x512xf32> to vector<2x128xf32>
    %829 = math.tanh %828 : vector<2x128xf32>
    %830 = arith.mulf %826, %807 : vector<2x128xf32>
    %831 = arith.mulf %825, %829 : vector<2x128xf32>
    %832 = arith.addf %830, %831 : vector<2x128xf32>
    %833 = math.tanh %832 : vector<2x128xf32>
    %834 = arith.mulf %827, %833 : vector<2x128xf32>
    %c6_i32_322 = arith.constant 6 : i32
    %835 = arith.addi %c3_i32_267, %c6_i32_322 : i32
    %836 = arith.index_cast %835 : i32 to index
    %c0_323 = arith.constant 0 : index
    %c0_324 = arith.constant 0 : index
    %837 = vector.load %arg9[%836, %c0_323, %c0_324] : memref<12x2x512xf32, #tpu.memory_space<vmem>>, vector<1x2x512xf32>
    %838 = vector.shape_cast %837 : vector<1x2x512xf32> to vector<2x512xf32>
    %c0_325 = arith.constant 0 : index
    %c0_326 = arith.constant 0 : index
    %839 = vector.load %arg4[%c0_325, %c0_326] : memref<128x512xf32, #tpu.memory_space<vmem>>, vector<128x512xf32>
    %cst_327 = arith.constant dense<0.000000e+00> : vector<2x512xf32>
    %840 = tpu.matmul %834, %839, %cst_327 {dimension_numbers = #tpu.dot_dimension_numbers<[1], [0], [0], [1], [0, 0, 1, 1], [], []>} : vector<2x128xf32>, vector<128x512xf32>, vector<2x512xf32> -> vector<2x512xf32>
    %841 = arith.addf %838, %840 : vector<2x512xf32>
    %842 = vector.extract_strided_slice %841 {offsets = [0, 0], sizes = [2, 384], strides = [1, 1]} : vector<2x512xf32> to vector<2x384xf32>
    %cst_328 = arith.constant 5.000000e-01 : f32
    %843 = vector.broadcast %cst_328 : f32 to vector<2x384xf32>
    %844 = arith.mulf %843, %842 : vector<2x384xf32>
    %845 = math.tanh %844 : vector<2x384xf32>
    %cst_329 = arith.constant 5.000000e-01 : f32
    %846 = vector.broadcast %cst_329 : f32 to vector<2x384xf32>
    %847 = arith.mulf %846, %845 : vector<2x384xf32>
    %cst_330 = arith.constant 5.000000e-01 : f32
    %848 = vector.broadcast %cst_330 : f32 to vector<2x384xf32>
    %849 = arith.addf %847, %848 : vector<2x384xf32>
    %850 = vector.extract_strided_slice %849 {offsets = [0, 0], sizes = [2, 128], strides = [1, 1]} : vector<2x384xf32> to vector<2x128xf32>
    %851 = vector.extract_strided_slice %849 {offsets = [0, 128], sizes = [2, 128], strides = [1, 1]} : vector<2x384xf32> to vector<2x128xf32>
    %852 = vector.extract_strided_slice %849 {offsets = [0, 256], sizes = [2, 128], strides = [1, 1]} : vector<2x384xf32> to vector<2x128xf32>
    %853 = vector.extract_strided_slice %841 {offsets = [0, 384], sizes = [2, 128], strides = [1, 1]} : vector<2x512xf32> to vector<2x128xf32>
    %854 = math.tanh %853 : vector<2x128xf32>
    %855 = arith.mulf %851, %832 : vector<2x128xf32>
    %856 = arith.mulf %850, %854 : vector<2x128xf32>
    %857 = arith.addf %855, %856 : vector<2x128xf32>
    %858 = math.tanh %857 : vector<2x128xf32>
    %859 = arith.mulf %852, %858 : vector<2x128xf32>
    %c7_i32_331 = arith.constant 7 : i32
    %860 = arith.addi %c3_i32_267, %c7_i32_331 : i32
    %861 = arith.index_cast %860 : i32 to index
    %c0_332 = arith.constant 0 : index
    %c0_333 = arith.constant 0 : index
    %862 = vector.load %arg9[%861, %c0_332, %c0_333] : memref<12x2x512xf32, #tpu.memory_space<vmem>>, vector<1x2x512xf32>
    %863 = vector.shape_cast %862 : vector<1x2x512xf32> to vector<2x512xf32>
    %c0_334 = arith.constant 0 : index
    %c0_335 = arith.constant 0 : index
    %864 = vector.load %arg4[%c0_334, %c0_335] : memref<128x512xf32, #tpu.memory_space<vmem>>, vector<128x512xf32>
    %cst_336 = arith.constant dense<0.000000e+00> : vector<2x512xf32>
    %865 = tpu.matmul %859, %864, %cst_336 {dimension_numbers = #tpu.dot_dimension_numbers<[1], [0], [0], [1], [0, 0, 1, 1], [], []>} : vector<2x128xf32>, vector<128x512xf32>, vector<2x512xf32> -> vector<2x512xf32>
    %866 = arith.addf %863, %865 : vector<2x512xf32>
    %867 = vector.extract_strided_slice %866 {offsets = [0, 0], sizes = [2, 384], strides = [1, 1]} : vector<2x512xf32> to vector<2x384xf32>
    %cst_337 = arith.constant 5.000000e-01 : f32
    %868 = vector.broadcast %cst_337 : f32 to vector<2x384xf32>
    %869 = arith.mulf %868, %867 : vector<2x384xf32>
    %870 = math.tanh %869 : vector<2x384xf32>
    %cst_338 = arith.constant 5.000000e-01 : f32
    %871 = vector.broadcast %cst_338 : f32 to vector<2x384xf32>
    %872 = arith.mulf %871, %870 : vector<2x384xf32>
    %cst_339 = arith.constant 5.000000e-01 : f32
    %873 = vector.broadcast %cst_339 : f32 to vector<2x384xf32>
    %874 = arith.addf %872, %873 : vector<2x384xf32>
    %875 = vector.extract_strided_slice %874 {offsets = [0, 0], sizes = [2, 128], strides = [1, 1]} : vector<2x384xf32> to vector<2x128xf32>
    %876 = vector.extract_strided_slice %874 {offsets = [0, 128], sizes = [2, 128], strides = [1, 1]} : vector<2x384xf32> to vector<2x128xf32>
    %877 = vector.extract_strided_slice %874 {offsets = [0, 256], sizes = [2, 128], strides = [1, 1]} : vector<2x384xf32> to vector<2x128xf32>
    %878 = vector.extract_strided_slice %866 {offsets = [0, 384], sizes = [2, 128], strides = [1, 1]} : vector<2x512xf32> to vector<2x128xf32>
    %879 = math.tanh %878 : vector<2x128xf32>
    %880 = arith.mulf %876, %857 : vector<2x128xf32>
    %881 = arith.mulf %875, %879 : vector<2x128xf32>
    %882 = arith.addf %880, %881 : vector<2x128xf32>
    %883 = math.tanh %882 : vector<2x128xf32>
    %884 = arith.mulf %877, %883 : vector<2x128xf32>
    %c8_i32_340 = arith.constant 8 : i32
    %c0_341 = arith.constant 0 : index
    %c0_342 = arith.constant 0 : index
    %885 = vector.load %arg6[%c0_341, %c0_342] : memref<1x128xf32, #tpu.memory_space<vmem>>, vector<1x128xf32>
    %886 = vector.broadcast %885 : vector<1x128xf32> to vector<2x128xf32>
    %887 = arith.mulf %884, %886 : vector<2x128xf32>
    %cst_343 = arith.constant dense<0.000000e+00> : vector<2xf32>
    %888 = vector.multi_reduction <add>, %887, %cst_343 [1] : vector<2x128xf32> to vector<2xf32>
    %889 = vector.shape_cast %888 : vector<2xf32> to vector<2x1xf32>
    %c0_344 = arith.constant 0 : index
    %c0_345 = arith.constant 0 : index
    %890 = vector.load %arg7[%c0_344, %c0_345] : memref<1x1xf32, #tpu.memory_space<vmem>>, vector<1x1xf32>
    %891 = vector.broadcast %890 : vector<1x1xf32> to vector<2x1xf32>
    %892 = arith.addf %889, %891 : vector<2x1xf32>
    %893 = arith.index_cast %c3_i32_267 : i32 to index
    %c0_346 = arith.constant 0 : index
    %c0_347 = arith.constant 0 : index
    %894 = vector.load %arg8[%893, %c0_346, %c0_347] : memref<4x2x1xf32, #tpu.memory_space<vmem>>, vector<1x2x1xf32>
    %895 = vector.shape_cast %894 : vector<1x2x1xf32> to vector<2x1xf32>
    %896 = vector.shape_cast %892 : vector<2x1xf32> to vector<1x2x1xf32>
    tpu.vector_store %arg8[%893, %c0_346, %c0_347], %896 {strides = array<i32>} : memref<4x2x1xf32, #tpu.memory_space<vmem>>, vector<1x2x1xf32>,
    %c0_348 = arith.constant 0 : index
    %c0_349 = arith.constant 0 : index
    %897 = vector.load %arg3[%c0_348, %c0_349] : memref<1x512xf32, #tpu.memory_space<vmem>>, vector<1x512xf32>
    %898 = vector.broadcast %892 : vector<2x1xf32> to vector<2x512xf32>
    %899 = vector.broadcast %897 : vector<1x512xf32> to vector<2x512xf32>
    %900 = arith.mulf %898, %899 : vector<2x512xf32>
    %c0_350 = arith.constant 0 : index
    %c0_351 = arith.constant 0 : index
    %901 = vector.load %arg5[%c0_350, %c0_351] : memref<1x512xf32, #tpu.memory_space<vmem>>, vector<1x512xf32>
    %902 = vector.broadcast %901 : vector<1x512xf32> to vector<2x512xf32>
    %903 = arith.addf %900, %902 : vector<2x512xf32>
    %c8_i32_352 = arith.constant 8 : i32
    %904 = arith.addi %c8_i32_352, %c3_i32_267 : i32
    %905 = arith.index_cast %904 : i32 to index
    %c0_353 = arith.constant 0 : index
    %c0_354 = arith.constant 0 : index
    %906 = vector.load %arg9[%905, %c0_353, %c0_354] : memref<12x2x512xf32, #tpu.memory_space<vmem>>, vector<1x2x512xf32>
    %907 = vector.shape_cast %906 : vector<1x2x512xf32> to vector<2x512xf32>
    %908 = vector.shape_cast %903 : vector<2x512xf32> to vector<1x2x512xf32>
    tpu.vector_store %arg9[%905, %c0_353, %c0_354], %908 {strides = array<i32>} : memref<12x2x512xf32, #tpu.memory_space<vmem>>, vector<1x2x512xf32>,
    %c4_i32_355 = arith.constant 4 : i32
    return
  }
}

</mosaic_0001>

<bundles_post_ra>
// kernel: local_lstm_forward.1
= control target key start
LH: loop header
LB: loop body
LE: loop exit
PB: predicated region body
PF: predicated region fallthrough
CT: control target
= control target key end

     0   :  { %v12597_v3 = vmov 0.0   ;;  %vm1924_vm0 = vcmask 1041408   ;;  %vm1936_vm1 = vcmask 1024   ;;  %s12588_s4 = inlined_call_operand.vmem [shape: f32[128,512], index: 4, kind: input, shape index: {}]   ;;  %s12589_s1 = inlined_call_operand.vmem [shape: f32[2,128], index: 1, kind: input, shape index: {}]   ;;  %s12590_s0 = inlined_call_operand.vmem [shape: f32[8,2,1], index: 0, kind: input, shape index: {}]   ;;  %s12591_s3 = inlined_call_operand.vmem [shape: f32[1,512], index: 3, kind: input, shape index: {}]   ;;  %s12592_s5 = inlined_call_operand.vmem [shape: f32[1,512], index: 5, kind: input, shape index: {}]   ;;  %s12593_s2 = inlined_call_operand.vmem [shape: f32[2,128], index: 2, kind: input, shape index: {}]   ;;  %s12594_s7 = inlined_call_operand.<no memory space> [shape: f32[1,1], index: 7, kind: input, shape index: {}]   ;;  %s12595_s6 = inlined_call_operand.vmem [shape: f32[1,128], index: 6, kind: input, shape index: {}]   ;;  %s12596_s8 = inlined_call_operand.vmem [shape: f32[4,2,1], index: 8, kind: output, shape index: {}]  }
   0x1   :  { %v7452_v0 = vld [vmem:[%s12588_s4 + $0x1e8] sm:$0xff]  ;;  %v7457_v1 = vld [vmem:[%s12588_s4 + $0x1f8] sm:$0xff]  ;;  %v7462_v2 = vld [vmem:[%s12588_s4 + $0x1e0] sm:$0xff]  ;;  %502 = vmatprep.mubr.f32.mxu0 %v12597_v3  ;;  %573 = vmatprep.mubr.f32.mxu1 %v12597_v3 }
   0x2   :  { %13042 = vst [vmem:[#allocation4_spill] sm:$0xff] %v7452_v0  ;;  %13043 = vst [vmem:[#allocation5_spill] sm:$0xff] %v7457_v1  ;;  %438 = vmatprep.subr.mxu0 %v7452_v0  ;;  %509 = vmatprep.subr.mxu1 %v7457_v1  ;;  %v7471_v4 = vld [vmem:[%s12588_s4 + $0x1f0] sm:$0xff]  ;;  %v7476_v5 = vld [vmem:[%s12588_s4 + $0x1c8] sm:$0xff] }
   0x3   :  { %v7481_v6 = vld [vmem:[%s12588_s4 + $0x1d8] sm:$0xff]  ;;  %439 = vmatpush1.msra.mxu0 %v7462_v2  ;;  %510 = vmatpush1.msra.mxu1 %v7471_v4  ;;  %v7488_v7 = vld [vmem:[%s12588_s4 + $0x1c0] sm:$0xff]  ;;  %v7493_v8 = vld [vmem:[%s12588_s4 + $0x1d0] sm:$0xff] }
   0x4   :  { %v7498_v9 = vld [vmem:[%s12588_s4 + $0x1a8] sm:$0xff]  ;;  %440 = vmatprep.subr.mxu0 %v7476_v5  ;;  %511 = vmatprep.subr.mxu1 %v7481_v6  ;;  %v7505_v10 = vld [vmem:[%s12588_s4 + $0x1b8] sm:$0xff]  ;;  %v7510_v11 = vld [vmem:[%s12588_s4 + $0x1a0] sm:$0xff] }
   0x5   :  { %v7515_v12 = vld [vmem:[%s12588_s4 + $0x1b0] sm:$0xff]  ;;  %441 = vmatpush1.msra.mxu0 %v7488_v7  ;;  %512 = vmatpush1.msra.mxu1 %v7493_v8  ;;  %v7522_v13 = vld [vmem:[%s12588_s4 + $0x188] sm:$0xff]  ;;  %v7527_v14 = vld [vmem:[%s12588_s4 + $0x198] sm:$0xff] }
   0x6   :  { %442 = vmatprep.subr.mxu0 %v7498_v9  ;;  %513 = vmatprep.subr.mxu1 %v7505_v10  ;;  %v7534_v15 = vld [vmem:[%s12588_s4 + $0x180] sm:$0xff]  ;;  %v7539_v16 = vld [vmem:[%s12588_s4 + $0x190] sm:$0xff]  ;;  %v7546_v17 = vld [vmem:[%s12588_s4 + $0x168] sm:$0xff] }
   0x7   :  { %443 = vmatpush1.msra.mxu0 %v7510_v11  ;;  %514 = vmatpush1.msra.mxu1 %v7515_v12  ;;  %v7551_v18 = vld [vmem:[%s12588_s4 + $0x178] sm:$0xff]  ;;  %v7558_v19 = vld [vmem:[%s12588_s4 + $0x160] sm:$0xff]  ;;  %v7563_v20 = vld [vmem:[%s12588_s4 + $0x170] sm:$0xff] }
   0x8   :  { %444 = vmatprep.subr.mxu0 %v7522_v13  ;;  %515 = vmatprep.subr.mxu1 %v7527_v14  ;;  %v7570_v21 = vld [vmem:[%s12588_s4 + $0x148] sm:$0xff]  ;;  %v7575_v22 = vld [vmem:[%s12588_s4 + $0x158] sm:$0xff]  ;;  %v7582_v23 = vld [vmem:[%s12588_s4 + $0x140] sm:$0xff] }
   0x9   :  { %445 = vmatpush1.msra.mxu0 %v7534_v15  ;;  %516 = vmatpush1.msra.mxu1 %v7539_v16  ;;  %v7587_v24 = vld [vmem:[%s12588_s4 + $0x150] sm:$0xff]  ;;  %v7594_v25 = vld [vmem:[%s12588_s4 + $0x128] sm:$0xff]  ;;  %v7599_v26 = vld [vmem:[%s12588_s4 + $0x138] sm:$0xff] }
   0xa   :  { %446 = vmatprep.subr.mxu0 %v7546_v17  ;;  %517 = vmatprep.subr.mxu1 %v7551_v18  ;;  %v7606_v27 = vld [vmem:[%s12588_s4 + $0x120] sm:$0xff]  ;;  %v7611_v28 = vld [vmem:[%s12588_s4 + $0x130] sm:$0xff]  ;;  %v7618_v29 = vld [vmem:[%s12588_s4 + $0x108] sm:$0xff] }
   0xb   :  { %447 = vmatpush1.msra.mxu0 %v7558_v19  ;;  %518 = vmatpush1.msra.mxu1 %v7563_v20  ;;  %v7623_v30 = vld [vmem:[%s12588_s4 + $0x118] sm:$0xff]  ;;  %v7630_v31 = vld [vmem:[%s12588_s4 + $0x100] sm:$0xff]  ;;  %v7635_v32 = vld [vmem:[%s12588_s4 + $0x110] sm:$0xff] }
   0xc   :  { %448 = vmatprep.subr.mxu0 %v7570_v21  ;;  %519 = vmatprep.subr.mxu1 %v7575_v22  ;;  %v7642_v33 = vld [vmem:[%s12588_s4 + $0xe8] sm:$0xff]  ;;  %v7647_v34 = vld [vmem:[%s12588_s4 + $0xf8] sm:$0xff]  ;;  %v7654_v35 = vld [vmem:[%s12588_s4 + $0xe0] sm:$0xff] }
   0xd   :  { %449 = vmatpush1.msra.mxu0 %v7582_v23  ;;  %520 = vmatpush1.msra.mxu1 %v7587_v24  ;;  %v7659_v36 = vld [vmem:[%s12588_s4 + $0xf0] sm:$0xff]  ;;  %v7666_v37 = vld [vmem:[%s12588_s4 + $0xc8] sm:$0xff]  ;;  %v7671_v38 = vld [vmem:[%s12588_s4 + $0xd8] sm:$0xff] }
   0xe   :  { %450 = vmatprep.subr.mxu0 %v7594_v25  ;;  %521 = vmatprep.subr.mxu1 %v7599_v26  ;;  %v7678_v39 = vld [vmem:[%s12588_s4 + $0xc0] sm:$0xff]  ;;  %v7683_v40 = vld [vmem:[%s12588_s4 + $0xd0] sm:$0xff]  ;;  %v7690_v41 = vld [vmem:[%s12588_s4 + $0xa8] sm:$0xff] }
   0xf   :  { %451 = vmatpush1.msra.mxu0 %v7606_v27  ;;  %522 = vmatpush1.msra.mxu1 %v7611_v28  ;;  %v7695_v42 = vld [vmem:[%s12588_s4 + $0xb8] sm:$0xff]  ;;  %v7702_v43 = vld [vmem:[%s12588_s4 + $0xa0] sm:$0xff]  ;;  %v7707_v44 = vld [vmem:[%s12588_s4 + $0xb0] sm:$0xff] }
  0x10   :  { %452 = vmatprep.subr.mxu0 %v7618_v29  ;;  %523 = vmatprep.subr.mxu1 %v7623_v30  ;;  %13044 = vst [vmem:[#allocation6_spill] sm:$0xff] %v7695_v42  ;;  %13045 = vst [vmem:[#allocation7_spill] sm:$0xff] %v7702_v43  ;;  %v7714_v45 = vld [vmem:[%s12588_s4 + $0x88] sm:$0xff]  ;;  %v7719_v46 = vld [vmem:[%s12588_s4 + $0x98] sm:$0xff] }
  0x11   :  { %453 = vmatpush1.msra.mxu0 %v7630_v31  ;;  %524 = vmatpush1.msra.mxu1 %v7635_v32  ;;  %13046 = vst [vmem:[#allocation8_spill] sm:$0xff] %v7707_v44  ;;  %13047 = vst [vmem:[#allocation9_spill] sm:$0xff] %v7714_v45  ;;  %v7726_v47 = vld [vmem:[%s12588_s4 + $0x80] sm:$0xff]  ;;  %v7731_v48 = vld [vmem:[%s12588_s4 + $0x90] sm:$0xff] }
  0x12   :  { %454 = vmatprep.subr.mxu0 %v7642_v33  ;;  %525 = vmatprep.subr.mxu1 %v7647_v34  ;;  %13048 = vst [vmem:[#allocation10_spill] sm:$0xff] %v7719_v46  ;;  %13049 = vst [vmem:[#allocation11_spill] sm:$0xff] %v7726_v47  ;;  %v7738_v49 = vld [vmem:[%s12588_s4 + $0x68] sm:$0xff]  ;;  %v7743_v50 = vld [vmem:[%s12588_s4 + $0x78] sm:$0xff] }
  0x13   :  { %455 = vmatpush1.msra.mxu0 %v7654_v35  ;;  %526 = vmatpush1.msra.mxu1 %v7659_v36  ;;  %13050 = vst [vmem:[#allocation12_spill] sm:$0xff] %v7731_v48  ;;  %13051 = vst [vmem:[#allocation13_spill] sm:$0xff] %v7738_v49  ;;  %v7750_v51 = vld [vmem:[%s12588_s4 + $0x60] sm:$0xff]  ;;  %v7755_v52 = vld [vmem:[%s12588_s4 + $0x70] sm:$0xff] }
  0x14   :  { %456 = vmatprep.subr.mxu0 %v7666_v37  ;;  %527 = vmatprep.subr.mxu1 %v7671_v38  ;;  %13052 = vst [vmem:[#allocation14_spill] sm:$0xff] %v7743_v50  ;;  %13053 = vst [vmem:[#allocation15_spill] sm:$0xff] %v7750_v51  ;;  %v7762_v53 = vld [vmem:[%s12588_s4 + $0x48] sm:$0xff]  ;;  %v7767_v54 = vld [vmem:[%s12588_s4 + $0x58] sm:$0xff] }
  0x15   :  { %457 = vmatpush1.msra.mxu0 %v7678_v39  ;;  %528 = vmatpush1.msra.mxu1 %v7683_v40  ;;  %13054 = vst [vmem:[#allocation16_spill] sm:$0xff] %v7755_v52  ;;  %13055 = vst [vmem:[#allocation17_spill] sm:$0xff] %v7762_v53  ;;  %v7774_v55 = vld [vmem:[%s12588_s4 + $0x40] sm:$0xff]  ;;  %v7779_v56 = vld [vmem:[%s12588_s4 + $0x50] sm:$0xff] }
  0x16   :  { %458 = vmatprep.subr.mxu0 %v7690_v41  ;;  %529 = vmatprep.subr.mxu1 %v7695_v42  ;;  %13056 = vst [vmem:[#allocation18_spill] sm:$0xff] %v7767_v54  ;;  %13057 = vst [vmem:[#allocation19_spill] sm:$0xff] %v7774_v55  ;;  %v7786_v57 = vld [vmem:[%s12588_s4 + $0x28] sm:$0xff]  ;;  %v7791_v58 = vld [vmem:[%s12588_s4 + $0x38] sm:$0xff] }
  0x17   :  { %459 = vmatpush1.msra.mxu0 %v7702_v43  ;;  %530 = vmatpush1.msra.mxu1 %v7707_v44  ;;  %13058 = vst [vmem:[#allocation20_spill] sm:$0xff] %v7779_v56  ;;  %13059 = vst [vmem:[#allocation21_spill] sm:$0xff] %v7786_v57  ;;  %v7798_v59 = vld [vmem:[%s12588_s4 + $0x20] sm:$0xff]  ;;  %v7803_v60 = vld [vmem:[%s12588_s4 + $0x30] sm:$0xff] }
  0x18   :  { %460 = vmatprep.subr.mxu0 %v7714_v45  ;;  %531 = vmatprep.subr.mxu1 %v7719_v46  ;;  %13060 = vst [vmem:[#allocation22_spill] sm:$0xff] %v7791_v58  ;;  %13061 = vst [vmem:[#allocation23_spill] sm:$0xff] %v7798_v59  ;;  %v7810_v61 = vld [vmem:[%s12588_s4 + $0x8] sm:$0xff]  ;;  %v7815_v62 = vld [vmem:[%s12588_s4 + $0x18] sm:$0xff] }
  0x19   :  { %461 = vmatpush1.msra.mxu0 %v7726_v47  ;;  %532 = vmatpush1.msra.mxu1 %v7731_v48  ;;  %13062 = vst [vmem:[#allocation24_spill] sm:$0xff] %v7803_v60  ;;  %13063 = vst [vmem:[#allocation25_spill] sm:$0xff] %v7810_v61  ;;  %v7822_v63 = vld [vmem:[%s12588_s4] sm:$0xff]  ;;  %v7827_v3 = vld [vmem:[%s12588_s4 + $0x10] sm:$0xff] }
  0x1a   :  { %462 = vmatprep.subr.mxu0 %v7738_v49  ;;  %533 = vmatprep.subr.mxu1 %v7743_v50  ;;  %13064 = vst [vmem:[#allocation26_spill] sm:$0xff] %v7815_v62  ;;  %13065 = vst [vmem:[#allocation27_spill] sm:$0xff] %v7822_v63 }
  0x1b   :  { %463 = vmatpush1.msra.mxu0 %v7750_v51  ;;  %534 = vmatpush1.msra.mxu1 %v7755_v52  ;;  %13066 = vst [vmem:[#allocation28_spill] sm:$0xff] %v7827_v3 }
  0x1c   :  { %464 = vmatprep.subr.mxu0 %v7762_v53  ;;  %535 = vmatprep.subr.mxu1 %v7767_v54 }
  0x1d   :  { %465 = vmatpush1.msra.mxu0 %v7774_v55  ;;  %536 = vmatpush1.msra.mxu1 %v7779_v56 }
  0x1e   :  { %466 = vmatprep.subr.mxu0 %v7786_v57  ;;  %537 = vmatprep.subr.mxu1 %v7791_v58  ;;  %v371_v57 = vld [vmem:[%s12589_s1] sm:$0x3] }
  0x1f   :  { %467 = vmatpush1.msra.mxu0 %v7798_v59  ;;  %538 = vmatpush1.msra.mxu1 %v7803_v60  ;;  %v31_v58 = vld [vmem:[%s12590_s0] sm:$0x3]  ;;  %v12607_v59 = vmov 0  }
  0x20   :  { %468 = vmatprep.subr.mxu0 %v7810_v61  ;;  %539 = vmatprep.subr.mxu1 %v7815_v62 }
  0x21   :  { %469 = vmatpush1.msra.mxu0 %v7822_v63  ;;  %540 = vmatpush1.msra.mxu1 %v7827_v3  ;;  %v32_v63 = vld [vmem:[%s12590_s0 + $0x2] sm:$0x3] }
  0x22   :  { %503 = vmatmul.mubr.f32.vlgmr.msra.gmra.mxu0 %v371_v57  ;;  %574 = vmatmul.mubr.f32.vlgmr.msra.gmra.mxu1 %v371_v57  ;;  %v35_v57 = vld [vmem:[%s12590_s0 + $0x8] sm:$0x3] }
  0x23   :  { %6951 = vset.pattern.permute.xlu0 %v12607_v59  ;;  %623 = vmatprep.subr.mxu0 %v7452_v0  ;;  %v13070_v59 = vld [vmem:[#allocation27_spill] sm:$0xff] }
  0x24   :  { %42 = vperm.xlu0 %6951, %v31_v58   ;;  %694 = vmatprep.subr.mxu1 %v7457_v1  ;;  %v37_v58 = vld [vmem:[%s12590_s0 + $0xc] sm:$0x3] }
  0x25   :  { %624 = vmatpush1.msra.mxu0 %v7462_v2  ;;  %695 = vmatpush1.msra.mxu1 %v7471_v4 }
  0x26   :  { %625 = vmatprep.subr.mxu0 %v7476_v5  ;;  %696 = vmatprep.subr.mxu1 %v7481_v6 }
  0x27   :  { %626 = vmatpush1.msra.mxu0 %v7488_v7  ;;  %697 = vmatpush1.msra.mxu1 %v7493_v8 }
  0x28   :  { %47 = vperm.xlu0 %6951, %v32_v63   ;;  %627 = vmatprep.subr.mxu0 %v7498_v9  ;;  %v13067_v63 = vld [vmem:[#allocation21_spill] sm:$0xff] }
  0x29   :  { %698 = vmatprep.subr.mxu1 %v7505_v10  ;;  %628 = vmatpush1.msra.mxu0 %v7510_v11 }
  0x2a   :  { %699 = vmatpush1.msra.mxu1 %v7515_v12  ;;  %629 = vmatprep.subr.mxu0 %v7522_v13 }
  0x2b   :  { %700 = vmatprep.subr.mxu1 %v7527_v14  ;;  %630 = vmatpush1.msra.mxu0 %v7534_v15 }
  0x2c   :  { %62 = vperm.xlu0 %6951, %v35_v57   ;;  %701 = vmatpush1.msra.mxu1 %v7539_v16  ;;  %v13068_v57 = vld [vmem:[#allocation22_spill] sm:$0xff] }
  0x2d   :  { %631 = vmatprep.subr.mxu0 %v7546_v17  ;;  %702 = vmatprep.subr.mxu1 %v7551_v18 }
  0x2e   :  { %632 = vmatpush1.msra.mxu0 %v7558_v19  ;;  %703 = vmatpush1.msra.mxu1 %v7563_v20 }
  0x2f   :  { %633 = vmatprep.subr.mxu0 %v7570_v21  ;;  %704 = vmatprep.subr.mxu1 %v7575_v22 }
  0x30   :  { %72 = vperm.xlu0 %6951, %v37_v58   ;;  %634 = vmatpush1.msra.mxu0 %v7582_v23  ;;  %v13069_v58 = vld [vmem:[#allocation23_spill] sm:$0xff] }
  0x31   :  { %705 = vmatpush1.msra.mxu1 %v7587_v24  ;;  %635 = vmatprep.subr.mxu0 %v7594_v25 }
  0x32   :  { %706 = vmatprep.subr.mxu1 %v7599_v26  ;;  %636 = vmatpush1.msra.mxu0 %v7606_v27 }
  0x33   :  { %707 = vmatpush1.msra.mxu1 %v7611_v28  ;;  %637 = vmatprep.subr.mxu0 %v7618_v29 }
  0x34   :  { %708 = vmatprep.subr.mxu1 %v7623_v30  ;;  %638 = vmatpush1.msra.mxu0 %v7630_v31 }
  0x35   :  { %709 = vmatpush1.msra.mxu1 %v7635_v32  ;;  %639 = vmatprep.subr.mxu0 %v7642_v33 }
  0x36   :  { %710 = vmatprep.subr.mxu1 %v7647_v34  ;;  %640 = vmatpush1.msra.mxu0 %v7654_v35 }
  0x37   :  { %711 = vmatpush1.msra.mxu1 %v7659_v36  ;;  %641 = vmatprep.subr.mxu0 %v7666_v37 }
  0x38   :  { %712 = vmatprep.subr.mxu1 %v7671_v38  ;;  %642 = vmatpush1.msra.mxu0 %v7678_v39 }
  0x39   :  { %713 = vmatpush1.msra.mxu1 %v7683_v40  ;;  %643 = vmatprep.subr.mxu0 %v7690_v41 }
  0x3a   :  { %714 = vmatprep.subr.mxu1 %v7695_v42  ;;  %644 = vmatpush1.msra.mxu0 %v7702_v43 }
  0x3b   :  { %715 = vmatpush1.msra.mxu1 %v7707_v44  ;;  %645 = vmatprep.subr.mxu0 %v7714_v45 }
  0x3c   :  { %716 = vmatprep.subr.mxu1 %v7719_v46  ;;  %646 = vmatpush1.msra.mxu0 %v7726_v47 }
  0x3d   :  { %717 = vmatpush1.msra.mxu1 %v7731_v48  ;;  %647 = vmatprep.subr.mxu0 %v7738_v49 }
  0x3e   :  { %718 = vmatprep.subr.mxu1 %v7743_v50  ;;  %648 = vmatpush1.msra.mxu0 %v7750_v51 }
  0x3f   :  { %719 = vmatpush1.msra.mxu1 %v7755_v52  ;;  %649 = vmatprep.subr.mxu0 %v7762_v53  ;;  %v13071_v53 = vmov 0.0  }
  0x40   :  { %720 = vmatprep.subr.mxu1 %v7767_v54  ;;  %650 = vmatpush1.msra.mxu0 %v7774_v55 }
  0x41   :  { %721 = vmatpush1.msra.mxu1 %v7779_v56  ;;  %651 = vmatprep.subr.mxu0 %v13067_v63  ;;  %v7403_v56 = vmov 1983009808  }
  0x42   :  { %722 = vmatprep.subr.mxu1 %v13068_v57  ;;  %652 = vmatpush1.msra.mxu0 %v13069_v58  ;;  %v13072_v57 = vmov 0   ;;  %v81_v58 = vlaneseq  ;;  %v222_v55 = vunpack.c.l.s4 %v7403_v56 }
  0x43   :  { %723 = vmatpush1.msra.mxu1 %v7803_v60  ;;  %653 = vmatprep.subr.mxu0 %v7810_v61 }
  0x44   :  { %724 = vmatprep.subr.mxu1 %v7815_v62  ;;  %654 = vmatpush1.msra.mxu0 %v13070_v59  ;;  %v82_v60 = vshrl.u32 %v81_v58, 7 }
  0x45   :  { %687 = vmatprep.mubr.f32.mxu0 %v13071_v53  ;;  %725 = vmatpush1.msra.mxu1 %v7827_v3  ;;  %v39_v3 = vld [vmem:[%s12591_s3] sm:$0xf] }
  0x46   :  { %758 = vmatprep.mubr.f32.mxu1 %v13071_v53  ;;  %808 = vmatprep.subr.mxu0 %v7452_v0  ;;  %v7920_v63 = vsub.s32 0, %v82_v60  ;;  %v7922_v61 = vsub.s32 1, %v82_v60  ;;  %v7924_v62 = vsub.s32 2, %v82_v60  ;;  %v7926_v59 = vsub.s32 3, %v82_v60  ;;  %v133_v53 = vld [vmem:[%s12592_s5] sm:$0xf] }
  0x47   :  { %879 = vmatprep.subr.mxu1 %v7457_v1  ;;  %6952 = vset.pattern.permute.xlu1 %v13072_v57 }
  0x48   :  { %13073 = vst [vmem:[#allocation29_spill] sm:$0xff] %v7920_v63  ;;  %13074 = vst [vmem:[#allocation30_spill] sm:$0xff] %v7922_v61  ;;  %v7932_v0 = vrot.slane %v39_v3, %v7920_v63  ;;  %v7935_v1 = vrot.slane %v39_v3, %v7922_v61  ;;  %v7938_v57 = vrot.slane %v39_v3, %v7924_v62 }
  0x49   :  { %13075 = vst [vmem:[#allocation31_spill] sm:$0xff] %v7924_v62  ;;  %13076 = vst [vmem:[#allocation32_spill] sm:$0xff] %v7926_v59  ;;  %v7941_v58 = vrot.slane %v39_v3, %v7926_v59  ;;  %v7947_v54 = vrot.slane %v133_v53, %v7920_v63  ;;  %v7950_v52 = vrot.slane %v133_v53, %v7922_v61  ;;  %v223_v63 = vunpack.c.0.s8 %v222_v55 }
  0x4a   :  { %13077 = vst [vmem:[#allocation33_spill] sm:$0xff] %v7932_v0  ;;  %13078 = vst [vmem:[#allocation34_spill] sm:$0xff] %v7935_v1  ;;  %v7953_v51 = vrot.slane %v133_v53, %v7924_v62  ;;  %v7956_v50 = vrot.slane %v133_v53, %v7926_v59 }
  0x4b   :  { %13079 = vst [vmem:[#allocation35_spill] sm:$0xff] %v7938_v57  ;;  %13080 = vst [vmem:[#allocation36_spill] sm:$0xff] %v7941_v58  ;;  %v7966_v53 = vsub.s32 %v223_v63, %v82_v60 }
  0x4c   :  { %13081 = vst [vmem:[#allocation37_spill] sm:$0xff] %v7947_v54  ;;  %13082 = vst [vmem:[#allocation38_spill] sm:$0xff] %v7950_v52 }
  0x4d   :  { %13083 = vst [vmem:[#allocation39_spill] sm:$0xff] %v7956_v50 }
  0x9f   :  { %v43_v3 = vpop.permute.xlu0 %42 }
  0xa0   :  { %v101_v49 = vmul.f32 %v7932_v0, %v43_v3  ;;  %v102_v48 = vmul.f32 %v7935_v1, %v43_v3  ;;  %v103_v47 = vmul.f32 %v7938_v57, %v43_v3  ;;  %v104_v56 = vmul.f32 %v7941_v58, %v43_v3 }
  0xa2   :  { %v155_v46 = vadd.f32 %v7947_v54, %v101_v49  ;;  %v156_v61 = vadd.f32 %v7950_v52, %v102_v48  ;;  %v157_v62 = vadd.f32 %v7953_v51, %v103_v47  ;;  %v158_v45 = vadd.f32 %v7956_v50, %v104_v56 }
  0xa4   :  { %v219_v59 = vcombine.low %v155_v46, %v156_v61  ;;  %v220_v44 = vcombine.low %v157_v62, %v158_v45 }
  0xa6   :  { %v227_v1 = vrot.slane %v219_v59, %v7966_v53  ;;  %v234_v57 = vrot.slane %v220_v44, %v7966_v53  ;;  %v372_v44 = vld [vmem:[%s12593_s2] sm:$0x3] }
  0xa8   :  { %v235_v52 = vcombine.low %v227_v1, %v234_v57 }
  0xe2   :  { %v504_v0 = vpop.f32.mrf.mxu0  ;;  %v575_v43 = vpop.f32.mrf.mxu1 }
  0xe4   :  { %v506_v3 = vpop.f32.mrf.mxu0  ;;  %v577_v55 = vpop.f32.mrf.mxu1 }
  0xe5   :  { %v584_v58 = vcombine.low %v504_v0, %v506_v3  ;;  %v585_v49 = vcombine.low %v575_v43, %v577_v55  ;;  %v13084_v55 = vld [vmem:[#allocation7_spill] sm:$0xff] }
  0xe7   :  { %v592_v48 = vrot.slane %v584_v58, %v7966_v53  ;;  %v599_v47 = vrot.slane %v585_v49, %v7966_v53  ;;  %v13085_v49 = vld [vmem:[#allocation8_spill] sm:$0xff] }
  0xe9   :  { %v600_v56 = vcombine.low %v592_v48, %v599_v47  ;;  %v13086_v48 = vld [vmem:[#allocation9_spill] sm:$0xff]  ;;  %v13087_v47 = vld [vmem:[#allocation10_spill] sm:$0xff] }
  0xeb   :  { %v602_v60 = vadd.f32 %v600_v56, %v235_v52  ;;  %v13088_v56 = vld [vmem:[#allocation11_spill] sm:$0xff] }
  0xed   :  { %v603_v63 = vmul.f32 0.5, %v602_v60  ;;  %v608_v45 = vrot.slane %v602_v60, 6  ;;  %v13089_v60 = vld [vmem:[#allocation12_spill] sm:$0xff] }
  0xef   :  { %6953 = vtanh.f32 %v603_v63  ;;  %v13090_v63 = vld [vmem:[#allocation13_spill] sm:$0xff] }
  0xf0   :  { %6955 = vtanh.f32 %v608_v45  ;;  %v13091_v45 = vld [vmem:[#allocation14_spill] sm:$0xff] }
  0xfc   :  { %v6954_v46 = vpop.eup %6953 }
  0xfd   :  { %v605_v61 = vmul.f32 0.5, %v6954_v46  ;;  %v6956_v43 = vpop.eup %6955  ;;  %v13092_v46 = vld [vmem:[#allocation15_spill] sm:$0xff] }
  0xff   :  { %v606_v59 = vadd.f32 0.5, %v605_v61  ;;  %v13093_v61 = vld [vmem:[#allocation16_spill] sm:$0xff] }
 0x101   :  { %v612_v0 = vrot.slane %v606_v59, 2  ;;  %v615_v58 = vmul.f32 %v6956_v43, %v606_v59  ;;  %v618_v52 = vrot.slane %v606_v59, 4  ;;  %v13094_v59 = vld [vmem:[#allocation17_spill] sm:$0xff]  ;;  %v13097_v43 = vld [vmem:[#allocation20_spill] sm:$0xff] }
 0x103   :  { %v614_v62 = vmul.f32 %v612_v0, %v372_v44  ;;  %v13095_v44 = vld [vmem:[#allocation18_spill] sm:$0xff]  ;;  %v13096_v0 = vld [vmem:[#allocation19_spill] sm:$0xff] }
 0x105   :  { %v7975_v1 = vadd.f32 %v615_v58, %v614_v62  ;;  %v13098_v62 = vld [vmem:[#allocation21_spill] sm:$0xff]  ;;  %v13099_v58 = vld [vmem:[#allocation22_spill] sm:$0xff] }
 0x107   :  { %6957 = vtanh.f32 %v7975_v1 }
 0x114   :  { %v6958_v57 = vpop.eup %6957 }
 0x115   :  { %v620_v3 = vmul.f32 %v6958_v57, %v618_v52  ;;  %v13100_v52 = vld [vmem:[#allocation23_spill] sm:$0xff]  ;;  %v13101_v57 = vld [vmem:[#allocation24_spill] sm:$0xff] }
 0x117   :  { %688 = vmatmul.mubr.f32.vlgmr.msra.gmra.mxu0 %v620_v3  ;;  %759 = vmatmul.mubr.f32.vlgmr.msra.gmra.mxu1 %v620_v3  ;;  %v13102_v3 = vld [vmem:[#allocation25_spill] sm:$0xff] }
 0x118   :  { %809 = vmatpush1.msra.mxu0 %v7462_v2  ;;  %880 = vmatpush1.msra.mxu1 %v7471_v4 }
 0x119   :  { %810 = vmatprep.subr.mxu0 %v7476_v5  ;;  %881 = vmatprep.subr.mxu1 %v7481_v6 }
 0x11a   :  { %811 = vmatpush1.msra.mxu0 %v7488_v7  ;;  %882 = vmatpush1.msra.mxu1 %v7493_v8 }
 0x11b   :  { %812 = vmatprep.subr.mxu0 %v7498_v9  ;;  %883 = vmatprep.subr.mxu1 %v7505_v10 }
 0x11c   :  { %813 = vmatpush1.msra.mxu0 %v7510_v11  ;;  %884 = vmatpush1.msra.mxu1 %v7515_v12 }
 0x11d   :  { %814 = vmatprep.subr.mxu0 %v7522_v13  ;;  %885 = vmatprep.subr.mxu1 %v7527_v14 }
 0x11e   :  { %815 = vmatpush1.msra.mxu0 %v7534_v15  ;;  %886 = vmatpush1.msra.mxu1 %v7539_v16 }
 0x11f   :  { %816 = vmatprep.subr.mxu0 %v7546_v17  ;;  %887 = vmatprep.subr.mxu1 %v7551_v18 }
 0x120   :  { %817 = vmatpush1.msra.mxu0 %v7558_v19  ;;  %888 = vmatpush1.msra.mxu1 %v7563_v20 }
 0x121   :  { %818 = vmatprep.subr.mxu0 %v7570_v21  ;;  %889 = vmatprep.subr.mxu1 %v7575_v22 }
 0x122   :  { %819 = vmatpush1.msra.mxu0 %v7582_v23  ;;  %890 = vmatpush1.msra.mxu1 %v7587_v24 }
 0x123   :  { %820 = vmatprep.subr.mxu0 %v7594_v25  ;;  %891 = vmatprep.subr.mxu1 %v7599_v26 }
 0x124   :  { %821 = vmatpush1.msra.mxu0 %v7606_v27  ;;  %892 = vmatpush1.msra.mxu1 %v7611_v28 }
 0x125   :  { %822 = vmatprep.subr.mxu0 %v7618_v29  ;;  %893 = vmatprep.subr.mxu1 %v7623_v30 }
 0x126   :  { %823 = vmatpush1.msra.mxu0 %v7630_v31  ;;  %894 = vmatpush1.msra.mxu1 %v7635_v32 }
 0x127   :  { %824 = vmatprep.subr.mxu0 %v7642_v33  ;;  %895 = vmatprep.subr.mxu1 %v7647_v34 }
 0x128   :  { %825 = vmatpush1.msra.mxu0 %v7654_v35  ;;  %896 = vmatpush1.msra.mxu1 %v7659_v36 }
 0x129   :  { %826 = vmatprep.subr.mxu0 %v7666_v37  ;;  %897 = vmatprep.subr.mxu1 %v7671_v38 }
 0x12a   :  { %827 = vmatpush1.msra.mxu0 %v7678_v39  ;;  %898 = vmatpush1.msra.mxu1 %v7683_v40 }
 0x12b   :  { %828 = vmatprep.subr.mxu0 %v7690_v41  ;;  %899 = vmatprep.subr.mxu1 %v7695_v42 }
 0x12c   :  { %829 = vmatpush1.msra.mxu0 %v13084_v55  ;;  %900 = vmatpush1.msra.mxu1 %v13085_v49 }
 0x12d   :  { %830 = vmatprep.subr.mxu0 %v13086_v48  ;;  %901 = vmatprep.subr.mxu1 %v13087_v47 }
 0x12e   :  { %831 = vmatpush1.msra.mxu0 %v13088_v56  ;;  %902 = vmatpush1.msra.mxu1 %v13089_v60 }
 0x12f   :  { %832 = vmatprep.subr.mxu0 %v13090_v63  ;;  %903 = vmatprep.subr.mxu1 %v13091_v45  ;;  %v13113_v63 = vld [vmem:[#allocation38_spill] sm:$0xff] }
 0x130   :  { %833 = vmatpush1.msra.mxu0 %v13092_v46  ;;  %904 = vmatpush1.msra.mxu1 %v13093_v61  ;;  %v13103_v46 = vld [vmem:[#allocation26_spill] sm:$0xff]  ;;  %v13104_v61 = vld [vmem:[#allocation27_spill] sm:$0xff] }
 0x131   :  { %834 = vmatprep.subr.mxu0 %v13094_v59  ;;  %905 = vmatprep.subr.mxu1 %v13095_v44  ;;  %v13105_v59 = vmov 0.0   ;;  %v13106_v44 = vld [vmem:[#allocation28_spill] sm:$0xff] }
 0x132   :  { %835 = vmatpush1.msra.mxu0 %v13096_v0  ;;  %906 = vmatpush1.msra.mxu1 %v13097_v43  ;;  %v13107_v43 = vld [vmem:[#allocation4_spill] sm:$0xff] }
 0x133   :  { %836 = vmatprep.subr.mxu0 %v13098_v62  ;;  %907 = vmatprep.subr.mxu1 %v13099_v58  ;;  %v13108_v62 = vld [vmem:[#allocation5_spill] sm:$0xff]  ;;  %v13112_v0 = vld [vmem:[#allocation36_spill] sm:$0xff] }
 0x134   :  { %837 = vmatpush1.msra.mxu0 %v13100_v52  ;;  %908 = vmatpush1.msra.mxu1 %v13101_v57  ;;  %v33_v57 = vld [vmem:[%s12590_s0 + $0x4] sm:$0x3]  ;;  %v13111_v52 = vld [vmem:[#allocation35_spill] sm:$0xff] }
 0x135   :  { %838 = vmatprep.subr.mxu0 %v13102_v3  ;;  %909 = vmatprep.subr.mxu1 %v13103_v46  ;;  %v34_v46 = vld [vmem:[%s12590_s0 + $0x6] sm:$0x3]  ;;  %v13110_v3 = vld [vmem:[#allocation34_spill] sm:$0xff] }
 0x136   :  { %839 = vmatpush1.msra.mxu0 %v13104_v61  ;;  %872 = vmatprep.mubr.f32.mxu0 %v13105_v59 }
 0x137   :  { %910 = vmatpush1.msra.mxu1 %v13106_v44  ;;  %943 = vmatprep.mubr.f32.mxu1 %v13105_v59  ;;  %v36_v44 = vld [vmem:[%s12590_s0 + $0xa] sm:$0x3] }
 0x138   :  { %993 = vmatprep.subr.mxu0 %v13107_v43  ;;  %1064 = vmatprep.subr.mxu1 %v13108_v62  ;;  %v38_v43 = vld [vmem:[%s12590_s0 + $0xe] sm:$0x3]  ;;  %v48_v62 = vpop.permute.xlu0 %47 }
 0x139   :  { %52 = vperm.xlu1 %6952, %v33_v57   ;;  %v13109_v59 = vld [vmem:[#allocation33_spill] sm:$0xff]  ;;  %v106_v57 = vmul.f32 %v13110_v3, %v48_v62  ;;  %v107_v58 = vmul.f32 %v13111_v52, %v48_v62  ;;  %v108_v45 = vmul.f32 %v13112_v0, %v48_v62 }
 0x13a   :  { %v105_v61 = vmul.f32 %v13109_v59, %v48_v62 }
 0x13b   :  { %v160_v60 = vadd.f32 %v13113_v63, %v106_v57  ;;  %v162_v56 = vadd.f32 %v7956_v50, %v108_v45 }
 0x13d   :  { %57 = vperm.xlu1 %6952, %v34_v46   ;;  %v159_v46 = vadd.f32 %v7947_v54, %v105_v61 }
 0x13f   :  { %v236_v47 = vcombine.low %v159_v46, %v160_v60 }
 0x141   :  { %67 = vperm.xlu1 %6952, %v36_v44   ;;  %v161_v44 = vadd.f32 %v7953_v51, %v107_v58  ;;  %v244_v3 = vrot.slane %v236_v47, %v7966_v53 }
 0x143   :  { %v237_v48 = vcombine.low %v161_v44, %v162_v56 }
 0x145   :  { %77 = vperm.xlu1 %6952, %v38_v43   ;;  %v251_v52 = vrot.slane %v237_v48, %v7966_v53 }
 0x147   :  { %v8068_v63 = vcombine.low %v244_v3, %v251_v52 }
 0x149   :  { %13114 = vst [vmem:[#allocation36_spill] sm:$0xff] %v8068_v63 }
 0x1d7   :  { %v689_v43 = vpop.f32.mrf.mxu0  ;;  %v760_v49 = vpop.f32.mrf.mxu1 }
 0x1d9   :  { %v691_v55 = vpop.f32.mrf.mxu0  ;;  %v762_v59 = vpop.f32.mrf.mxu1 }
 0x1da   :  { %v769_v42 = vcombine.low %v689_v43, %v691_v55  ;;  %v770_v62 = vcombine.low %v760_v49, %v762_v59 }
 0x1dc   :  { %v777_v61 = vrot.slane %v769_v42, %v7966_v53  ;;  %v784_v57 = vrot.slane %v770_v62, %v7966_v53  ;;  %v13116_v62 = vld [vmem:[#allocation7_spill] sm:$0xff] }
 0x1de   :  { %v785_v58 = vcombine.low %v777_v61, %v784_v57  ;;  %v13117_v61 = vld [vmem:[#allocation8_spill] sm:$0xff]  ;;  %v13118_v57 = vld [vmem:[#allocation9_spill] sm:$0xff] }
 0x1e0   :  { %v787_v60 = vadd.f32 %v785_v58, %v8068_v63  ;;  %v13119_v58 = vld [vmem:[#allocation10_spill] sm:$0xff]  ;;  %v13133_v63 = vld [vmem:[#allocation24_spill] sm:$0xff] }
 0x1e2   :  { %v788_v56 = vmul.f32 0.5, %v787_v60  ;;  %v793_v45 = vrot.slane %v787_v60, 6  ;;  %v13120_v60 = vld [vmem:[#allocation11_spill] sm:$0xff] }
 0x1e4   :  { %6959 = vtanh.f32 %v788_v56  ;;  %v13121_v56 = vld [vmem:[#allocation12_spill] sm:$0xff] }
 0x1e5   :  { %6961 = vtanh.f32 %v793_v45  ;;  %v13122_v45 = vld [vmem:[#allocation13_spill] sm:$0xff] }
 0x1f1   :  { %v6960_v46 = vpop.eup %6959 }
 0x1f2   :  { %v790_v55 = vmul.f32 0.5, %v6960_v46  ;;  %v6962_v43 = vpop.eup %6961  ;;  %v13123_v46 = vld [vmem:[#allocation14_spill] sm:$0xff] }
 0x1f4   :  { %v791_v44 = vadd.f32 0.5, %v790_v55  ;;  %v13124_v55 = vld [vmem:[#allocation15_spill] sm:$0xff] }
 0x1f6   :  { %v797_v47 = vrot.slane %v791_v44, 2  ;;  %v800_v48 = vmul.f32 %v6962_v43, %v791_v44  ;;  %v803_v59 = vrot.slane %v791_v44, 4  ;;  %v13125_v44 = vld [vmem:[#allocation16_spill] sm:$0xff]  ;;  %v13127_v43 = vld [vmem:[#allocation18_spill] sm:$0xff] }
 0x1f8   :  { %v799_v49 = vmul.f32 %v797_v47, %v7975_v1  ;;  %v13115_v1 = vld [vmem:[#allocation6_spill] sm:$0xff]  ;;  %v13126_v47 = vld [vmem:[#allocation17_spill] sm:$0xff] }
 0x1fa   :  { %v8072_v42 = vadd.f32 %v800_v48, %v799_v49  ;;  %v13128_v49 = vld [vmem:[#allocation19_spill] sm:$0xff]  ;;  %v13129_v48 = vld [vmem:[#allocation20_spill] sm:$0xff] }
 0x1fc   :  { %6963 = vtanh.f32 %v8072_v42 }
 0x209   :  { %v6964_v52 = vpop.eup %6963 }
 0x20a   :  { %v805_v3 = vmul.f32 %v6964_v52, %v803_v59  ;;  %v13130_v59 = vld [vmem:[#allocation21_spill] sm:$0xff]  ;;  %v13131_v52 = vld [vmem:[#allocation22_spill] sm:$0xff] }
 0x20c   :  { %873 = vmatmul.mubr.f32.vlgmr.msra.gmra.mxu0 %v805_v3  ;;  %944 = vmatmul.mubr.f32.vlgmr.msra.gmra.mxu1 %v805_v3  ;;  %v13132_v3 = vld [vmem:[#allocation23_spill] sm:$0xff] }
 0x20d   :  { %994 = vmatpush1.msra.mxu0 %v7462_v2  ;;  %1065 = vmatpush1.msra.mxu1 %v7471_v4 }
 0x20e   :  { %995 = vmatprep.subr.mxu0 %v7476_v5  ;;  %1066 = vmatprep.subr.mxu1 %v7481_v6 }
 0x20f   :  { %996 = vmatpush1.msra.mxu0 %v7488_v7  ;;  %1067 = vmatpush1.msra.mxu1 %v7493_v8 }
 0x210   :  { %997 = vmatprep.subr.mxu0 %v7498_v9  ;;  %1068 = vmatprep.subr.mxu1 %v7505_v10 }
 0x211   :  { %998 = vmatpush1.msra.mxu0 %v7510_v11  ;;  %1069 = vmatpush1.msra.mxu1 %v7515_v12 }
 0x212   :  { %999 = vmatprep.subr.mxu0 %v7522_v13  ;;  %1070 = vmatprep.subr.mxu1 %v7527_v14 }
 0x213   :  { %1000 = vmatpush1.msra.mxu0 %v7534_v15  ;;  %1071 = vmatpush1.msra.mxu1 %v7539_v16 }
 0x214   :  { %1001 = vmatprep.subr.mxu0 %v7546_v17  ;;  %1072 = vmatprep.subr.mxu1 %v7551_v18 }
 0x215   :  { %1002 = vmatpush1.msra.mxu0 %v7558_v19  ;;  %1073 = vmatpush1.msra.mxu1 %v7563_v20 }
 0x216   :  { %1003 = vmatprep.subr.mxu0 %v7570_v21  ;;  %1074 = vmatprep.subr.mxu1 %v7575_v22 }
 0x217   :  { %1004 = vmatpush1.msra.mxu0 %v7582_v23  ;;  %1075 = vmatpush1.msra.mxu1 %v7587_v24 }
 0x218   :  { %1005 = vmatprep.subr.mxu0 %v7594_v25  ;;  %1076 = vmatprep.subr.mxu1 %v7599_v26 }
 0x219   :  { %1006 = vmatpush1.msra.mxu0 %v7606_v27  ;;  %1077 = vmatpush1.msra.mxu1 %v7611_v28 }
 0x21a   :  { %1007 = vmatprep.subr.mxu0 %v7618_v29  ;;  %1078 = vmatprep.subr.mxu1 %v7623_v30 }
 0x21b   :  { %1008 = vmatpush1.msra.mxu0 %v7630_v31  ;;  %1079 = vmatpush1.msra.mxu1 %v7635_v32 }
 0x21c   :  { %1009 = vmatprep.subr.mxu0 %v7642_v33  ;;  %1080 = vmatprep.subr.mxu1 %v7647_v34 }
 0x21d   :  { %1010 = vmatpush1.msra.mxu0 %v7654_v35  ;;  %1081 = vmatpush1.msra.mxu1 %v7659_v36 }
 0x21e   :  { %1011 = vmatprep.subr.mxu0 %v7666_v37  ;;  %1082 = vmatprep.subr.mxu1 %v7671_v38 }
 0x21f   :  { %1012 = vmatpush1.msra.mxu0 %v7678_v39  ;;  %1083 = vmatpush1.msra.mxu1 %v7683_v40 }
 0x220   :  { %1013 = vmatprep.subr.mxu0 %v7690_v41  ;;  %1084 = vmatprep.subr.mxu1 %v13115_v1 }
 0x221   :  { %1014 = vmatpush1.msra.mxu0 %v13116_v62  ;;  %1085 = vmatpush1.msra.mxu1 %v13117_v61 }
 0x222   :  { %1015 = vmatprep.subr.mxu0 %v13118_v57  ;;  %1086 = vmatprep.subr.mxu1 %v13119_v58 }
 0x223   :  { %1016 = vmatpush1.msra.mxu0 %v13120_v60  ;;  %1087 = vmatpush1.msra.mxu1 %v13121_v56  ;;  %v13144_v60 = vld [vmem:[#allocation38_spill] sm:$0xff] }
 0x224   :  { %1017 = vmatprep.subr.mxu0 %v13122_v45  ;;  %1088 = vmatprep.subr.mxu1 %v13123_v46  ;;  %v13134_v46 = vld [vmem:[#allocation25_spill] sm:$0xff] }
 0x225   :  { %1018 = vmatpush1.msra.mxu0 %v13124_v55  ;;  %1089 = vmatpush1.msra.mxu1 %v13125_v44  ;;  %v13135_v55 = vld [vmem:[#allocation26_spill] sm:$0xff]  ;;  %v13136_v44 = vld [vmem:[#allocation27_spill] sm:$0xff] }
 0x226   :  { %1019 = vmatprep.subr.mxu0 %v13126_v47  ;;  %1090 = vmatprep.subr.mxu1 %v13127_v43  ;;  %v13137_v47 = vmov 0.0   ;;  %v13138_v43 = vld [vmem:[#allocation28_spill] sm:$0xff] }
 0x227   :  { %1020 = vmatpush1.msra.mxu0 %v13128_v49  ;;  %1091 = vmatpush1.msra.mxu1 %v13129_v48  ;;  %v13139_v48 = vld [vmem:[#allocation4_spill] sm:$0xff] }
 0x228   :  { %1021 = vmatprep.subr.mxu0 %v13130_v59  ;;  %1092 = vmatprep.subr.mxu1 %v13131_v52  ;;  %v13140_v59 = vld [vmem:[#allocation5_spill] sm:$0xff]  ;;  %v53_v52 = vpop.permute.xlu1 %52 }
 0x229   :  { %1022 = vmatpush1.msra.mxu0 %v13132_v3  ;;  %1093 = vmatpush1.msra.mxu1 %v13133_v63  ;;  %v13141_v3 = vld [vmem:[#allocation33_spill] sm:$0xff]  ;;  %v13142_v63 = vld [vmem:[#allocation34_spill] sm:$0xff] }
 0x22a   :  { %1023 = vmatprep.subr.mxu0 %v13134_v46  ;;  %1094 = vmatprep.subr.mxu1 %v13135_v55  ;;  %v109_v49 = vmul.f32 %v13141_v3, %v53_v52  ;;  %v110_v45 = vmul.f32 %v13142_v63, %v53_v52  ;;  %v13143_v46 = vld [vmem:[#allocation35_spill] sm:$0xff]  ;;  %v112_v55 = vmul.f32 %v13112_v0, %v53_v52 }
 0x22b   :  { %1024 = vmatpush1.msra.mxu0 %v13136_v44  ;;  %1057 = vmatprep.mubr.f32.mxu0 %v13137_v47  ;;  %v111_v56 = vmul.f32 %v13143_v46, %v53_v52 }
 0x22c   :  { %1095 = vmatpush1.msra.mxu1 %v13138_v43  ;;  %1128 = vmatprep.mubr.f32.mxu1 %v13137_v47  ;;  %v163_v44 = vadd.f32 %v7947_v54, %v109_v49  ;;  %v164_v58 = vadd.f32 %v13144_v60, %v110_v45  ;;  %v166_v47 = vadd.f32 %v7956_v50, %v112_v55 }
 0x22d   :  { %1178 = vmatprep.subr.mxu0 %v13139_v48  ;;  %1249 = vmatprep.subr.mxu1 %v13140_v59  ;;  %v165_v43 = vadd.f32 %v7953_v51, %v111_v56 }
 0x22e   :  { %v253_v48 = vcombine.low %v163_v44, %v164_v58 }
 0x22f   :  { %v254_v57 = vcombine.low %v165_v43, %v166_v47 }
 0x230   :  { %v261_v3 = vrot.slane %v253_v48, %v7966_v53 }
 0x231   :  { %v268_v63 = vrot.slane %v254_v57, %v7966_v53 }
 0x233   :  { %v8152_v54 = vcombine.low %v261_v3, %v268_v63 }
 0x235   :  { %13145 = vst [vmem:[#allocation4_spill] sm:$0xff] %v8152_v54 }
 0x2cc   :  { %v874_v59 = vpop.f32.mrf.mxu0  ;;  %v945_v61 = vpop.f32.mrf.mxu1 }
 0x2ce   :  { %v876_v62 = vpop.f32.mrf.mxu0  ;;  %v947_v46 = vpop.f32.mrf.mxu1 }
 0x2cf   :  { %v954_v1 = vcombine.low %v874_v59, %v876_v62  ;;  %v955_v52 = vcombine.low %v945_v61, %v947_v46 }
 0x2d1   :  { %v962_v49 = vrot.slane %v954_v1, %v7966_v53  ;;  %v969_v56 = vrot.slane %v955_v52, %v7966_v53 }
 0x2d3   :  { %v970_v45 = vcombine.low %v962_v49, %v969_v56 }
 0x2d5   :  { %v972_v58 = vadd.f32 %v970_v45, %v8152_v54  ;;  %v8558_v54 = vld [vmem:[%s12588_s4 + $0x48] sm:$0xff] }
 0x2d7   :  { %v973_v55 = vmul.f32 0.5, %v972_v58  ;;  %v978_v44 = vrot.slane %v972_v58, 6 }
 0x2d9   :  { %6965 = vtanh.f32 %v973_v55 }
 0x2da   :  { %6967 = vtanh.f32 %v978_v44 }
 0x2e6   :  { %v6966_v47 = vpop.eup %6965 }
 0x2e7   :  { %v975_v43 = vmul.f32 0.5, %v6966_v47  ;;  %v6968_v50 = vpop.eup %6967 }
 0x2e9   :  { %v976_v57 = vadd.f32 0.5, %v975_v43 }
 0x2eb   :  { %v982_v48 = vrot.slane %v976_v57, 2  ;;  %v985_v61 = vmul.f32 %v6968_v50, %v976_v57  ;;  %v988_v63 = vrot.slane %v976_v57, 4 }
 0x2ed   :  { %v984_v62 = vmul.f32 %v982_v48, %v8072_v42 }
 0x2ef   :  { %v8157_v1 = vadd.f32 %v985_v61, %v984_v62 }
 0x2f1   :  { %6969 = vtanh.f32 %v8157_v1 }
 0x2fe   :  { %v6970_v46 = vpop.eup %6969 }
 0x2ff   :  { %v990_v3 = vmul.f32 %v6970_v46, %v988_v63 }
 0x301   :  { %1058 = vmatmul.mubr.f32.vlgmr.msra.gmra.mxu0 %v990_v3  ;;  %1129 = vmatmul.mubr.f32.vlgmr.msra.gmra.mxu1 %v990_v3 }
 0x302   :  { %1179 = vmatpush1.msra.mxu0 %v7462_v2  ;;  %1250 = vmatpush1.msra.mxu1 %v7471_v4  ;;  %v13146_v2 = vld [vmem:[#allocation6_spill] sm:$0xff]  ;;  %v13147_v4 = vld [vmem:[#allocation7_spill] sm:$0xff] }
 0x303   :  { %1180 = vmatprep.subr.mxu0 %v7476_v5  ;;  %1251 = vmatprep.subr.mxu1 %v7481_v6  ;;  %v13148_v5 = vld [vmem:[#allocation8_spill] sm:$0xff]  ;;  %v13149_v6 = vld [vmem:[#allocation9_spill] sm:$0xff] }
 0x304   :  { %1181 = vmatpush1.msra.mxu0 %v7488_v7  ;;  %1252 = vmatpush1.msra.mxu1 %v7493_v8  ;;  %v13150_v7 = vld [vmem:[#allocation10_spill] sm:$0xff]  ;;  %v13151_v8 = vld [vmem:[#allocation11_spill] sm:$0xff] }
 0x305   :  { %1182 = vmatprep.subr.mxu0 %v7498_v9  ;;  %1253 = vmatprep.subr.mxu1 %v7505_v10  ;;  %v13152_v9 = vld [vmem:[#allocation12_spill] sm:$0xff]  ;;  %v13153_v10 = vld [vmem:[#allocation13_spill] sm:$0xff] }
 0x306   :  { %1183 = vmatpush1.msra.mxu0 %v7510_v11  ;;  %1254 = vmatpush1.msra.mxu1 %v7515_v12  ;;  %v13154_v11 = vld [vmem:[#allocation14_spill] sm:$0xff]  ;;  %v13155_v12 = vld [vmem:[#allocation15_spill] sm:$0xff] }
 0x307   :  { %1184 = vmatprep.subr.mxu0 %v7522_v13  ;;  %1255 = vmatprep.subr.mxu1 %v7527_v14  ;;  %v13156_v13 = vld [vmem:[#allocation16_spill] sm:$0xff]  ;;  %v13157_v14 = vld [vmem:[#allocation17_spill] sm:$0xff] }
 0x308   :  { %1185 = vmatpush1.msra.mxu0 %v7534_v15  ;;  %1256 = vmatpush1.msra.mxu1 %v7539_v16  ;;  %v13158_v15 = vld [vmem:[#allocation18_spill] sm:$0xff]  ;;  %v13159_v16 = vld [vmem:[#allocation19_spill] sm:$0xff] }
 0x309   :  { %1186 = vmatprep.subr.mxu0 %v7546_v17  ;;  %1257 = vmatprep.subr.mxu1 %v7551_v18  ;;  %v13160_v17 = vld [vmem:[#allocation20_spill] sm:$0xff]  ;;  %v13161_v18 = vld [vmem:[#allocation21_spill] sm:$0xff]  ;;  %13189 = vst [vmem:[#allocation19_spill] sm:$0xff] %v8558_v54 }
 0x30a   :  { %1187 = vmatpush1.msra.mxu0 %v7558_v19  ;;  %1258 = vmatpush1.msra.mxu1 %v7563_v20  ;;  %v13162_v19 = vld [vmem:[#allocation22_spill] sm:$0xff]  ;;  %v13163_v20 = vld [vmem:[#allocation23_spill] sm:$0xff] }
 0x30b   :  { %1188 = vmatprep.subr.mxu0 %v7570_v21  ;;  %1259 = vmatprep.subr.mxu1 %v7575_v22  ;;  %v13164_v21 = vld [vmem:[#allocation24_spill] sm:$0xff]  ;;  %v13165_v22 = vld [vmem:[#allocation25_spill] sm:$0xff] }
 0x30c   :  { %1189 = vmatpush1.msra.mxu0 %v7582_v23  ;;  %1260 = vmatpush1.msra.mxu1 %v7587_v24  ;;  %v13166_v23 = vld [vmem:[#allocation26_spill] sm:$0xff]  ;;  %v13167_v24 = vld [vmem:[#allocation27_spill] sm:$0xff] }
 0x30d   :  { %1190 = vmatprep.subr.mxu0 %v7594_v25  ;;  %1261 = vmatprep.subr.mxu1 %v7599_v26  ;;  %v13168_v25 = vmov 0.0   ;;  %v13169_v26 = vld [vmem:[#allocation28_spill] sm:$0xff] }
 0x30e   :  { %1191 = vmatpush1.msra.mxu0 %v7606_v27  ;;  %1262 = vmatpush1.msra.mxu1 %v7611_v28  ;;  %v8227_v27 = vld [vmem:[%s12588_s4 + $0x1e8] sm:$0xff]  ;;  %v8233_v28 = vld [vmem:[%s12588_s4 + $0x1f8] sm:$0xff] }
 0x30f   :  { %1192 = vmatprep.subr.mxu0 %v7618_v29  ;;  %1263 = vmatprep.subr.mxu1 %v7623_v30  ;;  %13170 = vst [vmem:[#allocation5_spill] sm:$0xff] %v8227_v27  ;;  %13171 = vst [vmem:[#allocation6_spill] sm:$0xff] %v8233_v28  ;;  %v58_v29 = vpop.permute.xlu1 %57  ;;  %v13172_v30 = vld [vmem:[#allocation33_spill] sm:$0xff] }
 0x310   :  { %1193 = vmatpush1.msra.mxu0 %v7630_v31  ;;  %1264 = vmatpush1.msra.mxu1 %v7635_v32  ;;  %v113_v31 = vmul.f32 %v13172_v30, %v58_v29  ;;  %v13173_v32 = vld [vmem:[#allocation34_spill] sm:$0xff] }
 0x311   :  { %1194 = vmatprep.subr.mxu0 %v7642_v33  ;;  %1265 = vmatprep.subr.mxu1 %v7647_v34  ;;  %v114_v33 = vmul.f32 %v13173_v32, %v58_v29  ;;  %v13174_v34 = vld [vmem:[#allocation35_spill] sm:$0xff] }
 0x312   :  { %1195 = vmatpush1.msra.mxu0 %v7654_v35  ;;  %1266 = vmatpush1.msra.mxu1 %v7659_v36  ;;  %v115_v35 = vmul.f32 %v13174_v34, %v58_v29  ;;  %v116_v36 = vmul.f32 %v13112_v0, %v58_v29  ;;  %v8342_v29 = vld [vmem:[%s12588_s4 + $0x168] sm:$0xff] }
 0x313   :  { %1196 = vmatprep.subr.mxu0 %v7666_v37  ;;  %1267 = vmatprep.subr.mxu1 %v7671_v38  ;;  %v13175_v37 = vld [vmem:[#allocation37_spill] sm:$0xff] }
 0x314   :  { %1197 = vmatpush1.msra.mxu0 %v7678_v39  ;;  %1268 = vmatpush1.msra.mxu1 %v7683_v40  ;;  %v167_v38 = vadd.f32 %v13175_v37, %v113_v31  ;;  %v168_v39 = vadd.f32 %v13144_v60, %v114_v33  ;;  %v169_v40 = vadd.f32 %v7953_v51, %v115_v35  ;;  %v8348_v31 = vld [vmem:[%s12588_s4 + $0x178] sm:$0xff]  ;;  %v8354_v33 = vld [vmem:[%s12588_s4 + $0x160] sm:$0xff]  ;;  %v8360_v35 = vld [vmem:[%s12588_s4 + $0x170] sm:$0xff] }
 0x315   :  { %1198 = vmatprep.subr.mxu0 %v7690_v41  ;;  %1269 = vmatprep.subr.mxu1 %v13146_v2  ;;  %v13176_v41 = vld [vmem:[#allocation39_spill] sm:$0xff] }
 0x316   :  { %1199 = vmatpush1.msra.mxu0 %v13147_v4  ;;  %1270 = vmatpush1.msra.mxu1 %v13148_v5  ;;  %v170_v50 = vadd.f32 %v13176_v41, %v116_v36  ;;  %v270_v42 = vcombine.low %v167_v38, %v168_v39  ;;  %v8366_v36 = vld [vmem:[%s12588_s4 + $0x148] sm:$0xff]  ;;  %v8372_v38 = vld [vmem:[%s12588_s4 + $0x158] sm:$0xff]  ;;  %v8378_v39 = vld [vmem:[%s12588_s4 + $0x140] sm:$0xff] }
 0x317   :  { %1200 = vmatprep.subr.mxu0 %v13149_v6  ;;  %1271 = vmatprep.subr.mxu1 %v13150_v7 }
 0x318   :  { %1201 = vmatpush1.msra.mxu0 %v13151_v8  ;;  %1272 = vmatpush1.msra.mxu1 %v13152_v9  ;;  %v271_v59 = vcombine.low %v169_v40, %v170_v50  ;;  %v278_v58 = vrot.slane %v270_v42, %v7966_v53  ;;  %v8384_v40 = vld [vmem:[%s12588_s4 + $0x150] sm:$0xff]  ;;  %v8390_v50 = vld [vmem:[%s12588_s4 + $0x128] sm:$0xff]  ;;  %v8396_v42 = vld [vmem:[%s12588_s4 + $0x138] sm:$0xff] }
 0x319   :  { %1202 = vmatprep.subr.mxu0 %v13153_v10  ;;  %1273 = vmatprep.subr.mxu1 %v13154_v11 }
 0x31a   :  { %1203 = vmatpush1.msra.mxu0 %v13155_v12  ;;  %1274 = vmatpush1.msra.mxu1 %v13156_v13  ;;  %v285_v55 = vrot.slane %v271_v59, %v7966_v53  ;;  %v8258_v13 = vld [vmem:[%s12588_s4 + $0x1e0] sm:$0xff] }
 0x31b   :  { %1204 = vmatprep.subr.mxu0 %v13157_v14  ;;  %1275 = vmatprep.subr.mxu1 %v13158_v15  ;;  %v8270_v14 = vld [vmem:[%s12588_s4 + $0x1c8] sm:$0xff]  ;;  %v8276_v15 = vld [vmem:[%s12588_s4 + $0x1d8] sm:$0xff]  ;;  %v8402_v59 = vld [vmem:[%s12588_s4 + $0x120] sm:$0xff] }
 0x31c   :  { %1205 = vmatpush1.msra.mxu0 %v13159_v16  ;;  %1276 = vmatpush1.msra.mxu1 %v13160_v17  ;;  %v8248_v48 = vcombine.low %v278_v58, %v285_v55  ;;  %v8282_v16 = vld [vmem:[%s12588_s4 + $0x1c0] sm:$0xff]  ;;  %v8288_v17 = vld [vmem:[%s12588_s4 + $0x1d0] sm:$0xff]  ;;  %v8438_v55 = vld [vmem:[%s12588_s4 + $0xe8] sm:$0xff] }
 0x31d   :  { %1206 = vmatprep.subr.mxu0 %v13161_v18  ;;  %1277 = vmatprep.subr.mxu1 %v13162_v19  ;;  %v8294_v18 = vld [vmem:[%s12588_s4 + $0x1a8] sm:$0xff]  ;;  %v8300_v19 = vld [vmem:[%s12588_s4 + $0x1b8] sm:$0xff]  ;;  %v8432_v58 = vld [vmem:[%s12588_s4 + $0x110] sm:$0xff] }
 0x31e   :  { %1207 = vmatpush1.msra.mxu0 %v13163_v20  ;;  %1278 = vmatpush1.msra.mxu1 %v13164_v21  ;;  %13177 = vst [vmem:[#allocation7_spill] sm:$0xff] %v8248_v48  ;;  %v8306_v20 = vld [vmem:[%s12588_s4 + $0x1a0] sm:$0xff]  ;;  %v8312_v21 = vld [vmem:[%s12588_s4 + $0x1b0] sm:$0xff] }
 0x31f   :  { %1208 = vmatprep.subr.mxu0 %v13165_v22  ;;  %1279 = vmatprep.subr.mxu1 %v13166_v23  ;;  %v8318_v22 = vld [vmem:[%s12588_s4 + $0x188] sm:$0xff]  ;;  %v8324_v23 = vld [vmem:[%s12588_s4 + $0x198] sm:$0xff] }
 0x320   :  { %1209 = vmatpush1.msra.mxu0 %v13167_v24  ;;  %1242 = vmatprep.mubr.f32.mxu0 %v13168_v25  ;;  %v8330_v24 = vld [vmem:[%s12588_s4 + $0x180] sm:$0xff] }
 0x321   :  { %1280 = vmatpush1.msra.mxu1 %v13169_v26  ;;  %1313 = vmatprep.mubr.f32.mxu1 %v13168_v25  ;;  %v8336_v26 = vld [vmem:[%s12588_s4 + $0x190] sm:$0xff] }
 0x322   :  { %1363 = vmatprep.subr.mxu0 %v8227_v27  ;;  %1434 = vmatprep.subr.mxu1 %v8233_v28 }
 0x3c1   :  { %v1059_v52 = vpop.f32.mrf.mxu0  ;;  %v1130_v49 = vpop.f32.mrf.mxu1 }
 0x3c3   :  { %v1061_v56 = vpop.f32.mrf.mxu0  ;;  %v1132_v45 = vpop.f32.mrf.mxu1 }
 0x3c4   :  { %v1139_v44 = vcombine.low %v1059_v52, %v1061_v56  ;;  %v1140_v47 = vcombine.low %v1130_v49, %v1132_v45  ;;  %v8408_v52 = vld [vmem:[%s12588_s4 + $0x130] sm:$0xff]  ;;  %v8414_v49 = vld [vmem:[%s12588_s4 + $0x108] sm:$0xff]  ;;  %v8420_v56 = vld [vmem:[%s12588_s4 + $0x118] sm:$0xff] }
 0x3c5   :  { %v8426_v45 = vld [vmem:[%s12588_s4 + $0x100] sm:$0xff] }
 0x3c6   :  { %v1147_v43 = vrot.slane %v1139_v44, %v7966_v53  ;;  %v1154_v57 = vrot.slane %v1140_v47, %v7966_v53  ;;  %v8444_v44 = vld [vmem:[%s12588_s4 + $0xf8] sm:$0xff]  ;;  %v8450_v47 = vld [vmem:[%s12588_s4 + $0xe0] sm:$0xff] }
 0x3c8   :  { %v1155_v62 = vcombine.low %v1147_v43, %v1154_v57  ;;  %v8456_v43 = vld [vmem:[%s12588_s4 + $0xf0] sm:$0xff]  ;;  %v8462_v57 = vld [vmem:[%s12588_s4 + $0xc8] sm:$0xff] }
 0x3ca   :  { %v1157_v61 = vadd.f32 %v1155_v62, %v8248_v48  ;;  %v8468_v62 = vld [vmem:[%s12588_s4 + $0xd8] sm:$0xff]  ;;  %v8552_v48 = vld [vmem:[%s12588_s4 + $0x70] sm:$0xff] }
 0x3cb   :  { %13188 = vst [vmem:[#allocation18_spill] sm:$0xff] %v8552_v48 }
 0x3cc   :  { %v1158_v63 = vmul.f32 0.5, %v1157_v61  ;;  %v1163_v46 = vrot.slane %v1157_v61, 6  ;;  %v8474_v61 = vld [vmem:[%s12588_s4 + $0xc0] sm:$0xff] }
 0x3ce   :  { %6971 = vtanh.f32 %v1158_v63  ;;  %v8480_v63 = vld [vmem:[%s12588_s4 + $0xd0] sm:$0xff] }
 0x3cf   :  { %6973 = vtanh.f32 %v1163_v46  ;;  %v8486_v46 = vld [vmem:[%s12588_s4 + $0xa8] sm:$0xff] }
 0x3db   :  { %v6972_v3 = vpop.eup %6971 }
 0x3dc   :  { %v1160_v2 = vmul.f32 0.5, %v6972_v3  ;;  %v6974_v6 = vpop.eup %6973  ;;  %v8492_v3 = vld [vmem:[%s12588_s4 + $0xb8] sm:$0xff] }
 0x3dd   :  { %13178 = vst [vmem:[#allocation8_spill] sm:$0xff] %v8492_v3 }
 0x3de   :  { %v1161_v4 = vadd.f32 0.5, %v1160_v2  ;;  %v8498_v2 = vld [vmem:[%s12588_s4 + $0xa0] sm:$0xff] }
 0x3df   :  { %13179 = vst [vmem:[#allocation9_spill] sm:$0xff] %v8498_v2 }
 0x3e0   :  { %v1167_v5 = vrot.slane %v1161_v4, 2  ;;  %v1170_v8 = vmul.f32 %v6974_v6, %v1161_v4  ;;  %v1173_v10 = vrot.slane %v1161_v4, 4  ;;  %v8504_v4 = vld [vmem:[%s12588_s4 + $0xb0] sm:$0xff]  ;;  %v8516_v6 = vld [vmem:[%s12588_s4 + $0x98] sm:$0xff] }
 0x3e1   :  { %13180 = vst [vmem:[#allocation10_spill] sm:$0xff] %v8504_v4  ;;  %13182 = vst [vmem:[#allocation12_spill] sm:$0xff] %v8516_v6 }
 0x3e2   :  { %v1169_v7 = vmul.f32 %v1167_v5, %v8157_v1  ;;  %v8264_v1 = vld [vmem:[%s12588_s4 + $0x1f0] sm:$0xff]  ;;  %v8510_v5 = vld [vmem:[%s12588_s4 + $0x88] sm:$0xff] }
 0x3e3   :  { %13181 = vst [vmem:[#allocation11_spill] sm:$0xff] %v8510_v5 }
 0x3e4   :  { %v8252_v9 = vadd.f32 %v1170_v8, %v1169_v7  ;;  %v8522_v7 = vld [vmem:[%s12588_s4 + $0x80] sm:$0xff]  ;;  %v8528_v8 = vld [vmem:[%s12588_s4 + $0x90] sm:$0xff] }
 0x3e5   :  { %13183 = vst [vmem:[#allocation13_spill] sm:$0xff] %v8522_v7  ;;  %13184 = vst [vmem:[#allocation14_spill] sm:$0xff] %v8528_v8 }
 0x3e6   :  { %6975 = vtanh.f32 %v8252_v9 }
 0x3f3   :  { %v6976_v11 = vpop.eup %6975 }
 0x3f4   :  { %v1175_v12 = vmul.f32 %v6976_v11, %v1173_v10  ;;  %v8534_v10 = vld [vmem:[%s12588_s4 + $0x68] sm:$0xff]  ;;  %v8540_v11 = vld [vmem:[%s12588_s4 + $0x78] sm:$0xff] }
 0x3f5   :  { %13185 = vst [vmem:[#allocation15_spill] sm:$0xff] %v8534_v10  ;;  %13186 = vst [vmem:[#allocation16_spill] sm:$0xff] %v8540_v11 }
 0x3f6   :  { %1243 = vmatmul.mubr.f32.vlgmr.msra.gmra.mxu0 %v1175_v12  ;;  %1314 = vmatmul.mubr.f32.vlgmr.msra.gmra.mxu1 %v1175_v12  ;;  %v8546_v12 = vld [vmem:[%s12588_s4 + $0x60] sm:$0xff] }
 0x3f7   :  { %1364 = vmatpush1.msra.mxu0 %v8258_v13  ;;  %1435 = vmatpush1.msra.mxu1 %v8264_v1  ;;  %13187 = vst [vmem:[#allocation17_spill] sm:$0xff] %v8546_v12 }
 0x3f8   :  { %1365 = vmatprep.subr.mxu0 %v8270_v14  ;;  %1436 = vmatprep.subr.mxu1 %v8276_v15 }
 0x3f9   :  { %1366 = vmatpush1.msra.mxu0 %v8282_v16  ;;  %1437 = vmatpush1.msra.mxu1 %v8288_v17 }
 0x3fa   :  { %1367 = vmatprep.subr.mxu0 %v8294_v18  ;;  %1438 = vmatprep.subr.mxu1 %v8300_v19 }
 0x3fb   :  { %1368 = vmatpush1.msra.mxu0 %v8306_v20  ;;  %1439 = vmatpush1.msra.mxu1 %v8312_v21 }
 0x3fc   :  { %1369 = vmatprep.subr.mxu0 %v8318_v22  ;;  %1440 = vmatprep.subr.mxu1 %v8324_v23 }
 0x3fd   :  { %1370 = vmatpush1.msra.mxu0 %v8330_v24  ;;  %1441 = vmatpush1.msra.mxu1 %v8336_v26 }
 0x3fe   :  { %1371 = vmatprep.subr.mxu0 %v8342_v29  ;;  %1442 = vmatprep.subr.mxu1 %v8348_v31 }
 0x3ff   :  { %1372 = vmatpush1.msra.mxu0 %v8354_v33  ;;  %1443 = vmatpush1.msra.mxu1 %v8360_v35 }
 0x400   :  { %1373 = vmatprep.subr.mxu0 %v8366_v36  ;;  %1444 = vmatprep.subr.mxu1 %v8372_v38 }
 0x401   :  { %1374 = vmatpush1.msra.mxu0 %v8378_v39  ;;  %1445 = vmatpush1.msra.mxu1 %v8384_v40 }
 0x402   :  { %1375 = vmatprep.subr.mxu0 %v8390_v50  ;;  %1446 = vmatprep.subr.mxu1 %v8396_v42 }
 0x403   :  { %1376 = vmatpush1.msra.mxu0 %v8402_v59  ;;  %1447 = vmatpush1.msra.mxu1 %v8408_v52 }
 0x404   :  { %1377 = vmatprep.subr.mxu0 %v8414_v49  ;;  %1448 = vmatprep.subr.mxu1 %v8420_v56 }
 0x405   :  { %1378 = vmatpush1.msra.mxu0 %v8426_v45  ;;  %1449 = vmatpush1.msra.mxu1 %v8432_v58 }
 0x406   :  { %1379 = vmatprep.subr.mxu0 %v8438_v55  ;;  %1450 = vmatprep.subr.mxu1 %v8444_v44 }
 0x407   :  { %1380 = vmatpush1.msra.mxu0 %v8450_v47  ;;  %1451 = vmatpush1.msra.mxu1 %v8456_v43 }
 0x408   :  { %1381 = vmatprep.subr.mxu0 %v8462_v57  ;;  %1452 = vmatprep.subr.mxu1 %v8468_v62 }
 0x409   :  { %1382 = vmatpush1.msra.mxu0 %v8474_v61  ;;  %1453 = vmatpush1.msra.mxu1 %v8480_v63 }
 0x40a   :  { %1383 = vmatprep.subr.mxu0 %v8486_v46  ;;  %1454 = vmatprep.subr.mxu1 %v8492_v3 }
 0x40b   :  { %1384 = vmatpush1.msra.mxu0 %v8498_v2  ;;  %1455 = vmatpush1.msra.mxu1 %v8504_v4 }
 0x40c   :  { %1385 = vmatprep.subr.mxu0 %v8510_v5  ;;  %1456 = vmatprep.subr.mxu1 %v8516_v6 }
 0x40d   :  { %1386 = vmatpush1.msra.mxu0 %v8522_v7  ;;  %1457 = vmatpush1.msra.mxu1 %v8528_v8 }
 0x40e   :  { %1387 = vmatprep.subr.mxu0 %v8534_v10  ;;  %1458 = vmatprep.subr.mxu1 %v8540_v11  ;;  %v8564_v11 = vld [vmem:[%s12588_s4 + $0x58] sm:$0xff] }
 0x40f   :  { %1388 = vmatpush1.msra.mxu0 %v8546_v12  ;;  %1459 = vmatpush1.msra.mxu1 %v8552_v48  ;;  %13190 = vst [vmem:[#allocation20_spill] sm:$0xff] %v8564_v11  ;;  %v8570_v12 = vld [vmem:[%s12588_s4 + $0x40] sm:$0xff]  ;;  %v8576_v48 = vld [vmem:[%s12588_s4 + $0x50] sm:$0xff] }
 0x410   :  { %1389 = vmatprep.subr.mxu0 %v8558_v54  ;;  %1460 = vmatprep.subr.mxu1 %v8564_v11  ;;  %13191 = vst [vmem:[#allocation21_spill] sm:$0xff] %v8570_v12  ;;  %13192 = vst [vmem:[#allocation22_spill] sm:$0xff] %v8576_v48  ;;  %v8582_v54 = vld [vmem:[%s12588_s4 + $0x28] sm:$0xff]  ;;  %v8588_v11 = vld [vmem:[%s12588_s4 + $0x38] sm:$0xff] }
 0x411   :  { %1390 = vmatpush1.msra.mxu0 %v8570_v12  ;;  %1461 = vmatpush1.msra.mxu1 %v8576_v48  ;;  %13193 = vst [vmem:[#allocation23_spill] sm:$0xff] %v8582_v54  ;;  %13194 = vst [vmem:[#allocation24_spill] sm:$0xff] %v8588_v11  ;;  %v8594_v12 = vld [vmem:[%s12588_s4 + $0x20] sm:$0xff]  ;;  %v8600_v48 = vld [vmem:[%s12588_s4 + $0x30] sm:$0xff] }
 0x412   :  { %1391 = vmatprep.subr.mxu0 %v8582_v54  ;;  %1462 = vmatprep.subr.mxu1 %v8588_v11  ;;  %13195 = vst [vmem:[#allocation25_spill] sm:$0xff] %v8594_v12  ;;  %13196 = vst [vmem:[#allocation26_spill] sm:$0xff] %v8600_v48  ;;  %v8606_v54 = vld [vmem:[%s12588_s4 + $0x8] sm:$0xff]  ;;  %v8612_v11 = vld [vmem:[%s12588_s4 + $0x18] sm:$0xff] }
 0x413   :  { %1392 = vmatpush1.msra.mxu0 %v8594_v12  ;;  %1463 = vmatpush1.msra.mxu1 %v8600_v48  ;;  %13197 = vst [vmem:[#allocation27_spill] sm:$0xff] %v8606_v54  ;;  %13198 = vst [vmem:[#allocation28_spill] sm:$0xff] %v8612_v11  ;;  %v8618_v12 = vld [vmem:[%s12588_s4] sm:$0xff] }
 0x414   :  { %1393 = vmatprep.subr.mxu0 %v8606_v54  ;;  %1464 = vmatprep.subr.mxu1 %v8612_v11  ;;  %13199 = vst [vmem:[#allocation37_spill] sm:$0xff] %v8618_v12  ;;  %v8625_v54 = vld [vmem:[%s12588_s4 + $0x10] sm:$0xff]  ;;  %v63_v11 = vpop.permute.xlu0 %62 }
 0x415   :  { %1394 = vmatpush1.msra.mxu0 %v8618_v12  ;;  %1427 = vmatprep.mubr.f32.mxu0 %v13168_v25  ;;  %13200 = vst [vmem:[#allocation40_spill] sm:$0xff] %v8625_v54  ;;  %v117_v48 = vmul.f32 %v13172_v30, %v63_v11  ;;  %v118_v12 = vmul.f32 %v13173_v32, %v63_v11 }
 0x416   :  { %1465 = vmatpush1.msra.mxu1 %v8625_v54  ;;  %1498 = vmatprep.mubr.f32.mxu1 %v13168_v25  ;;  %v119_v10 = vmul.f32 %v13174_v34, %v63_v11  ;;  %v120_v8 = vmul.f32 %v13112_v0, %v63_v11 }
 0x417   :  { %1548 = vmatprep.subr.mxu0 %v8227_v27  ;;  %1619 = vmatprep.subr.mxu1 %v8233_v28  ;;  %v171_v7 = vadd.f32 %v13175_v37, %v117_v48  ;;  %v172_v6 = vadd.f32 %v13144_v60, %v118_v12 }
 0x418   :  { %v173_v54 = vadd.f32 %v7953_v51, %v119_v10  ;;  %v174_v25 = vadd.f32 %v13176_v41, %v120_v8 }
 0x419   :  { %v287_v27 = vcombine.low %v171_v7, %v172_v6 }
 0x41a   :  { %v288_v5 = vcombine.low %v173_v54, %v174_v25 }
 0x41b   :  { %v295_v32 = vrot.slane %v287_v27, %v7966_v53 }
 0x41c   :  { %v302_v34 = vrot.slane %v288_v5, %v7966_v53 }
 0x41e   :  { %v8643_v60 = vcombine.low %v295_v32, %v302_v34 }
 0x420   :  { %13201 = vst [vmem:[#allocation41_spill] sm:$0xff] %v8643_v60 }
 0x4b6   :  { %v1244_v28 = vpop.f32.mrf.mxu0  ;;  %v1315_v4 = vpop.f32.mrf.mxu1 }
 0x4b8   :  { %v1246_v2 = vpop.f32.mrf.mxu0  ;;  %v1317_v30 = vpop.f32.mrf.mxu1 }
 0x4b9   :  { %v1324_v3 = vcombine.low %v1244_v28, %v1246_v2  ;;  %v1325_v11 = vcombine.low %v1315_v4, %v1317_v30  ;;  %v13204_v4 = vld [vmem:[#allocation10_spill] sm:$0xff] }
 0x4bb   :  { %v1332_v48 = vrot.slane %v1324_v3, %v7966_v53  ;;  %v1339_v12 = vrot.slane %v1325_v11, %v7966_v53  ;;  %v13205_v11 = vld [vmem:[#allocation11_spill] sm:$0xff] }
 0x4bd   :  { %v1340_v10 = vcombine.low %v1332_v48, %v1339_v12  ;;  %v13206_v48 = vld [vmem:[#allocation12_spill] sm:$0xff]  ;;  %v13207_v12 = vld [vmem:[#allocation13_spill] sm:$0xff] }
 0x4bf   :  { %v1342_v6 = vadd.f32 %v1340_v10, %v8643_v60  ;;  %v13208_v10 = vld [vmem:[#allocation14_spill] sm:$0xff]  ;;  %v13221_v60 = vld [vmem:[#allocation27_spill] sm:$0xff] }
 0x4c1   :  { %v1343_v54 = vmul.f32 0.5, %v1342_v6  ;;  %v1348_v25 = vrot.slane %v1342_v6, 6  ;;  %v13209_v6 = vld [vmem:[#allocation15_spill] sm:$0xff] }
 0x4c3   :  { %6977 = vtanh.f32 %v1343_v54  ;;  %v13210_v54 = vld [vmem:[#allocation16_spill] sm:$0xff] }
 0x4c4   :  { %6979 = vtanh.f32 %v1348_v25  ;;  %v13211_v25 = vld [vmem:[#allocation17_spill] sm:$0xff] }
 0x4d0   :  { %v6978_v7 = vpop.eup %6977 }
 0x4d1   :  { %v1345_v8 = vmul.f32 0.5, %v6978_v7  ;;  %v6980_v5 = vpop.eup %6979  ;;  %v13212_v7 = vld [vmem:[#allocation18_spill] sm:$0xff] }
 0x4d3   :  { %v1346_v27 = vadd.f32 0.5, %v1345_v8  ;;  %v13213_v8 = vld [vmem:[#allocation19_spill] sm:$0xff] }
 0x4d5   :  { %v1352_v41 = vrot.slane %v1346_v27, 2  ;;  %v1355_v30 = vmul.f32 %v6980_v5, %v1346_v27  ;;  %v1358_v32 = vrot.slane %v1346_v27, 4  ;;  %v13214_v27 = vld [vmem:[#allocation20_spill] sm:$0xff]  ;;  %v13215_v5 = vld [vmem:[#allocation21_spill] sm:$0xff] }
 0x4d7   :  { %v1354_v28 = vmul.f32 %v1352_v41, %v8252_v9  ;;  %v13202_v41 = vld [vmem:[#allocation8_spill] sm:$0xff]  ;;  %v13203_v9 = vld [vmem:[#allocation9_spill] sm:$0xff] }
 0x4d9   :  { %v8647_v3 = vadd.f32 %v1355_v30, %v1354_v28  ;;  %v13216_v28 = vld [vmem:[#allocation22_spill] sm:$0xff]  ;;  %v13217_v30 = vld [vmem:[#allocation23_spill] sm:$0xff] }
 0x4db   :  { %6981 = vtanh.f32 %v8647_v3 }
 0x4e8   :  { %v6982_v34 = vpop.eup %6981 }
 0x4e9   :  { %v1360_v2 = vmul.f32 %v6982_v34, %v1358_v32  ;;  %v13218_v32 = vld [vmem:[#allocation24_spill] sm:$0xff]  ;;  %v13219_v34 = vld [vmem:[#allocation25_spill] sm:$0xff] }
 0x4eb   :  { %1428 = vmatmul.mubr.f32.vlgmr.msra.gmra.mxu0 %v1360_v2  ;;  %1499 = vmatmul.mubr.f32.vlgmr.msra.gmra.mxu1 %v1360_v2  ;;  %v13220_v2 = vld [vmem:[#allocation26_spill] sm:$0xff] }
 0x4ec   :  { %1549 = vmatpush1.msra.mxu0 %v8258_v13  ;;  %1620 = vmatpush1.msra.mxu1 %v8264_v1 }
 0x4ed   :  { %1550 = vmatprep.subr.mxu0 %v8270_v14  ;;  %1621 = vmatprep.subr.mxu1 %v8276_v15 }
 0x4ee   :  { %1551 = vmatpush1.msra.mxu0 %v8282_v16  ;;  %1622 = vmatpush1.msra.mxu1 %v8288_v17 }
 0x4ef   :  { %1552 = vmatprep.subr.mxu0 %v8294_v18  ;;  %1623 = vmatprep.subr.mxu1 %v8300_v19 }
 0x4f0   :  { %1553 = vmatpush1.msra.mxu0 %v8306_v20  ;;  %1624 = vmatpush1.msra.mxu1 %v8312_v21 }
 0x4f1   :  { %1554 = vmatprep.subr.mxu0 %v8318_v22  ;;  %1625 = vmatprep.subr.mxu1 %v8324_v23 }
 0x4f2   :  { %1555 = vmatpush1.msra.mxu0 %v8330_v24  ;;  %1626 = vmatpush1.msra.mxu1 %v8336_v26 }
 0x4f3   :  { %1556 = vmatprep.subr.mxu0 %v8342_v29  ;;  %1627 = vmatprep.subr.mxu1 %v8348_v31 }
 0x4f4   :  { %1557 = vmatpush1.msra.mxu0 %v8354_v33  ;;  %1628 = vmatpush1.msra.mxu1 %v8360_v35 }
 0x4f5   :  { %1558 = vmatprep.subr.mxu0 %v8366_v36  ;;  %1629 = vmatprep.subr.mxu1 %v8372_v38 }
 0x4f6   :  { %1559 = vmatpush1.msra.mxu0 %v8378_v39  ;;  %1630 = vmatpush1.msra.mxu1 %v8384_v40 }
 0x4f7   :  { %1560 = vmatprep.subr.mxu0 %v8390_v50  ;;  %1631 = vmatprep.subr.mxu1 %v8396_v42 }
 0x4f8   :  { %1561 = vmatpush1.msra.mxu0 %v8402_v59  ;;  %1632 = vmatpush1.msra.mxu1 %v8408_v52 }
 0x4f9   :  { %1562 = vmatprep.subr.mxu0 %v8414_v49  ;;  %1633 = vmatprep.subr.mxu1 %v8420_v56 }
 0x4fa   :  { %1563 = vmatpush1.msra.mxu0 %v8426_v45  ;;  %1634 = vmatpush1.msra.mxu1 %v8432_v58 }
 0x4fb   :  { %1564 = vmatprep.subr.mxu0 %v8438_v55  ;;  %1635 = vmatprep.subr.mxu1 %v8444_v44 }
 0x4fc   :  { %1565 = vmatpush1.msra.mxu0 %v8450_v47  ;;  %1636 = vmatpush1.msra.mxu1 %v8456_v43 }
 0x4fd   :  { %1566 = vmatprep.subr.mxu0 %v8462_v57  ;;  %1637 = vmatprep.subr.mxu1 %v8468_v62 }
 0x4fe   :  { %1567 = vmatpush1.msra.mxu0 %v8474_v61  ;;  %1638 = vmatpush1.msra.mxu1 %v8480_v63 }
 0x4ff   :  { %1568 = vmatprep.subr.mxu0 %v8486_v46  ;;  %1639 = vmatprep.subr.mxu1 %v13202_v41 }
 0x500   :  { %1569 = vmatpush1.msra.mxu0 %v13203_v9  ;;  %1640 = vmatpush1.msra.mxu1 %v13204_v4 }
 0x501   :  { %1570 = vmatprep.subr.mxu0 %v13205_v11  ;;  %1641 = vmatprep.subr.mxu1 %v13206_v48 }
 0x502   :  { %1571 = vmatpush1.msra.mxu0 %v13207_v12  ;;  %1642 = vmatpush1.msra.mxu1 %v13208_v10  ;;  %v13231_v10 = vld [vmem:[#allocation38_spill] sm:$0xff] }
 0x503   :  { %1572 = vmatprep.subr.mxu0 %v13209_v6  ;;  %1643 = vmatprep.subr.mxu1 %v13210_v54 }
 0x504   :  { %1573 = vmatpush1.msra.mxu0 %v13211_v25  ;;  %1644 = vmatpush1.msra.mxu1 %v13212_v7  ;;  %v13222_v25 = vld [vmem:[#allocation28_spill] sm:$0xff]  ;;  %v13223_v7 = vld [vmem:[#allocation37_spill] sm:$0xff] }
 0x505   :  { %1574 = vmatprep.subr.mxu0 %v13213_v8  ;;  %1645 = vmatprep.subr.mxu1 %v13214_v27  ;;  %v13224_v8 = vmov 0.0   ;;  %v13225_v27 = vld [vmem:[#allocation40_spill] sm:$0xff] }
 0x506   :  { %1575 = vmatpush1.msra.mxu0 %v13215_v5  ;;  %1646 = vmatpush1.msra.mxu1 %v13216_v28  ;;  %v13226_v28 = vld [vmem:[#allocation5_spill] sm:$0xff] }
 0x507   :  { %1576 = vmatprep.subr.mxu0 %v13217_v30  ;;  %1647 = vmatprep.subr.mxu1 %v13218_v32  ;;  %v13227_v30 = vld [vmem:[#allocation6_spill] sm:$0xff]  ;;  %v68_v32 = vpop.permute.xlu1 %67 }
 0x508   :  { %1577 = vmatpush1.msra.mxu0 %v13219_v34  ;;  %1648 = vmatpush1.msra.mxu1 %v13220_v2  ;;  %v13228_v34 = vld [vmem:[#allocation33_spill] sm:$0xff]  ;;  %v13229_v2 = vld [vmem:[#allocation34_spill] sm:$0xff] }
 0x509   :  { %1578 = vmatprep.subr.mxu0 %v13221_v60  ;;  %1649 = vmatprep.subr.mxu1 %v13222_v25  ;;  %v121_v5 = vmul.f32 %v13228_v34, %v68_v32  ;;  %v122_v54 = vmul.f32 %v13229_v2, %v68_v32  ;;  %v13230_v60 = vld [vmem:[#allocation35_spill] sm:$0xff]  ;;  %v124_v25 = vmul.f32 %v13112_v0, %v68_v32 }
 0x50a   :  { %1579 = vmatpush1.msra.mxu0 %v13223_v7  ;;  %1612 = vmatprep.mubr.f32.mxu0 %v13224_v8  ;;  %v123_v6 = vmul.f32 %v13230_v60, %v68_v32 }
 0x50b   :  { %1650 = vmatpush1.msra.mxu1 %v13225_v27  ;;  %1683 = vmatprep.mubr.f32.mxu1 %v13224_v8  ;;  %v175_v7 = vadd.f32 %v13175_v37, %v121_v5  ;;  %v176_v12 = vadd.f32 %v13231_v10, %v122_v54  ;;  %v13232_v8 = vld [vmem:[#allocation39_spill] sm:$0xff] }
 0x50c   :  { %1733 = vmatprep.subr.mxu0 %v13226_v28  ;;  %1804 = vmatprep.subr.mxu1 %v13227_v30  ;;  %v177_v27 = vadd.f32 %v7953_v51, %v123_v6  ;;  %v178_v48 = vadd.f32 %v13232_v8, %v124_v25 }
 0x50d   :  { %v304_v28 = vcombine.low %v175_v7, %v176_v12 }
 0x50e   :  { %v305_v11 = vcombine.low %v177_v27, %v178_v48 }
 0x50f   :  { %v312_v2 = vrot.slane %v304_v28, %v7966_v53 }
 0x510   :  { %v319_v60 = vrot.slane %v305_v11, %v7966_v53 }
 0x512   :  { %v8728_v10 = vcombine.low %v312_v2, %v319_v60 }
 0x514   :  { %13233 = vst [vmem:[#allocation5_spill] sm:$0xff] %v8728_v10 }
 0x5ab   :  { %v1429_v30 = vpop.f32.mrf.mxu0  ;;  %v1500_v4 = vpop.f32.mrf.mxu1 }
 0x5ad   :  { %v1431_v9 = vpop.f32.mrf.mxu0  ;;  %v1502_v34 = vpop.f32.mrf.mxu1 }
 0x5ae   :  { %v1509_v41 = vcombine.low %v1429_v30, %v1431_v9  ;;  %v1510_v32 = vcombine.low %v1500_v4, %v1502_v34 }
 0x5b0   :  { %v1517_v5 = vrot.slane %v1509_v41, %v7966_v53  ;;  %v1524_v54 = vrot.slane %v1510_v32, %v7966_v53 }
 0x5b2   :  { %v1525_v6 = vcombine.low %v1517_v5, %v1524_v54 }
 0x5b4   :  { %v1527_v12 = vadd.f32 %v1525_v6, %v8728_v10  ;;  %v9131_v10 = vld [vmem:[%s12588_s4 + $0x48] sm:$0xff] }
 0x5b6   :  { %v1528_v48 = vmul.f32 0.5, %v1527_v12  ;;  %v1533_v25 = vrot.slane %v1527_v12, 6 }
 0x5b8   :  { %6983 = vtanh.f32 %v1528_v48 }
 0x5b9   :  { %6985 = vtanh.f32 %v1533_v25 }
 0x5c5   :  { %v6984_v7 = vpop.eup %6983 }
 0x5c6   :  { %v1530_v27 = vmul.f32 0.5, %v6984_v7  ;;  %v6986_v11 = vpop.eup %6985 }
 0x5c8   :  { %v1531_v28 = vadd.f32 0.5, %v1530_v27 }
 0x5ca   :  { %v1537_v8 = vrot.slane %v1531_v28, 2  ;;  %v1540_v4 = vmul.f32 %v6986_v11, %v1531_v28  ;;  %v1543_v60 = vrot.slane %v1531_v28, 4 }
 0x5cc   :  { %v1539_v9 = vmul.f32 %v1537_v8, %v8647_v3 }
 0x5ce   :  { %v8732_v41 = vadd.f32 %v1540_v4, %v1539_v9 }
 0x5d0   :  { %6987 = vtanh.f32 %v8732_v41 }
 0x5dd   :  { %v6988_v34 = vpop.eup %6987 }
 0x5de   :  { %v1545_v2 = vmul.f32 %v6988_v34, %v1543_v60 }
 0x5e0   :  { %1613 = vmatmul.mubr.f32.vlgmr.msra.gmra.mxu0 %v1545_v2  ;;  %1684 = vmatmul.mubr.f32.vlgmr.msra.gmra.mxu1 %v1545_v2 }
 0x5e1   :  { %1734 = vmatpush1.msra.mxu0 %v8258_v13  ;;  %1805 = vmatpush1.msra.mxu1 %v8264_v1  ;;  %v13234_v13 = vld [vmem:[#allocation8_spill] sm:$0xff]  ;;  %v13235_v1 = vld [vmem:[#allocation9_spill] sm:$0xff] }
 0x5e2   :  { %1735 = vmatprep.subr.mxu0 %v8270_v14  ;;  %1806 = vmatprep.subr.mxu1 %v8276_v15  ;;  %v13236_v14 = vld [vmem:[#allocation10_spill] sm:$0xff]  ;;  %v13237_v15 = vld [vmem:[#allocation11_spill] sm:$0xff] }
 0x5e3   :  { %1736 = vmatpush1.msra.mxu0 %v8282_v16  ;;  %1807 = vmatpush1.msra.mxu1 %v8288_v17  ;;  %v13238_v16 = vld [vmem:[#allocation12_spill] sm:$0xff]  ;;  %v13239_v17 = vld [vmem:[#allocation13_spill] sm:$0xff] }
 0x5e4   :  { %1737 = vmatprep.subr.mxu0 %v8294_v18  ;;  %1808 = vmatprep.subr.mxu1 %v8300_v19  ;;  %v13240_v18 = vld [vmem:[#allocation14_spill] sm:$0xff]  ;;  %v13241_v19 = vld [vmem:[#allocation15_spill] sm:$0xff] }
 0x5e5   :  { %1738 = vmatpush1.msra.mxu0 %v8306_v20  ;;  %1809 = vmatpush1.msra.mxu1 %v8312_v21  ;;  %v13242_v20 = vld [vmem:[#allocation16_spill] sm:$0xff]  ;;  %v13243_v21 = vld [vmem:[#allocation17_spill] sm:$0xff] }
 0x5e6   :  { %1739 = vmatprep.subr.mxu0 %v8318_v22  ;;  %1810 = vmatprep.subr.mxu1 %v8324_v23  ;;  %v13244_v22 = vld [vmem:[#allocation18_spill] sm:$0xff]  ;;  %v13245_v23 = vld [vmem:[#allocation19_spill] sm:$0xff] }
 0x5e7   :  { %1740 = vmatpush1.msra.mxu0 %v8330_v24  ;;  %1811 = vmatpush1.msra.mxu1 %v8336_v26  ;;  %v13246_v24 = vld [vmem:[#allocation20_spill] sm:$0xff]  ;;  %v13247_v26 = vld [vmem:[#allocation21_spill] sm:$0xff] }
 0x5e8   :  { %1741 = vmatprep.subr.mxu0 %v8342_v29  ;;  %1812 = vmatprep.subr.mxu1 %v8348_v31  ;;  %v13248_v29 = vld [vmem:[#allocation22_spill] sm:$0xff]  ;;  %v13249_v31 = vld [vmem:[#allocation23_spill] sm:$0xff]  ;;  %13277 = vst [vmem:[#allocation21_spill] sm:$0xff] %v9131_v10 }
 0x5e9   :  { %1742 = vmatpush1.msra.mxu0 %v8354_v33  ;;  %1813 = vmatpush1.msra.mxu1 %v8360_v35  ;;  %v13250_v33 = vld [vmem:[#allocation24_spill] sm:$0xff]  ;;  %v13251_v35 = vld [vmem:[#allocation25_spill] sm:$0xff] }
 0x5ea   :  { %1743 = vmatprep.subr.mxu0 %v8366_v36  ;;  %1814 = vmatprep.subr.mxu1 %v8372_v38  ;;  %v13252_v36 = vld [vmem:[#allocation26_spill] sm:$0xff]  ;;  %v13253_v38 = vld [vmem:[#allocation27_spill] sm:$0xff] }
 0x5eb   :  { %1744 = vmatpush1.msra.mxu0 %v8378_v39  ;;  %1815 = vmatpush1.msra.mxu1 %v8384_v40  ;;  %v13254_v39 = vld [vmem:[#allocation28_spill] sm:$0xff]  ;;  %v13255_v40 = vld [vmem:[#allocation37_spill] sm:$0xff] }
 0x5ec   :  { %1745 = vmatprep.subr.mxu0 %v8390_v50  ;;  %1816 = vmatprep.subr.mxu1 %v8396_v42  ;;  %v13256_v50 = vmov 0.0   ;;  %v13257_v42 = vld [vmem:[#allocation40_spill] sm:$0xff] }
 0x5ed   :  { %1746 = vmatpush1.msra.mxu0 %v8402_v59  ;;  %1817 = vmatpush1.msra.mxu1 %v8408_v52  ;;  %v73_v59 = vpop.permute.xlu0 %72  ;;  %v13258_v52 = vld [vmem:[#allocation33_spill] sm:$0xff] }
 0x5ee   :  { %1747 = vmatprep.subr.mxu0 %v8414_v49  ;;  %1818 = vmatprep.subr.mxu1 %v8420_v56  ;;  %v125_v49 = vmul.f32 %v13258_v52, %v73_v59  ;;  %v13259_v56 = vld [vmem:[#allocation34_spill] sm:$0xff] }
 0x5ef   :  { %1748 = vmatpush1.msra.mxu0 %v8426_v45  ;;  %1819 = vmatpush1.msra.mxu1 %v8432_v58  ;;  %v126_v45 = vmul.f32 %v13259_v56, %v73_v59  ;;  %v13260_v58 = vld [vmem:[#allocation35_spill] sm:$0xff] }
 0x5f0   :  { %1749 = vmatprep.subr.mxu0 %v8438_v55  ;;  %1820 = vmatprep.subr.mxu1 %v8444_v44  ;;  %v127_v55 = vmul.f32 %v13260_v58, %v73_v59  ;;  %v128_v44 = vmul.f32 %v13112_v0, %v73_v59  ;;  %v8919_v59 = vld [vmem:[%s12588_s4 + $0x168] sm:$0xff] }
 0x5f1   :  { %1750 = vmatpush1.msra.mxu0 %v8450_v47  ;;  %1821 = vmatpush1.msra.mxu1 %v8456_v43  ;;  %v179_v47 = vadd.f32 %v13175_v37, %v125_v49  ;;  %v13261_v43 = vld [vmem:[#allocation38_spill] sm:$0xff] }
 0x5f2   :  { %1751 = vmatprep.subr.mxu0 %v8462_v57  ;;  %1822 = vmatprep.subr.mxu1 %v8468_v62  ;;  %v180_v57 = vadd.f32 %v13261_v43, %v126_v45  ;;  %v181_v62 = vadd.f32 %v7953_v51, %v127_v55  ;;  %v8924_v49 = vld [vmem:[%s12588_s4 + $0x178] sm:$0xff]  ;;  %v8931_v45 = vld [vmem:[%s12588_s4 + $0x160] sm:$0xff]  ;;  %v8936_v55 = vld [vmem:[%s12588_s4 + $0x170] sm:$0xff] }
 0x5f3   :  { %1752 = vmatpush1.msra.mxu0 %v8474_v61  ;;  %1823 = vmatpush1.msra.mxu1 %v8480_v63  ;;  %v13262_v61 = vld [vmem:[#allocation39_spill] sm:$0xff] }
 0x5f4   :  { %1753 = vmatprep.subr.mxu0 %v8486_v46  ;;  %1824 = vmatprep.subr.mxu1 %v13234_v13  ;;  %v182_v63 = vadd.f32 %v13262_v61, %v128_v44  ;;  %v321_v46 = vcombine.low %v179_v47, %v180_v57  ;;  %v8943_v44 = vld [vmem:[%s12588_s4 + $0x148] sm:$0xff]  ;;  %v8948_v47 = vld [vmem:[%s12588_s4 + $0x158] sm:$0xff]  ;;  %v8955_v57 = vld [vmem:[%s12588_s4 + $0x140] sm:$0xff] }
 0x5f5   :  { %1754 = vmatpush1.msra.mxu0 %v13235_v1  ;;  %1825 = vmatpush1.msra.mxu1 %v13236_v14 }
 0x5f6   :  { %1755 = vmatprep.subr.mxu0 %v13237_v15  ;;  %1826 = vmatprep.subr.mxu1 %v13238_v16  ;;  %v322_v3 = vcombine.low %v181_v62, %v182_v63  ;;  %v329_v54 = vrot.slane %v321_v46, %v7966_v53  ;;  %v8960_v62 = vld [vmem:[%s12588_s4 + $0x150] sm:$0xff]  ;;  %v8967_v63 = vld [vmem:[%s12588_s4 + $0x128] sm:$0xff]  ;;  %v8972_v46 = vld [vmem:[%s12588_s4 + $0x138] sm:$0xff] }
 0x5f7   :  { %1756 = vmatpush1.msra.mxu0 %v13239_v17  ;;  %1827 = vmatpush1.msra.mxu1 %v13240_v18 }
 0x5f8   :  { %1757 = vmatprep.subr.mxu0 %v13241_v19  ;;  %1828 = vmatprep.subr.mxu1 %v13242_v20  ;;  %v336_v6 = vrot.slane %v322_v3, %v7966_v53  ;;  %v8823_v20 = vld [vmem:[%s12588_s4 + $0x1e8] sm:$0xff]  ;;  %v8979_v3 = vld [vmem:[%s12588_s4 + $0x120] sm:$0xff] }
 0x5f9   :  { %1758 = vmatpush1.msra.mxu0 %v13243_v21  ;;  %1829 = vmatpush1.msra.mxu1 %v13244_v22  ;;  %13264 = vst [vmem:[#allocation8_spill] sm:$0xff] %v8823_v20  ;;  %v8835_v21 = vld [vmem:[%s12588_s4 + $0x1e0] sm:$0xff]  ;;  %v8840_v22 = vld [vmem:[%s12588_s4 + $0x1f0] sm:$0xff] }
 0x5fa   :  { %1759 = vmatprep.subr.mxu0 %v13245_v23  ;;  %1830 = vmatprep.subr.mxu1 %v13246_v24  ;;  %v8811_v27 = vcombine.low %v329_v54, %v336_v6  ;;  %v8847_v23 = vld [vmem:[%s12588_s4 + $0x1c8] sm:$0xff]  ;;  %v8852_v24 = vld [vmem:[%s12588_s4 + $0x1d8] sm:$0xff]  ;;  %v9008_v54 = vld [vmem:[%s12588_s4 + $0x110] sm:$0xff] }
 0x5fb   :  { %1760 = vmatpush1.msra.mxu0 %v13247_v26  ;;  %1831 = vmatpush1.msra.mxu1 %v13248_v29  ;;  %v8859_v26 = vld [vmem:[%s12588_s4 + $0x1c0] sm:$0xff]  ;;  %v8864_v29 = vld [vmem:[%s12588_s4 + $0x1d0] sm:$0xff]  ;;  %v9013_v6 = vld [vmem:[%s12588_s4 + $0xe8] sm:$0xff] }
 0x5fc   :  { %1761 = vmatprep.subr.mxu0 %v13249_v31  ;;  %1832 = vmatprep.subr.mxu1 %v13250_v33  ;;  %13263 = vst [vmem:[#allocation6_spill] sm:$0xff] %v8811_v27  ;;  %v8871_v31 = vld [vmem:[%s12588_s4 + $0x1a8] sm:$0xff]  ;;  %v8876_v33 = vld [vmem:[%s12588_s4 + $0x1b8] sm:$0xff] }
 0x5fd   :  { %1762 = vmatpush1.msra.mxu0 %v13251_v35  ;;  %1833 = vmatpush1.msra.mxu1 %v13252_v36  ;;  %v8883_v35 = vld [vmem:[%s12588_s4 + $0x1a0] sm:$0xff]  ;;  %v8888_v36 = vld [vmem:[%s12588_s4 + $0x1b0] sm:$0xff] }
 0x5fe   :  { %1763 = vmatprep.subr.mxu0 %v13253_v38  ;;  %1834 = vmatprep.subr.mxu1 %v13254_v39  ;;  %v8895_v38 = vld [vmem:[%s12588_s4 + $0x188] sm:$0xff]  ;;  %v8900_v39 = vld [vmem:[%s12588_s4 + $0x198] sm:$0xff] }
 0x5ff   :  { %1764 = vmatpush1.msra.mxu0 %v13255_v40  ;;  %1797 = vmatprep.mubr.f32.mxu0 %v13256_v50  ;;  %v8907_v40 = vld [vmem:[%s12588_s4 + $0x180] sm:$0xff] }
 0x600   :  { %1835 = vmatpush1.msra.mxu1 %v13257_v42  ;;  %1868 = vmatprep.mubr.f32.mxu1 %v13256_v50  ;;  %v8912_v42 = vld [vmem:[%s12588_s4 + $0x190] sm:$0xff] }
 0x601   :  { %2084 = vmatprep.subr.mxu0 %v8823_v20 }
 0x6a0   :  { %v1614_v8 = vpop.f32.mrf.mxu0  ;;  %v1685_v30 = vpop.f32.mrf.mxu1 }
 0x6a2   :  { %v1616_v32 = vpop.f32.mrf.mxu0  ;;  %v1687_v5 = vpop.f32.mrf.mxu1 }
 0x6a3   :  { %v1694_v12 = vcombine.low %v1614_v8, %v1616_v32  ;;  %v1695_v48 = vcombine.low %v1685_v30, %v1687_v5  ;;  %v8984_v8 = vld [vmem:[%s12588_s4 + $0x130] sm:$0xff]  ;;  %v8991_v30 = vld [vmem:[%s12588_s4 + $0x108] sm:$0xff]  ;;  %v8996_v32 = vld [vmem:[%s12588_s4 + $0x118] sm:$0xff] }
 0x6a4   :  { %v9001_v5 = vld [vmem:[%s12588_s4 + $0x100] sm:$0xff] }
 0x6a5   :  { %v1702_v25 = vrot.slane %v1694_v12, %v7966_v53  ;;  %v1709_v7 = vrot.slane %v1695_v48, %v7966_v53  ;;  %v9018_v12 = vld [vmem:[%s12588_s4 + $0xf8] sm:$0xff]  ;;  %v9025_v48 = vld [vmem:[%s12588_s4 + $0xe0] sm:$0xff] }
 0x6a7   :  { %v1710_v28 = vcombine.low %v1702_v25, %v1709_v7  ;;  %v9030_v25 = vld [vmem:[%s12588_s4 + $0xf0] sm:$0xff]  ;;  %v9035_v7 = vld [vmem:[%s12588_s4 + $0xc8] sm:$0xff] }
 0x6a9   :  { %v1712_v11 = vadd.f32 %v1710_v28, %v8811_v27  ;;  %v9042_v28 = vld [vmem:[%s12588_s4 + $0xd8] sm:$0xff]  ;;  %v9124_v27 = vld [vmem:[%s12588_s4 + $0x70] sm:$0xff] }
 0x6aa   :  { %13276 = vst [vmem:[#allocation20_spill] sm:$0xff] %v9124_v27 }
 0x6ab   :  { %v1713_v9 = vmul.f32 0.5, %v1712_v11  ;;  %v1718_v4 = vrot.slane %v1712_v11, 6  ;;  %v9047_v11 = vld [vmem:[%s12588_s4 + $0xc0] sm:$0xff] }
 0x6ad   :  { %6989 = vtanh.f32 %v1713_v9  ;;  %v9052_v9 = vld [vmem:[%s12588_s4 + $0xd0] sm:$0xff] }
 0x6ae   :  { %6991 = vtanh.f32 %v1718_v4  ;;  %v9059_v4 = vld [vmem:[%s12588_s4 + $0xa8] sm:$0xff] }
 0x6ba   :  { %v6990_v60 = vpop.eup %6989 }
 0x6bb   :  { %v1715_v34 = vmul.f32 0.5, %v6990_v60  ;;  %v6992_v1 = vpop.eup %6991  ;;  %v9064_v60 = vld [vmem:[%s12588_s4 + $0xb8] sm:$0xff] }
 0x6bc   :  { %13266 = vst [vmem:[#allocation10_spill] sm:$0xff] %v9064_v60 }
 0x6bd   :  { %v1716_v2 = vadd.f32 0.5, %v1715_v34  ;;  %v9071_v34 = vld [vmem:[%s12588_s4 + $0xa0] sm:$0xff] }
 0x6be   :  { %13267 = vst [vmem:[#allocation11_spill] sm:$0xff] %v9071_v34 }
 0x6bf   :  { %v1722_v13 = vrot.slane %v1716_v2, 2  ;;  %v1725_v15 = vmul.f32 %v6992_v1, %v1716_v2  ;;  %v1728_v17 = vrot.slane %v1716_v2, 4  ;;  %v9076_v2 = vld [vmem:[%s12588_s4 + $0xb0] sm:$0xff]  ;;  %v9088_v1 = vld [vmem:[%s12588_s4 + $0x98] sm:$0xff] }
 0x6c0   :  { %13268 = vst [vmem:[#allocation12_spill] sm:$0xff] %v9076_v2  ;;  %13270 = vst [vmem:[#allocation14_spill] sm:$0xff] %v9088_v1 }
 0x6c1   :  { %v1724_v14 = vmul.f32 %v1722_v13, %v8732_v41  ;;  %v8828_v41 = vld [vmem:[%s12588_s4 + $0x1f8] sm:$0xff]  ;;  %v9083_v13 = vld [vmem:[%s12588_s4 + $0x88] sm:$0xff] }
 0x6c2   :  { %13265 = vst [vmem:[#allocation9_spill] sm:$0xff] %v8828_v41  ;;  %2155 = vmatprep.subr.mxu1 %v8828_v41  ;;  %13269 = vst [vmem:[#allocation13_spill] sm:$0xff] %v9083_v13 }
 0x6c3   :  { %v8815_v16 = vadd.f32 %v1725_v15, %v1724_v14  ;;  %v9095_v14 = vld [vmem:[%s12588_s4 + $0x80] sm:$0xff]  ;;  %v9100_v15 = vld [vmem:[%s12588_s4 + $0x90] sm:$0xff] }
 0x6c4   :  { %13271 = vst [vmem:[#allocation15_spill] sm:$0xff] %v9095_v14  ;;  %13272 = vst [vmem:[#allocation16_spill] sm:$0xff] %v9100_v15 }
 0x6c5   :  { %6993 = vtanh.f32 %v8815_v16 }
 0x6d2   :  { %v6994_v18 = vpop.eup %6993 }
 0x6d3   :  { %v1730_v19 = vmul.f32 %v6994_v18, %v1728_v17  ;;  %v9107_v17 = vld [vmem:[%s12588_s4 + $0x68] sm:$0xff]  ;;  %v9112_v18 = vld [vmem:[%s12588_s4 + $0x78] sm:$0xff] }
 0x6d4   :  { %13273 = vst [vmem:[#allocation17_spill] sm:$0xff] %v9107_v17  ;;  %13274 = vst [vmem:[#allocation18_spill] sm:$0xff] %v9112_v18 }
 0x6d5   :  { %1798 = vmatmul.mubr.f32.vlgmr.msra.gmra.mxu0 %v1730_v19  ;;  %1869 = vmatmul.mubr.f32.vlgmr.msra.gmra.mxu1 %v1730_v19  ;;  %v9119_v19 = vld [vmem:[%s12588_s4 + $0x60] sm:$0xff] }
 0x6d6   :  { %2148 = vmatprep.mubr.f32.mxu0 %v13256_v50  ;;  %2219 = vmatprep.mubr.f32.mxu1 %v13256_v50  ;;  %13275 = vst [vmem:[#allocation19_spill] sm:$0xff] %v9119_v19  ;;  %v9136_v50 = vld [vmem:[%s12588_s4 + $0x58] sm:$0xff] }
 0x6d7   :  { %2085 = vmatpush1.msra.mxu0 %v8835_v21  ;;  %2156 = vmatpush1.msra.mxu1 %v8840_v22  ;;  %13278 = vst [vmem:[#allocation22_spill] sm:$0xff] %v9136_v50 }
 0x6d8   :  { %2086 = vmatprep.subr.mxu0 %v8847_v23  ;;  %2157 = vmatprep.subr.mxu1 %v8852_v24 }
 0x6d9   :  { %2087 = vmatpush1.msra.mxu0 %v8859_v26  ;;  %2158 = vmatpush1.msra.mxu1 %v8864_v29 }
 0x6da   :  { %2088 = vmatprep.subr.mxu0 %v8871_v31  ;;  %2159 = vmatprep.subr.mxu1 %v8876_v33 }
 0x6db   :  { %2089 = vmatpush1.msra.mxu0 %v8883_v35  ;;  %2160 = vmatpush1.msra.mxu1 %v8888_v36 }
 0x6dc   :  { %2090 = vmatprep.subr.mxu0 %v8895_v38  ;;  %2161 = vmatprep.subr.mxu1 %v8900_v39 }
 0x6dd   :  { %2091 = vmatpush1.msra.mxu0 %v8907_v40  ;;  %2162 = vmatpush1.msra.mxu1 %v8912_v42 }
 0x6de   :  { %2092 = vmatprep.subr.mxu0 %v8919_v59  ;;  %2163 = vmatprep.subr.mxu1 %v8924_v49 }
 0x6df   :  { %2093 = vmatpush1.msra.mxu0 %v8931_v45  ;;  %2164 = vmatpush1.msra.mxu1 %v8936_v55 }
 0x6e0   :  { %2094 = vmatprep.subr.mxu0 %v8943_v44  ;;  %2165 = vmatprep.subr.mxu1 %v8948_v47 }
 0x6e1   :  { %2095 = vmatpush1.msra.mxu0 %v8955_v57  ;;  %2166 = vmatpush1.msra.mxu1 %v8960_v62 }
 0x6e2   :  { %2096 = vmatprep.subr.mxu0 %v8967_v63  ;;  %2167 = vmatprep.subr.mxu1 %v8972_v46 }
 0x6e3   :  { %2097 = vmatpush1.msra.mxu0 %v8979_v3  ;;  %2168 = vmatpush1.msra.mxu1 %v8984_v8 }
 0x6e4   :  { %2098 = vmatprep.subr.mxu0 %v8991_v30  ;;  %2169 = vmatprep.subr.mxu1 %v8996_v32 }
 0x6e5   :  { %2099 = vmatpush1.msra.mxu0 %v9001_v5  ;;  %2170 = vmatpush1.msra.mxu1 %v9008_v54 }
 0x6e6   :  { %2100 = vmatprep.subr.mxu0 %v9013_v6  ;;  %2171 = vmatprep.subr.mxu1 %v9018_v12 }
 0x6e7   :  { %2101 = vmatpush1.msra.mxu0 %v9025_v48  ;;  %2172 = vmatpush1.msra.mxu1 %v9030_v25 }
 0x6e8   :  { %2102 = vmatprep.subr.mxu0 %v9035_v7  ;;  %2173 = vmatprep.subr.mxu1 %v9042_v28 }
 0x6e9   :  { %2103 = vmatpush1.msra.mxu0 %v9047_v11  ;;  %2174 = vmatpush1.msra.mxu1 %v9052_v9 }
 0x6ea   :  { %2104 = vmatprep.subr.mxu0 %v9059_v4  ;;  %2175 = vmatprep.subr.mxu1 %v9064_v60 }
 0x6eb   :  { %2105 = vmatpush1.msra.mxu0 %v9071_v34  ;;  %2176 = vmatpush1.msra.mxu1 %v9076_v2 }
 0x6ec   :  { %2106 = vmatprep.subr.mxu0 %v9083_v13  ;;  %2177 = vmatprep.subr.mxu1 %v9088_v1 }
 0x6ed   :  { %2107 = vmatpush1.msra.mxu0 %v9095_v14  ;;  %2178 = vmatpush1.msra.mxu1 %v9100_v15  ;;  %v9143_v14 = vld [vmem:[%s12588_s4 + $0x40] sm:$0xff]  ;;  %v9148_v15 = vld [vmem:[%s12588_s4 + $0x50] sm:$0xff] }
 0x6ee   :  { %2108 = vmatprep.subr.mxu0 %v9107_v17  ;;  %2179 = vmatprep.subr.mxu1 %v9112_v18  ;;  %13279 = vst [vmem:[#allocation23_spill] sm:$0xff] %v9143_v14  ;;  %13280 = vst [vmem:[#allocation24_spill] sm:$0xff] %v9148_v15  ;;  %v9155_v17 = vld [vmem:[%s12588_s4 + $0x28] sm:$0xff]  ;;  %v9160_v18 = vld [vmem:[%s12588_s4 + $0x38] sm:$0xff] }
 0x6ef   :  { %2109 = vmatpush1.msra.mxu0 %v9119_v19  ;;  %2180 = vmatpush1.msra.mxu1 %v9124_v27  ;;  %13281 = vst [vmem:[#allocation25_spill] sm:$0xff] %v9155_v17  ;;  %13282 = vst [vmem:[#allocation26_spill] sm:$0xff] %v9160_v18  ;;  %v9167_v19 = vld [vmem:[%s12588_s4 + $0x20] sm:$0xff]  ;;  %v9172_v27 = vld [vmem:[%s12588_s4 + $0x30] sm:$0xff] }
 0x6f0   :  { %2110 = vmatprep.subr.mxu0 %v9131_v10  ;;  %2181 = vmatprep.subr.mxu1 %v9136_v50  ;;  %13283 = vst [vmem:[#allocation27_spill] sm:$0xff] %v9167_v19  ;;  %13284 = vst [vmem:[#allocation28_spill] sm:$0xff] %v9172_v27  ;;  %v9179_v10 = vld [vmem:[%s12588_s4 + $0x8] sm:$0xff]  ;;  %v9184_v50 = vld [vmem:[%s12588_s4 + $0x18] sm:$0xff] }
 0x6f1   :  { %2111 = vmatpush1.msra.mxu0 %v9143_v14  ;;  %2182 = vmatpush1.msra.mxu1 %v9148_v15  ;;  %13285 = vst [vmem:[#allocation37_spill] sm:$0xff] %v9179_v10  ;;  %13286 = vst [vmem:[#allocation40_spill] sm:$0xff] %v9184_v50  ;;  %v9191_v14 = vld [vmem:[%s12588_s4] sm:$0xff]  ;;  %v9196_v15 = vld [vmem:[%s12588_s4 + $0x10] sm:$0xff] }
 0x6f2   :  { %2112 = vmatprep.subr.mxu0 %v9155_v17  ;;  %2183 = vmatprep.subr.mxu1 %v9160_v18  ;;  %13287 = vst [vmem:[#allocation33_spill] sm:$0xff] %v9191_v14  ;;  %13288 = vst [vmem:[#allocation34_spill] sm:$0xff] %v9196_v15  ;;  %v13_v18 = vstv %s12594_s7 }
 0x6f3   :  { %2113 = vmatpush1.msra.mxu0 %v9167_v19  ;;  %2184 = vmatpush1.msra.mxu1 %v9172_v27  ;;  %14 = vst [vmem:[#allocation3] sm:$0x1] %v13_v18  ;;  %v78_v19 = vpop.permute.xlu1 %77 }
 0x6f4   :  { %2114 = vmatprep.subr.mxu0 %v9179_v10  ;;  %2185 = vmatprep.subr.mxu1 %v9184_v50  ;;  %v129_v27 = vmul.f32 %v13258_v52, %v78_v19  ;;  %v130_v10 = vmul.f32 %v13259_v56, %v78_v19  ;;  %v131_v50 = vmul.f32 %v13260_v58, %v78_v19 }
 0x6f5   :  { %2115 = vmatpush1.msra.mxu0 %v9191_v14  ;;  %2186 = vmatpush1.msra.mxu1 %v9196_v15  ;;  %v132_v14 = vmul.f32 %v13112_v0, %v78_v19  ;;  %v6937_v19 = vld [vmem:[%s12595_s6] ss:$0 sm:$0xff] }
 0x6f6   :  { %2268 = vmatprep.subr.mxu0 %v8823_v20  ;;  %2339 = vmatprep.subr.mxu1 %v8828_v41  ;;  %v183_v15 = vadd.f32 %v13175_v37, %v129_v27  ;;  %v184_v20 = vadd.f32 %v13261_v43, %v130_v10  ;;  %v185_v41 = vadd.f32 %v7953_v51, %v131_v50 }
 0x6f7   :  { %v186_v17 = vadd.f32 %v13262_v61, %v132_v14 }
 0x6f8   :  { %v338_v1 = vcombine.low %v183_v15, %v184_v20 }
 0x6f9   :  { %v339_v13 = vcombine.low %v185_v41, %v186_v17 }
 0x6fa   :  { %v346_v56 = vrot.slane %v338_v1, %v7966_v53 }
 0x6fb   :  { %v353_v58 = vrot.slane %v339_v13, %v7966_v53 }
 0x6fd   :  { %v9221_v43 = vcombine.low %v346_v56, %v353_v58  ;;  %v13290_v56 = vld [vmem:[#allocation10_spill] sm:$0xff]  ;;  %v13291_v58 = vld [vmem:[#allocation11_spill] sm:$0xff] }
 0x6ff   :  { %13289 = vst [vmem:[#allocation35_spill] sm:$0xff] %v9221_v43 }
 0x795   :  { %v1799_v18 = vpop.f32.mrf.mxu0  ;;  %v1870_v2 = vpop.f32.mrf.mxu1 }
 0x797   :  { %v1801_v34 = vpop.f32.mrf.mxu0  ;;  %v1872_v52 = vpop.f32.mrf.mxu1 }
 0x798   :  { %v1879_v60 = vcombine.low %v1799_v18, %v1801_v34  ;;  %v1880_v0 = vcombine.low %v1870_v2, %v1872_v52 }
 0x79a   :  { %v1887_v37 = vrot.slane %v1879_v60, %v7966_v53  ;;  %v1894_v10 = vrot.slane %v1880_v0, %v7966_v53  ;;  %v13292_v0 = vld [vmem:[#allocation12_spill] sm:$0xff] }
 0x79c   :  { %v1895_v51 = vcombine.low %v1887_v37, %v1894_v10  ;;  %v13293_v37 = vld [vmem:[#allocation13_spill] sm:$0xff]  ;;  %v13294_v10 = vld [vmem:[#allocation14_spill] sm:$0xff] }
 0x79e   :  { %v1897_v50 = vadd.f32 %v1895_v51, %v9221_v43  ;;  %v13295_v51 = vld [vmem:[#allocation15_spill] sm:$0xff]  ;;  %v13312_v43 = vmov 0.0  }
 0x7a0   :  { %v1898_v61 = vmul.f32 0.5, %v1897_v50  ;;  %v1903_v27 = vrot.slane %v1897_v50, 6  ;;  %v13296_v50 = vld [vmem:[#allocation16_spill] sm:$0xff] }
 0x7a2   :  { %6995 = vtanh.f32 %v1898_v61  ;;  %v13297_v61 = vld [vmem:[#allocation17_spill] sm:$0xff] }
 0x7a3   :  { %6997 = vtanh.f32 %v1903_v27  ;;  %v13298_v27 = vld [vmem:[#allocation18_spill] sm:$0xff] }
 0x7af   :  { %v6996_v20 = vpop.eup %6995 }
 0x7b0   :  { %v1900_v41 = vmul.f32 0.5, %v6996_v20  ;;  %v6998_v13 = vpop.eup %6997  ;;  %v13299_v20 = vld [vmem:[#allocation19_spill] sm:$0xff] }
 0x7b2   :  { %v1901_v1 = vadd.f32 0.5, %v1900_v41  ;;  %v13300_v41 = vld [vmem:[#allocation20_spill] sm:$0xff] }
 0x7b4   :  { %v1907_v14 = vrot.slane %v1901_v1, 2  ;;  %v1910_v2 = vmul.f32 %v6998_v13, %v1901_v1  ;;  %v1913_v15 = vrot.slane %v1901_v1, 4  ;;  %v13301_v1 = vld [vmem:[#allocation21_spill] sm:$0xff]  ;;  %v13303_v13 = vld [vmem:[#allocation23_spill] sm:$0xff] }
 0x7b6   :  { %v1909_v34 = vmul.f32 %v1907_v14, %v8815_v16  ;;  %v13302_v14 = vld [vmem:[#allocation22_spill] sm:$0xff] }
 0x7b8   :  { %v9225_v60 = vadd.f32 %v1910_v2, %v1909_v34  ;;  %v13304_v34 = vld [vmem:[#allocation24_spill] sm:$0xff]  ;;  %v13305_v2 = vld [vmem:[#allocation25_spill] sm:$0xff] }
 0x7ba   :  { %6999 = vtanh.f32 %v9225_v60 }
 0x7c7   :  { %v7000_v17 = vpop.eup %6999 }
 0x7c8   :  { %v1915_v18 = vmul.f32 %v7000_v17, %v1913_v15  ;;  %v13306_v15 = vld [vmem:[#allocation26_spill] sm:$0xff]  ;;  %v13307_v17 = vld [vmem:[#allocation27_spill] sm:$0xff] }
 0x7ca   :  { %2149 = vmatmul.mubr.f32.vlgmr.msra.gmra.mxu0 %v1915_v18  ;;  %2220 = vmatmul.mubr.f32.vlgmr.msra.gmra.mxu1 %v1915_v18  ;;  %v1923_v52 = vmul.f32 %v6937_v19, %v1915_v18  ;;  %v13308_v19 = vld [vmem:[#allocation28_spill] sm:$0xff]  ;;  %v13309_v18 = vld [vmem:[#allocation37_spill] sm:$0xff] }
 0x7cb   :  { %2269 = vmatpush1.msra.mxu0 %v8835_v21  ;;  %2340 = vmatpush1.msra.mxu1 %v8840_v22 }
 0x7cc   :  { %v1925_v16 = vsel %vm1924_vm0, %v1923_v52, 0.0  ;;  %2270 = vmatprep.subr.mxu0 %v8847_v23  ;;  %2341 = vmatprep.subr.mxu1 %v8852_v24  ;;  %v13310_v52 = vld [vmem:[#allocation40_spill] sm:$0xff] }
 0x7cd   :  { %1926 = vadd.xlane.f32.xlu0 %v1925_v16  ;;  %2271 = vmatpush1.msra.mxu0 %v8859_v26  ;;  %v13311_v16 = vld [vmem:[#allocation33_spill] sm:$0xff] }
 0x7ce   :  { %2342 = vmatpush1.msra.mxu1 %v8864_v29  ;;  %2272 = vmatprep.subr.mxu0 %v8871_v31 }
 0x7cf   :  { %2343 = vmatprep.subr.mxu1 %v8876_v33  ;;  %2273 = vmatpush1.msra.mxu0 %v8883_v35 }
 0x7d0   :  { %2344 = vmatpush1.msra.mxu1 %v8888_v36  ;;  %2274 = vmatprep.subr.mxu0 %v8895_v38 }
 0x7d1   :  { %2345 = vmatprep.subr.mxu1 %v8900_v39  ;;  %2275 = vmatpush1.msra.mxu0 %v8907_v40 }
 0x7d2   :  { %2346 = vmatpush1.msra.mxu1 %v8912_v42  ;;  %2276 = vmatprep.subr.mxu0 %v8919_v59 }
 0x7d3   :  { %2347 = vmatprep.subr.mxu1 %v8924_v49  ;;  %2277 = vmatpush1.msra.mxu0 %v8931_v45 }
 0x7d4   :  { %2348 = vmatpush1.msra.mxu1 %v8936_v55  ;;  %2278 = vmatprep.subr.mxu0 %v8943_v44 }
 0x7d5   :  { %2349 = vmatprep.subr.mxu1 %v8948_v47  ;;  %2279 = vmatpush1.msra.mxu0 %v8955_v57 }
 0x7d6   :  { %2350 = vmatpush1.msra.mxu1 %v8960_v62  ;;  %2280 = vmatprep.subr.mxu0 %v8967_v63 }
 0x7d7   :  { %2351 = vmatprep.subr.mxu1 %v8972_v46  ;;  %2281 = vmatpush1.msra.mxu0 %v8979_v3 }
 0x7d8   :  { %2352 = vmatpush1.msra.mxu1 %v8984_v8  ;;  %2282 = vmatprep.subr.mxu0 %v8991_v30 }
 0x7d9   :  { %2353 = vmatprep.subr.mxu1 %v8996_v32  ;;  %2283 = vmatpush1.msra.mxu0 %v9001_v5 }
 0x7da   :  { %2354 = vmatpush1.msra.mxu1 %v9008_v54  ;;  %2284 = vmatprep.subr.mxu0 %v9013_v6 }
 0x7db   :  { %2355 = vmatprep.subr.mxu1 %v9018_v12  ;;  %2285 = vmatpush1.msra.mxu0 %v9025_v48 }
 0x7dc   :  { %2356 = vmatpush1.msra.mxu1 %v9030_v25  ;;  %2286 = vmatprep.subr.mxu0 %v9035_v7 }
 0x7dd   :  { %2357 = vmatprep.subr.mxu1 %v9042_v28  ;;  %2287 = vmatpush1.msra.mxu0 %v9047_v11 }
 0x7de   :  { %2358 = vmatpush1.msra.mxu1 %v9052_v9  ;;  %2288 = vmatprep.subr.mxu0 %v9059_v4 }
 0x7df   :  { %2359 = vmatprep.subr.mxu1 %v13290_v56  ;;  %2289 = vmatpush1.msra.mxu0 %v13291_v58 }
 0x7e0   :  { %2360 = vmatpush1.msra.mxu1 %v13292_v0  ;;  %2290 = vmatprep.subr.mxu0 %v13293_v37 }
 0x7e1   :  { %2361 = vmatprep.subr.mxu1 %v13294_v10  ;;  %2291 = vmatpush1.msra.mxu0 %v13295_v51 }
 0x7e2   :  { %2362 = vmatpush1.msra.mxu1 %v13296_v50  ;;  %2292 = vmatprep.subr.mxu0 %v13297_v61 }
 0x7e3   :  { %2363 = vmatprep.subr.mxu1 %v13298_v27  ;;  %2293 = vmatpush1.msra.mxu0 %v13299_v20 }
 0x7e4   :  { %2364 = vmatpush1.msra.mxu1 %v13300_v41  ;;  %2294 = vmatprep.subr.mxu0 %v13301_v1  ;;  %v13316_v41 = vld [vmem:[#allocation36_spill] sm:$0xff] }
 0x7e5   :  { %2365 = vmatprep.subr.mxu1 %v13302_v14  ;;  %2295 = vmatpush1.msra.mxu0 %v13303_v13  ;;  %v13313_v14 = vld [vmem:[#allocation34_spill] sm:$0xff] }
 0x7e6   :  { %2366 = vmatpush1.msra.mxu1 %v13304_v34  ;;  %2296 = vmatprep.subr.mxu0 %v13305_v2  ;;  %v13314_v34 = vld [vmem:[#allocation8_spill] sm:$0xff]  ;;  %v13315_v2 = vld [vmem:[#allocation9_spill] sm:$0xff] }
 0x7e7   :  { %2367 = vmatprep.subr.mxu1 %v13306_v15  ;;  %2297 = vmatpush1.msra.mxu0 %v13307_v17  ;;  %v6938_v15 = vld [vmem:[#allocation3] ss:$0 sm:$0xff] }
 0x7e8   :  { %2368 = vmatpush1.msra.mxu1 %v13308_v19  ;;  %2298 = vmatprep.subr.mxu0 %v13309_v18 }
 0x7e9   :  { %2369 = vmatprep.subr.mxu1 %v13310_v52  ;;  %2299 = vmatpush1.msra.mxu0 %v13311_v16 }
 0x7ea   :  { %2332 = vmatprep.mubr.f32.mxu0 %v13312_v43  ;;  %2370 = vmatpush1.msra.mxu1 %v13313_v14 }
 0x7eb   :  { %2403 = vmatprep.mubr.f32.mxu1 %v13312_v43  ;;  %2452 = vmatprep.subr.mxu0 %v13314_v34 }
 0x7ec   :  { %2523 = vmatprep.subr.mxu1 %v13315_v2 }
 0x856   :  { %v1927_v17 = vpop.xlane.xlu0 %1926 }
 0x857   :  { %v1935_v19 = vadd.f32 %v6938_v15, %v1927_v17 }
 0x859   :  { %1937 = vst.msk [vmem:[%s12596_s8] sm:$0x3] %vm1936_vm1, %v1935_v19  ;;  %1941 = vperm.xlu1 %6952, %v1935_v19  }
 0x88a   :  { %v2150_v16 = vpop.f32.mrf.mxu0  ;;  %v2221_v52 = vpop.f32.mrf.mxu1 }
 0x88c   :  { %v2152_v18 = vpop.f32.mrf.mxu0  ;;  %v2223_v14 = vpop.f32.mrf.mxu1 }
 0x88d   :  { %v2230_v13 = vcombine.low %v2150_v16, %v2152_v18  ;;  %v2231_v43 = vcombine.low %v2221_v52, %v2223_v14  ;;  %v13327_v52 = vld [vmem:[#allocation24_spill] sm:$0xff]  ;;  %v13328_v16 = vld [vmem:[#allocation25_spill] sm:$0xff] }
 0x88f   :  { %v2238_v34 = vrot.slane %v2230_v13, %v7966_v53  ;;  %v2245_v2 = vrot.slane %v2231_v43, %v7966_v53 }
 0x891   :  { %v2246_v1 = vcombine.low %v2238_v34, %v2245_v2  ;;  %v13326_v2 = vld [vmem:[#allocation23_spill] sm:$0xff] }
 0x893   :  { %v2248_v20 = vadd.f32 %v2246_v1, %v13316_v41  ;;  %v13324_v41 = vld [vmem:[#allocation21_spill] sm:$0xff]  ;;  %v13325_v1 = vld [vmem:[#allocation22_spill] sm:$0xff] }
 0x895   :  { %v2249_v15 = vmul.f32 0.5, %v2248_v20  ;;  %v2254_v17 = vrot.slane %v2248_v20, 6  ;;  %v13323_v20 = vld [vmem:[#allocation20_spill] sm:$0xff] }
 0x897   :  { %7001 = vtanh.f32 %v2249_v15  ;;  %v13329_v15 = vld [vmem:[#allocation26_spill] sm:$0xff] }
 0x898   :  { %7003 = vtanh.f32 %v2254_v17  ;;  %v13330_v17 = vld [vmem:[#allocation27_spill] sm:$0xff] }
 0x8a4   :  { %v7002_v27 = vpop.eup %7001 }
 0x8a5   :  { %v2251_v61 = vmul.f32 0.5, %v7002_v27  ;;  %v7004_v51 = vpop.eup %7003  ;;  %v13322_v27 = vld [vmem:[#allocation19_spill] sm:$0xff] }
 0x8a7   :  { %v2252_v19 = vadd.f32 0.5, %v2251_v61  ;;  %v13321_v61 = vld [vmem:[#allocation18_spill] sm:$0xff] }
 0x8a9   :  { %v2258_v50 = vrot.slane %v2252_v19, 2  ;;  %v2261_v18 = vmul.f32 %v7004_v51, %v2252_v19  ;;  %v2264_v43 = vrot.slane %v2252_v19, 4  ;;  %v13319_v51 = vld [vmem:[#allocation16_spill] sm:$0xff] }
 0x8aa   :  { %v13331_v19 = vld [vmem:[#allocation28_spill] sm:$0xff] }
 0x8ab   :  { %v2260_v10 = vmul.f32 %v2258_v50, %v9225_v60  ;;  %v13317_v60 = vld [vmem:[#allocation14_spill] sm:$0xff]  ;;  %v13320_v50 = vld [vmem:[#allocation17_spill] sm:$0xff] }
 0x8ad   :  { %v9306_v14 = vadd.f32 %v2261_v18, %v2260_v10  ;;  %v13318_v10 = vld [vmem:[#allocation15_spill] sm:$0xff]  ;;  %v13332_v18 = vld [vmem:[#allocation37_spill] sm:$0xff] }
 0x8af   :  { %7005 = vtanh.f32 %v9306_v14 }
 0x8bc   :  { %v7006_v13 = vpop.eup %7005 }
 0x8bd   :  { %v2266_v34 = vmul.f32 %v7006_v13, %v2264_v43  ;;  %v13333_v43 = vld [vmem:[#allocation40_spill] sm:$0xff]  ;;  %v13334_v13 = vld [vmem:[#allocation33_spill] sm:$0xff] }
 0x8bf   :  { %2333 = vmatmul.mubr.f32.vlgmr.msra.gmra.mxu0 %v2266_v34  ;;  %2404 = vmatmul.mubr.f32.vlgmr.msra.gmra.mxu1 %v2266_v34  ;;  %v13335_v34 = vmov 0.0  }
 0x8c0   :  { %2453 = vmatpush1.msra.mxu0 %v8835_v21  ;;  %2524 = vmatpush1.msra.mxu1 %v8840_v22 }
 0x8c1   :  { %2454 = vmatprep.subr.mxu0 %v8847_v23  ;;  %2525 = vmatprep.subr.mxu1 %v8852_v24 }
 0x8c2   :  { %2455 = vmatpush1.msra.mxu0 %v8859_v26  ;;  %2526 = vmatpush1.msra.mxu1 %v8864_v29 }
 0x8c3   :  { %2456 = vmatprep.subr.mxu0 %v8871_v31  ;;  %2527 = vmatprep.subr.mxu1 %v8876_v33 }
 0x8c4   :  { %2457 = vmatpush1.msra.mxu0 %v8883_v35  ;;  %2528 = vmatpush1.msra.mxu1 %v8888_v36 }
 0x8c5   :  { %2458 = vmatprep.subr.mxu0 %v8895_v38  ;;  %2529 = vmatprep.subr.mxu1 %v8900_v39 }
 0x8c6   :  { %2459 = vmatpush1.msra.mxu0 %v8907_v40  ;;  %2530 = vmatpush1.msra.mxu1 %v8912_v42 }
 0x8c7   :  { %2460 = vmatprep.subr.mxu0 %v8919_v59  ;;  %2531 = vmatprep.subr.mxu1 %v8924_v49 }
 0x8c8   :  { %2461 = vmatpush1.msra.mxu0 %v8931_v45  ;;  %2532 = vmatpush1.msra.mxu1 %v8936_v55 }
 0x8c9   :  { %2462 = vmatprep.subr.mxu0 %v8943_v44  ;;  %2533 = vmatprep.subr.mxu1 %v8948_v47 }
 0x8ca   :  { %2463 = vmatpush1.msra.mxu0 %v8955_v57  ;;  %2534 = vmatpush1.msra.mxu1 %v8960_v62 }
 0x8cb   :  { %2464 = vmatprep.subr.mxu0 %v8967_v63  ;;  %2535 = vmatprep.subr.mxu1 %v8972_v46 }
 0x8cc   :  { %2465 = vmatpush1.msra.mxu0 %v8979_v3  ;;  %2536 = vmatpush1.msra.mxu1 %v8984_v8 }
 0x8cd   :  { %2466 = vmatprep.subr.mxu0 %v8991_v30  ;;  %2537 = vmatprep.subr.mxu1 %v8996_v32 }
 0x8ce   :  { %2467 = vmatpush1.msra.mxu0 %v9001_v5  ;;  %2538 = vmatpush1.msra.mxu1 %v9008_v54 }
 0x8cf   :  { %2468 = vmatprep.subr.mxu0 %v9013_v6  ;;  %2539 = vmatprep.subr.mxu1 %v9018_v12 }
 0x8d0   :  { %2469 = vmatpush1.msra.mxu0 %v9025_v48  ;;  %2540 = vmatpush1.msra.mxu1 %v9030_v25 }
 0x8d1   :  { %2470 = vmatprep.subr.mxu0 %v9035_v7  ;;  %2541 = vmatprep.subr.mxu1 %v9042_v28 }
 0x8d2   :  { %2471 = vmatpush1.msra.mxu0 %v9047_v11  ;;  %2542 = vmatpush1.msra.mxu1 %v9052_v9 }
 0x8d3   :  { %2472 = vmatprep.subr.mxu0 %v9059_v4  ;;  %2543 = vmatprep.subr.mxu1 %v13290_v56 }
 0x8d4   :  { %2473 = vmatpush1.msra.mxu0 %v13291_v58  ;;  %2544 = vmatpush1.msra.mxu1 %v13292_v0 }
 0x8d5   :  { %2474 = vmatprep.subr.mxu0 %v13293_v37  ;;  %2545 = vmatprep.subr.mxu1 %v13317_v60 }
 0x8d6   :  { %2475 = vmatpush1.msra.mxu0 %v13318_v10  ;;  %2546 = vmatpush1.msra.mxu1 %v13319_v51 }
 0x8d7   :  { %2476 = vmatprep.subr.mxu0 %v13320_v50  ;;  %2547 = vmatprep.subr.mxu1 %v13321_v61 }
 0x8d8   :  { %2477 = vmatpush1.msra.mxu0 %v13322_v27  ;;  %2548 = vmatpush1.msra.mxu1 %v13323_v20  ;;  %v13339_v27 = vld [vmem:[#allocation4_spill] sm:$0xff] }
 0x8d9   :  { %2478 = vmatprep.subr.mxu0 %v13324_v41  ;;  %2549 = vmatprep.subr.mxu1 %v13325_v1  ;;  %v13336_v1 = vld [vmem:[#allocation34_spill] sm:$0xff] }
 0x8da   :  { %2479 = vmatpush1.msra.mxu0 %v13326_v2  ;;  %2550 = vmatpush1.msra.mxu1 %v13327_v52  ;;  %v13337_v52 = vld [vmem:[#allocation8_spill] sm:$0xff] }
 0x8db   :  { %2480 = vmatprep.subr.mxu0 %v13328_v16  ;;  %2551 = vmatprep.subr.mxu1 %v13329_v15  ;;  %v13338_v16 = vld [vmem:[#allocation9_spill] sm:$0xff] }
 0x8dc   :  { %2481 = vmatpush1.msra.mxu0 %v13330_v17  ;;  %2552 = vmatpush1.msra.mxu1 %v13331_v19 }
 0x8dd   :  { %2482 = vmatprep.subr.mxu0 %v13332_v18  ;;  %2553 = vmatprep.subr.mxu1 %v13333_v43 }
 0x8de   :  { %2483 = vmatpush1.msra.mxu0 %v13334_v13  ;;  %2516 = vmatprep.mubr.f32.mxu0 %v13335_v34 }
 0x8df   :  { %2554 = vmatpush1.msra.mxu1 %v13336_v1  ;;  %2587 = vmatprep.mubr.f32.mxu1 %v13335_v34 }
 0x8e0   :  { %2636 = vmatprep.subr.mxu0 %v13337_v52  ;;  %2707 = vmatprep.subr.mxu1 %v13338_v16 }
 0x97f   :  { %v2334_v15 = vpop.f32.mrf.mxu0  ;;  %v2405_v17 = vpop.f32.mrf.mxu1 }
 0x981   :  { %v2336_v2 = vpop.f32.mrf.mxu0  ;;  %v2407_v19 = vpop.f32.mrf.mxu1 }
 0x982   :  { %v2414_v41 = vcombine.low %v2334_v15, %v2336_v2  ;;  %v2415_v18 = vcombine.low %v2405_v17, %v2407_v19 }
 0x984   :  { %v2422_v43 = vrot.slane %v2414_v41, %v7966_v53  ;;  %v2429_v13 = vrot.slane %v2415_v18, %v7966_v53  ;;  %v13350_v18 = vld [vmem:[#allocation24_spill] sm:$0xff] }
 0x986   :  { %v2430_v20 = vcombine.low %v2422_v43, %v2429_v13  ;;  %v13351_v43 = vld [vmem:[#allocation25_spill] sm:$0xff]  ;;  %v13352_v13 = vld [vmem:[#allocation26_spill] sm:$0xff] }
 0x988   :  { %v2432_v61 = vadd.f32 %v2430_v20, %v13339_v27  ;;  %v13346_v20 = vld [vmem:[#allocation20_spill] sm:$0xff]  ;;  %v13358_v27 = vmov 0.0  }
 0x98a   :  { %v2433_v1 = vmul.f32 0.5, %v2432_v61  ;;  %v2438_v34 = vrot.slane %v2432_v61, 6  ;;  %v13345_v61 = vld [vmem:[#allocation19_spill] sm:$0xff] }
 0x98c   :  { %7007 = vtanh.f32 %v2433_v1  ;;  %v13347_v1 = vld [vmem:[#allocation21_spill] sm:$0xff] }
 0x98d   :  { %7009 = vtanh.f32 %v2438_v34  ;;  %v13353_v34 = vld [vmem:[#allocation27_spill] sm:$0xff] }
 0x999   :  { %v7008_v52 = vpop.eup %7007 }
 0x99a   :  { %v2435_v50 = vmul.f32 0.5, %v7008_v52  ;;  %v7010_v10 = vpop.eup %7009  ;;  %v13348_v52 = vld [vmem:[#allocation22_spill] sm:$0xff] }
 0x99c   :  { %v2436_v16 = vadd.f32 0.5, %v2435_v50  ;;  %v13344_v50 = vld [vmem:[#allocation18_spill] sm:$0xff] }
 0x99e   :  { %v2442_v51 = vrot.slane %v2436_v16, 2  ;;  %v2445_v2 = vmul.f32 %v7010_v10, %v2436_v16  ;;  %v2448_v41 = vrot.slane %v2436_v16, 4  ;;  %v13342_v10 = vld [vmem:[#allocation16_spill] sm:$0xff]  ;;  %v13349_v16 = vld [vmem:[#allocation23_spill] sm:$0xff] }
 0x9a0   :  { %v2444_v60 = vmul.f32 %v2442_v51, %v9306_v14  ;;  %v13340_v14 = vld [vmem:[#allocation14_spill] sm:$0xff]  ;;  %v13343_v51 = vld [vmem:[#allocation17_spill] sm:$0xff] }
 0x9a2   :  { %v9379_v15 = vadd.f32 %v2445_v2, %v2444_v60  ;;  %v13341_v60 = vld [vmem:[#allocation15_spill] sm:$0xff]  ;;  %v13354_v2 = vld [vmem:[#allocation28_spill] sm:$0xff] }
 0x9a4   :  { %7011 = vtanh.f32 %v9379_v15 }
 0x9b1   :  { %v7012_v17 = vpop.eup %7011 }
 0x9b2   :  { %v2450_v19 = vmul.f32 %v7012_v17, %v2448_v41  ;;  %v13355_v41 = vld [vmem:[#allocation37_spill] sm:$0xff]  ;;  %v13356_v17 = vld [vmem:[#allocation40_spill] sm:$0xff] }
 0x9b4   :  { %2517 = vmatmul.mubr.f32.vlgmr.msra.gmra.mxu0 %v2450_v19  ;;  %2588 = vmatmul.mubr.f32.vlgmr.msra.gmra.mxu1 %v2450_v19  ;;  %v13357_v19 = vld [vmem:[#allocation33_spill] sm:$0xff] }
 0x9b5   :  { %2637 = vmatpush1.msra.mxu0 %v8835_v21  ;;  %2708 = vmatpush1.msra.mxu1 %v8840_v22 }
 0x9b6   :  { %2638 = vmatprep.subr.mxu0 %v8847_v23  ;;  %2709 = vmatprep.subr.mxu1 %v8852_v24 }
 0x9b7   :  { %2639 = vmatpush1.msra.mxu0 %v8859_v26  ;;  %2710 = vmatpush1.msra.mxu1 %v8864_v29 }
 0x9b8   :  { %2640 = vmatprep.subr.mxu0 %v8871_v31  ;;  %2711 = vmatprep.subr.mxu1 %v8876_v33 }
 0x9b9   :  { %2641 = vmatpush1.msra.mxu0 %v8883_v35  ;;  %2712 = vmatpush1.msra.mxu1 %v8888_v36 }
 0x9ba   :  { %2642 = vmatprep.subr.mxu0 %v8895_v38  ;;  %2713 = vmatprep.subr.mxu1 %v8900_v39 }
 0x9bb   :  { %2643 = vmatpush1.msra.mxu0 %v8907_v40  ;;  %2714 = vmatpush1.msra.mxu1 %v8912_v42 }
 0x9bc   :  { %2644 = vmatprep.subr.mxu0 %v8919_v59  ;;  %2715 = vmatprep.subr.mxu1 %v8924_v49 }
 0x9bd   :  { %2645 = vmatpush1.msra.mxu0 %v8931_v45  ;;  %2716 = vmatpush1.msra.mxu1 %v8936_v55 }
 0x9be   :  { %2646 = vmatprep.subr.mxu0 %v8943_v44  ;;  %2717 = vmatprep.subr.mxu1 %v8948_v47 }
 0x9bf   :  { %2647 = vmatpush1.msra.mxu0 %v8955_v57  ;;  %2718 = vmatpush1.msra.mxu1 %v8960_v62 }
 0x9c0   :  { %2648 = vmatprep.subr.mxu0 %v8967_v63  ;;  %2719 = vmatprep.subr.mxu1 %v8972_v46 }
 0x9c1   :  { %2649 = vmatpush1.msra.mxu0 %v8979_v3  ;;  %2720 = vmatpush1.msra.mxu1 %v8984_v8 }
 0x9c2   :  { %2650 = vmatprep.subr.mxu0 %v8991_v30  ;;  %2721 = vmatprep.subr.mxu1 %v8996_v32 }
 0x9c3   :  { %2651 = vmatpush1.msra.mxu0 %v9001_v5  ;;  %2722 = vmatpush1.msra.mxu1 %v9008_v54 }
 0x9c4   :  { %2652 = vmatprep.subr.mxu0 %v9013_v6  ;;  %2723 = vmatprep.subr.mxu1 %v9018_v12 }
 0x9c5   :  { %2653 = vmatpush1.msra.mxu0 %v9025_v48  ;;  %2724 = vmatpush1.msra.mxu1 %v9030_v25 }
 0x9c6   :  { %2654 = vmatprep.subr.mxu0 %v9035_v7  ;;  %2725 = vmatprep.subr.mxu1 %v9042_v28 }
 0x9c7   :  { %2655 = vmatpush1.msra.mxu0 %v9047_v11  ;;  %2726 = vmatpush1.msra.mxu1 %v9052_v9 }
 0x9c8   :  { %2656 = vmatprep.subr.mxu0 %v9059_v4  ;;  %2727 = vmatprep.subr.mxu1 %v13290_v56 }
 0x9c9   :  { %2657 = vmatpush1.msra.mxu0 %v13291_v58  ;;  %2728 = vmatpush1.msra.mxu1 %v13292_v0 }
 0x9ca   :  { %2658 = vmatprep.subr.mxu0 %v13293_v37  ;;  %2729 = vmatprep.subr.mxu1 %v13340_v14 }
 0x9cb   :  { %2659 = vmatpush1.msra.mxu0 %v13341_v60  ;;  %2730 = vmatpush1.msra.mxu1 %v13342_v10 }
 0x9cc   :  { %2660 = vmatprep.subr.mxu0 %v13343_v51  ;;  %2731 = vmatprep.subr.mxu1 %v13344_v50 }
 0x9cd   :  { %2661 = vmatpush1.msra.mxu0 %v13345_v61  ;;  %2732 = vmatpush1.msra.mxu1 %v13346_v20  ;;  %v13362_v61 = vld [vmem:[#allocation7_spill] sm:$0xff] }
 0x9ce   :  { %2662 = vmatprep.subr.mxu0 %v13347_v1  ;;  %2733 = vmatprep.subr.mxu1 %v13348_v52  ;;  %v13359_v52 = vld [vmem:[#allocation34_spill] sm:$0xff] }
 0x9cf   :  { %2663 = vmatpush1.msra.mxu0 %v13349_v16  ;;  %2734 = vmatpush1.msra.mxu1 %v13350_v18  ;;  %v13360_v18 = vld [vmem:[#allocation8_spill] sm:$0xff] }
 0x9d0   :  { %2664 = vmatprep.subr.mxu0 %v13351_v43  ;;  %2735 = vmatprep.subr.mxu1 %v13352_v13  ;;  %v13361_v43 = vld [vmem:[#allocation9_spill] sm:$0xff] }
 0x9d1   :  { %2665 = vmatpush1.msra.mxu0 %v13353_v34  ;;  %2736 = vmatpush1.msra.mxu1 %v13354_v2 }
 0x9d2   :  { %2666 = vmatprep.subr.mxu0 %v13355_v41  ;;  %2737 = vmatprep.subr.mxu1 %v13356_v17 }
 0x9d3   :  { %2667 = vmatpush1.msra.mxu0 %v13357_v19  ;;  %2700 = vmatprep.mubr.f32.mxu0 %v13358_v27 }
 0x9d4   :  { %2738 = vmatpush1.msra.mxu1 %v13359_v52  ;;  %2771 = vmatprep.mubr.f32.mxu1 %v13358_v27 }
 0x9d5   :  { %2820 = vmatprep.subr.mxu0 %v13360_v18  ;;  %2891 = vmatprep.subr.mxu1 %v13361_v43 }
 0xa74   :  { %v2518_v13 = vpop.f32.mrf.mxu0  ;;  %v2589_v34 = vpop.f32.mrf.mxu1 }
 0xa76   :  { %v2520_v16 = vpop.f32.mrf.mxu0  ;;  %v2591_v2 = vpop.f32.mrf.mxu1 }
 0xa77   :  { %v2598_v1 = vcombine.low %v2518_v13, %v2520_v16  ;;  %v2599_v41 = vcombine.low %v2589_v34, %v2591_v2 }
 0xa79   :  { %v2606_v17 = vrot.slane %v2598_v1, %v7966_v53  ;;  %v2613_v19 = vrot.slane %v2599_v41, %v7966_v53  ;;  %v9577_v41 = vld [vmem:[%s12588_s4 + $0x1a8] sm:$0xff] }
 0xa7b   :  { %v2614_v20 = vcombine.low %v2606_v17, %v2613_v19  ;;  %v9583_v17 = vld [vmem:[%s12588_s4 + $0x1b8] sm:$0xff]  ;;  %v9589_v19 = vld [vmem:[%s12588_s4 + $0x1a0] sm:$0xff] }
 0xa7d   :  { %v2616_v50 = vadd.f32 %v2614_v20, %v13362_v61  ;;  %v9565_v20 = vld [vmem:[%s12588_s4 + $0x1c0] sm:$0xff]  ;;  %v9841_v61 = vld [vmem:[%s12588_s4 + $0x48] sm:$0xff] }
 0xa7f   :  { %v2617_v52 = vmul.f32 0.5, %v2616_v50  ;;  %v2622_v27 = vrot.slane %v2616_v50, 6  ;;  %v9559_v50 = vld [vmem:[%s12588_s4 + $0x1d8] sm:$0xff] }
 0xa81   :  { %7013 = vtanh.f32 %v2617_v52  ;;  %v9571_v52 = vld [vmem:[%s12588_s4 + $0x1d0] sm:$0xff] }
 0xa82   :  { %7015 = vtanh.f32 %v2622_v27 }
 0xa8e   :  { %v7014_v18 = vpop.eup %7013 }
 0xa8f   :  { %v2619_v51 = vmul.f32 0.5, %v7014_v18  ;;  %v7016_v60 = vpop.eup %7015  ;;  %v9595_v18 = vld [vmem:[%s12588_s4 + $0x1b0] sm:$0xff] }
 0xa91   :  { %v2620_v43 = vadd.f32 0.5, %v2619_v51  ;;  %v9553_v51 = vld [vmem:[%s12588_s4 + $0x1c8] sm:$0xff] }
 0xa93   :  { %v2626_v10 = vrot.slane %v2620_v43, 2  ;;  %v2629_v16 = vmul.f32 %v7016_v60, %v2620_v43  ;;  %v2632_v1 = vrot.slane %v2620_v43, 4  ;;  %v9541_v60 = vld [vmem:[%s12588_s4 + $0x1e0] sm:$0xff]  ;;  %v9601_v43 = vld [vmem:[%s12588_s4 + $0x188] sm:$0xff] }
 0xa95   :  { %v2628_v14 = vmul.f32 %v2626_v10, %v9379_v15  ;;  %v9547_v10 = vld [vmem:[%s12588_s4 + $0x1f0] sm:$0xff] }
 0xa97   :  { %v9452_v13 = vadd.f32 %v2629_v16, %v2628_v14  ;;  %v9607_v16 = vld [vmem:[%s12588_s4 + $0x198] sm:$0xff] }
 0xa99   :  { %7017 = vtanh.f32 %v9452_v13 }
 0xaa6   :  { %v7018_v34 = vpop.eup %7017 }
 0xaa7   :  { %v2634_v2 = vmul.f32 %v7018_v34, %v2632_v1  ;;  %v9619_v1 = vld [vmem:[%s12588_s4 + $0x190] sm:$0xff]  ;;  %v9625_v34 = vld [vmem:[%s12588_s4 + $0x168] sm:$0xff] }
 0xaa9   :  { %2701 = vmatmul.mubr.f32.vlgmr.msra.gmra.mxu0 %v2634_v2  ;;  %2772 = vmatmul.mubr.f32.vlgmr.msra.gmra.mxu1 %v2634_v2  ;;  %v9631_v2 = vld [vmem:[%s12588_s4 + $0x178] sm:$0xff] }
 0xaaa   :  { %2821 = vmatpush1.msra.mxu0 %v8835_v21  ;;  %2892 = vmatpush1.msra.mxu1 %v8840_v22  ;;  %v13363_v21 = vld [vmem:[#allocation14_spill] sm:$0xff]  ;;  %v13364_v22 = vld [vmem:[#allocation15_spill] sm:$0xff] }
 0xaab   :  { %2822 = vmatprep.subr.mxu0 %v8847_v23  ;;  %2893 = vmatprep.subr.mxu1 %v8852_v24  ;;  %v13365_v23 = vld [vmem:[#allocation16_spill] sm:$0xff]  ;;  %v13366_v24 = vld [vmem:[#allocation17_spill] sm:$0xff]  ;;  %13393 = vst [vmem:[#allocation14_spill] sm:$0xff] %v9841_v61 }
 0xaac   :  { %2823 = vmatpush1.msra.mxu0 %v8859_v26  ;;  %2894 = vmatpush1.msra.mxu1 %v8864_v29  ;;  %v13367_v26 = vld [vmem:[#allocation18_spill] sm:$0xff]  ;;  %v13368_v29 = vld [vmem:[#allocation19_spill] sm:$0xff] }
 0xaad   :  { %2824 = vmatprep.subr.mxu0 %v8871_v31  ;;  %2895 = vmatprep.subr.mxu1 %v8876_v33  ;;  %v13369_v31 = vld [vmem:[#allocation20_spill] sm:$0xff]  ;;  %v13370_v33 = vld [vmem:[#allocation21_spill] sm:$0xff] }
 0xaae   :  { %2825 = vmatpush1.msra.mxu0 %v8883_v35  ;;  %2896 = vmatpush1.msra.mxu1 %v8888_v36  ;;  %v13371_v35 = vld [vmem:[#allocation22_spill] sm:$0xff]  ;;  %v13372_v36 = vld [vmem:[#allocation23_spill] sm:$0xff] }
 0xaaf   :  { %2826 = vmatprep.subr.mxu0 %v8895_v38  ;;  %2897 = vmatprep.subr.mxu1 %v8900_v39  ;;  %v13373_v38 = vld [vmem:[#allocation24_spill] sm:$0xff]  ;;  %v13374_v39 = vld [vmem:[#allocation25_spill] sm:$0xff] }
 0xab0   :  { %2827 = vmatpush1.msra.mxu0 %v8907_v40  ;;  %2898 = vmatpush1.msra.mxu1 %v8912_v42  ;;  %v13375_v40 = vld [vmem:[#allocation26_spill] sm:$0xff]  ;;  %v13376_v42 = vld [vmem:[#allocation27_spill] sm:$0xff] }
 0xab1   :  { %2828 = vmatprep.subr.mxu0 %v8919_v59  ;;  %2899 = vmatprep.subr.mxu1 %v8924_v49  ;;  %v13377_v59 = vld [vmem:[#allocation28_spill] sm:$0xff]  ;;  %v13378_v49 = vld [vmem:[#allocation37_spill] sm:$0xff] }
 0xab2   :  { %2829 = vmatpush1.msra.mxu0 %v8931_v45  ;;  %2900 = vmatpush1.msra.mxu1 %v8936_v55  ;;  %v13379_v45 = vld [vmem:[#allocation40_spill] sm:$0xff]  ;;  %v13380_v55 = vld [vmem:[#allocation33_spill] sm:$0xff] }
 0xab3   :  { %2830 = vmatprep.subr.mxu0 %v8943_v44  ;;  %2901 = vmatprep.subr.mxu1 %v8948_v47  ;;  %v13381_v44 = vmov 0.0   ;;  %v13382_v47 = vld [vmem:[#allocation34_spill] sm:$0xff] }
 0xab4   :  { %2831 = vmatpush1.msra.mxu0 %v8955_v57  ;;  %2902 = vmatpush1.msra.mxu1 %v8960_v62  ;;  %v9522_v57 = vld [vmem:[%s12588_s4 + $0x1e8] sm:$0xff]  ;;  %v9528_v62 = vld [vmem:[%s12588_s4 + $0x1f8] sm:$0xff] }
 0xab5   :  { %2832 = vmatprep.subr.mxu0 %v8967_v63  ;;  %2903 = vmatprep.subr.mxu1 %v8972_v46  ;;  %13383 = vst [vmem:[#allocation38_spill] sm:$0xff] %v9522_v57  ;;  %13384 = vst [vmem:[#allocation39_spill] sm:$0xff] %v9528_v62 }
 0xab6   :  { %2833 = vmatpush1.msra.mxu0 %v8979_v3  ;;  %2904 = vmatpush1.msra.mxu1 %v8984_v8 }
 0xab7   :  { %2834 = vmatprep.subr.mxu0 %v8991_v30  ;;  %2905 = vmatprep.subr.mxu1 %v8996_v32 }
 0xab8   :  { %2835 = vmatpush1.msra.mxu0 %v9001_v5  ;;  %2906 = vmatpush1.msra.mxu1 %v9008_v54 }
 0xab9   :  { %2836 = vmatprep.subr.mxu0 %v9013_v6  ;;  %2907 = vmatprep.subr.mxu1 %v9018_v12  ;;  %v13385_v12 = vld [vmem:[#allocation41_spill] sm:$0xff] }
 0xaba   :  { %2837 = vmatpush1.msra.mxu0 %v9025_v48  ;;  %2908 = vmatpush1.msra.mxu1 %v9030_v25 }
 0xabb   :  { %2838 = vmatprep.subr.mxu0 %v9035_v7  ;;  %2909 = vmatprep.subr.mxu1 %v9042_v28 }
 0xabc   :  { %2839 = vmatpush1.msra.mxu0 %v9047_v11  ;;  %2910 = vmatpush1.msra.mxu1 %v9052_v9 }
 0xabd   :  { %2840 = vmatprep.subr.mxu0 %v9059_v4  ;;  %2911 = vmatprep.subr.mxu1 %v13290_v56 }
 0xabe   :  { %2841 = vmatpush1.msra.mxu0 %v13291_v58  ;;  %2912 = vmatpush1.msra.mxu1 %v13292_v0 }
 0xabf   :  { %2842 = vmatprep.subr.mxu0 %v13293_v37  ;;  %2913 = vmatprep.subr.mxu1 %v13363_v21  ;;  %v9637_v21 = vld [vmem:[%s12588_s4 + $0x160] sm:$0xff] }
 0xac0   :  { %2843 = vmatpush1.msra.mxu0 %v13364_v22  ;;  %2914 = vmatpush1.msra.mxu1 %v13365_v23  ;;  %v9643_v22 = vld [vmem:[%s12588_s4 + $0x170] sm:$0xff]  ;;  %v9649_v23 = vld [vmem:[%s12588_s4 + $0x148] sm:$0xff] }
 0xac1   :  { %2844 = vmatprep.subr.mxu0 %v13366_v24  ;;  %2915 = vmatprep.subr.mxu1 %v13367_v26  ;;  %v9655_v24 = vld [vmem:[%s12588_s4 + $0x158] sm:$0xff]  ;;  %v9661_v26 = vld [vmem:[%s12588_s4 + $0x140] sm:$0xff] }
 0xac2   :  { %2845 = vmatpush1.msra.mxu0 %v13368_v29  ;;  %2916 = vmatpush1.msra.mxu1 %v13369_v31  ;;  %v9667_v29 = vld [vmem:[%s12588_s4 + $0x150] sm:$0xff]  ;;  %v9673_v31 = vld [vmem:[%s12588_s4 + $0x128] sm:$0xff] }
 0xac3   :  { %2846 = vmatprep.subr.mxu0 %v13370_v33  ;;  %2917 = vmatprep.subr.mxu1 %v13371_v35  ;;  %v9679_v33 = vld [vmem:[%s12588_s4 + $0x138] sm:$0xff]  ;;  %v9685_v35 = vld [vmem:[%s12588_s4 + $0x120] sm:$0xff] }
 0xac4   :  { %2847 = vmatpush1.msra.mxu0 %v13372_v36  ;;  %2918 = vmatpush1.msra.mxu1 %v13373_v38  ;;  %v9691_v36 = vld [vmem:[%s12588_s4 + $0x130] sm:$0xff]  ;;  %v9697_v38 = vld [vmem:[%s12588_s4 + $0x108] sm:$0xff] }
 0xac5   :  { %2848 = vmatprep.subr.mxu0 %v13374_v39  ;;  %2919 = vmatprep.subr.mxu1 %v13375_v40 }
 0xac6   :  { %2849 = vmatpush1.msra.mxu0 %v13376_v42  ;;  %2920 = vmatpush1.msra.mxu1 %v13377_v59 }
 0xac7   :  { %2850 = vmatprep.subr.mxu0 %v13378_v49  ;;  %2921 = vmatprep.subr.mxu1 %v13379_v45 }
 0xac8   :  { %2851 = vmatpush1.msra.mxu0 %v13380_v55  ;;  %2884 = vmatprep.mubr.f32.mxu0 %v13381_v44 }
 0xac9   :  { %2922 = vmatpush1.msra.mxu1 %v13382_v47  ;;  %2955 = vmatprep.mubr.f32.mxu1 %v13381_v44 }
 0xaca   :  { %3004 = vmatprep.subr.mxu0 %v9522_v57  ;;  %3075 = vmatprep.subr.mxu1 %v9528_v62 }
 0xb69   :  { %v2702_v63 = vpop.f32.mrf.mxu0  ;;  %v2773_v46 = vpop.f32.mrf.mxu1 }
 0xb6b   :  { %v2704_v3 = vpop.f32.mrf.mxu0  ;;  %v2775_v8 = vpop.f32.mrf.mxu1 }
 0xb6c   :  { %v2782_v30 = vcombine.low %v2702_v63, %v2704_v3  ;;  %v2783_v32 = vcombine.low %v2773_v46, %v2775_v8  ;;  %v9703_v63 = vld [vmem:[%s12588_s4 + $0x118] sm:$0xff]  ;;  %v9709_v46 = vld [vmem:[%s12588_s4 + $0x100] sm:$0xff]  ;;  %v9715_v3 = vld [vmem:[%s12588_s4 + $0x110] sm:$0xff] }
 0xb6d   :  { %v9721_v8 = vld [vmem:[%s12588_s4 + $0xe8] sm:$0xff] }
 0xb6e   :  { %v2790_v5 = vrot.slane %v2782_v30, %v7966_v53  ;;  %v2797_v54 = vrot.slane %v2783_v32, %v7966_v53  ;;  %v9727_v30 = vld [vmem:[%s12588_s4 + $0xf8] sm:$0xff]  ;;  %v9733_v32 = vld [vmem:[%s12588_s4 + $0xe0] sm:$0xff] }
 0xb70   :  { %v2798_v6 = vcombine.low %v2790_v5, %v2797_v54  ;;  %v9739_v5 = vld [vmem:[%s12588_s4 + $0xf0] sm:$0xff]  ;;  %v9745_v54 = vld [vmem:[%s12588_s4 + $0xc8] sm:$0xff] }
 0xb72   :  { %v2800_v48 = vadd.f32 %v2798_v6, %v13385_v12  ;;  %v9751_v6 = vld [vmem:[%s12588_s4 + $0xd8] sm:$0xff]  ;;  %v9835_v12 = vld [vmem:[%s12588_s4 + $0x70] sm:$0xff] }
 0xb73   :  { %13392 = vst [vmem:[#allocation9_spill] sm:$0xff] %v9835_v12 }
 0xb74   :  { %v2801_v25 = vmul.f32 0.5, %v2800_v48  ;;  %v2806_v7 = vrot.slane %v2800_v48, 6  ;;  %v9757_v48 = vld [vmem:[%s12588_s4 + $0xc0] sm:$0xff] }
 0xb76   :  { %7019 = vtanh.f32 %v2801_v25  ;;  %v9763_v25 = vld [vmem:[%s12588_s4 + $0xd0] sm:$0xff] }
 0xb77   :  { %7021 = vtanh.f32 %v2806_v7  ;;  %v9769_v7 = vld [vmem:[%s12588_s4 + $0xa8] sm:$0xff] }
 0xb83   :  { %v7020_v28 = vpop.eup %7019 }
 0xb84   :  { %v2803_v11 = vmul.f32 0.5, %v7020_v28  ;;  %v7022_v56 = vpop.eup %7021  ;;  %v9775_v28 = vld [vmem:[%s12588_s4 + $0xb8] sm:$0xff] }
 0xb86   :  { %v2804_v9 = vadd.f32 0.5, %v2803_v11  ;;  %v9781_v11 = vld [vmem:[%s12588_s4 + $0xa0] sm:$0xff] }
 0xb88   :  { %v2810_v4 = vrot.slane %v2804_v9, 2  ;;  %v2813_v0 = vmul.f32 %v7022_v56, %v2804_v9  ;;  %v2816_v27 = vrot.slane %v2804_v9, 4  ;;  %v9787_v9 = vld [vmem:[%s12588_s4 + $0xb0] sm:$0xff]  ;;  %v9799_v56 = vld [vmem:[%s12588_s4 + $0x98] sm:$0xff] }
 0xb89   :  { %13386 = vst [vmem:[#allocation10_spill] sm:$0xff] %v9799_v56 }
 0xb8a   :  { %v2812_v58 = vmul.f32 %v2810_v4, %v9452_v13  ;;  %v9613_v13 = vld [vmem:[%s12588_s4 + $0x180] sm:$0xff]  ;;  %v9793_v4 = vld [vmem:[%s12588_s4 + $0x88] sm:$0xff] }
 0xb8c   :  { %v9535_v37 = vadd.f32 %v2813_v0, %v2812_v58  ;;  %v9805_v58 = vld [vmem:[%s12588_s4 + $0x80] sm:$0xff]  ;;  %v9811_v0 = vld [vmem:[%s12588_s4 + $0x90] sm:$0xff] }
 0xb8d   :  { %13387 = vst [vmem:[#allocation11_spill] sm:$0xff] %v9805_v58  ;;  %13388 = vst [vmem:[#allocation12_spill] sm:$0xff] %v9811_v0 }
 0xb8e   :  { %7023 = vtanh.f32 %v9535_v37 }
 0xb9b   :  { %v7024_v15 = vpop.eup %7023 }
 0xb9c   :  { %v2818_v14 = vmul.f32 %v7024_v15, %v2816_v27  ;;  %v9817_v27 = vld [vmem:[%s12588_s4 + $0x68] sm:$0xff]  ;;  %v9823_v15 = vld [vmem:[%s12588_s4 + $0x78] sm:$0xff] }
 0xb9d   :  { %13389 = vst [vmem:[#allocation13_spill] sm:$0xff] %v9817_v27  ;;  %13390 = vst [vmem:[#allocation36_spill] sm:$0xff] %v9823_v15 }
 0xb9e   :  { %2885 = vmatmul.mubr.f32.vlgmr.msra.gmra.mxu0 %v2818_v14  ;;  %2956 = vmatmul.mubr.f32.vlgmr.msra.gmra.mxu1 %v2818_v14  ;;  %v9829_v14 = vld [vmem:[%s12588_s4 + $0x60] sm:$0xff] }
 0xb9f   :  { %3005 = vmatpush1.msra.mxu0 %v9541_v60  ;;  %3076 = vmatpush1.msra.mxu1 %v9547_v10  ;;  %13391 = vst [vmem:[#allocation8_spill] sm:$0xff] %v9829_v14 }
 0xba0   :  { %3006 = vmatprep.subr.mxu0 %v9553_v51  ;;  %3077 = vmatprep.subr.mxu1 %v9559_v50 }
 0xba1   :  { %3007 = vmatpush1.msra.mxu0 %v9565_v20  ;;  %3078 = vmatpush1.msra.mxu1 %v9571_v52 }
 0xba2   :  { %3008 = vmatprep.subr.mxu0 %v9577_v41  ;;  %3079 = vmatprep.subr.mxu1 %v9583_v17 }
 0xba3   :  { %3009 = vmatpush1.msra.mxu0 %v9589_v19  ;;  %3080 = vmatpush1.msra.mxu1 %v9595_v18 }
 0xba4   :  { %3010 = vmatprep.subr.mxu0 %v9601_v43  ;;  %3081 = vmatprep.subr.mxu1 %v9607_v16 }
 0xba5   :  { %3011 = vmatpush1.msra.mxu0 %v9613_v13  ;;  %3082 = vmatpush1.msra.mxu1 %v9619_v1 }
 0xba6   :  { %3012 = vmatprep.subr.mxu0 %v9625_v34  ;;  %3083 = vmatprep.subr.mxu1 %v9631_v2 }
 0xba7   :  { %3013 = vmatpush1.msra.mxu0 %v9637_v21  ;;  %3084 = vmatpush1.msra.mxu1 %v9643_v22 }
 0xba8   :  { %3014 = vmatprep.subr.mxu0 %v9649_v23  ;;  %3085 = vmatprep.subr.mxu1 %v9655_v24 }
 0xba9   :  { %3015 = vmatpush1.msra.mxu0 %v9661_v26  ;;  %3086 = vmatpush1.msra.mxu1 %v9667_v29 }
 0xbaa   :  { %3016 = vmatprep.subr.mxu0 %v9673_v31  ;;  %3087 = vmatprep.subr.mxu1 %v9679_v33 }
 0xbab   :  { %3017 = vmatpush1.msra.mxu0 %v9685_v35  ;;  %3088 = vmatpush1.msra.mxu1 %v9691_v36 }
 0xbac   :  { %3018 = vmatprep.subr.mxu0 %v9697_v38  ;;  %3089 = vmatprep.subr.mxu1 %v9703_v63 }
 0xbad   :  { %3019 = vmatpush1.msra.mxu0 %v9709_v46  ;;  %3090 = vmatpush1.msra.mxu1 %v9715_v3 }
 0xbae   :  { %3020 = vmatprep.subr.mxu0 %v9721_v8  ;;  %3091 = vmatprep.subr.mxu1 %v9727_v30 }
 0xbaf   :  { %3021 = vmatpush1.msra.mxu0 %v9733_v32  ;;  %3092 = vmatpush1.msra.mxu1 %v9739_v5 }
 0xbb0   :  { %3022 = vmatprep.subr.mxu0 %v9745_v54  ;;  %3093 = vmatprep.subr.mxu1 %v9751_v6 }
 0xbb1   :  { %3023 = vmatpush1.msra.mxu0 %v9757_v48  ;;  %3094 = vmatpush1.msra.mxu1 %v9763_v25 }
 0xbb2   :  { %3024 = vmatprep.subr.mxu0 %v9769_v7  ;;  %3095 = vmatprep.subr.mxu1 %v9775_v28 }
 0xbb3   :  { %3025 = vmatpush1.msra.mxu0 %v9781_v11  ;;  %3096 = vmatpush1.msra.mxu1 %v9787_v9 }
 0xbb4   :  { %3026 = vmatprep.subr.mxu0 %v9793_v4  ;;  %3097 = vmatprep.subr.mxu1 %v9799_v56 }
 0xbb5   :  { %3027 = vmatpush1.msra.mxu0 %v9805_v58  ;;  %3098 = vmatpush1.msra.mxu1 %v9811_v0 }
 0xbb6   :  { %3028 = vmatprep.subr.mxu0 %v9817_v27  ;;  %3099 = vmatprep.subr.mxu1 %v9823_v15  ;;  %v9847_v15 = vld [vmem:[%s12588_s4 + $0x58] sm:$0xff] }
 0xbb7   :  { %3029 = vmatpush1.msra.mxu0 %v9829_v14  ;;  %3100 = vmatpush1.msra.mxu1 %v9835_v12  ;;  %13394 = vst [vmem:[#allocation15_spill] sm:$0xff] %v9847_v15  ;;  %v9853_v14 = vld [vmem:[%s12588_s4 + $0x40] sm:$0xff]  ;;  %v9859_v12 = vld [vmem:[%s12588_s4 + $0x50] sm:$0xff] }
 0xbb8   :  { %3030 = vmatprep.subr.mxu0 %v9841_v61  ;;  %3101 = vmatprep.subr.mxu1 %v9847_v15  ;;  %13395 = vst [vmem:[#allocation16_spill] sm:$0xff] %v9853_v14  ;;  %13396 = vst [vmem:[#allocation17_spill] sm:$0xff] %v9859_v12  ;;  %v13397_v15 = vld [vmem:[#allocation5_spill] sm:$0xff] }
 0xbb9   :  { %3031 = vmatpush1.msra.mxu0 %v9853_v14  ;;  %3102 = vmatpush1.msra.mxu1 %v9859_v12 }
 0xbba   :  { %3032 = vmatprep.subr.mxu0 %v13374_v39  ;;  %3103 = vmatprep.subr.mxu1 %v13375_v40 }
 0xbbb   :  { %3033 = vmatpush1.msra.mxu0 %v13376_v42  ;;  %3104 = vmatpush1.msra.mxu1 %v13377_v59 }
 0xbbc   :  { %3034 = vmatprep.subr.mxu0 %v13378_v49  ;;  %3105 = vmatprep.subr.mxu1 %v13379_v45 }
 0xbbd   :  { %3035 = vmatpush1.msra.mxu0 %v13380_v55  ;;  %3068 = vmatprep.mubr.f32.mxu0 %v13381_v44 }
 0xbbe   :  { %3106 = vmatpush1.msra.mxu1 %v13382_v47  ;;  %3139 = vmatprep.mubr.f32.mxu1 %v13381_v44 }
 0xbbf   :  { %3188 = vmatprep.subr.mxu0 %v9522_v57  ;;  %3259 = vmatprep.subr.mxu1 %v9528_v62 }
 0xc5e   :  { %v2886_v39 = vpop.f32.mrf.mxu0  ;;  %v2957_v40 = vpop.f32.mrf.mxu1 }
 0xc60   :  { %v2888_v42 = vpop.f32.mrf.mxu0  ;;  %v2959_v59 = vpop.f32.mrf.mxu1 }
 0xc61   :  { %v2966_v12 = vcombine.low %v2886_v39, %v2888_v42  ;;  %v2967_v49 = vcombine.low %v2957_v40, %v2959_v59 }
 0xc63   :  { %v2974_v45 = vrot.slane %v2966_v12, %v7966_v53  ;;  %v2981_v55 = vrot.slane %v2967_v49, %v7966_v53  ;;  %v13408_v49 = vld [vmem:[#allocation17_spill] sm:$0xff] }
 0xc65   :  { %v2982_v14 = vcombine.low %v2974_v45, %v2981_v55  ;;  %v9938_v45 = vld [vmem:[%s12588_s4 + $0x28] sm:$0xff]  ;;  %v9944_v55 = vld [vmem:[%s12588_s4 + $0x38] sm:$0xff] }
 0xc66   :  { %13409 = vst [vmem:[#allocation18_spill] sm:$0xff] %v9938_v45  ;;  %13410 = vst [vmem:[#allocation19_spill] sm:$0xff] %v9944_v55 }
 0xc67   :  { %v2984_v61 = vadd.f32 %v2982_v14, %v13397_v15  ;;  %v13407_v14 = vld [vmem:[#allocation16_spill] sm:$0xff]  ;;  %v13416_v15 = vmov 0.0  }
 0xc69   :  { %v2985_v47 = vmul.f32 0.5, %v2984_v61  ;;  %v2990_v44 = vrot.slane %v2984_v61, 6  ;;  %v13398_v61 = vld [vmem:[#allocation10_spill] sm:$0xff] }
 0xc6b   :  { %7025 = vtanh.f32 %v2985_v47  ;;  %v9950_v47 = vld [vmem:[%s12588_s4 + $0x20] sm:$0xff] }
 0xc6c   :  { %7027 = vtanh.f32 %v2990_v44  ;;  %v13399_v44 = vld [vmem:[#allocation11_spill] sm:$0xff]  ;;  %13411 = vst [vmem:[#allocation20_spill] sm:$0xff] %v9950_v47 }
 0xc78   :  { %v7026_v57 = vpop.eup %7025 }
 0xc79   :  { %v2987_v27 = vmul.f32 0.5, %v7026_v57  ;;  %v7028_v58 = vpop.eup %7027  ;;  %v13400_v57 = vld [vmem:[#allocation12_spill] sm:$0xff] }
 0xc7b   :  { %v2988_v62 = vadd.f32 0.5, %v2987_v27  ;;  %v13406_v27 = vld [vmem:[#allocation15_spill] sm:$0xff] }
 0xc7d   :  { %v2994_v0 = vrot.slane %v2988_v62, 2  ;;  %v2997_v39 = vmul.f32 %v7028_v58, %v2988_v62  ;;  %v3000_v12 = vrot.slane %v2988_v62, 4  ;;  %v13401_v62 = vld [vmem:[#allocation13_spill] sm:$0xff] }
 0xc7e   :  { %v13404_v58 = vld [vmem:[#allocation9_spill] sm:$0xff] }
 0xc7f   :  { %v2996_v56 = vmul.f32 %v2994_v0, %v9535_v37  ;;  %v13402_v37 = vld [vmem:[#allocation36_spill] sm:$0xff]  ;;  %v13405_v0 = vld [vmem:[#allocation14_spill] sm:$0xff] }
 0xc81   :  { %v9878_v40 = vadd.f32 %v2997_v39, %v2996_v56  ;;  %v13403_v56 = vld [vmem:[#allocation8_spill] sm:$0xff]  ;;  %v9956_v39 = vld [vmem:[%s12588_s4 + $0x30] sm:$0xff] }
 0xc82   :  { %13412 = vst [vmem:[#allocation21_spill] sm:$0xff] %v9956_v39 }
 0xc83   :  { %7029 = vtanh.f32 %v9878_v40 }
 0xc90   :  { %v7030_v42 = vpop.eup %7029 }
 0xc91   :  { %v3002_v59 = vmul.f32 %v7030_v42, %v3000_v12  ;;  %v9962_v12 = vld [vmem:[%s12588_s4 + $0x8] sm:$0xff]  ;;  %v9968_v42 = vld [vmem:[%s12588_s4 + $0x18] sm:$0xff] }
 0xc92   :  { %13413 = vst [vmem:[#allocation22_spill] sm:$0xff] %v9962_v12  ;;  %13414 = vst [vmem:[#allocation23_spill] sm:$0xff] %v9968_v42 }
 0xc93   :  { %3069 = vmatmul.mubr.f32.vlgmr.msra.gmra.mxu0 %v3002_v59  ;;  %3140 = vmatmul.mubr.f32.vlgmr.msra.gmra.mxu1 %v3002_v59  ;;  %v9974_v59 = vld [vmem:[%s12588_s4] sm:$0xff] }
 0xc94   :  { %3189 = vmatpush1.msra.mxu0 %v9541_v60  ;;  %3260 = vmatpush1.msra.mxu1 %v9547_v10  ;;  %13415 = vst [vmem:[#allocation24_spill] sm:$0xff] %v9974_v59 }
 0xc95   :  { %3190 = vmatprep.subr.mxu0 %v9553_v51  ;;  %3261 = vmatprep.subr.mxu1 %v9559_v50 }
 0xc96   :  { %3191 = vmatpush1.msra.mxu0 %v9565_v20  ;;  %3262 = vmatpush1.msra.mxu1 %v9571_v52 }
 0xc97   :  { %3192 = vmatprep.subr.mxu0 %v9577_v41  ;;  %3263 = vmatprep.subr.mxu1 %v9583_v17 }
 0xc98   :  { %3193 = vmatpush1.msra.mxu0 %v9589_v19  ;;  %3264 = vmatpush1.msra.mxu1 %v9595_v18 }
 0xc99   :  { %3194 = vmatprep.subr.mxu0 %v9601_v43  ;;  %3265 = vmatprep.subr.mxu1 %v9607_v16 }
 0xc9a   :  { %3195 = vmatpush1.msra.mxu0 %v9613_v13  ;;  %3266 = vmatpush1.msra.mxu1 %v9619_v1 }
 0xc9b   :  { %3196 = vmatprep.subr.mxu0 %v9625_v34  ;;  %3267 = vmatprep.subr.mxu1 %v9631_v2 }
 0xc9c   :  { %3197 = vmatpush1.msra.mxu0 %v9637_v21  ;;  %3268 = vmatpush1.msra.mxu1 %v9643_v22 }
 0xc9d   :  { %3198 = vmatprep.subr.mxu0 %v9649_v23  ;;  %3269 = vmatprep.subr.mxu1 %v9655_v24 }
 0xc9e   :  { %3199 = vmatpush1.msra.mxu0 %v9661_v26  ;;  %3270 = vmatpush1.msra.mxu1 %v9667_v29 }
 0xc9f   :  { %3200 = vmatprep.subr.mxu0 %v9673_v31  ;;  %3271 = vmatprep.subr.mxu1 %v9679_v33 }
 0xca0   :  { %3201 = vmatpush1.msra.mxu0 %v9685_v35  ;;  %3272 = vmatpush1.msra.mxu1 %v9691_v36 }
 0xca1   :  { %3202 = vmatprep.subr.mxu0 %v9697_v38  ;;  %3273 = vmatprep.subr.mxu1 %v9703_v63 }
 0xca2   :  { %3203 = vmatpush1.msra.mxu0 %v9709_v46  ;;  %3274 = vmatpush1.msra.mxu1 %v9715_v3 }
 0xca3   :  { %3204 = vmatprep.subr.mxu0 %v9721_v8  ;;  %3275 = vmatprep.subr.mxu1 %v9727_v30 }
 0xca4   :  { %3205 = vmatpush1.msra.mxu0 %v9733_v32  ;;  %3276 = vmatpush1.msra.mxu1 %v9739_v5 }
 0xca5   :  { %3206 = vmatprep.subr.mxu0 %v9745_v54  ;;  %3277 = vmatprep.subr.mxu1 %v9751_v6 }
 0xca6   :  { %3207 = vmatpush1.msra.mxu0 %v9757_v48  ;;  %3278 = vmatpush1.msra.mxu1 %v9763_v25 }
 0xca7   :  { %3208 = vmatprep.subr.mxu0 %v9769_v7  ;;  %3279 = vmatprep.subr.mxu1 %v9775_v28 }
 0xca8   :  { %3209 = vmatpush1.msra.mxu0 %v9781_v11  ;;  %3280 = vmatpush1.msra.mxu1 %v9787_v9 }
 0xca9   :  { %3210 = vmatprep.subr.mxu0 %v9793_v4  ;;  %3281 = vmatprep.subr.mxu1 %v13398_v61 }
 0xcaa   :  { %3211 = vmatpush1.msra.mxu0 %v13399_v44  ;;  %3282 = vmatpush1.msra.mxu1 %v13400_v57 }
 0xcab   :  { %3212 = vmatprep.subr.mxu0 %v13401_v62  ;;  %3283 = vmatprep.subr.mxu1 %v13402_v37 }
 0xcac   :  { %3213 = vmatpush1.msra.mxu0 %v13403_v56  ;;  %3284 = vmatpush1.msra.mxu1 %v13404_v58  ;;  %v13420_v56 = vld [vmem:[#allocation6_spill] sm:$0xff] }
 0xcad   :  { %3214 = vmatprep.subr.mxu0 %v13405_v0  ;;  %3285 = vmatprep.subr.mxu1 %v13406_v27 }
 0xcae   :  { %3215 = vmatpush1.msra.mxu0 %v13407_v14  ;;  %3286 = vmatpush1.msra.mxu1 %v13408_v49 }
 0xcaf   :  { %3216 = vmatprep.subr.mxu0 %v9938_v45  ;;  %3287 = vmatprep.subr.mxu1 %v9944_v55 }
 0xcb0   :  { %3217 = vmatpush1.msra.mxu0 %v9950_v47  ;;  %3288 = vmatpush1.msra.mxu1 %v9956_v39  ;;  %v13418_v39 = vld [vmem:[#allocation38_spill] sm:$0xff] }
 0xcb1   :  { %3218 = vmatprep.subr.mxu0 %v9962_v12  ;;  %3289 = vmatprep.subr.mxu1 %v9968_v42  ;;  %v9981_v12 = vld [vmem:[%s12588_s4 + $0x10] sm:$0xff]  ;;  %v13419_v42 = vld [vmem:[#allocation39_spill] sm:$0xff] }
 0xcb2   :  { %3219 = vmatpush1.msra.mxu0 %v9974_v59  ;;  %3252 = vmatprep.mubr.f32.mxu0 %v13416_v15  ;;  %13417 = vst [vmem:[#allocation25_spill] sm:$0xff] %v9981_v12 }
 0xcb3   :  { %3290 = vmatpush1.msra.mxu1 %v9981_v12  ;;  %3323 = vmatprep.mubr.f32.mxu1 %v13416_v15 }
 0xcb4   :  { %3372 = vmatprep.subr.mxu0 %v13418_v39  ;;  %3443 = vmatprep.subr.mxu1 %v13419_v42 }
 0xd53   :  { %v3070_v47 = vpop.f32.mrf.mxu0  ;;  %v3141_v55 = vpop.f32.mrf.mxu1 }
 0xd55   :  { %v3072_v45 = vpop.f32.mrf.mxu0  ;;  %v3143_v49 = vpop.f32.mrf.mxu1 }
 0xd56   :  { %v3150_v59 = vcombine.low %v3070_v47, %v3072_v45  ;;  %v3151_v14 = vcombine.low %v3141_v55, %v3143_v49  ;;  %v10111_v55 = vld [vmem:[%s12588_s4 + $0x1d0] sm:$0xff]  ;;  %v10118_v47 = vld [vmem:[%s12588_s4 + $0x1a8] sm:$0xff] }
 0xd58   :  { %v3158_v27 = vrot.slane %v3150_v59, %v7966_v53  ;;  %v3165_v0 = vrot.slane %v3151_v14, %v7966_v53  ;;  %v10130_v59 = vld [vmem:[%s12588_s4 + $0x1a0] sm:$0xff] }
 0xd5a   :  { %v3166_v58 = vcombine.low %v3158_v27, %v3165_v0 }
 0xd5c   :  { %v3168_v37 = vadd.f32 %v3166_v58, %v13420_v56  ;;  %v10106_v58 = vld [vmem:[%s12588_s4 + $0x1c0] sm:$0xff]  ;;  %v10426_v56 = vld [vmem:[%s12588_s4 + $0x8] sm:$0xff] }
 0xd5e   :  { %v3169_v12 = vmul.f32 0.5, %v3168_v37  ;;  %v3174_v15 = vrot.slane %v3168_v37, 6  ;;  %v10099_v37 = vld [vmem:[%s12588_s4 + $0x1d8] sm:$0xff] }
 0xd60   :  { %7031 = vtanh.f32 %v3169_v12  ;;  %v10123_v12 = vld [vmem:[%s12588_s4 + $0x1b8] sm:$0xff] }
 0xd61   :  { %7033 = vtanh.f32 %v3174_v15 }
 0xd6d   :  { %v7032_v39 = vpop.eup %7031 }
 0xd6e   :  { %v3171_v62 = vmul.f32 0.5, %v7032_v39  ;;  %v7034_v44 = vpop.eup %7033  ;;  %v10135_v39 = vld [vmem:[%s12588_s4 + $0x1b0] sm:$0xff] }
 0xd70   :  { %v3172_v42 = vadd.f32 0.5, %v3171_v62  ;;  %v10094_v62 = vld [vmem:[%s12588_s4 + $0x1c8] sm:$0xff] }
 0xd72   :  { %v3178_v57 = vrot.slane %v3172_v42, 2  ;;  %v3181_v45 = vmul.f32 %v7034_v44, %v3172_v42  ;;  %v3184_v14 = vrot.slane %v3172_v42, 4  ;;  %v10082_v44 = vld [vmem:[%s12588_s4 + $0x1e0] sm:$0xff]  ;;  %v10142_v42 = vld [vmem:[%s12588_s4 + $0x188] sm:$0xff] }
 0xd74   :  { %v3180_v61 = vmul.f32 %v3178_v57, %v9878_v40  ;;  %v10070_v40 = vld [vmem:[%s12588_s4 + $0x1e8] sm:$0xff]  ;;  %v10087_v57 = vld [vmem:[%s12588_s4 + $0x1f0] sm:$0xff] }
 0xd75   :  { %13442 = vst [vmem:[#allocation26_spill] sm:$0xff] %v10070_v40 }
 0xd76   :  { %v9991_v49 = vadd.f32 %v3181_v45, %v3180_v61  ;;  %v10075_v61 = vld [vmem:[%s12588_s4 + $0x1f8] sm:$0xff] }
 0xd77   :  { %13443 = vst [vmem:[#allocation27_spill] sm:$0xff] %v10075_v61  ;;  %v10147_v45 = vld [vmem:[%s12588_s4 + $0x198] sm:$0xff] }
 0xd78   :  { %7035 = vtanh.f32 %v9991_v49 }
 0xd85   :  { %v7036_v0 = vpop.eup %7035 }
 0xd86   :  { %v3186_v27 = vmul.f32 %v7036_v0, %v3184_v14  ;;  %v10159_v14 = vld [vmem:[%s12588_s4 + $0x190] sm:$0xff]  ;;  %v10166_v0 = vld [vmem:[%s12588_s4 + $0x168] sm:$0xff] }
 0xd88   :  { %3253 = vmatmul.mubr.f32.vlgmr.msra.gmra.mxu0 %v3186_v27  ;;  %3324 = vmatmul.mubr.f32.vlgmr.msra.gmra.mxu1 %v3186_v27  ;;  %v10171_v27 = vld [vmem:[%s12588_s4 + $0x178] sm:$0xff] }
 0xd89   :  { %3373 = vmatpush1.msra.mxu0 %v9541_v60  ;;  %3444 = vmatpush1.msra.mxu1 %v9547_v10  ;;  %v13421_v60 = vld [vmem:[#allocation10_spill] sm:$0xff]  ;;  %v13422_v10 = vld [vmem:[#allocation11_spill] sm:$0xff] }
 0xd8a   :  { %3374 = vmatprep.subr.mxu0 %v9553_v51  ;;  %3445 = vmatprep.subr.mxu1 %v9559_v50  ;;  %v13423_v51 = vld [vmem:[#allocation12_spill] sm:$0xff]  ;;  %v13424_v50 = vld [vmem:[#allocation13_spill] sm:$0xff] }
 0xd8b   :  { %3375 = vmatpush1.msra.mxu0 %v9565_v20  ;;  %3446 = vmatpush1.msra.mxu1 %v9571_v52  ;;  %v13425_v20 = vld [vmem:[#allocation36_spill] sm:$0xff] }
 0xd8c   :  { %3376 = vmatprep.subr.mxu0 %v9577_v41  ;;  %3447 = vmatprep.subr.mxu1 %v9583_v17  ;;  %v13426_v52 = vld [vmem:[#allocation8_spill] sm:$0xff]  ;;  %v13427_v41 = vld [vmem:[#allocation9_spill] sm:$0xff]  ;;  %v13428_v17 = vld [vmem:[#allocation14_spill] sm:$0xff] }
 0xd8d   :  { %3377 = vmatpush1.msra.mxu0 %v9589_v19  ;;  %3448 = vmatpush1.msra.mxu1 %v9595_v18  ;;  %v13429_v19 = vld [vmem:[#allocation15_spill] sm:$0xff]  ;;  %v13430_v18 = vld [vmem:[#allocation16_spill] sm:$0xff] }
 0xd8e   :  { %3378 = vmatprep.subr.mxu0 %v9601_v43  ;;  %3449 = vmatprep.subr.mxu1 %v9607_v16  ;;  %v13431_v43 = vld [vmem:[#allocation17_spill] sm:$0xff]  ;;  %v13432_v16 = vld [vmem:[#allocation18_spill] sm:$0xff] }
 0xd8f   :  { %3379 = vmatpush1.msra.mxu0 %v9613_v13  ;;  %3450 = vmatpush1.msra.mxu1 %v9619_v1  ;;  %v13433_v13 = vld [vmem:[#allocation19_spill] sm:$0xff]  ;;  %v13434_v1 = vld [vmem:[#allocation20_spill] sm:$0xff] }
 0xd90   :  { %3380 = vmatprep.subr.mxu0 %v9625_v34  ;;  %3451 = vmatprep.subr.mxu1 %v9631_v2  ;;  %v13435_v34 = vld [vmem:[#allocation21_spill] sm:$0xff]  ;;  %v13436_v2 = vld [vmem:[#allocation22_spill] sm:$0xff] }
 0xd91   :  { %3381 = vmatpush1.msra.mxu0 %v9637_v21  ;;  %3452 = vmatpush1.msra.mxu1 %v9643_v22  ;;  %v13437_v21 = vld [vmem:[#allocation23_spill] sm:$0xff]  ;;  %v13438_v22 = vld [vmem:[#allocation24_spill] sm:$0xff] }
 0xd92   :  { %3382 = vmatprep.subr.mxu0 %v9649_v23  ;;  %3453 = vmatprep.subr.mxu1 %v9655_v24  ;;  %v13439_v23 = vmov 0.0   ;;  %v13440_v24 = vld [vmem:[#allocation25_spill] sm:$0xff]  ;;  %13468 = vst [vmem:[#allocation24_spill] sm:$0xff] %v10426_v56 }
 0xd93   :  { %3383 = vmatpush1.msra.mxu0 %v9661_v26  ;;  %3454 = vmatpush1.msra.mxu1 %v9667_v29 }
 0xd94   :  { %3384 = vmatprep.subr.mxu0 %v9673_v31  ;;  %3455 = vmatprep.subr.mxu1 %v9679_v33 }
 0xd95   :  { %3385 = vmatpush1.msra.mxu0 %v9685_v35  ;;  %3456 = vmatpush1.msra.mxu1 %v9691_v36 }
 0xd96   :  { %3386 = vmatprep.subr.mxu0 %v9697_v38  ;;  %3457 = vmatprep.subr.mxu1 %v9703_v63 }
 0xd97   :  { %3387 = vmatpush1.msra.mxu0 %v9709_v46  ;;  %3458 = vmatpush1.msra.mxu1 %v9715_v3  ;;  %v13441_v3 = vld [vmem:[#allocation35_spill] sm:$0xff] }
 0xd98   :  { %3388 = vmatprep.subr.mxu0 %v9721_v8  ;;  %3459 = vmatprep.subr.mxu1 %v9727_v30 }
 0xd99   :  { %3389 = vmatpush1.msra.mxu0 %v9733_v32  ;;  %3460 = vmatpush1.msra.mxu1 %v9739_v5 }
 0xd9a   :  { %3390 = vmatprep.subr.mxu0 %v9745_v54  ;;  %3461 = vmatprep.subr.mxu1 %v9751_v6 }
 0xd9b   :  { %3391 = vmatpush1.msra.mxu0 %v9757_v48  ;;  %3462 = vmatpush1.msra.mxu1 %v9763_v25 }
 0xd9c   :  { %3392 = vmatprep.subr.mxu0 %v9769_v7  ;;  %3463 = vmatprep.subr.mxu1 %v9775_v28 }
 0xd9d   :  { %3393 = vmatpush1.msra.mxu0 %v9781_v11  ;;  %3464 = vmatpush1.msra.mxu1 %v9787_v9 }
 0xd9e   :  { %3394 = vmatprep.subr.mxu0 %v9793_v4  ;;  %3465 = vmatprep.subr.mxu1 %v13421_v60  ;;  %v10178_v60 = vld [vmem:[%s12588_s4 + $0x160] sm:$0xff] }
 0xd9f   :  { %3395 = vmatpush1.msra.mxu0 %v13422_v10  ;;  %3466 = vmatpush1.msra.mxu1 %v13423_v51  ;;  %v10183_v10 = vld [vmem:[%s12588_s4 + $0x170] sm:$0xff]  ;;  %v10190_v51 = vld [vmem:[%s12588_s4 + $0x148] sm:$0xff] }
 0xda0   :  { %3396 = vmatprep.subr.mxu0 %v13424_v50  ;;  %3467 = vmatprep.subr.mxu1 %v13425_v20  ;;  %v10195_v50 = vld [vmem:[%s12588_s4 + $0x158] sm:$0xff]  ;;  %v10202_v20 = vld [vmem:[%s12588_s4 + $0x140] sm:$0xff] }
 0xda1   :  { %3397 = vmatpush1.msra.mxu0 %v13426_v52  ;;  %3468 = vmatpush1.msra.mxu1 %v13427_v41  ;;  %v10207_v52 = vld [vmem:[%s12588_s4 + $0x150] sm:$0xff]  ;;  %v10214_v41 = vld [vmem:[%s12588_s4 + $0x128] sm:$0xff] }
 0xda2   :  { %3398 = vmatprep.subr.mxu0 %v13428_v17  ;;  %3469 = vmatprep.subr.mxu1 %v13429_v19  ;;  %v10219_v17 = vld [vmem:[%s12588_s4 + $0x138] sm:$0xff]  ;;  %v10226_v19 = vld [vmem:[%s12588_s4 + $0x120] sm:$0xff] }
 0xda3   :  { %3399 = vmatpush1.msra.mxu0 %v13430_v18  ;;  %3470 = vmatpush1.msra.mxu1 %v13431_v43  ;;  %v10231_v18 = vld [vmem:[%s12588_s4 + $0x130] sm:$0xff]  ;;  %v10238_v43 = vld [vmem:[%s12588_s4 + $0x108] sm:$0xff] }
 0xda4   :  { %3400 = vmatprep.subr.mxu0 %v13432_v16  ;;  %3471 = vmatprep.subr.mxu1 %v13433_v13  ;;  %v10243_v16 = vld [vmem:[%s12588_s4 + $0x118] sm:$0xff]  ;;  %v10248_v13 = vld [vmem:[%s12588_s4 + $0x100] sm:$0xff] }
 0xda5   :  { %3401 = vmatpush1.msra.mxu0 %v13434_v1  ;;  %3472 = vmatpush1.msra.mxu1 %v13435_v34  ;;  %v10255_v1 = vld [vmem:[%s12588_s4 + $0x110] sm:$0xff]  ;;  %v10260_v34 = vld [vmem:[%s12588_s4 + $0xe8] sm:$0xff] }
 0xda6   :  { %3402 = vmatprep.subr.mxu0 %v13436_v2  ;;  %3473 = vmatprep.subr.mxu1 %v13437_v21  ;;  %v10265_v2 = vld [vmem:[%s12588_s4 + $0xf8] sm:$0xff]  ;;  %v10272_v21 = vld [vmem:[%s12588_s4 + $0xe0] sm:$0xff] }
 0xda7   :  { %3403 = vmatpush1.msra.mxu0 %v13438_v22  ;;  %3436 = vmatprep.mubr.f32.mxu0 %v13439_v23  ;;  %v10277_v22 = vld [vmem:[%s12588_s4 + $0xf0] sm:$0xff] }
 0xda8   :  { %3474 = vmatpush1.msra.mxu1 %v13440_v24  ;;  %3507 = vmatprep.mubr.f32.mxu1 %v13439_v23  ;;  %v10282_v24 = vld [vmem:[%s12588_s4 + $0xc8] sm:$0xff] }
 0xda9   :  { %3722 = vmatprep.subr.mxu0 %v10070_v40  ;;  %3793 = vmatprep.subr.mxu1 %v10075_v61  ;;  %13444 = vst [vmem:[#allocation28_spill] sm:$0xff] %v10282_v24 }
 0xe48   :  { %v3254_v26 = vpop.f32.mrf.mxu0  ;;  %v3325_v29 = vpop.f32.mrf.mxu1 }
 0xe4a   :  { %v3256_v31 = vpop.f32.mrf.mxu0  ;;  %v3327_v33 = vpop.f32.mrf.mxu1 }
 0xe4b   :  { %v3334_v35 = vcombine.low %v3254_v26, %v3256_v31  ;;  %v3335_v36 = vcombine.low %v3325_v29, %v3327_v33  ;;  %v10289_v26 = vld [vmem:[%s12588_s4 + $0xd8] sm:$0xff]  ;;  %v10294_v29 = vld [vmem:[%s12588_s4 + $0xc0] sm:$0xff]  ;;  %v10299_v31 = vld [vmem:[%s12588_s4 + $0xd0] sm:$0xff] }
 0xe4c   :  { %13445 = vst [vmem:[#allocation37_spill] sm:$0xff] %v10289_v26  ;;  %13446 = vst [vmem:[#allocation40_spill] sm:$0xff] %v10294_v29  ;;  %v10306_v33 = vld [vmem:[%s12588_s4 + $0xa8] sm:$0xff] }
 0xe4d   :  { %v3342_v38 = vrot.slane %v3334_v35, %v7966_v53  ;;  %v3349_v63 = vrot.slane %v3335_v36, %v7966_v53  ;;  %13447 = vst [vmem:[#allocation33_spill] sm:$0xff] %v10299_v31  ;;  %13448 = vst [vmem:[#allocation34_spill] sm:$0xff] %v10306_v33  ;;  %v10311_v35 = vld [vmem:[%s12588_s4 + $0xb8] sm:$0xff]  ;;  %v10318_v36 = vld [vmem:[%s12588_s4 + $0xa0] sm:$0xff] }
 0xe4e   :  { %13449 = vst [vmem:[#allocation38_spill] sm:$0xff] %v10311_v35  ;;  %13450 = vst [vmem:[#allocation39_spill] sm:$0xff] %v10318_v36 }
 0xe4f   :  { %v3350_v46 = vcombine.low %v3342_v38, %v3349_v63  ;;  %v10323_v38 = vld [vmem:[%s12588_s4 + $0xb0] sm:$0xff]  ;;  %v10330_v63 = vld [vmem:[%s12588_s4 + $0x88] sm:$0xff] }
 0xe50   :  { %13451 = vst [vmem:[#allocation10_spill] sm:$0xff] %v10323_v38  ;;  %13452 = vst [vmem:[#allocation11_spill] sm:$0xff] %v10330_v63 }
 0xe51   :  { %v3352_v8 = vadd.f32 %v3350_v46, %v13441_v3  ;;  %v10335_v46 = vld [vmem:[%s12588_s4 + $0x98] sm:$0xff]  ;;  %v10419_v3 = vld [vmem:[%s12588_s4 + $0x30] sm:$0xff] }
 0xe52   :  { %13453 = vst [vmem:[#allocation12_spill] sm:$0xff] %v10335_v46  ;;  %13467 = vst [vmem:[#allocation23_spill] sm:$0xff] %v10419_v3 }
 0xe53   :  { %v3353_v30 = vmul.f32 0.5, %v3352_v8  ;;  %v3358_v32 = vrot.slane %v3352_v8, 6  ;;  %v10342_v8 = vld [vmem:[%s12588_s4 + $0x80] sm:$0xff] }
 0xe54   :  { %13454 = vst [vmem:[#allocation13_spill] sm:$0xff] %v10342_v8 }
 0xe55   :  { %7037 = vtanh.f32 %v3353_v30  ;;  %v10347_v30 = vld [vmem:[%s12588_s4 + $0x90] sm:$0xff] }
 0xe56   :  { %7039 = vtanh.f32 %v3358_v32  ;;  %13455 = vst [vmem:[#allocation36_spill] sm:$0xff] %v10347_v30  ;;  %v10354_v32 = vld [vmem:[%s12588_s4 + $0x68] sm:$0xff] }
 0xe57   :  { %13456 = vst [vmem:[#allocation8_spill] sm:$0xff] %v10354_v32 }
 0xe62   :  { %v7038_v5 = vpop.eup %7037 }
 0xe63   :  { %v3355_v54 = vmul.f32 0.5, %v7038_v5  ;;  %v7040_v25 = vpop.eup %7039  ;;  %v10359_v5 = vld [vmem:[%s12588_s4 + $0x78] sm:$0xff] }
 0xe64   :  { %13457 = vst [vmem:[#allocation9_spill] sm:$0xff] %v10359_v5 }
 0xe65   :  { %v3356_v6 = vadd.f32 0.5, %v3355_v54  ;;  %v10366_v54 = vld [vmem:[%s12588_s4 + $0x60] sm:$0xff] }
 0xe66   :  { %13458 = vst [vmem:[#allocation14_spill] sm:$0xff] %v10366_v54 }
 0xe67   :  { %v3362_v48 = vrot.slane %v3356_v6, 2  ;;  %v3365_v28 = vmul.f32 %v7040_v25, %v3356_v6  ;;  %v3368_v9 = vrot.slane %v3356_v6, 4  ;;  %v10371_v6 = vld [vmem:[%s12588_s4 + $0x70] sm:$0xff]  ;;  %v10383_v25 = vld [vmem:[%s12588_s4 + $0x58] sm:$0xff] }
 0xe68   :  { %13459 = vst [vmem:[#allocation15_spill] sm:$0xff] %v10371_v6  ;;  %13461 = vst [vmem:[#allocation17_spill] sm:$0xff] %v10383_v25 }
 0xe69   :  { %v3364_v7 = vmul.f32 %v3362_v48, %v9991_v49  ;;  %v10154_v49 = vld [vmem:[%s12588_s4 + $0x180] sm:$0xff]  ;;  %v10378_v48 = vld [vmem:[%s12588_s4 + $0x48] sm:$0xff] }
 0xe6a   :  { %13460 = vst [vmem:[#allocation16_spill] sm:$0xff] %v10378_v48 }
 0xe6b   :  { %v10062_v11 = vadd.f32 %v3365_v28, %v3364_v7  ;;  %v10390_v7 = vld [vmem:[%s12588_s4 + $0x40] sm:$0xff]  ;;  %v10395_v28 = vld [vmem:[%s12588_s4 + $0x50] sm:$0xff] }
 0xe6c   :  { %13462 = vst [vmem:[#allocation18_spill] sm:$0xff] %v10390_v7  ;;  %13463 = vst [vmem:[#allocation19_spill] sm:$0xff] %v10395_v28 }
 0xe6d   :  { %7041 = vtanh.f32 %v10062_v11 }
 0xe7a   :  { %v7042_v4 = vpop.eup %7041 }
 0xe7b   :  { %v3370_v15 = vmul.f32 %v7042_v4, %v3368_v9  ;;  %v10402_v9 = vld [vmem:[%s12588_s4 + $0x28] sm:$0xff]  ;;  %v10407_v4 = vld [vmem:[%s12588_s4 + $0x38] sm:$0xff] }
 0xe7c   :  { %13464 = vst [vmem:[#allocation20_spill] sm:$0xff] %v10402_v9  ;;  %13465 = vst [vmem:[#allocation21_spill] sm:$0xff] %v10407_v4 }
 0xe7d   :  { %3437 = vmatmul.mubr.f32.vlgmr.msra.gmra.mxu0 %v3370_v15  ;;  %3508 = vmatmul.mubr.f32.vlgmr.msra.gmra.mxu1 %v3370_v15  ;;  %v10414_v15 = vld [vmem:[%s12588_s4 + $0x20] sm:$0xff] }
 0xe7e   :  { %3786 = vmatprep.mubr.f32.mxu0 %v13439_v23  ;;  %3857 = vmatprep.mubr.f32.mxu1 %v13439_v23  ;;  %13466 = vst [vmem:[#allocation22_spill] sm:$0xff] %v10414_v15  ;;  %v10431_v23 = vld [vmem:[%s12588_s4 + $0x18] sm:$0xff] }
 0xe7f   :  { %3723 = vmatpush1.msra.mxu0 %v10082_v44  ;;  %3794 = vmatpush1.msra.mxu1 %v10087_v57  ;;  %13469 = vst [vmem:[#allocation25_spill] sm:$0xff] %v10431_v23 }
 0xe80   :  { %3724 = vmatprep.subr.mxu0 %v10094_v62  ;;  %3795 = vmatprep.subr.mxu1 %v10099_v37 }
 0xe81   :  { %3725 = vmatpush1.msra.mxu0 %v10106_v58  ;;  %3796 = vmatpush1.msra.mxu1 %v10111_v55 }
 0xe82   :  { %3726 = vmatprep.subr.mxu0 %v10118_v47  ;;  %3797 = vmatprep.subr.mxu1 %v10123_v12 }
 0xe83   :  { %3727 = vmatpush1.msra.mxu0 %v10130_v59  ;;  %3798 = vmatpush1.msra.mxu1 %v10135_v39 }
 0xe84   :  { %3728 = vmatprep.subr.mxu0 %v10142_v42  ;;  %3799 = vmatprep.subr.mxu1 %v10147_v45 }
 0xe85   :  { %3729 = vmatpush1.msra.mxu0 %v10154_v49  ;;  %3800 = vmatpush1.msra.mxu1 %v10159_v14 }
 0xe86   :  { %3730 = vmatprep.subr.mxu0 %v10166_v0  ;;  %3801 = vmatprep.subr.mxu1 %v10171_v27 }
 0xe87   :  { %3731 = vmatpush1.msra.mxu0 %v10178_v60  ;;  %3802 = vmatpush1.msra.mxu1 %v10183_v10 }
 0xe88   :  { %3732 = vmatprep.subr.mxu0 %v10190_v51  ;;  %3803 = vmatprep.subr.mxu1 %v10195_v50 }
 0xe89   :  { %3733 = vmatpush1.msra.mxu0 %v10202_v20  ;;  %3804 = vmatpush1.msra.mxu1 %v10207_v52 }
 0xe8a   :  { %3734 = vmatprep.subr.mxu0 %v10214_v41  ;;  %3805 = vmatprep.subr.mxu1 %v10219_v17 }
 0xe8b   :  { %3735 = vmatpush1.msra.mxu0 %v10226_v19  ;;  %3806 = vmatpush1.msra.mxu1 %v10231_v18 }
 0xe8c   :  { %3736 = vmatprep.subr.mxu0 %v10238_v43  ;;  %3807 = vmatprep.subr.mxu1 %v10243_v16 }
 0xe8d   :  { %3737 = vmatpush1.msra.mxu0 %v10248_v13  ;;  %3808 = vmatpush1.msra.mxu1 %v10255_v1 }
 0xe8e   :  { %3738 = vmatprep.subr.mxu0 %v10260_v34  ;;  %3809 = vmatprep.subr.mxu1 %v10265_v2 }
 0xe8f   :  { %3739 = vmatpush1.msra.mxu0 %v10272_v21  ;;  %3810 = vmatpush1.msra.mxu1 %v10277_v22 }
 0xe90   :  { %3740 = vmatprep.subr.mxu0 %v10282_v24  ;;  %3811 = vmatprep.subr.mxu1 %v10289_v26 }
 0xe91   :  { %3741 = vmatpush1.msra.mxu0 %v10294_v29  ;;  %3812 = vmatpush1.msra.mxu1 %v10299_v31 }
 0xe92   :  { %3742 = vmatprep.subr.mxu0 %v10306_v33  ;;  %3813 = vmatprep.subr.mxu1 %v10311_v35 }
 0xe93   :  { %3743 = vmatpush1.msra.mxu0 %v10318_v36  ;;  %3814 = vmatpush1.msra.mxu1 %v10323_v38 }
 0xe94   :  { %3744 = vmatprep.subr.mxu0 %v10330_v63  ;;  %3815 = vmatprep.subr.mxu1 %v10335_v46 }
 0xe95   :  { %3745 = vmatpush1.msra.mxu0 %v10342_v8  ;;  %3816 = vmatpush1.msra.mxu1 %v10347_v30 }
 0xe96   :  { %3746 = vmatprep.subr.mxu0 %v10354_v32  ;;  %3817 = vmatprep.subr.mxu1 %v10359_v5 }
 0xe97   :  { %3747 = vmatpush1.msra.mxu0 %v10366_v54  ;;  %3818 = vmatpush1.msra.mxu1 %v10371_v6  ;;  %v13475_v6 = vld [vmem:[#allocation32_spill] sm:$0xff] }
 0xe98   :  { %3748 = vmatprep.subr.mxu0 %v10378_v48  ;;  %3819 = vmatprep.subr.mxu1 %v10383_v25  ;;  %v13473_v25 = vld [vmem:[#allocation30_spill] sm:$0xff]  ;;  %v13474_v48 = vld [vmem:[#allocation31_spill] sm:$0xff] }
 0xe99   :  { %3749 = vmatpush1.msra.mxu0 %v10390_v7  ;;  %3820 = vmatpush1.msra.mxu1 %v10395_v28  ;;  %v10438_v7 = vld [vmem:[%s12588_s4] sm:$0xff]  ;;  %v10443_v28 = vld [vmem:[%s12588_s4 + $0x10] sm:$0xff] }
 0xe9a   :  { %3750 = vmatprep.subr.mxu0 %v10402_v9  ;;  %3821 = vmatprep.subr.mxu1 %v10407_v4  ;;  %13470 = vst [vmem:[#allocation42_spill] sm:$0xff] %v10438_v7  ;;  %13471 = vst [vmem:[#allocation43_spill] sm:$0xff] %v10443_v28  ;;  %v1938_v4 = vld [vmem:[%s12591_s3] sm:$0xf]  ;;  %v13472_v9 = vld [vmem:[#allocation29_spill] sm:$0xff] }
 0xe9b   :  { %3751 = vmatpush1.msra.mxu0 %v10414_v15  ;;  %3822 = vmatpush1.msra.mxu1 %v10419_v3  ;;  %v1948_v15 = vrot.slane %v1938_v4, %v13472_v9  ;;  %v1952_v3 = vrot.slane %v1938_v4, %v13473_v25 }
 0xe9c   :  { %3752 = vmatprep.subr.mxu0 %v10426_v56  ;;  %3823 = vmatprep.subr.mxu1 %v10431_v23  ;;  %v1956_v56 = vrot.slane %v1938_v4, %v13474_v48  ;;  %v1960_v23 = vrot.slane %v1938_v4, %v13475_v6 }
 0xe9d   :  { %3753 = vmatpush1.msra.mxu0 %v10438_v7  ;;  %3824 = vmatpush1.msra.mxu1 %v10443_v28  ;;  %v1969_v28 = vld [vmem:[%s12592_s5] sm:$0xf]  ;;  %v1942_v7 = vpop.permute.xlu1 %1941 }
 0xe9e   :  { %3906 = vmatprep.subr.mxu0 %v10070_v40  ;;  %3977 = vmatprep.subr.mxu1 %v10075_v61  ;;  %v1974_v40 = vrot.slane %v1969_v28, %v13472_v9  ;;  %v1978_v61 = vrot.slane %v1969_v28, %v13473_v25  ;;  %v1982_v54 = vrot.slane %v1969_v28, %v13474_v48 }
 0xe9f   :  { %v1986_v5 = vrot.slane %v1969_v28, %v13475_v6  ;;  %v1965_v32 = vmul.f32 %v1948_v15, %v1942_v7  ;;  %v1966_v30 = vmul.f32 %v1952_v3, %v1942_v7  ;;  %v1967_v8 = vmul.f32 %v1956_v56, %v1942_v7  ;;  %v13481_v15 = vld [vmem:[#allocation34_spill] sm:$0xff] }
 0xea0   :  { %v1968_v46 = vmul.f32 %v1960_v23, %v1942_v7  ;;  %v13479_v7 = vld [vmem:[#allocation40_spill] sm:$0xff] }
 0xea1   :  { %v1991_v63 = vadd.f32 %v1974_v40, %v1965_v32  ;;  %v1992_v38 = vadd.f32 %v1978_v61, %v1966_v30  ;;  %v1993_v4 = vadd.f32 %v1982_v54, %v1967_v8  ;;  %v6939_v32 = vld [vmem:[%s12595_s6] ss:$0 sm:$0xff]  ;;  %v13503_v6 = vld [vmem:[#allocation42_spill] sm:$0xff] }
 0xea2   :  { %v1994_v36 = vadd.f32 %v1986_v5, %v1968_v46 }
 0xea3   :  { %v1999_v35 = vcombine.low %v1991_v63, %v1992_v38 }
 0xea4   :  { %v2000_v33 = vcombine.low %v1993_v4, %v1994_v36  ;;  %v13482_v4 = vld [vmem:[#allocation38_spill] sm:$0xff] }
 0xea5   :  { %v2007_v25 = vrot.slane %v1999_v35, %v7966_v53 }
 0xea6   :  { %v2014_v48 = vrot.slane %v2000_v33, %v7966_v53 }
 0xea8   :  { %v10471_v23 = vcombine.low %v2007_v25, %v2014_v48  ;;  %v13477_v48 = vld [vmem:[#allocation28_spill] sm:$0xff]  ;;  %v13478_v25 = vld [vmem:[#allocation37_spill] sm:$0xff] }
 0xeaa   :  { %13476 = vst [vmem:[#allocation44_spill] sm:$0xff] %v10471_v23 }
 0xf3d   :  { %v3438_v31 = vpop.f32.mrf.mxu0  ;;  %v3509_v29 = vpop.f32.mrf.mxu1 }
 0xf3f   :  { %v3440_v26 = vpop.f32.mrf.mxu0  ;;  %v3511_v9 = vpop.f32.mrf.mxu1 }
 0xf40   :  { %v3518_v24 = vcombine.low %v3438_v31, %v3440_v26  ;;  %v3519_v28 = vcombine.low %v3509_v29, %v3511_v9  ;;  %v13480_v9 = vld [vmem:[#allocation33_spill] sm:$0xff] }
 0xf42   :  { %v3526_v3 = vrot.slane %v3518_v24, %v7966_v53  ;;  %v3533_v56 = vrot.slane %v3519_v28, %v7966_v53  ;;  %v13483_v28 = vld [vmem:[#allocation39_spill] sm:$0xff] }
 0xf44   :  { %v3534_v40 = vcombine.low %v3526_v3, %v3533_v56  ;;  %v13484_v3 = vld [vmem:[#allocation10_spill] sm:$0xff]  ;;  %v13485_v56 = vld [vmem:[#allocation11_spill] sm:$0xff] }
 0xf46   :  { %v3536_v61 = vadd.f32 %v3534_v40, %v10471_v23  ;;  %v13486_v40 = vld [vmem:[#allocation12_spill] sm:$0xff]  ;;  %v13504_v23 = vmov 0.0  }
 0xf48   :  { %v3537_v36 = vmul.f32 0.5, %v3536_v61  ;;  %v3542_v38 = vrot.slane %v3536_v61, 6  ;;  %v13487_v61 = vld [vmem:[#allocation13_spill] sm:$0xff] }
 0xf4a   :  { %7043 = vtanh.f32 %v3537_v36  ;;  %v13488_v36 = vld [vmem:[#allocation36_spill] sm:$0xff] }
 0xf4b   :  { %7045 = vtanh.f32 %v3542_v38  ;;  %v13489_v38 = vld [vmem:[#allocation8_spill] sm:$0xff] }
 0xf57   :  { %v7044_v63 = vpop.eup %7043 }
 0xf58   :  { %v3539_v46 = vmul.f32 0.5, %v7044_v63  ;;  %v7046_v33 = vpop.eup %7045  ;;  %v13490_v63 = vld [vmem:[#allocation9_spill] sm:$0xff] }
 0xf5a   :  { %v3540_v35 = vadd.f32 0.5, %v3539_v46  ;;  %v13491_v46 = vld [vmem:[#allocation14_spill] sm:$0xff] }
 0xf5c   :  { %v3546_v8 = vrot.slane %v3540_v35, 2  ;;  %v3549_v29 = vmul.f32 %v7046_v33, %v3540_v35  ;;  %v3552_v31 = vrot.slane %v3540_v35, 4  ;;  %v13492_v35 = vld [vmem:[#allocation15_spill] sm:$0xff]  ;;  %v13494_v33 = vld [vmem:[#allocation17_spill] sm:$0xff] }
 0xf5e   :  { %v3548_v26 = vmul.f32 %v3546_v8, %v10062_v11  ;;  %v13493_v8 = vld [vmem:[#allocation16_spill] sm:$0xff] }
 0xf60   :  { %v10475_v24 = vadd.f32 %v3549_v29, %v3548_v26  ;;  %v13495_v26 = vld [vmem:[#allocation18_spill] sm:$0xff]  ;;  %v13496_v29 = vld [vmem:[#allocation19_spill] sm:$0xff] }
 0xf62   :  { %7047 = vtanh.f32 %v10475_v24 }
 0xf6f   :  { %v7048_v30 = vpop.eup %7047 }
 0xf70   :  { %v3554_v5 = vmul.f32 %v7048_v30, %v3552_v31  ;;  %v13497_v31 = vld [vmem:[#allocation20_spill] sm:$0xff]  ;;  %v13498_v30 = vld [vmem:[#allocation21_spill] sm:$0xff] }
 0xf72   :  { %3787 = vmatmul.mubr.f32.vlgmr.msra.gmra.mxu0 %v3554_v5  ;;  %3858 = vmatmul.mubr.f32.vlgmr.msra.gmra.mxu1 %v3554_v5  ;;  %v3562_v54 = vmul.f32 %v6939_v32, %v3554_v5  ;;  %v13499_v32 = vld [vmem:[#allocation22_spill] sm:$0xff]  ;;  %v13500_v5 = vld [vmem:[#allocation23_spill] sm:$0xff] }
 0xf73   :  { %3907 = vmatpush1.msra.mxu0 %v10082_v44  ;;  %3978 = vmatpush1.msra.mxu1 %v10087_v57 }
 0xf74   :  { %v3563_v11 = vsel %vm1924_vm0, %v3562_v54, 0.0  ;;  %3908 = vmatprep.subr.mxu0 %v10094_v62  ;;  %3979 = vmatprep.subr.mxu1 %v10099_v37  ;;  %v13501_v54 = vld [vmem:[#allocation24_spill] sm:$0xff] }
 0xf75   :  { %3564 = vadd.xlane.f32.xlu1 %v3563_v11  ;;  %3909 = vmatpush1.msra.mxu0 %v10106_v58  ;;  %v13502_v11 = vld [vmem:[#allocation25_spill] sm:$0xff] }
 0xf76   :  { %3980 = vmatpush1.msra.mxu1 %v10111_v55  ;;  %3910 = vmatprep.subr.mxu0 %v10118_v47 }
 0xf77   :  { %3981 = vmatprep.subr.mxu1 %v10123_v12  ;;  %3911 = vmatpush1.msra.mxu0 %v10130_v59 }
 0xf78   :  { %3982 = vmatpush1.msra.mxu1 %v10135_v39  ;;  %3912 = vmatprep.subr.mxu0 %v10142_v42 }
 0xf79   :  { %3983 = vmatprep.subr.mxu1 %v10147_v45  ;;  %3913 = vmatpush1.msra.mxu0 %v10154_v49 }
 0xf7a   :  { %3984 = vmatpush1.msra.mxu1 %v10159_v14  ;;  %3914 = vmatprep.subr.mxu0 %v10166_v0 }
 0xf7b   :  { %3985 = vmatprep.subr.mxu1 %v10171_v27  ;;  %3915 = vmatpush1.msra.mxu0 %v10178_v60 }
 0xf7c   :  { %3986 = vmatpush1.msra.mxu1 %v10183_v10  ;;  %3916 = vmatprep.subr.mxu0 %v10190_v51 }
 0xf7d   :  { %3987 = vmatprep.subr.mxu1 %v10195_v50  ;;  %3917 = vmatpush1.msra.mxu0 %v10202_v20 }
 0xf7e   :  { %3988 = vmatpush1.msra.mxu1 %v10207_v52  ;;  %3918 = vmatprep.subr.mxu0 %v10214_v41 }
 0xf7f   :  { %3989 = vmatprep.subr.mxu1 %v10219_v17  ;;  %3919 = vmatpush1.msra.mxu0 %v10226_v19 }
 0xf80   :  { %3990 = vmatpush1.msra.mxu1 %v10231_v18  ;;  %3920 = vmatprep.subr.mxu0 %v10238_v43 }
 0xf81   :  { %3991 = vmatprep.subr.mxu1 %v10243_v16  ;;  %3921 = vmatpush1.msra.mxu0 %v10248_v13 }
 0xf82   :  { %3992 = vmatpush1.msra.mxu1 %v10255_v1  ;;  %3922 = vmatprep.subr.mxu0 %v10260_v34 }
 0xf83   :  { %3993 = vmatprep.subr.mxu1 %v10265_v2  ;;  %3923 = vmatpush1.msra.mxu0 %v10272_v21 }
 0xf84   :  { %3994 = vmatpush1.msra.mxu1 %v10277_v22  ;;  %3924 = vmatprep.subr.mxu0 %v13477_v48 }
 0xf85   :  { %3995 = vmatprep.subr.mxu1 %v13478_v25  ;;  %3925 = vmatpush1.msra.mxu0 %v13479_v7 }
 0xf86   :  { %3996 = vmatpush1.msra.mxu1 %v13480_v9  ;;  %3926 = vmatprep.subr.mxu0 %v13481_v15 }
 0xf87   :  { %3997 = vmatprep.subr.mxu1 %v13482_v4  ;;  %3927 = vmatpush1.msra.mxu0 %v13483_v28 }
 0xf88   :  { %3998 = vmatpush1.msra.mxu1 %v13484_v3  ;;  %3928 = vmatprep.subr.mxu0 %v13485_v56 }
 0xf89   :  { %3999 = vmatprep.subr.mxu1 %v13486_v40  ;;  %3929 = vmatpush1.msra.mxu0 %v13487_v61 }
 0xf8a   :  { %4000 = vmatpush1.msra.mxu1 %v13488_v36  ;;  %3930 = vmatprep.subr.mxu0 %v13489_v38 }
 0xf8b   :  { %4001 = vmatprep.subr.mxu1 %v13490_v63  ;;  %3931 = vmatpush1.msra.mxu0 %v13491_v46 }
 0xf8c   :  { %4002 = vmatpush1.msra.mxu1 %v13492_v35  ;;  %3932 = vmatprep.subr.mxu0 %v13493_v8  ;;  %v13508_v35 = vld [vmem:[#allocation4_spill] sm:$0xff] }
 0xf8d   :  { %4003 = vmatprep.subr.mxu1 %v13494_v33  ;;  %3933 = vmatpush1.msra.mxu0 %v13495_v26  ;;  %v13505_v33 = vld [vmem:[#allocation43_spill] sm:$0xff] }
 0xf8e   :  { %4004 = vmatpush1.msra.mxu1 %v13496_v29  ;;  %3934 = vmatprep.subr.mxu0 %v13497_v31  ;;  %v13506_v29 = vld [vmem:[#allocation26_spill] sm:$0xff]  ;;  %v13507_v31 = vld [vmem:[#allocation27_spill] sm:$0xff] }
 0xf8f   :  { %4005 = vmatprep.subr.mxu1 %v13498_v30  ;;  %3935 = vmatpush1.msra.mxu0 %v13499_v32  ;;  %v6940_v30 = vld [vmem:[#allocation3] ss:$0 sm:$0xff] }
 0xf90   :  { %4006 = vmatpush1.msra.mxu1 %v13500_v5  ;;  %3936 = vmatprep.subr.mxu0 %v13501_v54 }
 0xf91   :  { %4007 = vmatprep.subr.mxu1 %v13502_v11  ;;  %3937 = vmatpush1.msra.mxu0 %v13503_v6 }
 0xf92   :  { %3970 = vmatprep.mubr.f32.mxu0 %v13504_v23  ;;  %4008 = vmatpush1.msra.mxu1 %v13505_v33 }
 0xf93   :  { %4041 = vmatprep.mubr.f32.mxu1 %v13504_v23  ;;  %4090 = vmatprep.subr.mxu0 %v13506_v29 }
 0xf94   :  { %4161 = vmatprep.subr.mxu1 %v13507_v31 }
 0xffe   :  { %v3565_v32 = vpop.xlane.xlu1 %3564 }
 0xfff   :  { %v3573_v26 = vadd.f32 %v6940_v30, %v3565_v32 }
0x1001   :  { %6941 = vst.msk [vmem:[%s12596_s8 + $0x2] sm:$0x3] %vm1936_vm1, %v3573_v26  ;;  %3579 = vperm.xlu0 %6951, %v3573_v26  }
0x1032   :  { %v3788_v6 = vpop.f32.mrf.mxu0  ;;  %v3859_v11 = vpop.f32.mrf.mxu1 }
0x1034   :  { %v3790_v54 = vpop.f32.mrf.mxu0  ;;  %v3861_v5 = vpop.f32.mrf.mxu1 }
0x1035   :  { %v3868_v33 = vcombine.low %v3788_v6, %v3790_v54  ;;  %v3869_v8 = vcombine.low %v3859_v11, %v3861_v5  ;;  %v13519_v54 = vld [vmem:[#allocation19_spill] sm:$0xff]  ;;  %v13520_v11 = vld [vmem:[#allocation20_spill] sm:$0xff] }
0x1037   :  { %v3876_v23 = vrot.slane %v3868_v33, %v7966_v53  ;;  %v3883_v29 = vrot.slane %v3869_v8, %v7966_v53 }
0x1039   :  { %v3884_v31 = vcombine.low %v3876_v23, %v3883_v29  ;;  %v13517_v29 = vld [vmem:[#allocation17_spill] sm:$0xff] }
0x103b   :  { %v3886_v46 = vadd.f32 %v3884_v31, %v13508_v35  ;;  %v13516_v35 = vld [vmem:[#allocation16_spill] sm:$0xff]  ;;  %v13518_v31 = vld [vmem:[#allocation18_spill] sm:$0xff] }
0x103d   :  { %v3887_v30 = vmul.f32 0.5, %v3886_v46  ;;  %v3892_v32 = vrot.slane %v3886_v46, 6  ;;  %v13515_v46 = vld [vmem:[#allocation15_spill] sm:$0xff] }
0x103f   :  { %7049 = vtanh.f32 %v3887_v30  ;;  %v13521_v30 = vld [vmem:[#allocation21_spill] sm:$0xff] }
0x1040   :  { %7051 = vtanh.f32 %v3892_v32  ;;  %v13522_v32 = vld [vmem:[#allocation22_spill] sm:$0xff] }
0x104c   :  { %v7050_v63 = vpop.eup %7049 }
0x104d   :  { %v3889_v38 = vmul.f32 0.5, %v7050_v63  ;;  %v7052_v61 = vpop.eup %7051  ;;  %v13514_v63 = vld [vmem:[#allocation14_spill] sm:$0xff] }
0x104f   :  { %v3890_v26 = vadd.f32 0.5, %v3889_v38  ;;  %v13513_v38 = vld [vmem:[#allocation9_spill] sm:$0xff] }
0x1051   :  { %v3896_v36 = vrot.slane %v3890_v26, 2  ;;  %v3899_v6 = vmul.f32 %v7052_v61, %v3890_v26  ;;  %v3902_v8 = vrot.slane %v3890_v26, 4  ;;  %v13511_v61 = vld [vmem:[#allocation36_spill] sm:$0xff]  ;;  %v13523_v26 = vld [vmem:[#allocation23_spill] sm:$0xff] }
0x1053   :  { %v3898_v40 = vmul.f32 %v3896_v36, %v10475_v24  ;;  %v13509_v24 = vld [vmem:[#allocation12_spill] sm:$0xff] }
0x1054   :  { %v13512_v36 = vld [vmem:[#allocation8_spill] sm:$0xff] }
0x1055   :  { %v10556_v5 = vadd.f32 %v3899_v6, %v3898_v40  ;;  %v13510_v40 = vld [vmem:[#allocation13_spill] sm:$0xff]  ;;  %v13524_v6 = vld [vmem:[#allocation24_spill] sm:$0xff] }
0x1057   :  { %7053 = vtanh.f32 %v10556_v5 }
0x1064   :  { %v7054_v23 = vpop.eup %7053 }
0x1065   :  { %v3904_v33 = vmul.f32 %v7054_v23, %v3902_v8  ;;  %v13525_v8 = vld [vmem:[#allocation25_spill] sm:$0xff]  ;;  %v13526_v23 = vld [vmem:[#allocation42_spill] sm:$0xff] }
0x1067   :  { %3971 = vmatmul.mubr.f32.vlgmr.msra.gmra.mxu0 %v3904_v33  ;;  %4042 = vmatmul.mubr.f32.vlgmr.msra.gmra.mxu1 %v3904_v33  ;;  %v13527_v33 = vmov 0.0  }
0x1068   :  { %4091 = vmatpush1.msra.mxu0 %v10082_v44  ;;  %4162 = vmatpush1.msra.mxu1 %v10087_v57 }
0x1069   :  { %4092 = vmatprep.subr.mxu0 %v10094_v62  ;;  %4163 = vmatprep.subr.mxu1 %v10099_v37 }
0x106a   :  { %4093 = vmatpush1.msra.mxu0 %v10106_v58  ;;  %4164 = vmatpush1.msra.mxu1 %v10111_v55 }
0x106b   :  { %4094 = vmatprep.subr.mxu0 %v10118_v47  ;;  %4165 = vmatprep.subr.mxu1 %v10123_v12 }
0x106c   :  { %4095 = vmatpush1.msra.mxu0 %v10130_v59  ;;  %4166 = vmatpush1.msra.mxu1 %v10135_v39 }
0x106d   :  { %4096 = vmatprep.subr.mxu0 %v10142_v42  ;;  %4167 = vmatprep.subr.mxu1 %v10147_v45 }
0x106e   :  { %4097 = vmatpush1.msra.mxu0 %v10154_v49  ;;  %4168 = vmatpush1.msra.mxu1 %v10159_v14 }
0x106f   :  { %4098 = vmatprep.subr.mxu0 %v10166_v0  ;;  %4169 = vmatprep.subr.mxu1 %v10171_v27 }
0x1070   :  { %4099 = vmatpush1.msra.mxu0 %v10178_v60  ;;  %4170 = vmatpush1.msra.mxu1 %v10183_v10 }
0x1071   :  { %4100 = vmatprep.subr.mxu0 %v10190_v51  ;;  %4171 = vmatprep.subr.mxu1 %v10195_v50 }
0x1072   :  { %4101 = vmatpush1.msra.mxu0 %v10202_v20  ;;  %4172 = vmatpush1.msra.mxu1 %v10207_v52 }
0x1073   :  { %4102 = vmatprep.subr.mxu0 %v10214_v41  ;;  %4173 = vmatprep.subr.mxu1 %v10219_v17 }
0x1074   :  { %4103 = vmatpush1.msra.mxu0 %v10226_v19  ;;  %4174 = vmatpush1.msra.mxu1 %v10231_v18 }
0x1075   :  { %4104 = vmatprep.subr.mxu0 %v10238_v43  ;;  %4175 = vmatprep.subr.mxu1 %v10243_v16 }
0x1076   :  { %4105 = vmatpush1.msra.mxu0 %v10248_v13  ;;  %4176 = vmatpush1.msra.mxu1 %v10255_v1 }
0x1077   :  { %4106 = vmatprep.subr.mxu0 %v10260_v34  ;;  %4177 = vmatprep.subr.mxu1 %v10265_v2 }
0x1078   :  { %4107 = vmatpush1.msra.mxu0 %v10272_v21  ;;  %4178 = vmatpush1.msra.mxu1 %v10277_v22 }
0x1079   :  { %4108 = vmatprep.subr.mxu0 %v13477_v48  ;;  %4179 = vmatprep.subr.mxu1 %v13478_v25 }
0x107a   :  { %4109 = vmatpush1.msra.mxu0 %v13479_v7  ;;  %4180 = vmatpush1.msra.mxu1 %v13480_v9 }
0x107b   :  { %4110 = vmatprep.subr.mxu0 %v13481_v15  ;;  %4181 = vmatprep.subr.mxu1 %v13482_v4 }
0x107c   :  { %4111 = vmatpush1.msra.mxu0 %v13483_v28  ;;  %4182 = vmatpush1.msra.mxu1 %v13484_v3 }
0x107d   :  { %4112 = vmatprep.subr.mxu0 %v13485_v56  ;;  %4183 = vmatprep.subr.mxu1 %v13509_v24 }
0x107e   :  { %4113 = vmatpush1.msra.mxu0 %v13510_v40  ;;  %4184 = vmatpush1.msra.mxu1 %v13511_v61 }
0x107f   :  { %4114 = vmatprep.subr.mxu0 %v13512_v36  ;;  %4185 = vmatprep.subr.mxu1 %v13513_v38 }
0x1080   :  { %4115 = vmatpush1.msra.mxu0 %v13514_v63  ;;  %4186 = vmatpush1.msra.mxu1 %v13515_v46  ;;  %v13531_v63 = vld [vmem:[#allocation7_spill] sm:$0xff] }
0x1081   :  { %4116 = vmatprep.subr.mxu0 %v13516_v35  ;;  %4187 = vmatprep.subr.mxu1 %v13517_v29  ;;  %v13528_v29 = vld [vmem:[#allocation43_spill] sm:$0xff] }
0x1082   :  { %4117 = vmatpush1.msra.mxu0 %v13518_v31  ;;  %4188 = vmatpush1.msra.mxu1 %v13519_v54  ;;  %v13529_v54 = vld [vmem:[#allocation26_spill] sm:$0xff] }
0x1083   :  { %4118 = vmatprep.subr.mxu0 %v13520_v11  ;;  %4189 = vmatprep.subr.mxu1 %v13521_v30  ;;  %v13530_v11 = vld [vmem:[#allocation27_spill] sm:$0xff] }
0x1084   :  { %4119 = vmatpush1.msra.mxu0 %v13522_v32  ;;  %4190 = vmatpush1.msra.mxu1 %v13523_v26 }
0x1085   :  { %4120 = vmatprep.subr.mxu0 %v13524_v6  ;;  %4191 = vmatprep.subr.mxu1 %v13525_v8 }
0x1086   :  { %4121 = vmatpush1.msra.mxu0 %v13526_v23  ;;  %4154 = vmatprep.mubr.f32.mxu0 %v13527_v33 }
0x1087   :  { %4192 = vmatpush1.msra.mxu1 %v13528_v29  ;;  %4225 = vmatprep.mubr.f32.mxu1 %v13527_v33 }
0x1088   :  { %4274 = vmatprep.subr.mxu0 %v13529_v54  ;;  %4345 = vmatprep.subr.mxu1 %v13530_v11 }
0x1127   :  { %v3972_v30 = vpop.f32.mrf.mxu0  ;;  %v4043_v32 = vpop.f32.mrf.mxu1 }
0x1129   :  { %v3974_v31 = vpop.f32.mrf.mxu0  ;;  %v4045_v26 = vpop.f32.mrf.mxu1 }
0x112a   :  { %v4052_v35 = vcombine.low %v3972_v30, %v3974_v31  ;;  %v4053_v6 = vcombine.low %v4043_v32, %v4045_v26 }
0x112c   :  { %v4060_v8 = vrot.slane %v4052_v35, %v7966_v53  ;;  %v4067_v23 = vrot.slane %v4053_v6, %v7966_v53  ;;  %v13542_v6 = vld [vmem:[#allocation19_spill] sm:$0xff] }
0x112e   :  { %v4068_v46 = vcombine.low %v4060_v8, %v4067_v23  ;;  %v13543_v8 = vld [vmem:[#allocation20_spill] sm:$0xff]  ;;  %v13544_v23 = vld [vmem:[#allocation21_spill] sm:$0xff] }
0x1130   :  { %v4070_v38 = vadd.f32 %v4068_v46, %v13531_v63  ;;  %v13538_v46 = vld [vmem:[#allocation15_spill] sm:$0xff]  ;;  %v13550_v63 = vmov 0.0  }
0x1132   :  { %v4071_v29 = vmul.f32 0.5, %v4070_v38  ;;  %v4076_v33 = vrot.slane %v4070_v38, 6  ;;  %v13537_v38 = vld [vmem:[#allocation14_spill] sm:$0xff] }
0x1134   :  { %7055 = vtanh.f32 %v4071_v29  ;;  %v13539_v29 = vld [vmem:[#allocation16_spill] sm:$0xff] }
0x1135   :  { %7057 = vtanh.f32 %v4076_v33  ;;  %v13545_v33 = vld [vmem:[#allocation22_spill] sm:$0xff] }
0x1141   :  { %v7056_v54 = vpop.eup %7055 }
0x1142   :  { %v4073_v36 = vmul.f32 0.5, %v7056_v54  ;;  %v7058_v40 = vpop.eup %7057  ;;  %v13540_v54 = vld [vmem:[#allocation17_spill] sm:$0xff] }
0x1144   :  { %v4074_v11 = vadd.f32 0.5, %v4073_v36  ;;  %v13536_v36 = vld [vmem:[#allocation9_spill] sm:$0xff] }
0x1146   :  { %v4080_v61 = vrot.slane %v4074_v11, 2  ;;  %v4083_v31 = vmul.f32 %v7058_v40, %v4074_v11  ;;  %v4086_v35 = vrot.slane %v4074_v11, 4  ;;  %v13534_v40 = vld [vmem:[#allocation36_spill] sm:$0xff]  ;;  %v13541_v11 = vld [vmem:[#allocation18_spill] sm:$0xff] }
0x1148   :  { %v4082_v24 = vmul.f32 %v4080_v61, %v10556_v5  ;;  %v13532_v5 = vld [vmem:[#allocation12_spill] sm:$0xff] }
0x1149   :  { %v13535_v61 = vld [vmem:[#allocation8_spill] sm:$0xff] }
0x114a   :  { %v10629_v30 = vadd.f32 %v4083_v31, %v4082_v24  ;;  %v13533_v24 = vld [vmem:[#allocation13_spill] sm:$0xff]  ;;  %v13546_v31 = vld [vmem:[#allocation23_spill] sm:$0xff] }
0x114c   :  { %7059 = vtanh.f32 %v10629_v30 }
0x1159   :  { %v7060_v32 = vpop.eup %7059 }
0x115a   :  { %v4088_v26 = vmul.f32 %v7060_v32, %v4086_v35  ;;  %v13547_v35 = vld [vmem:[#allocation24_spill] sm:$0xff]  ;;  %v13548_v32 = vld [vmem:[#allocation25_spill] sm:$0xff] }
0x115c   :  { %4155 = vmatmul.mubr.f32.vlgmr.msra.gmra.mxu0 %v4088_v26  ;;  %4226 = vmatmul.mubr.f32.vlgmr.msra.gmra.mxu1 %v4088_v26  ;;  %v13549_v26 = vld [vmem:[#allocation42_spill] sm:$0xff] }
0x115d   :  { %4275 = vmatpush1.msra.mxu0 %v10082_v44  ;;  %4346 = vmatpush1.msra.mxu1 %v10087_v57 }
0x115e   :  { %4276 = vmatprep.subr.mxu0 %v10094_v62  ;;  %4347 = vmatprep.subr.mxu1 %v10099_v37 }
0x115f   :  { %4277 = vmatpush1.msra.mxu0 %v10106_v58  ;;  %4348 = vmatpush1.msra.mxu1 %v10111_v55 }
0x1160   :  { %4278 = vmatprep.subr.mxu0 %v10118_v47  ;;  %4349 = vmatprep.subr.mxu1 %v10123_v12 }
0x1161   :  { %4279 = vmatpush1.msra.mxu0 %v10130_v59  ;;  %4350 = vmatpush1.msra.mxu1 %v10135_v39 }
0x1162   :  { %4280 = vmatprep.subr.mxu0 %v10142_v42  ;;  %4351 = vmatprep.subr.mxu1 %v10147_v45 }
0x1163   :  { %4281 = vmatpush1.msra.mxu0 %v10154_v49  ;;  %4352 = vmatpush1.msra.mxu1 %v10159_v14 }
0x1164   :  { %4282 = vmatprep.subr.mxu0 %v10166_v0  ;;  %4353 = vmatprep.subr.mxu1 %v10171_v27 }
0x1165   :  { %4283 = vmatpush1.msra.mxu0 %v10178_v60  ;;  %4354 = vmatpush1.msra.mxu1 %v10183_v10 }
0x1166   :  { %4284 = vmatprep.subr.mxu0 %v10190_v51  ;;  %4355 = vmatprep.subr.mxu1 %v10195_v50 }
0x1167   :  { %4285 = vmatpush1.msra.mxu0 %v10202_v20  ;;  %4356 = vmatpush1.msra.mxu1 %v10207_v52 }
0x1168   :  { %4286 = vmatprep.subr.mxu0 %v10214_v41  ;;  %4357 = vmatprep.subr.mxu1 %v10219_v17 }
0x1169   :  { %4287 = vmatpush1.msra.mxu0 %v10226_v19  ;;  %4358 = vmatpush1.msra.mxu1 %v10231_v18 }
0x116a   :  { %4288 = vmatprep.subr.mxu0 %v10238_v43  ;;  %4359 = vmatprep.subr.mxu1 %v10243_v16 }
0x116b   :  { %4289 = vmatpush1.msra.mxu0 %v10248_v13  ;;  %4360 = vmatpush1.msra.mxu1 %v10255_v1 }
0x116c   :  { %4290 = vmatprep.subr.mxu0 %v10260_v34  ;;  %4361 = vmatprep.subr.mxu1 %v10265_v2 }
0x116d   :  { %4291 = vmatpush1.msra.mxu0 %v10272_v21  ;;  %4362 = vmatpush1.msra.mxu1 %v10277_v22 }
0x116e   :  { %4292 = vmatprep.subr.mxu0 %v13477_v48  ;;  %4363 = vmatprep.subr.mxu1 %v13478_v25 }
0x116f   :  { %4293 = vmatpush1.msra.mxu0 %v13479_v7  ;;  %4364 = vmatpush1.msra.mxu1 %v13480_v9 }
0x1170   :  { %4294 = vmatprep.subr.mxu0 %v13481_v15  ;;  %4365 = vmatprep.subr.mxu1 %v13482_v4 }
0x1171   :  { %4295 = vmatpush1.msra.mxu0 %v13483_v28  ;;  %4366 = vmatpush1.msra.mxu1 %v13484_v3 }
0x1172   :  { %4296 = vmatprep.subr.mxu0 %v13485_v56  ;;  %4367 = vmatprep.subr.mxu1 %v13532_v5 }
0x1173   :  { %4297 = vmatpush1.msra.mxu0 %v13533_v24  ;;  %4368 = vmatpush1.msra.mxu1 %v13534_v40 }
0x1174   :  { %4298 = vmatprep.subr.mxu0 %v13535_v61  ;;  %4369 = vmatprep.subr.mxu1 %v13536_v36 }
0x1175   :  { %4299 = vmatpush1.msra.mxu0 %v13537_v38  ;;  %4370 = vmatpush1.msra.mxu1 %v13538_v46  ;;  %v13554_v38 = vld [vmem:[#allocation41_spill] sm:$0xff] }
0x1176   :  { %4300 = vmatprep.subr.mxu0 %v13539_v29  ;;  %4371 = vmatprep.subr.mxu1 %v13540_v54  ;;  %v13551_v54 = vld [vmem:[#allocation43_spill] sm:$0xff] }
0x1177   :  { %4301 = vmatpush1.msra.mxu0 %v13541_v11  ;;  %4372 = vmatpush1.msra.mxu1 %v13542_v6  ;;  %v13552_v6 = vld [vmem:[#allocation26_spill] sm:$0xff] }
0x1178   :  { %4302 = vmatprep.subr.mxu0 %v13543_v8  ;;  %4373 = vmatprep.subr.mxu1 %v13544_v23  ;;  %v13553_v8 = vld [vmem:[#allocation27_spill] sm:$0xff] }
0x1179   :  { %4303 = vmatpush1.msra.mxu0 %v13545_v33  ;;  %4374 = vmatpush1.msra.mxu1 %v13546_v31 }
0x117a   :  { %4304 = vmatprep.subr.mxu0 %v13547_v35  ;;  %4375 = vmatprep.subr.mxu1 %v13548_v32 }
0x117b   :  { %4305 = vmatpush1.msra.mxu0 %v13549_v26  ;;  %4338 = vmatprep.mubr.f32.mxu0 %v13550_v63 }
0x117c   :  { %4376 = vmatpush1.msra.mxu1 %v13551_v54  ;;  %4409 = vmatprep.mubr.f32.mxu1 %v13550_v63 }
0x117d   :  { %4458 = vmatprep.subr.mxu0 %v13552_v6  ;;  %4529 = vmatprep.subr.mxu1 %v13553_v8 }
0x121c   :  { %v4156_v23 = vpop.f32.mrf.mxu0  ;;  %v4227_v33 = vpop.f32.mrf.mxu1 }
0x121e   :  { %v4158_v11 = vpop.f32.mrf.mxu0  ;;  %v4229_v31 = vpop.f32.mrf.mxu1 }
0x121f   :  { %v4236_v29 = vcombine.low %v4156_v23, %v4158_v11  ;;  %v4237_v35 = vcombine.low %v4227_v33, %v4229_v31 }
0x1221   :  { %v4244_v32 = vrot.slane %v4236_v29, %v7966_v53  ;;  %v4251_v26 = vrot.slane %v4237_v35, %v7966_v53  ;;  %v10827_v35 = vld [vmem:[%s12588_s4 + $0x1a8] sm:$0xff] }
0x1223   :  { %v4252_v46 = vcombine.low %v4244_v32, %v4251_v26  ;;  %v10833_v32 = vld [vmem:[%s12588_s4 + $0x1b8] sm:$0xff]  ;;  %v10839_v26 = vld [vmem:[%s12588_s4 + $0x1a0] sm:$0xff] }
0x1225   :  { %v4254_v36 = vadd.f32 %v4252_v46, %v13554_v38  ;;  %v10815_v46 = vld [vmem:[%s12588_s4 + $0x1c0] sm:$0xff] }
0x1226   :  { %v11103_v38 = vld [vmem:[%s12588_s4 + $0x40] sm:$0xff] }
0x1227   :  { %v4255_v54 = vmul.f32 0.5, %v4254_v36  ;;  %v4260_v63 = vrot.slane %v4254_v36, 6  ;;  %v10809_v36 = vld [vmem:[%s12588_s4 + $0x1d8] sm:$0xff]  ;;  %13587 = vst [vmem:[#allocation27_spill] sm:$0xff] %v11103_v38 }
0x1229   :  { %7061 = vtanh.f32 %v4255_v54  ;;  %v10821_v54 = vld [vmem:[%s12588_s4 + $0x1d0] sm:$0xff] }
0x122a   :  { %7063 = vtanh.f32 %v4260_v63 }
0x1236   :  { %v7062_v6 = vpop.eup %7061 }
0x1237   :  { %v4257_v61 = vmul.f32 0.5, %v7062_v6  ;;  %v7064_v24 = vpop.eup %7063  ;;  %v10845_v6 = vld [vmem:[%s12588_s4 + $0x1b0] sm:$0xff] }
0x1239   :  { %v4258_v8 = vadd.f32 0.5, %v4257_v61  ;;  %v10803_v61 = vld [vmem:[%s12588_s4 + $0x1c8] sm:$0xff] }
0x123b   :  { %v4264_v40 = vrot.slane %v4258_v8, 2  ;;  %v4267_v11 = vmul.f32 %v7064_v24, %v4258_v8  ;;  %v4270_v29 = vrot.slane %v4258_v8, 4  ;;  %v10791_v24 = vld [vmem:[%s12588_s4 + $0x1e0] sm:$0xff]  ;;  %v10851_v8 = vld [vmem:[%s12588_s4 + $0x188] sm:$0xff] }
0x123d   :  { %v4266_v5 = vmul.f32 %v4264_v40, %v10629_v30  ;;  %v10797_v40 = vld [vmem:[%s12588_s4 + $0x1f0] sm:$0xff] }
0x123f   :  { %v10702_v23 = vadd.f32 %v4267_v11, %v4266_v5  ;;  %v10857_v11 = vld [vmem:[%s12588_s4 + $0x198] sm:$0xff] }
0x1241   :  { %7065 = vtanh.f32 %v10702_v23 }
0x124e   :  { %v7066_v33 = vpop.eup %7065 }
0x124f   :  { %v4272_v31 = vmul.f32 %v7066_v33, %v4270_v29  ;;  %v10869_v29 = vld [vmem:[%s12588_s4 + $0x190] sm:$0xff]  ;;  %v10875_v33 = vld [vmem:[%s12588_s4 + $0x168] sm:$0xff] }
0x1251   :  { %4339 = vmatmul.mubr.f32.vlgmr.msra.gmra.mxu0 %v4272_v31  ;;  %4410 = vmatmul.mubr.f32.vlgmr.msra.gmra.mxu1 %v4272_v31  ;;  %v10881_v31 = vld [vmem:[%s12588_s4 + $0x178] sm:$0xff] }
0x1252   :  { %4459 = vmatpush1.msra.mxu0 %v10082_v44  ;;  %4530 = vmatpush1.msra.mxu1 %v10087_v57  ;;  %v13555_v44 = vld [vmem:[#allocation12_spill] sm:$0xff]  ;;  %v13556_v57 = vld [vmem:[#allocation13_spill] sm:$0xff] }
0x1253   :  { %4460 = vmatprep.subr.mxu0 %v10094_v62  ;;  %4531 = vmatprep.subr.mxu1 %v10099_v37  ;;  %v13557_v62 = vld [vmem:[#allocation36_spill] sm:$0xff] }
0x1254   :  { %4461 = vmatpush1.msra.mxu0 %v10106_v58  ;;  %4532 = vmatpush1.msra.mxu1 %v10111_v55  ;;  %v13558_v37 = vld [vmem:[#allocation8_spill] sm:$0xff]  ;;  %v13559_v58 = vld [vmem:[#allocation9_spill] sm:$0xff]  ;;  %v13560_v55 = vld [vmem:[#allocation14_spill] sm:$0xff] }
0x1255   :  { %4462 = vmatprep.subr.mxu0 %v10118_v47  ;;  %4533 = vmatprep.subr.mxu1 %v10123_v12  ;;  %v13561_v47 = vld [vmem:[#allocation15_spill] sm:$0xff]  ;;  %v13562_v12 = vld [vmem:[#allocation16_spill] sm:$0xff] }
0x1256   :  { %4463 = vmatpush1.msra.mxu0 %v10130_v59  ;;  %4534 = vmatpush1.msra.mxu1 %v10135_v39  ;;  %v13563_v59 = vld [vmem:[#allocation17_spill] sm:$0xff]  ;;  %v13564_v39 = vld [vmem:[#allocation18_spill] sm:$0xff] }
0x1257   :  { %4464 = vmatprep.subr.mxu0 %v10142_v42  ;;  %4535 = vmatprep.subr.mxu1 %v10147_v45  ;;  %v13565_v42 = vld [vmem:[#allocation19_spill] sm:$0xff]  ;;  %v13566_v45 = vld [vmem:[#allocation20_spill] sm:$0xff] }
0x1258   :  { %4465 = vmatpush1.msra.mxu0 %v10154_v49  ;;  %4536 = vmatpush1.msra.mxu1 %v10159_v14  ;;  %v13567_v49 = vld [vmem:[#allocation21_spill] sm:$0xff]  ;;  %v13568_v14 = vld [vmem:[#allocation22_spill] sm:$0xff] }
0x1259   :  { %4466 = vmatprep.subr.mxu0 %v10166_v0  ;;  %4537 = vmatprep.subr.mxu1 %v10171_v27  ;;  %v13569_v0 = vld [vmem:[#allocation23_spill] sm:$0xff]  ;;  %v13570_v27 = vld [vmem:[#allocation24_spill] sm:$0xff] }
0x125a   :  { %4467 = vmatpush1.msra.mxu0 %v10178_v60  ;;  %4538 = vmatpush1.msra.mxu1 %v10183_v10  ;;  %v13571_v60 = vld [vmem:[#allocation25_spill] sm:$0xff]  ;;  %v13572_v10 = vld [vmem:[#allocation42_spill] sm:$0xff] }
0x125b   :  { %4468 = vmatprep.subr.mxu0 %v10190_v51  ;;  %4539 = vmatprep.subr.mxu1 %v10195_v50  ;;  %v13573_v51 = vmov 0.0   ;;  %v13574_v50 = vld [vmem:[#allocation43_spill] sm:$0xff] }
0x125c   :  { %4469 = vmatpush1.msra.mxu0 %v10202_v20  ;;  %4540 = vmatpush1.msra.mxu1 %v10207_v52  ;;  %v10772_v20 = vld [vmem:[%s12588_s4 + $0x1e8] sm:$0xff]  ;;  %v10778_v52 = vld [vmem:[%s12588_s4 + $0x1f8] sm:$0xff] }
0x125d   :  { %4470 = vmatprep.subr.mxu0 %v10214_v41  ;;  %4541 = vmatprep.subr.mxu1 %v10219_v17  ;;  %13575 = vst [vmem:[#allocation28_spill] sm:$0xff] %v10772_v20  ;;  %13576 = vst [vmem:[#allocation37_spill] sm:$0xff] %v10778_v52 }
0x125e   :  { %4471 = vmatpush1.msra.mxu0 %v10226_v19  ;;  %4542 = vmatpush1.msra.mxu1 %v10231_v18 }
0x125f   :  { %4472 = vmatprep.subr.mxu0 %v10238_v43  ;;  %4543 = vmatprep.subr.mxu1 %v10243_v16 }
0x1260   :  { %4473 = vmatpush1.msra.mxu0 %v10248_v13  ;;  %4544 = vmatpush1.msra.mxu1 %v10255_v1 }
0x1261   :  { %4474 = vmatprep.subr.mxu0 %v10260_v34  ;;  %4545 = vmatprep.subr.mxu1 %v10265_v2  ;;  %v13577_v2 = vld [vmem:[#allocation5_spill] sm:$0xff] }
0x1262   :  { %4475 = vmatpush1.msra.mxu0 %v10272_v21  ;;  %4546 = vmatpush1.msra.mxu1 %v10277_v22 }
0x1263   :  { %4476 = vmatprep.subr.mxu0 %v13477_v48  ;;  %4547 = vmatprep.subr.mxu1 %v13478_v25 }
0x1264   :  { %4477 = vmatpush1.msra.mxu0 %v13479_v7  ;;  %4548 = vmatpush1.msra.mxu1 %v13480_v9 }
0x1265   :  { %4478 = vmatprep.subr.mxu0 %v13481_v15  ;;  %4549 = vmatprep.subr.mxu1 %v13482_v4 }
0x1266   :  { %4479 = vmatpush1.msra.mxu0 %v13483_v28  ;;  %4550 = vmatpush1.msra.mxu1 %v13484_v3 }
0x1267   :  { %4480 = vmatprep.subr.mxu0 %v13485_v56  ;;  %4551 = vmatprep.subr.mxu1 %v13555_v44  ;;  %v10887_v44 = vld [vmem:[%s12588_s4 + $0x160] sm:$0xff] }
0x1268   :  { %4481 = vmatpush1.msra.mxu0 %v13556_v57  ;;  %4552 = vmatpush1.msra.mxu1 %v13557_v62  ;;  %v10893_v57 = vld [vmem:[%s12588_s4 + $0x170] sm:$0xff]  ;;  %v10899_v62 = vld [vmem:[%s12588_s4 + $0x148] sm:$0xff] }
0x1269   :  { %4482 = vmatprep.subr.mxu0 %v13558_v37  ;;  %4553 = vmatprep.subr.mxu1 %v13559_v58  ;;  %v10905_v37 = vld [vmem:[%s12588_s4 + $0x158] sm:$0xff]  ;;  %v10911_v58 = vld [vmem:[%s12588_s4 + $0x140] sm:$0xff] }
0x126a   :  { %4483 = vmatpush1.msra.mxu0 %v13560_v55  ;;  %4554 = vmatpush1.msra.mxu1 %v13561_v47  ;;  %v10917_v55 = vld [vmem:[%s12588_s4 + $0x150] sm:$0xff]  ;;  %v10923_v47 = vld [vmem:[%s12588_s4 + $0x128] sm:$0xff] }
0x126b   :  { %4484 = vmatprep.subr.mxu0 %v13562_v12  ;;  %4555 = vmatprep.subr.mxu1 %v13563_v59  ;;  %v10929_v12 = vld [vmem:[%s12588_s4 + $0x138] sm:$0xff]  ;;  %v10935_v59 = vld [vmem:[%s12588_s4 + $0x120] sm:$0xff] }
0x126c   :  { %4485 = vmatpush1.msra.mxu0 %v13564_v39  ;;  %4556 = vmatpush1.msra.mxu1 %v13565_v42  ;;  %v10941_v39 = vld [vmem:[%s12588_s4 + $0x130] sm:$0xff]  ;;  %v10947_v42 = vld [vmem:[%s12588_s4 + $0x108] sm:$0xff] }
0x126d   :  { %4486 = vmatprep.subr.mxu0 %v13566_v45  ;;  %4557 = vmatprep.subr.mxu1 %v13567_v49  ;;  %v10953_v45 = vld [vmem:[%s12588_s4 + $0x118] sm:$0xff]  ;;  %v10959_v49 = vld [vmem:[%s12588_s4 + $0x100] sm:$0xff] }
0x126e   :  { %4487 = vmatpush1.msra.mxu0 %v13568_v14  ;;  %4558 = vmatpush1.msra.mxu1 %v13569_v0 }
0x126f   :  { %4488 = vmatprep.subr.mxu0 %v13570_v27  ;;  %4559 = vmatprep.subr.mxu1 %v13571_v60 }
0x1270   :  { %4489 = vmatpush1.msra.mxu0 %v13572_v10  ;;  %4522 = vmatprep.mubr.f32.mxu0 %v13573_v51 }
0x1271   :  { %4560 = vmatpush1.msra.mxu1 %v13574_v50  ;;  %4593 = vmatprep.mubr.f32.mxu1 %v13573_v51 }
0x1272   :  { %4642 = vmatprep.subr.mxu0 %v10772_v20  ;;  %4713 = vmatprep.subr.mxu1 %v10778_v52 }
0x1311   :  { %v4340_v41 = vpop.f32.mrf.mxu0  ;;  %v4411_v17 = vpop.f32.mrf.mxu1 }
0x1313   :  { %v4342_v19 = vpop.f32.mrf.mxu0  ;;  %v4413_v18 = vpop.f32.mrf.mxu1 }
0x1314   :  { %v4420_v43 = vcombine.low %v4340_v41, %v4342_v19  ;;  %v4421_v16 = vcombine.low %v4411_v17, %v4413_v18  ;;  %v10965_v41 = vld [vmem:[%s12588_s4 + $0x110] sm:$0xff]  ;;  %v10971_v17 = vld [vmem:[%s12588_s4 + $0xe8] sm:$0xff]  ;;  %v10977_v19 = vld [vmem:[%s12588_s4 + $0xf8] sm:$0xff] }
0x1315   :  { %v10983_v18 = vld [vmem:[%s12588_s4 + $0xe0] sm:$0xff] }
0x1316   :  { %v4428_v13 = vrot.slane %v4420_v43, %v7966_v53  ;;  %v4435_v1 = vrot.slane %v4421_v16, %v7966_v53  ;;  %v10989_v43 = vld [vmem:[%s12588_s4 + $0xf0] sm:$0xff]  ;;  %v10995_v16 = vld [vmem:[%s12588_s4 + $0xc8] sm:$0xff] }
0x1318   :  { %v4436_v34 = vcombine.low %v4428_v13, %v4435_v1  ;;  %v11001_v13 = vld [vmem:[%s12588_s4 + $0xd8] sm:$0xff]  ;;  %v11007_v1 = vld [vmem:[%s12588_s4 + $0xc0] sm:$0xff] }
0x131a   :  { %v4438_v21 = vadd.f32 %v4436_v34, %v13577_v2  ;;  %v11013_v34 = vld [vmem:[%s12588_s4 + $0xd0] sm:$0xff]  ;;  %v11097_v2 = vld [vmem:[%s12588_s4 + $0x58] sm:$0xff] }
0x131b   :  { %13586 = vst [vmem:[#allocation26_spill] sm:$0xff] %v11097_v2 }
0x131c   :  { %v4439_v22 = vmul.f32 0.5, %v4438_v21  ;;  %v4444_v48 = vrot.slane %v4438_v21, 6  ;;  %v11019_v21 = vld [vmem:[%s12588_s4 + $0xa8] sm:$0xff] }
0x131e   :  { %7067 = vtanh.f32 %v4439_v22  ;;  %v11025_v22 = vld [vmem:[%s12588_s4 + $0xb8] sm:$0xff] }
0x131f   :  { %7069 = vtanh.f32 %v4444_v48  ;;  %v11031_v48 = vld [vmem:[%s12588_s4 + $0xa0] sm:$0xff] }
0x132b   :  { %v7068_v25 = vpop.eup %7067 }
0x132c   :  { %v4441_v7 = vmul.f32 0.5, %v7068_v25  ;;  %v7070_v4 = vpop.eup %7069  ;;  %v11037_v25 = vld [vmem:[%s12588_s4 + $0xb0] sm:$0xff] }
0x132e   :  { %v4442_v9 = vadd.f32 0.5, %v4441_v7  ;;  %v11043_v7 = vld [vmem:[%s12588_s4 + $0x88] sm:$0xff] }
0x1330   :  { %v4448_v15 = vrot.slane %v4442_v9, 2  ;;  %v4451_v3 = vmul.f32 %v7070_v4, %v4442_v9  ;;  %v4454_v63 = vrot.slane %v4442_v9, 4  ;;  %v11049_v9 = vld [vmem:[%s12588_s4 + $0x98] sm:$0xff]  ;;  %v11061_v4 = vld [vmem:[%s12588_s4 + $0x90] sm:$0xff] }
0x1331   :  { %13578 = vst [vmem:[#allocation40_spill] sm:$0xff] %v11049_v9  ;;  %13580 = vst [vmem:[#allocation34_spill] sm:$0xff] %v11061_v4 }
0x1332   :  { %v4450_v28 = vmul.f32 %v4448_v15, %v10702_v23  ;;  %v10863_v23 = vld [vmem:[%s12588_s4 + $0x180] sm:$0xff] }
0x1333   :  { %v11055_v15 = vld [vmem:[%s12588_s4 + $0x80] sm:$0xff] }
0x1334   :  { %v10785_v56 = vadd.f32 %v4451_v3, %v4450_v28  ;;  %13579 = vst [vmem:[#allocation33_spill] sm:$0xff] %v11055_v15  ;;  %v11067_v28 = vld [vmem:[%s12588_s4 + $0x68] sm:$0xff]  ;;  %v11073_v3 = vld [vmem:[%s12588_s4 + $0x78] sm:$0xff] }
0x1335   :  { %13581 = vst [vmem:[#allocation38_spill] sm:$0xff] %v11067_v28  ;;  %13582 = vst [vmem:[#allocation39_spill] sm:$0xff] %v11073_v3 }
0x1336   :  { %7071 = vtanh.f32 %v10785_v56 }
0x1343   :  { %v7072_v30 = vpop.eup %7071 }
0x1344   :  { %v4456_v5 = vmul.f32 %v7072_v30, %v4454_v63  ;;  %v11079_v63 = vld [vmem:[%s12588_s4 + $0x60] sm:$0xff]  ;;  %v11085_v30 = vld [vmem:[%s12588_s4 + $0x70] sm:$0xff] }
0x1345   :  { %13583 = vst [vmem:[#allocation10_spill] sm:$0xff] %v11079_v63  ;;  %13584 = vst [vmem:[#allocation11_spill] sm:$0xff] %v11085_v30 }
0x1346   :  { %4523 = vmatmul.mubr.f32.vlgmr.msra.gmra.mxu0 %v4456_v5  ;;  %4594 = vmatmul.mubr.f32.vlgmr.msra.gmra.mxu1 %v4456_v5  ;;  %v11091_v5 = vld [vmem:[%s12588_s4 + $0x48] sm:$0xff] }
0x1347   :  { %4643 = vmatpush1.msra.mxu0 %v10791_v24  ;;  %4714 = vmatpush1.msra.mxu1 %v10797_v40  ;;  %13585 = vst [vmem:[#allocation4_spill] sm:$0xff] %v11091_v5 }
0x1348   :  { %4644 = vmatprep.subr.mxu0 %v10803_v61  ;;  %4715 = vmatprep.subr.mxu1 %v10809_v36 }
0x1349   :  { %4645 = vmatpush1.msra.mxu0 %v10815_v46  ;;  %4716 = vmatpush1.msra.mxu1 %v10821_v54 }
0x134a   :  { %4646 = vmatprep.subr.mxu0 %v10827_v35  ;;  %4717 = vmatprep.subr.mxu1 %v10833_v32 }
0x134b   :  { %4647 = vmatpush1.msra.mxu0 %v10839_v26  ;;  %4718 = vmatpush1.msra.mxu1 %v10845_v6 }
0x134c   :  { %4648 = vmatprep.subr.mxu0 %v10851_v8  ;;  %4719 = vmatprep.subr.mxu1 %v10857_v11 }
0x134d   :  { %4649 = vmatpush1.msra.mxu0 %v10863_v23  ;;  %4720 = vmatpush1.msra.mxu1 %v10869_v29 }
0x134e   :  { %4650 = vmatprep.subr.mxu0 %v10875_v33  ;;  %4721 = vmatprep.subr.mxu1 %v10881_v31 }
0x134f   :  { %4651 = vmatpush1.msra.mxu0 %v10887_v44  ;;  %4722 = vmatpush1.msra.mxu1 %v10893_v57 }
0x1350   :  { %4652 = vmatprep.subr.mxu0 %v10899_v62  ;;  %4723 = vmatprep.subr.mxu1 %v10905_v37 }
0x1351   :  { %4653 = vmatpush1.msra.mxu0 %v10911_v58  ;;  %4724 = vmatpush1.msra.mxu1 %v10917_v55 }
0x1352   :  { %4654 = vmatprep.subr.mxu0 %v10923_v47  ;;  %4725 = vmatprep.subr.mxu1 %v10929_v12 }
0x1353   :  { %4655 = vmatpush1.msra.mxu0 %v10935_v59  ;;  %4726 = vmatpush1.msra.mxu1 %v10941_v39 }
0x1354   :  { %4656 = vmatprep.subr.mxu0 %v10947_v42  ;;  %4727 = vmatprep.subr.mxu1 %v10953_v45 }
0x1355   :  { %4657 = vmatpush1.msra.mxu0 %v10959_v49  ;;  %4728 = vmatpush1.msra.mxu1 %v10965_v41 }
0x1356   :  { %4658 = vmatprep.subr.mxu0 %v10971_v17  ;;  %4729 = vmatprep.subr.mxu1 %v10977_v19 }
0x1357   :  { %4659 = vmatpush1.msra.mxu0 %v10983_v18  ;;  %4730 = vmatpush1.msra.mxu1 %v10989_v43 }
0x1358   :  { %4660 = vmatprep.subr.mxu0 %v10995_v16  ;;  %4731 = vmatprep.subr.mxu1 %v11001_v13 }
0x1359   :  { %4661 = vmatpush1.msra.mxu0 %v11007_v1  ;;  %4732 = vmatpush1.msra.mxu1 %v11013_v34 }
0x135a   :  { %4662 = vmatprep.subr.mxu0 %v11019_v21  ;;  %4733 = vmatprep.subr.mxu1 %v11025_v22 }
0x135b   :  { %4663 = vmatpush1.msra.mxu0 %v11031_v48  ;;  %4734 = vmatpush1.msra.mxu1 %v11037_v25 }
0x135c   :  { %4664 = vmatprep.subr.mxu0 %v11043_v7  ;;  %4735 = vmatprep.subr.mxu1 %v11049_v9 }
0x135d   :  { %4665 = vmatpush1.msra.mxu0 %v11055_v15  ;;  %4736 = vmatpush1.msra.mxu1 %v11061_v4 }
0x135e   :  { %4666 = vmatprep.subr.mxu0 %v11067_v28  ;;  %4737 = vmatprep.subr.mxu1 %v11073_v3 }
0x135f   :  { %4667 = vmatpush1.msra.mxu0 %v11079_v63  ;;  %4738 = vmatpush1.msra.mxu1 %v11085_v30  ;;  %v11109_v30 = vld [vmem:[%s12588_s4 + $0x50] sm:$0xff] }
0x1360   :  { %4668 = vmatprep.subr.mxu0 %v11091_v5  ;;  %4739 = vmatprep.subr.mxu1 %v11097_v2  ;;  %13588 = vst [vmem:[#allocation12_spill] sm:$0xff] %v11109_v30  ;;  %v11115_v5 = vld [vmem:[%s12588_s4 + $0x28] sm:$0xff]  ;;  %v11121_v2 = vld [vmem:[%s12588_s4 + $0x38] sm:$0xff] }
0x1361   :  { %4669 = vmatpush1.msra.mxu0 %v11103_v38  ;;  %4740 = vmatpush1.msra.mxu1 %v11109_v30  ;;  %13589 = vst [vmem:[#allocation13_spill] sm:$0xff] %v11115_v5  ;;  %13590 = vst [vmem:[#allocation36_spill] sm:$0xff] %v11121_v2  ;;  %v13591_v63 = vld [vmem:[#allocation6_spill] sm:$0xff] }
0x1362   :  { %4670 = vmatprep.subr.mxu0 %v11115_v5  ;;  %4741 = vmatprep.subr.mxu1 %v11121_v2 }
0x1363   :  { %4671 = vmatpush1.msra.mxu0 %v13568_v14  ;;  %4742 = vmatpush1.msra.mxu1 %v13569_v0 }
0x1364   :  { %4672 = vmatprep.subr.mxu0 %v13570_v27  ;;  %4743 = vmatprep.subr.mxu1 %v13571_v60 }
0x1365   :  { %4673 = vmatpush1.msra.mxu0 %v13572_v10  ;;  %4706 = vmatprep.mubr.f32.mxu0 %v13573_v51 }
0x1366   :  { %4744 = vmatpush1.msra.mxu1 %v13574_v50  ;;  %4777 = vmatprep.mubr.f32.mxu1 %v13573_v51 }
0x1367   :  { %4826 = vmatprep.subr.mxu0 %v10772_v20  ;;  %4897 = vmatprep.subr.mxu1 %v10778_v52 }
0x1406   :  { %v4524_v2 = vpop.f32.mrf.mxu0  ;;  %v4595_v14 = vpop.f32.mrf.mxu1 }
0x1408   :  { %v4526_v5 = vpop.f32.mrf.mxu0  ;;  %v4597_v0 = vpop.f32.mrf.mxu1 }
0x1409   :  { %v4604_v30 = vcombine.low %v4524_v2, %v4526_v5  ;;  %v4605_v27 = vcombine.low %v4595_v14, %v4597_v0 }
0x140b   :  { %v4612_v60 = vrot.slane %v4604_v30, %v7966_v53  ;;  %v4619_v10 = vrot.slane %v4605_v27, %v7966_v53  ;;  %v13602_v27 = vld [vmem:[#allocation12_spill] sm:$0xff] }
0x140d   :  { %v4620_v38 = vcombine.low %v4612_v60, %v4619_v10  ;;  %v13603_v60 = vld [vmem:[#allocation13_spill] sm:$0xff]  ;;  %v13604_v10 = vld [vmem:[#allocation36_spill] sm:$0xff] }
0x140f   :  { %v4622_v3 = vadd.f32 %v4620_v38, %v13591_v63  ;;  %v13592_v38 = vld [vmem:[#allocation40_spill] sm:$0xff]  ;;  %v13610_v63 = vmov 0.0  }
0x1411   :  { %v4623_v50 = vmul.f32 0.5, %v4622_v3  ;;  %v4628_v51 = vrot.slane %v4622_v3, 6  ;;  %v13601_v3 = vld [vmem:[#allocation27_spill] sm:$0xff] }
0x1413   :  { %7073 = vtanh.f32 %v4623_v50  ;;  %v11200_v50 = vld [vmem:[%s12588_s4 + $0x20] sm:$0xff] }
0x1414   :  { %7075 = vtanh.f32 %v4628_v51  ;;  %v13593_v51 = vld [vmem:[#allocation33_spill] sm:$0xff]  ;;  %13605 = vst [vmem:[#allocation8_spill] sm:$0xff] %v11200_v50 }
0x1420   :  { %v7074_v20 = vpop.eup %7073 }
0x1421   :  { %v4625_v28 = vmul.f32 0.5, %v7074_v20  ;;  %v7076_v15 = vpop.eup %7075  ;;  %v13594_v20 = vld [vmem:[#allocation34_spill] sm:$0xff] }
0x1423   :  { %v4626_v52 = vadd.f32 0.5, %v4625_v28  ;;  %v13600_v28 = vld [vmem:[#allocation26_spill] sm:$0xff] }
0x1425   :  { %v4632_v4 = vrot.slane %v4626_v52, 2  ;;  %v4635_v2 = vmul.f32 %v7076_v15, %v4626_v52  ;;  %v4638_v30 = vrot.slane %v4626_v52, 4  ;;  %v13595_v52 = vld [vmem:[#allocation38_spill] sm:$0xff]  ;;  %v13598_v15 = vld [vmem:[#allocation11_spill] sm:$0xff] }
0x1427   :  { %v4634_v9 = vmul.f32 %v4632_v4, %v10785_v56  ;;  %v13596_v56 = vld [vmem:[#allocation39_spill] sm:$0xff]  ;;  %v13599_v4 = vld [vmem:[#allocation4_spill] sm:$0xff] }
0x1429   :  { %v11138_v5 = vadd.f32 %v4635_v2, %v4634_v9  ;;  %v13597_v9 = vld [vmem:[#allocation10_spill] sm:$0xff] }
0x142a   :  { %v11206_v2 = vld [vmem:[%s12588_s4 + $0x30] sm:$0xff] }
0x142b   :  { %7077 = vtanh.f32 %v11138_v5  ;;  %13606 = vst [vmem:[#allocation9_spill] sm:$0xff] %v11206_v2 }
0x1438   :  { %v7078_v14 = vpop.eup %7077 }
0x1439   :  { %v4640_v0 = vmul.f32 %v7078_v14, %v4638_v30  ;;  %v11212_v30 = vld [vmem:[%s12588_s4 + $0x8] sm:$0xff]  ;;  %v11218_v14 = vld [vmem:[%s12588_s4 + $0x18] sm:$0xff] }
0x143a   :  { %13607 = vst [vmem:[#allocation14_spill] sm:$0xff] %v11212_v30  ;;  %13608 = vst [vmem:[#allocation15_spill] sm:$0xff] %v11218_v14 }
0x143b   :  { %4707 = vmatmul.mubr.f32.vlgmr.msra.gmra.mxu0 %v4640_v0  ;;  %4778 = vmatmul.mubr.f32.vlgmr.msra.gmra.mxu1 %v4640_v0  ;;  %v11224_v0 = vld [vmem:[%s12588_s4] sm:$0xff] }
0x143c   :  { %4827 = vmatpush1.msra.mxu0 %v10791_v24  ;;  %4898 = vmatpush1.msra.mxu1 %v10797_v40  ;;  %13609 = vst [vmem:[#allocation16_spill] sm:$0xff] %v11224_v0 }
0x143d   :  { %4828 = vmatprep.subr.mxu0 %v10803_v61  ;;  %4899 = vmatprep.subr.mxu1 %v10809_v36 }
0x143e   :  { %4829 = vmatpush1.msra.mxu0 %v10815_v46  ;;  %4900 = vmatpush1.msra.mxu1 %v10821_v54 }
0x143f   :  { %4830 = vmatprep.subr.mxu0 %v10827_v35  ;;  %4901 = vmatprep.subr.mxu1 %v10833_v32 }
0x1440   :  { %4831 = vmatpush1.msra.mxu0 %v10839_v26  ;;  %4902 = vmatpush1.msra.mxu1 %v10845_v6 }
0x1441   :  { %4832 = vmatprep.subr.mxu0 %v10851_v8  ;;  %4903 = vmatprep.subr.mxu1 %v10857_v11 }
0x1442   :  { %4833 = vmatpush1.msra.mxu0 %v10863_v23  ;;  %4904 = vmatpush1.msra.mxu1 %v10869_v29 }
0x1443   :  { %4834 = vmatprep.subr.mxu0 %v10875_v33  ;;  %4905 = vmatprep.subr.mxu1 %v10881_v31 }
0x1444   :  { %4835 = vmatpush1.msra.mxu0 %v10887_v44  ;;  %4906 = vmatpush1.msra.mxu1 %v10893_v57 }
0x1445   :  { %4836 = vmatprep.subr.mxu0 %v10899_v62  ;;  %4907 = vmatprep.subr.mxu1 %v10905_v37 }
0x1446   :  { %4837 = vmatpush1.msra.mxu0 %v10911_v58  ;;  %4908 = vmatpush1.msra.mxu1 %v10917_v55 }
0x1447   :  { %4838 = vmatprep.subr.mxu0 %v10923_v47  ;;  %4909 = vmatprep.subr.mxu1 %v10929_v12 }
0x1448   :  { %4839 = vmatpush1.msra.mxu0 %v10935_v59  ;;  %4910 = vmatpush1.msra.mxu1 %v10941_v39 }
0x1449   :  { %4840 = vmatprep.subr.mxu0 %v10947_v42  ;;  %4911 = vmatprep.subr.mxu1 %v10953_v45 }
0x144a   :  { %4841 = vmatpush1.msra.mxu0 %v10959_v49  ;;  %4912 = vmatpush1.msra.mxu1 %v10965_v41 }
0x144b   :  { %4842 = vmatprep.subr.mxu0 %v10971_v17  ;;  %4913 = vmatprep.subr.mxu1 %v10977_v19 }
0x144c   :  { %4843 = vmatpush1.msra.mxu0 %v10983_v18  ;;  %4914 = vmatpush1.msra.mxu1 %v10989_v43 }
0x144d   :  { %4844 = vmatprep.subr.mxu0 %v10995_v16  ;;  %4915 = vmatprep.subr.mxu1 %v11001_v13 }
0x144e   :  { %4845 = vmatpush1.msra.mxu0 %v11007_v1  ;;  %4916 = vmatpush1.msra.mxu1 %v11013_v34 }
0x144f   :  { %4846 = vmatprep.subr.mxu0 %v11019_v21  ;;  %4917 = vmatprep.subr.mxu1 %v11025_v22 }
0x1450   :  { %4847 = vmatpush1.msra.mxu0 %v11031_v48  ;;  %4918 = vmatpush1.msra.mxu1 %v11037_v25 }
0x1451   :  { %4848 = vmatprep.subr.mxu0 %v11043_v7  ;;  %4919 = vmatprep.subr.mxu1 %v13592_v38 }
0x1452   :  { %4849 = vmatpush1.msra.mxu0 %v13593_v51  ;;  %4920 = vmatpush1.msra.mxu1 %v13594_v20 }
0x1453   :  { %4850 = vmatprep.subr.mxu0 %v13595_v52  ;;  %4921 = vmatprep.subr.mxu1 %v13596_v56 }
0x1454   :  { %4851 = vmatpush1.msra.mxu0 %v13597_v9  ;;  %4922 = vmatpush1.msra.mxu1 %v13598_v15  ;;  %v13614_v9 = vld [vmem:[#allocation35_spill] sm:$0xff] }
0x1455   :  { %4852 = vmatprep.subr.mxu0 %v13599_v4  ;;  %4923 = vmatprep.subr.mxu1 %v13600_v28 }
0x1456   :  { %4853 = vmatpush1.msra.mxu0 %v13601_v3  ;;  %4924 = vmatpush1.msra.mxu1 %v13602_v27 }
0x1457   :  { %4854 = vmatprep.subr.mxu0 %v13603_v60  ;;  %4925 = vmatprep.subr.mxu1 %v13604_v10 }
0x1458   :  { %4855 = vmatpush1.msra.mxu0 %v11200_v50  ;;  %4926 = vmatpush1.msra.mxu1 %v11206_v2  ;;  %v13612_v2 = vld [vmem:[#allocation28_spill] sm:$0xff] }
0x1459   :  { %4856 = vmatprep.subr.mxu0 %v11212_v30  ;;  %4927 = vmatprep.subr.mxu1 %v11218_v14  ;;  %v11231_v30 = vld [vmem:[%s12588_s4 + $0x10] sm:$0xff] }
0x145a   :  { %4857 = vmatpush1.msra.mxu0 %v11224_v0  ;;  %4890 = vmatprep.mubr.f32.mxu0 %v13610_v63  ;;  %13611 = vst [vmem:[#allocation17_spill] sm:$0xff] %v11231_v30  ;;  %v13613_v14 = vld [vmem:[#allocation37_spill] sm:$0xff] }
0x145b   :  { %4928 = vmatpush1.msra.mxu1 %v11231_v30  ;;  %4961 = vmatprep.mubr.f32.mxu1 %v13610_v63 }
0x145c   :  { %5010 = vmatprep.subr.mxu0 %v13612_v2  ;;  %5081 = vmatprep.subr.mxu1 %v13613_v14 }
0x14fb   :  { %v4708_v50 = vpop.f32.mrf.mxu0  ;;  %v4779_v10 = vpop.f32.mrf.mxu1 }
0x14fd   :  { %v4710_v60 = vpop.f32.mrf.mxu0  ;;  %v4781_v27 = vpop.f32.mrf.mxu1 }
0x14fe   :  { %v4788_v0 = vcombine.low %v4708_v50, %v4710_v60  ;;  %v4789_v3 = vcombine.low %v4779_v10, %v4781_v27  ;;  %v11361_v10 = vld [vmem:[%s12588_s4 + $0x1d0] sm:$0xff]  ;;  %v11368_v50 = vld [vmem:[%s12588_s4 + $0x1a8] sm:$0xff] }
0x1500   :  { %v4796_v28 = vrot.slane %v4788_v0, %v7966_v53  ;;  %v4803_v4 = vrot.slane %v4789_v3, %v7966_v53  ;;  %v11380_v0 = vld [vmem:[%s12588_s4 + $0x1a0] sm:$0xff] }
0x1502   :  { %v4804_v15 = vcombine.low %v4796_v28, %v4803_v4 }
0x1504   :  { %v4806_v56 = vadd.f32 %v4804_v15, %v13614_v9  ;;  %v11356_v15 = vld [vmem:[%s12588_s4 + $0x1c0] sm:$0xff]  ;;  %v11676_v9 = vld [vmem:[%s12588_s4 + $0x8] sm:$0xff] }
0x1506   :  { %v4807_v30 = vmul.f32 0.5, %v4806_v56  ;;  %v4812_v63 = vrot.slane %v4806_v56, 6  ;;  %v11349_v56 = vld [vmem:[%s12588_s4 + $0x1d8] sm:$0xff] }
0x1508   :  { %7079 = vtanh.f32 %v4807_v30  ;;  %v11373_v30 = vld [vmem:[%s12588_s4 + $0x1b8] sm:$0xff] }
0x1509   :  { %7081 = vtanh.f32 %v4812_v63 }
0x1515   :  { %v7080_v2 = vpop.eup %7079 }
0x1516   :  { %v4809_v52 = vmul.f32 0.5, %v7080_v2  ;;  %v7082_v51 = vpop.eup %7081  ;;  %v11385_v2 = vld [vmem:[%s12588_s4 + $0x1b0] sm:$0xff] }
0x1518   :  { %v4810_v14 = vadd.f32 0.5, %v4809_v52  ;;  %v11344_v52 = vld [vmem:[%s12588_s4 + $0x1c8] sm:$0xff] }
0x151a   :  { %v4816_v20 = vrot.slane %v4810_v14, 2  ;;  %v4819_v60 = vmul.f32 %v7082_v51, %v4810_v14  ;;  %v4822_v3 = vrot.slane %v4810_v14, 4  ;;  %v11332_v51 = vld [vmem:[%s12588_s4 + $0x1e0] sm:$0xff]  ;;  %v11392_v14 = vld [vmem:[%s12588_s4 + $0x188] sm:$0xff] }
0x151c   :  { %v4818_v38 = vmul.f32 %v4816_v20, %v11138_v5  ;;  %v11320_v5 = vld [vmem:[%s12588_s4 + $0x1e8] sm:$0xff]  ;;  %v11337_v20 = vld [vmem:[%s12588_s4 + $0x1f0] sm:$0xff] }
0x151d   :  { %13636 = vst [vmem:[#allocation18_spill] sm:$0xff] %v11320_v5 }
0x151e   :  { %v11241_v27 = vadd.f32 %v4819_v60, %v4818_v38  ;;  %v11325_v38 = vld [vmem:[%s12588_s4 + $0x1f8] sm:$0xff] }
0x151f   :  { %13637 = vst [vmem:[#allocation19_spill] sm:$0xff] %v11325_v38  ;;  %v11397_v60 = vld [vmem:[%s12588_s4 + $0x198] sm:$0xff] }
0x1520   :  { %7083 = vtanh.f32 %v11241_v27 }
0x152d   :  { %v7084_v4 = vpop.eup %7083 }
0x152e   :  { %v4824_v28 = vmul.f32 %v7084_v4, %v4822_v3  ;;  %v11409_v3 = vld [vmem:[%s12588_s4 + $0x190] sm:$0xff]  ;;  %v11416_v4 = vld [vmem:[%s12588_s4 + $0x168] sm:$0xff] }
0x1530   :  { %4891 = vmatmul.mubr.f32.vlgmr.msra.gmra.mxu0 %v4824_v28  ;;  %4962 = vmatmul.mubr.f32.vlgmr.msra.gmra.mxu1 %v4824_v28  ;;  %v11421_v28 = vld [vmem:[%s12588_s4 + $0x178] sm:$0xff] }
0x1531   :  { %5011 = vmatpush1.msra.mxu0 %v10791_v24  ;;  %5082 = vmatpush1.msra.mxu1 %v10797_v40  ;;  %v13615_v24 = vld [vmem:[#allocation40_spill] sm:$0xff]  ;;  %v13616_v40 = vld [vmem:[#allocation33_spill] sm:$0xff] }
0x1532   :  { %5012 = vmatprep.subr.mxu0 %v10803_v61  ;;  %5083 = vmatprep.subr.mxu1 %v10809_v36  ;;  %v13617_v61 = vld [vmem:[#allocation34_spill] sm:$0xff] }
0x1533   :  { %5013 = vmatpush1.msra.mxu0 %v10815_v46  ;;  %5084 = vmatpush1.msra.mxu1 %v10821_v54  ;;  %v13618_v36 = vld [vmem:[#allocation38_spill] sm:$0xff]  ;;  %v13619_v46 = vld [vmem:[#allocation39_spill] sm:$0xff] }
0x1534   :  { %5014 = vmatprep.subr.mxu0 %v10827_v35  ;;  %5085 = vmatprep.subr.mxu1 %v10833_v32  ;;  %v13620_v54 = vld [vmem:[#allocation10_spill] sm:$0xff]  ;;  %v13621_v35 = vld [vmem:[#allocation11_spill] sm:$0xff]  ;;  %v13622_v32 = vld [vmem:[#allocation4_spill] sm:$0xff] }
0x1535   :  { %5015 = vmatpush1.msra.mxu0 %v10839_v26  ;;  %5086 = vmatpush1.msra.mxu1 %v10845_v6  ;;  %v13623_v26 = vld [vmem:[#allocation26_spill] sm:$0xff]  ;;  %v13624_v6 = vld [vmem:[#allocation27_spill] sm:$0xff] }
0x1536   :  { %5016 = vmatprep.subr.mxu0 %v10851_v8  ;;  %5087 = vmatprep.subr.mxu1 %v10857_v11  ;;  %v13625_v8 = vld [vmem:[#allocation12_spill] sm:$0xff]  ;;  %v13626_v11 = vld [vmem:[#allocation13_spill] sm:$0xff] }
0x1537   :  { %5017 = vmatpush1.msra.mxu0 %v10863_v23  ;;  %5088 = vmatpush1.msra.mxu1 %v10869_v29  ;;  %v13627_v23 = vld [vmem:[#allocation36_spill] sm:$0xff] }
0x1538   :  { %5018 = vmatprep.subr.mxu0 %v10875_v33  ;;  %5089 = vmatprep.subr.mxu1 %v10881_v31  ;;  %v13628_v29 = vld [vmem:[#allocation8_spill] sm:$0xff]  ;;  %v13629_v33 = vld [vmem:[#allocation9_spill] sm:$0xff]  ;;  %v13630_v31 = vld [vmem:[#allocation14_spill] sm:$0xff] }
0x1539   :  { %5019 = vmatpush1.msra.mxu0 %v10887_v44  ;;  %5090 = vmatpush1.msra.mxu1 %v10893_v57  ;;  %v13631_v44 = vld [vmem:[#allocation15_spill] sm:$0xff]  ;;  %v13632_v57 = vld [vmem:[#allocation16_spill] sm:$0xff]  ;;  %13662 = vst [vmem:[#allocation9_spill] sm:$0xff] %v11676_v9 }
0x153a   :  { %5020 = vmatprep.subr.mxu0 %v10899_v62  ;;  %5091 = vmatprep.subr.mxu1 %v10905_v37  ;;  %v13633_v62 = vmov 0.0   ;;  %v13634_v37 = vld [vmem:[#allocation17_spill] sm:$0xff] }
0x153b   :  { %5021 = vmatpush1.msra.mxu0 %v10911_v58  ;;  %5092 = vmatpush1.msra.mxu1 %v10917_v55 }
0x153c   :  { %5022 = vmatprep.subr.mxu0 %v10923_v47  ;;  %5093 = vmatprep.subr.mxu1 %v10929_v12 }
0x153d   :  { %5023 = vmatpush1.msra.mxu0 %v10935_v59  ;;  %5094 = vmatpush1.msra.mxu1 %v10941_v39 }
0x153e   :  { %5024 = vmatprep.subr.mxu0 %v10947_v42  ;;  %5095 = vmatprep.subr.mxu1 %v10953_v45 }
0x153f   :  { %5025 = vmatpush1.msra.mxu0 %v10959_v49  ;;  %5096 = vmatpush1.msra.mxu1 %v10965_v41  ;;  %v13635_v41 = vld [vmem:[#allocation44_spill] sm:$0xff] }
0x1540   :  { %5026 = vmatprep.subr.mxu0 %v10971_v17  ;;  %5097 = vmatprep.subr.mxu1 %v10977_v19 }
0x1541   :  { %5027 = vmatpush1.msra.mxu0 %v10983_v18  ;;  %5098 = vmatpush1.msra.mxu1 %v10989_v43 }
0x1542   :  { %5028 = vmatprep.subr.mxu0 %v10995_v16  ;;  %5099 = vmatprep.subr.mxu1 %v11001_v13 }
0x1543   :  { %5029 = vmatpush1.msra.mxu0 %v11007_v1  ;;  %5100 = vmatpush1.msra.mxu1 %v11013_v34 }
0x1544   :  { %5030 = vmatprep.subr.mxu0 %v11019_v21  ;;  %5101 = vmatprep.subr.mxu1 %v11025_v22 }
0x1545   :  { %5031 = vmatpush1.msra.mxu0 %v11031_v48  ;;  %5102 = vmatpush1.msra.mxu1 %v11037_v25 }
0x1546   :  { %5032 = vmatprep.subr.mxu0 %v11043_v7  ;;  %5103 = vmatprep.subr.mxu1 %v13615_v24  ;;  %v11428_v24 = vld [vmem:[%s12588_s4 + $0x160] sm:$0xff] }
0x1547   :  { %5033 = vmatpush1.msra.mxu0 %v13616_v40  ;;  %5104 = vmatpush1.msra.mxu1 %v13617_v61  ;;  %v11433_v40 = vld [vmem:[%s12588_s4 + $0x170] sm:$0xff]  ;;  %v11440_v61 = vld [vmem:[%s12588_s4 + $0x148] sm:$0xff] }
0x1548   :  { %5034 = vmatprep.subr.mxu0 %v13618_v36  ;;  %5105 = vmatprep.subr.mxu1 %v13619_v46  ;;  %v11445_v36 = vld [vmem:[%s12588_s4 + $0x158] sm:$0xff]  ;;  %v11452_v46 = vld [vmem:[%s12588_s4 + $0x140] sm:$0xff] }
0x1549   :  { %5035 = vmatpush1.msra.mxu0 %v13620_v54  ;;  %5106 = vmatpush1.msra.mxu1 %v13621_v35  ;;  %v11457_v54 = vld [vmem:[%s12588_s4 + $0x150] sm:$0xff]  ;;  %v11464_v35 = vld [vmem:[%s12588_s4 + $0x128] sm:$0xff] }
0x154a   :  { %5036 = vmatprep.subr.mxu0 %v13622_v32  ;;  %5107 = vmatprep.subr.mxu1 %v13623_v26  ;;  %v11469_v32 = vld [vmem:[%s12588_s4 + $0x138] sm:$0xff]  ;;  %v11476_v26 = vld [vmem:[%s12588_s4 + $0x120] sm:$0xff] }
0x154b   :  { %5037 = vmatpush1.msra.mxu0 %v13624_v6  ;;  %5108 = vmatpush1.msra.mxu1 %v13625_v8  ;;  %v11481_v6 = vld [vmem:[%s12588_s4 + $0x130] sm:$0xff]  ;;  %v11488_v8 = vld [vmem:[%s12588_s4 + $0x108] sm:$0xff] }
0x154c   :  { %5038 = vmatprep.subr.mxu0 %v13626_v11  ;;  %5109 = vmatprep.subr.mxu1 %v13627_v23  ;;  %v11493_v11 = vld [vmem:[%s12588_s4 + $0x118] sm:$0xff]  ;;  %v11498_v23 = vld [vmem:[%s12588_s4 + $0x100] sm:$0xff] }
0x154d   :  { %5039 = vmatpush1.msra.mxu0 %v13628_v29  ;;  %5110 = vmatpush1.msra.mxu1 %v13629_v33  ;;  %v11505_v29 = vld [vmem:[%s12588_s4 + $0x110] sm:$0xff]  ;;  %v11510_v33 = vld [vmem:[%s12588_s4 + $0xe8] sm:$0xff] }
0x154e   :  { %5040 = vmatprep.subr.mxu0 %v13630_v31  ;;  %5111 = vmatprep.subr.mxu1 %v13631_v44  ;;  %v11515_v31 = vld [vmem:[%s12588_s4 + $0xf8] sm:$0xff]  ;;  %v11522_v44 = vld [vmem:[%s12588_s4 + $0xe0] sm:$0xff] }
0x154f   :  { %5041 = vmatpush1.msra.mxu0 %v13632_v57  ;;  %5074 = vmatprep.mubr.f32.mxu0 %v13633_v62  ;;  %v11527_v57 = vld [vmem:[%s12588_s4 + $0xf0] sm:$0xff] }
0x1550   :  { %5112 = vmatpush1.msra.mxu1 %v13634_v37  ;;  %5145 = vmatprep.mubr.f32.mxu1 %v13633_v62  ;;  %v11532_v37 = vld [vmem:[%s12588_s4 + $0xc8] sm:$0xff] }
0x1551   :  { %5360 = vmatprep.subr.mxu0 %v11320_v5  ;;  %5431 = vmatprep.subr.mxu1 %v11325_v38  ;;  %13638 = vst [vmem:[#allocation20_spill] sm:$0xff] %v11532_v37 }
0x15f0   :  { %v4892_v58 = vpop.f32.mrf.mxu0  ;;  %v4963_v55 = vpop.f32.mrf.mxu1 }
0x15f2   :  { %v4894_v47 = vpop.f32.mrf.mxu0  ;;  %v4965_v12 = vpop.f32.mrf.mxu1 }
0x15f3   :  { %v4972_v59 = vcombine.low %v4892_v58, %v4894_v47  ;;  %v4973_v39 = vcombine.low %v4963_v55, %v4965_v12  ;;  %v11539_v58 = vld [vmem:[%s12588_s4 + $0xd8] sm:$0xff]  ;;  %v11544_v55 = vld [vmem:[%s12588_s4 + $0xc0] sm:$0xff]  ;;  %v11549_v47 = vld [vmem:[%s12588_s4 + $0xd0] sm:$0xff] }
0x15f4   :  { %13639 = vst [vmem:[#allocation21_spill] sm:$0xff] %v11539_v58  ;;  %13640 = vst [vmem:[#allocation22_spill] sm:$0xff] %v11544_v55  ;;  %v11556_v12 = vld [vmem:[%s12588_s4 + $0xa8] sm:$0xff] }
0x15f5   :  { %v4980_v42 = vrot.slane %v4972_v59, %v7966_v53  ;;  %v4987_v45 = vrot.slane %v4973_v39, %v7966_v53  ;;  %13641 = vst [vmem:[#allocation23_spill] sm:$0xff] %v11549_v47  ;;  %13642 = vst [vmem:[#allocation24_spill] sm:$0xff] %v11556_v12  ;;  %v11561_v59 = vld [vmem:[%s12588_s4 + $0xb8] sm:$0xff]  ;;  %v11568_v39 = vld [vmem:[%s12588_s4 + $0xa0] sm:$0xff] }
0x15f6   :  { %13643 = vst [vmem:[#allocation25_spill] sm:$0xff] %v11561_v59  ;;  %13644 = vst [vmem:[#allocation42_spill] sm:$0xff] %v11568_v39 }
0x15f7   :  { %v4988_v49 = vcombine.low %v4980_v42, %v4987_v45  ;;  %v11573_v42 = vld [vmem:[%s12588_s4 + $0xb0] sm:$0xff]  ;;  %v11580_v45 = vld [vmem:[%s12588_s4 + $0x88] sm:$0xff] }
0x15f8   :  { %13645 = vst [vmem:[#allocation43_spill] sm:$0xff] %v11573_v42  ;;  %13646 = vst [vmem:[#allocation28_spill] sm:$0xff] %v11580_v45 }
0x15f9   :  { %v4990_v17 = vadd.f32 %v4988_v49, %v13635_v41  ;;  %v11585_v49 = vld [vmem:[%s12588_s4 + $0x98] sm:$0xff]  ;;  %v11669_v41 = vld [vmem:[%s12588_s4 + $0x30] sm:$0xff] }
0x15fa   :  { %13647 = vst [vmem:[#allocation37_spill] sm:$0xff] %v11585_v49  ;;  %13661 = vst [vmem:[#allocation8_spill] sm:$0xff] %v11669_v41 }
0x15fb   :  { %v4991_v19 = vmul.f32 0.5, %v4990_v17  ;;  %v4996_v18 = vrot.slane %v4990_v17, 6  ;;  %v11592_v17 = vld [vmem:[%s12588_s4 + $0x80] sm:$0xff] }
0x15fc   :  { %13648 = vst [vmem:[#allocation40_spill] sm:$0xff] %v11592_v17 }
0x15fd   :  { %7085 = vtanh.f32 %v4991_v19  ;;  %v11597_v19 = vld [vmem:[%s12588_s4 + $0x90] sm:$0xff] }
0x15fe   :  { %7087 = vtanh.f32 %v4996_v18  ;;  %13649 = vst [vmem:[#allocation33_spill] sm:$0xff] %v11597_v19  ;;  %v11604_v18 = vld [vmem:[%s12588_s4 + $0x68] sm:$0xff] }
0x15ff   :  { %13650 = vst [vmem:[#allocation34_spill] sm:$0xff] %v11604_v18 }
0x160a   :  { %v7086_v43 = vpop.eup %7085 }
0x160b   :  { %v4993_v16 = vmul.f32 0.5, %v7086_v43  ;;  %v7088_v34 = vpop.eup %7087  ;;  %v11609_v43 = vld [vmem:[%s12588_s4 + $0x78] sm:$0xff] }
0x160c   :  { %13651 = vst [vmem:[#allocation38_spill] sm:$0xff] %v11609_v43 }
0x160d   :  { %v4994_v13 = vadd.f32 0.5, %v4993_v16  ;;  %v11616_v16 = vld [vmem:[%s12588_s4 + $0x60] sm:$0xff] }
0x160e   :  { %13652 = vst [vmem:[#allocation39_spill] sm:$0xff] %v11616_v16 }
0x160f   :  { %v5000_v1 = vrot.slane %v4994_v13, 2  ;;  %v5003_v22 = vmul.f32 %v7088_v34, %v4994_v13  ;;  %v5006_v25 = vrot.slane %v4994_v13, 4  ;;  %v11621_v13 = vld [vmem:[%s12588_s4 + $0x70] sm:$0xff]  ;;  %v11633_v34 = vld [vmem:[%s12588_s4 + $0x58] sm:$0xff] }
0x1610   :  { %13653 = vst [vmem:[#allocation10_spill] sm:$0xff] %v11621_v13  ;;  %13655 = vst [vmem:[#allocation4_spill] sm:$0xff] %v11633_v34 }
0x1611   :  { %v5002_v21 = vmul.f32 %v5000_v1, %v11241_v27  ;;  %v11404_v27 = vld [vmem:[%s12588_s4 + $0x180] sm:$0xff]  ;;  %v11628_v1 = vld [vmem:[%s12588_s4 + $0x48] sm:$0xff] }
0x1612   :  { %13654 = vst [vmem:[#allocation11_spill] sm:$0xff] %v11628_v1 }
0x1613   :  { %v11312_v48 = vadd.f32 %v5003_v22, %v5002_v21  ;;  %v11640_v21 = vld [vmem:[%s12588_s4 + $0x40] sm:$0xff]  ;;  %v11645_v22 = vld [vmem:[%s12588_s4 + $0x50] sm:$0xff] }
0x1614   :  { %13656 = vst [vmem:[#allocation26_spill] sm:$0xff] %v11640_v21  ;;  %13657 = vst [vmem:[#allocation27_spill] sm:$0xff] %v11645_v22 }
0x1615   :  { %7089 = vtanh.f32 %v11312_v48 }
0x1622   :  { %v7090_v7 = vpop.eup %7089 }
0x1623   :  { %v5008_v63 = vmul.f32 %v7090_v7, %v5006_v25  ;;  %v11652_v25 = vld [vmem:[%s12588_s4 + $0x28] sm:$0xff]  ;;  %v11657_v7 = vld [vmem:[%s12588_s4 + $0x38] sm:$0xff] }
0x1624   :  { %13658 = vst [vmem:[#allocation12_spill] sm:$0xff] %v11652_v25  ;;  %13659 = vst [vmem:[#allocation13_spill] sm:$0xff] %v11657_v7 }
0x1625   :  { %5075 = vmatmul.mubr.f32.vlgmr.msra.gmra.mxu0 %v5008_v63  ;;  %5146 = vmatmul.mubr.f32.vlgmr.msra.gmra.mxu1 %v5008_v63  ;;  %v11664_v63 = vld [vmem:[%s12588_s4 + $0x20] sm:$0xff] }
0x1626   :  { %5424 = vmatprep.mubr.f32.mxu0 %v13633_v62  ;;  %5495 = vmatprep.mubr.f32.mxu1 %v13633_v62  ;;  %13660 = vst [vmem:[#allocation36_spill] sm:$0xff] %v11664_v63  ;;  %v11681_v62 = vld [vmem:[%s12588_s4 + $0x18] sm:$0xff] }
0x1627   :  { %5361 = vmatpush1.msra.mxu0 %v11332_v51  ;;  %5432 = vmatpush1.msra.mxu1 %v11337_v20  ;;  %13663 = vst [vmem:[#allocation14_spill] sm:$0xff] %v11681_v62 }
0x1628   :  { %5362 = vmatprep.subr.mxu0 %v11344_v52  ;;  %5433 = vmatprep.subr.mxu1 %v11349_v56 }
0x1629   :  { %5363 = vmatpush1.msra.mxu0 %v11356_v15  ;;  %5434 = vmatpush1.msra.mxu1 %v11361_v10 }
0x162a   :  { %5364 = vmatprep.subr.mxu0 %v11368_v50  ;;  %5435 = vmatprep.subr.mxu1 %v11373_v30 }
0x162b   :  { %5365 = vmatpush1.msra.mxu0 %v11380_v0  ;;  %5436 = vmatpush1.msra.mxu1 %v11385_v2 }
0x162c   :  { %5366 = vmatprep.subr.mxu0 %v11392_v14  ;;  %5437 = vmatprep.subr.mxu1 %v11397_v60 }
0x162d   :  { %5367 = vmatpush1.msra.mxu0 %v11404_v27  ;;  %5438 = vmatpush1.msra.mxu1 %v11409_v3 }
0x162e   :  { %5368 = vmatprep.subr.mxu0 %v11416_v4  ;;  %5439 = vmatprep.subr.mxu1 %v11421_v28 }
0x162f   :  { %5369 = vmatpush1.msra.mxu0 %v11428_v24  ;;  %5440 = vmatpush1.msra.mxu1 %v11433_v40 }
0x1630   :  { %5370 = vmatprep.subr.mxu0 %v11440_v61  ;;  %5441 = vmatprep.subr.mxu1 %v11445_v36 }
0x1631   :  { %5371 = vmatpush1.msra.mxu0 %v11452_v46  ;;  %5442 = vmatpush1.msra.mxu1 %v11457_v54 }
0x1632   :  { %5372 = vmatprep.subr.mxu0 %v11464_v35  ;;  %5443 = vmatprep.subr.mxu1 %v11469_v32 }
0x1633   :  { %5373 = vmatpush1.msra.mxu0 %v11476_v26  ;;  %5444 = vmatpush1.msra.mxu1 %v11481_v6 }
0x1634   :  { %5374 = vmatprep.subr.mxu0 %v11488_v8  ;;  %5445 = vmatprep.subr.mxu1 %v11493_v11 }
0x1635   :  { %5375 = vmatpush1.msra.mxu0 %v11498_v23  ;;  %5446 = vmatpush1.msra.mxu1 %v11505_v29 }
0x1636   :  { %5376 = vmatprep.subr.mxu0 %v11510_v33  ;;  %5447 = vmatprep.subr.mxu1 %v11515_v31 }
0x1637   :  { %5377 = vmatpush1.msra.mxu0 %v11522_v44  ;;  %5448 = vmatpush1.msra.mxu1 %v11527_v57 }
0x1638   :  { %5378 = vmatprep.subr.mxu0 %v11532_v37  ;;  %5449 = vmatprep.subr.mxu1 %v11539_v58 }
0x1639   :  { %5379 = vmatpush1.msra.mxu0 %v11544_v55  ;;  %5450 = vmatpush1.msra.mxu1 %v11549_v47 }
0x163a   :  { %5380 = vmatprep.subr.mxu0 %v11556_v12  ;;  %5451 = vmatprep.subr.mxu1 %v11561_v59 }
0x163b   :  { %5381 = vmatpush1.msra.mxu0 %v11568_v39  ;;  %5452 = vmatpush1.msra.mxu1 %v11573_v42 }
0x163c   :  { %5382 = vmatprep.subr.mxu0 %v11580_v45  ;;  %5453 = vmatprep.subr.mxu1 %v11585_v49 }
0x163d   :  { %5383 = vmatpush1.msra.mxu0 %v11592_v17  ;;  %5454 = vmatpush1.msra.mxu1 %v11597_v19 }
0x163e   :  { %5384 = vmatprep.subr.mxu0 %v11604_v18  ;;  %5455 = vmatprep.subr.mxu1 %v11609_v43 }
0x163f   :  { %5385 = vmatpush1.msra.mxu0 %v11616_v16  ;;  %5456 = vmatpush1.msra.mxu1 %v11621_v13  ;;  %v13669_v13 = vld [vmem:[#allocation32_spill] sm:$0xff] }
0x1640   :  { %5386 = vmatprep.subr.mxu0 %v11628_v1  ;;  %5457 = vmatprep.subr.mxu1 %v11633_v34  ;;  %v13667_v34 = vld [vmem:[#allocation30_spill] sm:$0xff]  ;;  %v13668_v1 = vld [vmem:[#allocation31_spill] sm:$0xff] }
0x1641   :  { %5387 = vmatpush1.msra.mxu0 %v11640_v21  ;;  %5458 = vmatpush1.msra.mxu1 %v11645_v22  ;;  %v11688_v21 = vld [vmem:[%s12588_s4] sm:$0xff]  ;;  %v11693_v22 = vld [vmem:[%s12588_s4 + $0x10] sm:$0xff] }
0x1642   :  { %5388 = vmatprep.subr.mxu0 %v11652_v25  ;;  %5459 = vmatprep.subr.mxu1 %v11657_v7  ;;  %13664 = vst [vmem:[#allocation15_spill] sm:$0xff] %v11688_v21  ;;  %13665 = vst [vmem:[#allocation16_spill] sm:$0xff] %v11693_v22  ;;  %v3576_v7 = vld [vmem:[%s12591_s3] sm:$0xf]  ;;  %v13666_v25 = vld [vmem:[#allocation29_spill] sm:$0xff] }
0x1643   :  { %5389 = vmatpush1.msra.mxu0 %v11664_v63  ;;  %5460 = vmatpush1.msra.mxu1 %v11669_v41  ;;  %v3586_v63 = vrot.slane %v3576_v7, %v13666_v25  ;;  %v3590_v41 = vrot.slane %v3576_v7, %v13667_v34 }
0x1644   :  { %5390 = vmatprep.subr.mxu0 %v11676_v9  ;;  %5461 = vmatprep.subr.mxu1 %v11681_v62  ;;  %v3594_v9 = vrot.slane %v3576_v7, %v13668_v1  ;;  %v3598_v62 = vrot.slane %v3576_v7, %v13669_v13 }
0x1645   :  { %5391 = vmatpush1.msra.mxu0 %v11688_v21  ;;  %5462 = vmatpush1.msra.mxu1 %v11693_v22  ;;  %v3607_v22 = vld [vmem:[%s12592_s5] sm:$0xf]  ;;  %v3580_v21 = vpop.permute.xlu0 %3579 }
0x1646   :  { %5544 = vmatprep.subr.mxu0 %v11320_v5  ;;  %5615 = vmatprep.subr.mxu1 %v11325_v38  ;;  %v3612_v5 = vrot.slane %v3607_v22, %v13666_v25  ;;  %v3616_v38 = vrot.slane %v3607_v22, %v13667_v34  ;;  %v3620_v16 = vrot.slane %v3607_v22, %v13668_v1 }
0x1647   :  { %v3624_v43 = vrot.slane %v3607_v22, %v13669_v13  ;;  %v3603_v18 = vmul.f32 %v3586_v63, %v3580_v21  ;;  %v3604_v19 = vmul.f32 %v3590_v41, %v3580_v21  ;;  %v3605_v17 = vmul.f32 %v3594_v9, %v3580_v21  ;;  %v13675_v63 = vld [vmem:[#allocation24_spill] sm:$0xff] }
0x1648   :  { %v3606_v49 = vmul.f32 %v3598_v62, %v3580_v21  ;;  %v13673_v21 = vld [vmem:[#allocation22_spill] sm:$0xff] }
0x1649   :  { %v3629_v45 = vadd.f32 %v3612_v5, %v3603_v18  ;;  %v3630_v42 = vadd.f32 %v3616_v38, %v3604_v19  ;;  %v3631_v7 = vadd.f32 %v3620_v16, %v3605_v17  ;;  %v6942_v18 = vld [vmem:[%s12595_s6] ss:$0 sm:$0xff] }
0x164a   :  { %v3632_v39 = vadd.f32 %v3624_v43, %v3606_v49  ;;  %v13697_v13 = vld [vmem:[#allocation15_spill] sm:$0xff] }
0x164b   :  { %v3637_v59 = vcombine.low %v3629_v45, %v3630_v42 }
0x164c   :  { %v3638_v12 = vcombine.low %v3631_v7, %v3632_v39  ;;  %v13676_v7 = vld [vmem:[#allocation25_spill] sm:$0xff] }
0x164d   :  { %v3645_v34 = vrot.slane %v3637_v59, %v7966_v53 }
0x164e   :  { %v3652_v1 = vrot.slane %v3638_v12, %v7966_v53 }
0x1650   :  { %v11721_v62 = vcombine.low %v3645_v34, %v3652_v1  ;;  %v13671_v1 = vld [vmem:[#allocation20_spill] sm:$0xff]  ;;  %v13672_v34 = vld [vmem:[#allocation21_spill] sm:$0xff] }
0x1652   :  { %13670 = vst [vmem:[#allocation17_spill] sm:$0xff] %v11721_v62 }
0x16e5   :  { %v5076_v47 = vpop.f32.mrf.mxu0  ;;  %v5147_v55 = vpop.f32.mrf.mxu1 }
0x16e7   :  { %v5078_v58 = vpop.f32.mrf.mxu0  ;;  %v5149_v25 = vpop.f32.mrf.mxu1 }
0x16e8   :  { %v5156_v37 = vcombine.low %v5076_v47, %v5078_v58  ;;  %v5157_v22 = vcombine.low %v5147_v55, %v5149_v25  ;;  %v13674_v25 = vld [vmem:[#allocation23_spill] sm:$0xff] }
0x16ea   :  { %v5164_v41 = vrot.slane %v5156_v37, %v7966_v53  ;;  %v5171_v9 = vrot.slane %v5157_v22, %v7966_v53  ;;  %v13677_v22 = vld [vmem:[#allocation42_spill] sm:$0xff] }
0x16ec   :  { %v5172_v5 = vcombine.low %v5164_v41, %v5171_v9  ;;  %v13678_v41 = vld [vmem:[#allocation43_spill] sm:$0xff]  ;;  %v13679_v9 = vld [vmem:[#allocation28_spill] sm:$0xff] }
0x16ee   :  { %v5174_v38 = vadd.f32 %v5172_v5, %v11721_v62  ;;  %v13680_v5 = vld [vmem:[#allocation37_spill] sm:$0xff]  ;;  %v13698_v62 = vmov 0.0  }
0x16f0   :  { %v5175_v39 = vmul.f32 0.5, %v5174_v38  ;;  %v5180_v42 = vrot.slane %v5174_v38, 6  ;;  %v13681_v38 = vld [vmem:[#allocation40_spill] sm:$0xff] }
0x16f2   :  { %7091 = vtanh.f32 %v5175_v39  ;;  %v13682_v39 = vld [vmem:[#allocation33_spill] sm:$0xff] }
0x16f3   :  { %7093 = vtanh.f32 %v5180_v42  ;;  %v13683_v42 = vld [vmem:[#allocation34_spill] sm:$0xff] }
0x16ff   :  { %v7092_v45 = vpop.eup %7091 }
0x1700   :  { %v5177_v58 = vmul.f32 0.5, %v7092_v45  ;;  %v7094_v49 = vpop.eup %7093  ;;  %v13684_v45 = vld [vmem:[#allocation38_spill] sm:$0xff] }
0x1702   :  { %v5178_v47 = vadd.f32 0.5, %v5177_v58  ;;  %v13685_v58 = vld [vmem:[#allocation39_spill] sm:$0xff] }
0x1704   :  { %v5184_v59 = vrot.slane %v5178_v47, 2  ;;  %v5187_v12 = vmul.f32 %v7094_v49, %v5178_v47  ;;  %v5190_v17 = vrot.slane %v5178_v47, 4  ;;  %v13686_v47 = vld [vmem:[#allocation10_spill] sm:$0xff]  ;;  %v13688_v49 = vld [vmem:[#allocation4_spill] sm:$0xff] }
0x1706   :  { %v5186_v55 = vmul.f32 %v5184_v59, %v11312_v48  ;;  %v13687_v59 = vld [vmem:[#allocation11_spill] sm:$0xff] }
0x1708   :  { %v11725_v37 = vadd.f32 %v5187_v12, %v5186_v55  ;;  %v13689_v55 = vld [vmem:[#allocation26_spill] sm:$0xff]  ;;  %v13690_v12 = vld [vmem:[#allocation27_spill] sm:$0xff] }
0x170a   :  { %7095 = vtanh.f32 %v11725_v37 }
0x1717   :  { %v7096_v19 = vpop.eup %7095 }
0x1718   :  { %v5192_v43 = vmul.f32 %v7096_v19, %v5190_v17  ;;  %v13691_v17 = vld [vmem:[#allocation12_spill] sm:$0xff]  ;;  %v13692_v19 = vld [vmem:[#allocation13_spill] sm:$0xff] }
0x171a   :  { %5425 = vmatmul.mubr.f32.vlgmr.msra.gmra.mxu0 %v5192_v43  ;;  %5496 = vmatmul.mubr.f32.vlgmr.msra.gmra.mxu1 %v5192_v43  ;;  %v5200_v16 = vmul.f32 %v6942_v18, %v5192_v43  ;;  %v13693_v18 = vld [vmem:[#allocation36_spill] sm:$0xff] }
0x171b   :  { %5545 = vmatpush1.msra.mxu0 %v11332_v51  ;;  %5616 = vmatpush1.msra.mxu1 %v11337_v20  ;;  %v13694_v43 = vld [vmem:[#allocation8_spill] sm:$0xff] }
0x171c   :  { %v5201_v48 = vsel %vm1924_vm0, %v5200_v16, 0.0  ;;  %5546 = vmatprep.subr.mxu0 %v11344_v52  ;;  %5617 = vmatprep.subr.mxu1 %v11349_v56  ;;  %v13695_v16 = vld [vmem:[#allocation9_spill] sm:$0xff] }
0x171d   :  { %5202 = vadd.xlane.f32.xlu1 %v5201_v48  ;;  %5547 = vmatpush1.msra.mxu0 %v11356_v15  ;;  %v13696_v48 = vld [vmem:[#allocation14_spill] sm:$0xff] }
0x171e   :  { %5618 = vmatpush1.msra.mxu1 %v11361_v10  ;;  %5548 = vmatprep.subr.mxu0 %v11368_v50 }
0x171f   :  { %5619 = vmatprep.subr.mxu1 %v11373_v30  ;;  %5549 = vmatpush1.msra.mxu0 %v11380_v0 }
0x1720   :  { %5620 = vmatpush1.msra.mxu1 %v11385_v2  ;;  %5550 = vmatprep.subr.mxu0 %v11392_v14 }
0x1721   :  { %5621 = vmatprep.subr.mxu1 %v11397_v60  ;;  %5551 = vmatpush1.msra.mxu0 %v11404_v27 }
0x1722   :  { %5622 = vmatpush1.msra.mxu1 %v11409_v3  ;;  %5552 = vmatprep.subr.mxu0 %v11416_v4 }
0x1723   :  { %5623 = vmatprep.subr.mxu1 %v11421_v28  ;;  %5553 = vmatpush1.msra.mxu0 %v11428_v24 }
0x1724   :  { %5624 = vmatpush1.msra.mxu1 %v11433_v40  ;;  %5554 = vmatprep.subr.mxu0 %v11440_v61 }
0x1725   :  { %5625 = vmatprep.subr.mxu1 %v11445_v36  ;;  %5555 = vmatpush1.msra.mxu0 %v11452_v46 }
0x1726   :  { %5626 = vmatpush1.msra.mxu1 %v11457_v54  ;;  %5556 = vmatprep.subr.mxu0 %v11464_v35 }
0x1727   :  { %5627 = vmatprep.subr.mxu1 %v11469_v32  ;;  %5557 = vmatpush1.msra.mxu0 %v11476_v26 }
0x1728   :  { %5628 = vmatpush1.msra.mxu1 %v11481_v6  ;;  %5558 = vmatprep.subr.mxu0 %v11488_v8 }
0x1729   :  { %5629 = vmatprep.subr.mxu1 %v11493_v11  ;;  %5559 = vmatpush1.msra.mxu0 %v11498_v23 }
0x172a   :  { %5630 = vmatpush1.msra.mxu1 %v11505_v29  ;;  %5560 = vmatprep.subr.mxu0 %v11510_v33 }
0x172b   :  { %5631 = vmatprep.subr.mxu1 %v11515_v31  ;;  %5561 = vmatpush1.msra.mxu0 %v11522_v44 }
0x172c   :  { %5632 = vmatpush1.msra.mxu1 %v11527_v57  ;;  %5562 = vmatprep.subr.mxu0 %v13671_v1 }
0x172d   :  { %5633 = vmatprep.subr.mxu1 %v13672_v34  ;;  %5563 = vmatpush1.msra.mxu0 %v13673_v21 }
0x172e   :  { %5634 = vmatpush1.msra.mxu1 %v13674_v25  ;;  %5564 = vmatprep.subr.mxu0 %v13675_v63 }
0x172f   :  { %5635 = vmatprep.subr.mxu1 %v13676_v7  ;;  %5565 = vmatpush1.msra.mxu0 %v13677_v22 }
0x1730   :  { %5636 = vmatpush1.msra.mxu1 %v13678_v41  ;;  %5566 = vmatprep.subr.mxu0 %v13679_v9 }
0x1731   :  { %5637 = vmatprep.subr.mxu1 %v13680_v5  ;;  %5567 = vmatpush1.msra.mxu0 %v13681_v38 }
0x1732   :  { %5638 = vmatpush1.msra.mxu1 %v13682_v39  ;;  %5568 = vmatprep.subr.mxu0 %v13683_v42 }
0x1733   :  { %5639 = vmatprep.subr.mxu1 %v13684_v45  ;;  %5569 = vmatpush1.msra.mxu0 %v13685_v58 }
0x1734   :  { %5640 = vmatpush1.msra.mxu1 %v13686_v47  ;;  %5570 = vmatprep.subr.mxu0 %v13687_v59  ;;  %v13702_v47 = vld [vmem:[#allocation7_spill] sm:$0xff] }
0x1735   :  { %5641 = vmatprep.subr.mxu1 %v13688_v49  ;;  %5571 = vmatpush1.msra.mxu0 %v13689_v55  ;;  %v13699_v49 = vld [vmem:[#allocation16_spill] sm:$0xff] }
0x1736   :  { %5642 = vmatpush1.msra.mxu1 %v13690_v12  ;;  %5572 = vmatprep.subr.mxu0 %v13691_v17  ;;  %v13700_v12 = vld [vmem:[#allocation18_spill] sm:$0xff]  ;;  %v13701_v17 = vld [vmem:[#allocation19_spill] sm:$0xff] }
0x1737   :  { %5643 = vmatprep.subr.mxu1 %v13692_v19  ;;  %5573 = vmatpush1.msra.mxu0 %v13693_v18  ;;  %v6943_v19 = vld [vmem:[#allocation3] ss:$0 sm:$0xff] }
0x1738   :  { %5644 = vmatpush1.msra.mxu1 %v13694_v43  ;;  %5574 = vmatprep.subr.mxu0 %v13695_v16 }
0x1739   :  { %5645 = vmatprep.subr.mxu1 %v13696_v48  ;;  %5575 = vmatpush1.msra.mxu0 %v13697_v13 }
0x173a   :  { %5608 = vmatprep.mubr.f32.mxu0 %v13698_v62  ;;  %5646 = vmatpush1.msra.mxu1 %v13699_v49 }
0x173b   :  { %5679 = vmatprep.mubr.f32.mxu1 %v13698_v62  ;;  %5728 = vmatprep.subr.mxu0 %v13700_v12 }
0x173c   :  { %5799 = vmatprep.subr.mxu1 %v13701_v17 }
0x17a6   :  { %v5203_v18 = vpop.xlane.xlu1 %5202 }
0x17a7   :  { %v5211_v55 = vadd.f32 %v6943_v19, %v5203_v18 }
0x17a9   :  { %6944 = vst.msk [vmem:[%s12596_s8 + $0x4] sm:$0x3] %vm1936_vm1, %v5211_v55  ;;  %5217 = vperm.xlu1 %6952, %v5211_v55  }
0x17da   :  { %v5426_v13 = vpop.f32.mrf.mxu0  ;;  %v5497_v48 = vpop.f32.mrf.mxu1 }
0x17dc   :  { %v5428_v16 = vpop.f32.mrf.mxu0  ;;  %v5499_v43 = vpop.f32.mrf.mxu1 }
0x17dd   :  { %v5506_v49 = vcombine.low %v5426_v13, %v5428_v16  ;;  %v5507_v59 = vcombine.low %v5497_v48, %v5499_v43  ;;  %v13713_v16 = vld [vmem:[#allocation27_spill] sm:$0xff]  ;;  %v13714_v48 = vld [vmem:[#allocation12_spill] sm:$0xff] }
0x17df   :  { %v5514_v62 = vrot.slane %v5506_v49, %v7966_v53  ;;  %v5521_v12 = vrot.slane %v5507_v59, %v7966_v53 }
0x17e1   :  { %v5522_v17 = vcombine.low %v5514_v62, %v5521_v12  ;;  %v13711_v12 = vld [vmem:[#allocation4_spill] sm:$0xff] }
0x17e3   :  { %v5524_v58 = vadd.f32 %v5522_v17, %v13702_v47  ;;  %v13710_v47 = vld [vmem:[#allocation11_spill] sm:$0xff]  ;;  %v13712_v17 = vld [vmem:[#allocation26_spill] sm:$0xff] }
0x17e5   :  { %v5525_v19 = vmul.f32 0.5, %v5524_v58  ;;  %v5530_v18 = vrot.slane %v5524_v58, 6  ;;  %v13709_v58 = vld [vmem:[#allocation10_spill] sm:$0xff] }
0x17e7   :  { %7097 = vtanh.f32 %v5525_v19  ;;  %v13715_v19 = vld [vmem:[#allocation13_spill] sm:$0xff] }
0x17e8   :  { %7099 = vtanh.f32 %v5530_v18  ;;  %v13716_v18 = vld [vmem:[#allocation36_spill] sm:$0xff] }
0x17f4   :  { %v7098_v45 = vpop.eup %7097 }
0x17f5   :  { %v5527_v42 = vmul.f32 0.5, %v7098_v45  ;;  %v7100_v38 = vpop.eup %7099  ;;  %v13708_v45 = vld [vmem:[#allocation39_spill] sm:$0xff] }
0x17f7   :  { %v5528_v55 = vadd.f32 0.5, %v5527_v42  ;;  %v13707_v42 = vld [vmem:[#allocation38_spill] sm:$0xff] }
0x17f9   :  { %v5534_v39 = vrot.slane %v5528_v55, 2  ;;  %v5537_v13 = vmul.f32 %v7100_v38, %v5528_v55  ;;  %v5540_v59 = vrot.slane %v5528_v55, 4  ;;  %v13705_v38 = vld [vmem:[#allocation33_spill] sm:$0xff]  ;;  %v13717_v55 = vld [vmem:[#allocation8_spill] sm:$0xff] }
0x17fb   :  { %v5536_v5 = vmul.f32 %v5534_v39, %v11725_v37  ;;  %v13703_v37 = vld [vmem:[#allocation37_spill] sm:$0xff]  ;;  %v13706_v39 = vld [vmem:[#allocation34_spill] sm:$0xff] }
0x17fd   :  { %v11806_v43 = vadd.f32 %v5537_v13, %v5536_v5  ;;  %v13704_v5 = vld [vmem:[#allocation40_spill] sm:$0xff]  ;;  %v13718_v13 = vld [vmem:[#allocation9_spill] sm:$0xff] }
0x17ff   :  { %7101 = vtanh.f32 %v11806_v43 }
0x180c   :  { %v7102_v62 = vpop.eup %7101 }
0x180d   :  { %v5542_v49 = vmul.f32 %v7102_v62, %v5540_v59  ;;  %v13719_v59 = vld [vmem:[#allocation14_spill] sm:$0xff]  ;;  %v13720_v62 = vld [vmem:[#allocation15_spill] sm:$0xff] }
0x180f   :  { %5609 = vmatmul.mubr.f32.vlgmr.msra.gmra.mxu0 %v5542_v49  ;;  %5680 = vmatmul.mubr.f32.vlgmr.msra.gmra.mxu1 %v5542_v49  ;;  %v13721_v49 = vmov 0.0  }
0x1810   :  { %5729 = vmatpush1.msra.mxu0 %v11332_v51  ;;  %5800 = vmatpush1.msra.mxu1 %v11337_v20 }
0x1811   :  { %5730 = vmatprep.subr.mxu0 %v11344_v52  ;;  %5801 = vmatprep.subr.mxu1 %v11349_v56 }
0x1812   :  { %5731 = vmatpush1.msra.mxu0 %v11356_v15  ;;  %5802 = vmatpush1.msra.mxu1 %v11361_v10 }
0x1813   :  { %5732 = vmatprep.subr.mxu0 %v11368_v50  ;;  %5803 = vmatprep.subr.mxu1 %v11373_v30 }
0x1814   :  { %5733 = vmatpush1.msra.mxu0 %v11380_v0  ;;  %5804 = vmatpush1.msra.mxu1 %v11385_v2 }
0x1815   :  { %5734 = vmatprep.subr.mxu0 %v11392_v14  ;;  %5805 = vmatprep.subr.mxu1 %v11397_v60 }
0x1816   :  { %5735 = vmatpush1.msra.mxu0 %v11404_v27  ;;  %5806 = vmatpush1.msra.mxu1 %v11409_v3 }
0x1817   :  { %5736 = vmatprep.subr.mxu0 %v11416_v4  ;;  %5807 = vmatprep.subr.mxu1 %v11421_v28 }
0x1818   :  { %5737 = vmatpush1.msra.mxu0 %v11428_v24  ;;  %5808 = vmatpush1.msra.mxu1 %v11433_v40 }
0x1819   :  { %5738 = vmatprep.subr.mxu0 %v11440_v61  ;;  %5809 = vmatprep.subr.mxu1 %v11445_v36 }
0x181a   :  { %5739 = vmatpush1.msra.mxu0 %v11452_v46  ;;  %5810 = vmatpush1.msra.mxu1 %v11457_v54 }
0x181b   :  { %5740 = vmatprep.subr.mxu0 %v11464_v35  ;;  %5811 = vmatprep.subr.mxu1 %v11469_v32 }
0x181c   :  { %5741 = vmatpush1.msra.mxu0 %v11476_v26  ;;  %5812 = vmatpush1.msra.mxu1 %v11481_v6 }
0x181d   :  { %5742 = vmatprep.subr.mxu0 %v11488_v8  ;;  %5813 = vmatprep.subr.mxu1 %v11493_v11 }
0x181e   :  { %5743 = vmatpush1.msra.mxu0 %v11498_v23  ;;  %5814 = vmatpush1.msra.mxu1 %v11505_v29 }
0x181f   :  { %5744 = vmatprep.subr.mxu0 %v11510_v33  ;;  %5815 = vmatprep.subr.mxu1 %v11515_v31 }
0x1820   :  { %5745 = vmatpush1.msra.mxu0 %v11522_v44  ;;  %5816 = vmatpush1.msra.mxu1 %v11527_v57 }
0x1821   :  { %5746 = vmatprep.subr.mxu0 %v13671_v1  ;;  %5817 = vmatprep.subr.mxu1 %v13672_v34 }
0x1822   :  { %5747 = vmatpush1.msra.mxu0 %v13673_v21  ;;  %5818 = vmatpush1.msra.mxu1 %v13674_v25 }
0x1823   :  { %5748 = vmatprep.subr.mxu0 %v13675_v63  ;;  %5819 = vmatprep.subr.mxu1 %v13676_v7 }
0x1824   :  { %5749 = vmatpush1.msra.mxu0 %v13677_v22  ;;  %5820 = vmatpush1.msra.mxu1 %v13678_v41 }
0x1825   :  { %5750 = vmatprep.subr.mxu0 %v13679_v9  ;;  %5821 = vmatprep.subr.mxu1 %v13703_v37 }
0x1826   :  { %5751 = vmatpush1.msra.mxu0 %v13704_v5  ;;  %5822 = vmatpush1.msra.mxu1 %v13705_v38 }
0x1827   :  { %5752 = vmatprep.subr.mxu0 %v13706_v39  ;;  %5823 = vmatprep.subr.mxu1 %v13707_v42 }
0x1828   :  { %5753 = vmatpush1.msra.mxu0 %v13708_v45  ;;  %5824 = vmatpush1.msra.mxu1 %v13709_v58  ;;  %v13725_v45 = vld [vmem:[#allocation41_spill] sm:$0xff] }
0x1829   :  { %5754 = vmatprep.subr.mxu0 %v13710_v47  ;;  %5825 = vmatprep.subr.mxu1 %v13711_v12  ;;  %v13722_v12 = vld [vmem:[#allocation16_spill] sm:$0xff] }
0x182a   :  { %5755 = vmatpush1.msra.mxu0 %v13712_v17  ;;  %5826 = vmatpush1.msra.mxu1 %v13713_v16  ;;  %v13723_v16 = vld [vmem:[#allocation18_spill] sm:$0xff] }
0x182b   :  { %5756 = vmatprep.subr.mxu0 %v13714_v48  ;;  %5827 = vmatprep.subr.mxu1 %v13715_v19  ;;  %v13724_v48 = vld [vmem:[#allocation19_spill] sm:$0xff] }
0x182c   :  { %5757 = vmatpush1.msra.mxu0 %v13716_v18  ;;  %5828 = vmatpush1.msra.mxu1 %v13717_v55 }
0x182d   :  { %5758 = vmatprep.subr.mxu0 %v13718_v13  ;;  %5829 = vmatprep.subr.mxu1 %v13719_v59 }
0x182e   :  { %5759 = vmatpush1.msra.mxu0 %v13720_v62  ;;  %5792 = vmatprep.mubr.f32.mxu0 %v13721_v49 }
0x182f   :  { %5830 = vmatpush1.msra.mxu1 %v13722_v12  ;;  %5863 = vmatprep.mubr.f32.mxu1 %v13721_v49 }
0x1830   :  { %5912 = vmatprep.subr.mxu0 %v13723_v16  ;;  %5983 = vmatprep.subr.mxu1 %v13724_v48 }
0x18cf   :  { %v5610_v19 = vpop.f32.mrf.mxu0  ;;  %v5681_v18 = vpop.f32.mrf.mxu1 }
0x18d1   :  { %v5612_v17 = vpop.f32.mrf.mxu0  ;;  %v5683_v55 = vpop.f32.mrf.mxu1 }
0x18d2   :  { %v5690_v47 = vcombine.low %v5610_v19, %v5612_v17  ;;  %v5691_v13 = vcombine.low %v5681_v18, %v5683_v55 }
0x18d4   :  { %v5698_v59 = vrot.slane %v5690_v47, %v7966_v53  ;;  %v5705_v62 = vrot.slane %v5691_v13, %v7966_v53  ;;  %v13737_v13 = vld [vmem:[#allocation12_spill] sm:$0xff] }
0x18d6   :  { %v5706_v58 = vcombine.low %v5698_v59, %v5705_v62  ;;  %v13738_v59 = vld [vmem:[#allocation13_spill] sm:$0xff]  ;;  %v13739_v62 = vld [vmem:[#allocation36_spill] sm:$0xff] }
0x18d8   :  { %v5708_v42 = vadd.f32 %v5706_v58, %v13725_v45  ;;  %v13732_v45 = vld [vmem:[#allocation10_spill] sm:$0xff]  ;;  %v13733_v58 = vld [vmem:[#allocation11_spill] sm:$0xff] }
0x18da   :  { %v5709_v12 = vmul.f32 0.5, %v5708_v42  ;;  %v5714_v49 = vrot.slane %v5708_v42, 6  ;;  %v13731_v42 = vld [vmem:[#allocation39_spill] sm:$0xff] }
0x18dc   :  { %7103 = vtanh.f32 %v5709_v12  ;;  %v13734_v12 = vld [vmem:[#allocation4_spill] sm:$0xff] }
0x18dd   :  { %7105 = vtanh.f32 %v5714_v49  ;;  %v13740_v49 = vld [vmem:[#allocation8_spill] sm:$0xff] }
0x18e9   :  { %v7104_v16 = vpop.eup %7103 }
0x18ea   :  { %v5711_v39 = vmul.f32 0.5, %v7104_v16  ;;  %v7106_v5 = vpop.eup %7105  ;;  %v13735_v16 = vld [vmem:[#allocation26_spill] sm:$0xff] }
0x18ec   :  { %v5712_v48 = vadd.f32 0.5, %v5711_v39  ;;  %v13730_v39 = vld [vmem:[#allocation38_spill] sm:$0xff] }
0x18ee   :  { %v5718_v38 = vrot.slane %v5712_v48, 2  ;;  %v5721_v17 = vmul.f32 %v7106_v5, %v5712_v48  ;;  %v5724_v47 = vrot.slane %v5712_v48, 4  ;;  %v13728_v5 = vld [vmem:[#allocation33_spill] sm:$0xff]  ;;  %v13736_v48 = vld [vmem:[#allocation27_spill] sm:$0xff] }
0x18f0   :  { %v5720_v37 = vmul.f32 %v5718_v38, %v11806_v43  ;;  %v13726_v43 = vld [vmem:[#allocation37_spill] sm:$0xff]  ;;  %v13729_v38 = vld [vmem:[#allocation34_spill] sm:$0xff] }
0x18f2   :  { %v11879_v19 = vadd.f32 %v5721_v17, %v5720_v37  ;;  %v13727_v37 = vld [vmem:[#allocation40_spill] sm:$0xff]  ;;  %v13741_v17 = vld [vmem:[#allocation9_spill] sm:$0xff] }
0x18f4   :  { %7107 = vtanh.f32 %v11879_v19 }
0x1901   :  { %v7108_v18 = vpop.eup %7107 }
0x1902   :  { %v5726_v55 = vmul.f32 %v7108_v18, %v5724_v47  ;;  %v13742_v47 = vld [vmem:[#allocation14_spill] sm:$0xff]  ;;  %v13743_v18 = vld [vmem:[#allocation15_spill] sm:$0xff] }
0x1904   :  { %5793 = vmatmul.mubr.f32.vlgmr.msra.gmra.mxu0 %v5726_v55  ;;  %5864 = vmatmul.mubr.f32.vlgmr.msra.gmra.mxu1 %v5726_v55  ;;  %v13744_v55 = vmov 0.0  }
0x1905   :  { %5913 = vmatpush1.msra.mxu0 %v11332_v51  ;;  %5984 = vmatpush1.msra.mxu1 %v11337_v20 }
0x1906   :  { %5914 = vmatprep.subr.mxu0 %v11344_v52  ;;  %5985 = vmatprep.subr.mxu1 %v11349_v56 }
0x1907   :  { %5915 = vmatpush1.msra.mxu0 %v11356_v15  ;;  %5986 = vmatpush1.msra.mxu1 %v11361_v10 }
0x1908   :  { %5916 = vmatprep.subr.mxu0 %v11368_v50  ;;  %5987 = vmatprep.subr.mxu1 %v11373_v30 }
0x1909   :  { %5917 = vmatpush1.msra.mxu0 %v11380_v0  ;;  %5988 = vmatpush1.msra.mxu1 %v11385_v2 }
0x190a   :  { %5918 = vmatprep.subr.mxu0 %v11392_v14  ;;  %5989 = vmatprep.subr.mxu1 %v11397_v60 }
0x190b   :  { %5919 = vmatpush1.msra.mxu0 %v11404_v27  ;;  %5990 = vmatpush1.msra.mxu1 %v11409_v3 }
0x190c   :  { %5920 = vmatprep.subr.mxu0 %v11416_v4  ;;  %5991 = vmatprep.subr.mxu1 %v11421_v28 }
0x190d   :  { %5921 = vmatpush1.msra.mxu0 %v11428_v24  ;;  %5992 = vmatpush1.msra.mxu1 %v11433_v40 }
0x190e   :  { %5922 = vmatprep.subr.mxu0 %v11440_v61  ;;  %5993 = vmatprep.subr.mxu1 %v11445_v36 }
0x190f   :  { %5923 = vmatpush1.msra.mxu0 %v11452_v46  ;;  %5994 = vmatpush1.msra.mxu1 %v11457_v54 }
0x1910   :  { %5924 = vmatprep.subr.mxu0 %v11464_v35  ;;  %5995 = vmatprep.subr.mxu1 %v11469_v32 }
0x1911   :  { %5925 = vmatpush1.msra.mxu0 %v11476_v26  ;;  %5996 = vmatpush1.msra.mxu1 %v11481_v6 }
0x1912   :  { %5926 = vmatprep.subr.mxu0 %v11488_v8  ;;  %5997 = vmatprep.subr.mxu1 %v11493_v11 }
0x1913   :  { %5927 = vmatpush1.msra.mxu0 %v11498_v23  ;;  %5998 = vmatpush1.msra.mxu1 %v11505_v29 }
0x1914   :  { %5928 = vmatprep.subr.mxu0 %v11510_v33  ;;  %5999 = vmatprep.subr.mxu1 %v11515_v31 }
0x1915   :  { %5929 = vmatpush1.msra.mxu0 %v11522_v44  ;;  %6000 = vmatpush1.msra.mxu1 %v11527_v57 }
0x1916   :  { %5930 = vmatprep.subr.mxu0 %v13671_v1  ;;  %6001 = vmatprep.subr.mxu1 %v13672_v34 }
0x1917   :  { %5931 = vmatpush1.msra.mxu0 %v13673_v21  ;;  %6002 = vmatpush1.msra.mxu1 %v13674_v25 }
0x1918   :  { %5932 = vmatprep.subr.mxu0 %v13675_v63  ;;  %6003 = vmatprep.subr.mxu1 %v13676_v7 }
0x1919   :  { %5933 = vmatpush1.msra.mxu0 %v13677_v22  ;;  %6004 = vmatpush1.msra.mxu1 %v13678_v41 }
0x191a   :  { %5934 = vmatprep.subr.mxu0 %v13679_v9  ;;  %6005 = vmatprep.subr.mxu1 %v13726_v43 }
0x191b   :  { %5935 = vmatpush1.msra.mxu0 %v13727_v37  ;;  %6006 = vmatpush1.msra.mxu1 %v13728_v5 }
0x191c   :  { %5936 = vmatprep.subr.mxu0 %v13729_v38  ;;  %6007 = vmatprep.subr.mxu1 %v13730_v39 }
0x191d   :  { %5937 = vmatpush1.msra.mxu0 %v13731_v42  ;;  %6008 = vmatpush1.msra.mxu1 %v13732_v45  ;;  %v13748_v42 = vld [vmem:[#allocation5_spill] sm:$0xff] }
0x191e   :  { %5938 = vmatprep.subr.mxu0 %v13733_v58  ;;  %6009 = vmatprep.subr.mxu1 %v13734_v12  ;;  %v13745_v12 = vld [vmem:[#allocation16_spill] sm:$0xff] }
0x191f   :  { %5939 = vmatpush1.msra.mxu0 %v13735_v16  ;;  %6010 = vmatpush1.msra.mxu1 %v13736_v48  ;;  %v13746_v48 = vld [vmem:[#allocation18_spill] sm:$0xff] }
0x1920   :  { %5940 = vmatprep.subr.mxu0 %v13737_v13  ;;  %6011 = vmatprep.subr.mxu1 %v13738_v59  ;;  %v13747_v13 = vld [vmem:[#allocation19_spill] sm:$0xff] }
0x1921   :  { %5941 = vmatpush1.msra.mxu0 %v13739_v62  ;;  %6012 = vmatpush1.msra.mxu1 %v13740_v49 }
0x1922   :  { %5942 = vmatprep.subr.mxu0 %v13741_v17  ;;  %6013 = vmatprep.subr.mxu1 %v13742_v47 }
0x1923   :  { %5943 = vmatpush1.msra.mxu0 %v13743_v18  ;;  %5976 = vmatprep.mubr.f32.mxu0 %v13744_v55 }
0x1924   :  { %6014 = vmatpush1.msra.mxu1 %v13745_v12  ;;  %6047 = vmatprep.mubr.f32.mxu1 %v13744_v55 }
0x1925   :  { %6096 = vmatprep.subr.mxu0 %v13746_v48  ;;  %6167 = vmatprep.subr.mxu1 %v13747_v13 }
0x19c4   :  { %v5794_v59 = vpop.f32.mrf.mxu0  ;;  %v5865_v62 = vpop.f32.mrf.mxu1 }
0x19c6   :  { %v5796_v16 = vpop.f32.mrf.mxu0  ;;  %v5867_v49 = vpop.f32.mrf.mxu1 }
0x19c7   :  { %v5874_v58 = vcombine.low %v5794_v59, %v5796_v16  ;;  %v5875_v17 = vcombine.low %v5865_v62, %v5867_v49 }
0x19c9   :  { %v5882_v47 = vrot.slane %v5874_v58, %v7966_v53  ;;  %v5889_v18 = vrot.slane %v5875_v17, %v7966_v53  ;;  %v12077_v17 = vld [vmem:[%s12588_s4 + $0x1a8] sm:$0xff] }
0x19cb   :  { %v5890_v45 = vcombine.low %v5882_v47, %v5889_v18  ;;  %v12083_v47 = vld [vmem:[%s12588_s4 + $0x1b8] sm:$0xff]  ;;  %v12089_v18 = vld [vmem:[%s12588_s4 + $0x1a0] sm:$0xff] }
0x19cd   :  { %v5892_v39 = vadd.f32 %v5890_v45, %v13748_v42  ;;  %v12059_v42 = vld [vmem:[%s12588_s4 + $0x1d8] sm:$0xff]  ;;  %v12065_v45 = vld [vmem:[%s12588_s4 + $0x1c0] sm:$0xff] }
0x19cf   :  { %v5893_v12 = vmul.f32 0.5, %v5892_v39  ;;  %v5898_v55 = vrot.slane %v5892_v39, 6  ;;  %v12053_v39 = vld [vmem:[%s12588_s4 + $0x1c8] sm:$0xff] }
0x19d1   :  { %7109 = vtanh.f32 %v5893_v12  ;;  %v12071_v12 = vld [vmem:[%s12588_s4 + $0x1d0] sm:$0xff] }
0x19d2   :  { %7111 = vtanh.f32 %v5898_v55  ;;  %v12095_v55 = vld [vmem:[%s12588_s4 + $0x1b0] sm:$0xff] }
0x19de   :  { %v7110_v48 = vpop.eup %7109 }
0x19df   :  { %v5895_v38 = vmul.f32 0.5, %v7110_v48  ;;  %v7112_v37 = vpop.eup %7111  ;;  %v12101_v48 = vld [vmem:[%s12588_s4 + $0x188] sm:$0xff] }
0x19e1   :  { %v5896_v13 = vadd.f32 0.5, %v5895_v38  ;;  %v12047_v38 = vld [vmem:[%s12588_s4 + $0x1f0] sm:$0xff] }
0x19e3   :  { %v5902_v5 = vrot.slane %v5896_v13, 2  ;;  %v5905_v16 = vmul.f32 %v7112_v37, %v5896_v13  ;;  %v5908_v58 = vrot.slane %v5896_v13, 4  ;;  %v12107_v13 = vld [vmem:[%s12588_s4 + $0x198] sm:$0xff] }
0x19e5   :  { %v5904_v43 = vmul.f32 %v5902_v5, %v11879_v19  ;;  %v12041_v5 = vld [vmem:[%s12588_s4 + $0x1e0] sm:$0xff] }
0x19e7   :  { %v11952_v59 = vadd.f32 %v5905_v16, %v5904_v43  ;;  %v12113_v16 = vld [vmem:[%s12588_s4 + $0x180] sm:$0xff] }
0x19e9   :  { %7113 = vtanh.f32 %v11952_v59 }
0x19f6   :  { %v7114_v62 = vpop.eup %7113 }
0x19f7   :  { %v5910_v49 = vmul.f32 %v7114_v62, %v5908_v58  ;;  %v12125_v58 = vld [vmem:[%s12588_s4 + $0x168] sm:$0xff]  ;;  %v12131_v62 = vld [vmem:[%s12588_s4 + $0x178] sm:$0xff] }
0x19f9   :  { %5977 = vmatmul.mubr.f32.vlgmr.msra.gmra.mxu0 %v5910_v49  ;;  %6048 = vmatmul.mubr.f32.vlgmr.msra.gmra.mxu1 %v5910_v49  ;;  %v12137_v49 = vld [vmem:[%s12588_s4 + $0x160] sm:$0xff] }
0x19fa   :  { %6097 = vmatpush1.msra.mxu0 %v11332_v51  ;;  %6168 = vmatpush1.msra.mxu1 %v11337_v20  ;;  %v13749_v51 = vld [vmem:[#allocation37_spill] sm:$0xff]  ;;  %v13750_v20 = vld [vmem:[#allocation40_spill] sm:$0xff] }
0x19fb   :  { %6098 = vmatprep.subr.mxu0 %v11344_v52  ;;  %6169 = vmatprep.subr.mxu1 %v11349_v56  ;;  %v13751_v52 = vld [vmem:[#allocation33_spill] sm:$0xff]  ;;  %v13752_v56 = vld [vmem:[#allocation34_spill] sm:$0xff] }
0x19fc   :  { %6099 = vmatpush1.msra.mxu0 %v11356_v15  ;;  %6170 = vmatpush1.msra.mxu1 %v11361_v10  ;;  %v13753_v15 = vld [vmem:[#allocation38_spill] sm:$0xff]  ;;  %v13754_v10 = vld [vmem:[#allocation39_spill] sm:$0xff] }
0x19fd   :  { %6100 = vmatprep.subr.mxu0 %v11368_v50  ;;  %6171 = vmatprep.subr.mxu1 %v11373_v30  ;;  %v13755_v50 = vld [vmem:[#allocation10_spill] sm:$0xff]  ;;  %v13756_v30 = vld [vmem:[#allocation11_spill] sm:$0xff] }
0x19fe   :  { %6101 = vmatpush1.msra.mxu0 %v11380_v0  ;;  %6172 = vmatpush1.msra.mxu1 %v11385_v2  ;;  %v13757_v0 = vld [vmem:[#allocation4_spill] sm:$0xff]  ;;  %v13758_v2 = vld [vmem:[#allocation26_spill] sm:$0xff] }
0x19ff   :  { %6102 = vmatprep.subr.mxu0 %v11392_v14  ;;  %6173 = vmatprep.subr.mxu1 %v11397_v60  ;;  %v13759_v14 = vld [vmem:[#allocation27_spill] sm:$0xff]  ;;  %v13760_v60 = vld [vmem:[#allocation12_spill] sm:$0xff] }
0x1a00   :  { %6103 = vmatpush1.msra.mxu0 %v11404_v27  ;;  %6174 = vmatpush1.msra.mxu1 %v11409_v3  ;;  %v13761_v27 = vld [vmem:[#allocation13_spill] sm:$0xff]  ;;  %v13762_v3 = vld [vmem:[#allocation36_spill] sm:$0xff] }
0x1a01   :  { %6104 = vmatprep.subr.mxu0 %v11416_v4  ;;  %6175 = vmatprep.subr.mxu1 %v11421_v28  ;;  %v13763_v4 = vld [vmem:[#allocation8_spill] sm:$0xff]  ;;  %v13764_v28 = vld [vmem:[#allocation9_spill] sm:$0xff] }
0x1a02   :  { %6105 = vmatpush1.msra.mxu0 %v11428_v24  ;;  %6176 = vmatpush1.msra.mxu1 %v11433_v40  ;;  %v13765_v24 = vld [vmem:[#allocation14_spill] sm:$0xff]  ;;  %v13766_v40 = vld [vmem:[#allocation15_spill] sm:$0xff] }
0x1a03   :  { %6106 = vmatprep.subr.mxu0 %v11440_v61  ;;  %6177 = vmatprep.subr.mxu1 %v11445_v36  ;;  %v13767_v61 = vmov 0.0   ;;  %v13768_v36 = vld [vmem:[#allocation16_spill] sm:$0xff] }
0x1a04   :  { %6107 = vmatpush1.msra.mxu0 %v11452_v46  ;;  %6178 = vmatpush1.msra.mxu1 %v11457_v54  ;;  %v12022_v46 = vld [vmem:[%s12588_s4 + $0x1e8] sm:$0xff]  ;;  %v12028_v54 = vld [vmem:[%s12588_s4 + $0x1f8] sm:$0xff] }
0x1a05   :  { %6108 = vmatprep.subr.mxu0 %v11464_v35  ;;  %6179 = vmatprep.subr.mxu1 %v11469_v32  ;;  %13769 = vst [vmem:[#allocation20_spill] sm:$0xff] %v12022_v46  ;;  %13770 = vst [vmem:[#allocation21_spill] sm:$0xff] %v12028_v54 }
0x1a06   :  { %6109 = vmatpush1.msra.mxu0 %v11476_v26  ;;  %6180 = vmatpush1.msra.mxu1 %v11481_v6 }
0x1a07   :  { %6110 = vmatprep.subr.mxu0 %v11488_v8  ;;  %6181 = vmatprep.subr.mxu1 %v11493_v11 }
0x1a08   :  { %6111 = vmatpush1.msra.mxu0 %v11498_v23  ;;  %6182 = vmatpush1.msra.mxu1 %v11505_v29 }
0x1a09   :  { %6112 = vmatprep.subr.mxu0 %v11510_v33  ;;  %6183 = vmatprep.subr.mxu1 %v11515_v31  ;;  %v13771_v31 = vld [vmem:[#allocation6_spill] sm:$0xff] }
0x1a0a   :  { %6113 = vmatpush1.msra.mxu0 %v11522_v44  ;;  %6184 = vmatpush1.msra.mxu1 %v11527_v57 }
0x1a0b   :  { %6114 = vmatprep.subr.mxu0 %v13671_v1  ;;  %6185 = vmatprep.subr.mxu1 %v13672_v34 }
0x1a0c   :  { %6115 = vmatpush1.msra.mxu0 %v13673_v21  ;;  %6186 = vmatpush1.msra.mxu1 %v13674_v25 }
0x1a0d   :  { %6116 = vmatprep.subr.mxu0 %v13675_v63  ;;  %6187 = vmatprep.subr.mxu1 %v13676_v7 }
0x1a0e   :  { %6117 = vmatpush1.msra.mxu0 %v13677_v22  ;;  %6188 = vmatpush1.msra.mxu1 %v13678_v41 }
0x1a0f   :  { %6118 = vmatprep.subr.mxu0 %v13679_v9  ;;  %6189 = vmatprep.subr.mxu1 %v13749_v51  ;;  %v12143_v51 = vld [vmem:[%s12588_s4 + $0x170] sm:$0xff] }
0x1a10   :  { %6119 = vmatpush1.msra.mxu0 %v13750_v20  ;;  %6190 = vmatpush1.msra.mxu1 %v13751_v52  ;;  %v12149_v20 = vld [vmem:[%s12588_s4 + $0x148] sm:$0xff]  ;;  %v12155_v52 = vld [vmem:[%s12588_s4 + $0x158] sm:$0xff] }
0x1a11   :  { %6120 = vmatprep.subr.mxu0 %v13752_v56  ;;  %6191 = vmatprep.subr.mxu1 %v13753_v15  ;;  %v12161_v56 = vld [vmem:[%s12588_s4 + $0x140] sm:$0xff]  ;;  %v12167_v15 = vld [vmem:[%s12588_s4 + $0x150] sm:$0xff] }
0x1a12   :  { %6121 = vmatpush1.msra.mxu0 %v13754_v10  ;;  %6192 = vmatpush1.msra.mxu1 %v13755_v50  ;;  %v12173_v10 = vld [vmem:[%s12588_s4 + $0x128] sm:$0xff]  ;;  %v12179_v50 = vld [vmem:[%s12588_s4 + $0x138] sm:$0xff] }
0x1a13   :  { %6122 = vmatprep.subr.mxu0 %v13756_v30  ;;  %6193 = vmatprep.subr.mxu1 %v13757_v0  ;;  %v12185_v30 = vld [vmem:[%s12588_s4 + $0x120] sm:$0xff]  ;;  %v12191_v0 = vld [vmem:[%s12588_s4 + $0x130] sm:$0xff] }
0x1a14   :  { %6123 = vmatpush1.msra.mxu0 %v13758_v2  ;;  %6194 = vmatpush1.msra.mxu1 %v13759_v14  ;;  %v12197_v2 = vld [vmem:[%s12588_s4 + $0x108] sm:$0xff]  ;;  %v12203_v14 = vld [vmem:[%s12588_s4 + $0x118] sm:$0xff] }
0x1a15   :  { %6124 = vmatprep.subr.mxu0 %v13760_v60  ;;  %6195 = vmatprep.subr.mxu1 %v13761_v27  ;;  %v12209_v60 = vld [vmem:[%s12588_s4 + $0x100] sm:$0xff]  ;;  %v12215_v27 = vld [vmem:[%s12588_s4 + $0x110] sm:$0xff] }
0x1a16   :  { %6125 = vmatpush1.msra.mxu0 %v13762_v3  ;;  %6196 = vmatpush1.msra.mxu1 %v13763_v4 }
0x1a17   :  { %6126 = vmatprep.subr.mxu0 %v13764_v28  ;;  %6197 = vmatprep.subr.mxu1 %v13765_v24 }
0x1a18   :  { %6127 = vmatpush1.msra.mxu0 %v13766_v40  ;;  %6160 = vmatprep.mubr.f32.mxu0 %v13767_v61 }
0x1a19   :  { %6198 = vmatpush1.msra.mxu1 %v13768_v36  ;;  %6231 = vmatprep.mubr.f32.mxu1 %v13767_v61 }
0x1a1a   :  { %6280 = vmatprep.subr.mxu0 %v12022_v46  ;;  %6351 = vmatprep.subr.mxu1 %v12028_v54 }
0x1ab9   :  { %v5978_v35 = vpop.f32.mrf.mxu0  ;;  %v6049_v32 = vpop.f32.mrf.mxu1 }
0x1abb   :  { %v5980_v26 = vpop.f32.mrf.mxu0  ;;  %v6051_v6 = vpop.f32.mrf.mxu1 }
0x1abc   :  { %v6058_v8 = vcombine.low %v5978_v35, %v5980_v26  ;;  %v6059_v11 = vcombine.low %v6049_v32, %v6051_v6  ;;  %v12221_v35 = vld [vmem:[%s12588_s4 + $0xe8] sm:$0xff]  ;;  %v12227_v32 = vld [vmem:[%s12588_s4 + $0xf8] sm:$0xff]  ;;  %v12233_v26 = vld [vmem:[%s12588_s4 + $0xe0] sm:$0xff] }
0x1abd   :  { %v12239_v6 = vld [vmem:[%s12588_s4 + $0xf0] sm:$0xff] }
0x1abe   :  { %v6066_v23 = vrot.slane %v6058_v8, %v7966_v53  ;;  %v6073_v29 = vrot.slane %v6059_v11, %v7966_v53  ;;  %v12245_v8 = vld [vmem:[%s12588_s4 + $0xc8] sm:$0xff]  ;;  %v12251_v11 = vld [vmem:[%s12588_s4 + $0xd8] sm:$0xff] }
0x1ac0   :  { %v6074_v33 = vcombine.low %v6066_v23, %v6073_v29  ;;  %v12257_v23 = vld [vmem:[%s12588_s4 + $0xc0] sm:$0xff]  ;;  %v12263_v29 = vld [vmem:[%s12588_s4 + $0xd0] sm:$0xff] }
0x1ac2   :  { %v6076_v44 = vadd.f32 %v6074_v33, %v13771_v31  ;;  %v12269_v33 = vld [vmem:[%s12588_s4 + $0xa8] sm:$0xff]  ;;  %v12275_v31 = vld [vmem:[%s12588_s4 + $0xb8] sm:$0xff] }
0x1ac4   :  { %v6077_v57 = vmul.f32 0.5, %v6076_v44  ;;  %v6082_v1 = vrot.slane %v6076_v44, 6  ;;  %v12281_v44 = vld [vmem:[%s12588_s4 + $0xa0] sm:$0xff] }
0x1ac6   :  { %7115 = vtanh.f32 %v6077_v57  ;;  %v12287_v57 = vld [vmem:[%s12588_s4 + $0xb0] sm:$0xff] }
0x1ac7   :  { %7117 = vtanh.f32 %v6082_v1  ;;  %v12293_v1 = vld [vmem:[%s12588_s4 + $0x88] sm:$0xff] }
0x1ad3   :  { %v7116_v34 = vpop.eup %7115 }
0x1ad4   :  { %v6079_v21 = vmul.f32 0.5, %v7116_v34  ;;  %v7118_v7 = vpop.eup %7117  ;;  %v12299_v34 = vld [vmem:[%s12588_s4 + $0x98] sm:$0xff] }
0x1ad5   :  { %13772 = vst [vmem:[#allocation22_spill] sm:$0xff] %v12299_v34 }
0x1ad6   :  { %v6080_v25 = vadd.f32 0.5, %v6079_v21  ;;  %v12305_v21 = vld [vmem:[%s12588_s4 + $0x80] sm:$0xff] }
0x1ad7   :  { %13773 = vst [vmem:[#allocation23_spill] sm:$0xff] %v12305_v21 }
0x1ad8   :  { %v6086_v63 = vrot.slane %v6080_v25, 2  ;;  %v6089_v41 = vmul.f32 %v7118_v7, %v6080_v25  ;;  %v6092_v19 = vrot.slane %v6080_v25, 4  ;;  %v12311_v25 = vld [vmem:[%s12588_s4 + $0x90] sm:$0xff]  ;;  %v12323_v7 = vld [vmem:[%s12588_s4 + $0x78] sm:$0xff] }
0x1ad9   :  { %13774 = vst [vmem:[#allocation24_spill] sm:$0xff] %v12311_v25  ;;  %13776 = vst [vmem:[#allocation42_spill] sm:$0xff] %v12323_v7 }
0x1ada   :  { %v6088_v22 = vmul.f32 %v6086_v63, %v11952_v59  ;;  %v12119_v59 = vld [vmem:[%s12588_s4 + $0x190] sm:$0xff]  ;;  %v12317_v63 = vld [vmem:[%s12588_s4 + $0x68] sm:$0xff] }
0x1adb   :  { %13775 = vst [vmem:[#allocation25_spill] sm:$0xff] %v12317_v63 }
0x1adc   :  { %v12035_v9 = vadd.f32 %v6089_v41, %v6088_v22  ;;  %v12329_v22 = vld [vmem:[%s12588_s4 + $0x60] sm:$0xff]  ;;  %v12335_v41 = vld [vmem:[%s12588_s4 + $0x70] sm:$0xff] }
0x1add   :  { %13777 = vst [vmem:[#allocation43_spill] sm:$0xff] %v12329_v22  ;;  %13778 = vst [vmem:[#allocation28_spill] sm:$0xff] %v12335_v41 }
0x1ade   :  { %7119 = vtanh.f32 %v12035_v9 }
0x1aeb   :  { %v7120_v43 = vpop.eup %7119 }
0x1aec   :  { %v6094_v37 = vmul.f32 %v7120_v43, %v6092_v19  ;;  %v12341_v19 = vld [vmem:[%s12588_s4 + $0x48] sm:$0xff]  ;;  %v12347_v43 = vld [vmem:[%s12588_s4 + $0x58] sm:$0xff] }
0x1aed   :  { %13779 = vst [vmem:[#allocation7_spill] sm:$0xff] %v12341_v19  ;;  %13780 = vst [vmem:[#allocation41_spill] sm:$0xff] %v12347_v43 }
0x1aee   :  { %6161 = vmatmul.mubr.f32.vlgmr.msra.gmra.mxu0 %v6094_v37  ;;  %6232 = vmatmul.mubr.f32.vlgmr.msra.gmra.mxu1 %v6094_v37  ;;  %v12353_v37 = vld [vmem:[%s12588_s4 + $0x40] sm:$0xff] }
0x1aef   :  { %6281 = vmatpush1.msra.mxu0 %v12041_v5  ;;  %6352 = vmatpush1.msra.mxu1 %v12047_v38  ;;  %13781 = vst [vmem:[#allocation18_spill] sm:$0xff] %v12353_v37 }
0x1af0   :  { %6282 = vmatprep.subr.mxu0 %v12053_v39  ;;  %6353 = vmatprep.subr.mxu1 %v12059_v42 }
0x1af1   :  { %6283 = vmatpush1.msra.mxu0 %v12065_v45  ;;  %6354 = vmatpush1.msra.mxu1 %v12071_v12 }
0x1af2   :  { %6284 = vmatprep.subr.mxu0 %v12077_v17  ;;  %6355 = vmatprep.subr.mxu1 %v12083_v47 }
0x1af3   :  { %6285 = vmatpush1.msra.mxu0 %v12089_v18  ;;  %6356 = vmatpush1.msra.mxu1 %v12095_v55 }
0x1af4   :  { %6286 = vmatprep.subr.mxu0 %v12101_v48  ;;  %6357 = vmatprep.subr.mxu1 %v12107_v13 }
0x1af5   :  { %6287 = vmatpush1.msra.mxu0 %v12113_v16  ;;  %6358 = vmatpush1.msra.mxu1 %v12119_v59 }
0x1af6   :  { %6288 = vmatprep.subr.mxu0 %v12125_v58  ;;  %6359 = vmatprep.subr.mxu1 %v12131_v62 }
0x1af7   :  { %6289 = vmatpush1.msra.mxu0 %v12137_v49  ;;  %6360 = vmatpush1.msra.mxu1 %v12143_v51 }
0x1af8   :  { %6290 = vmatprep.subr.mxu0 %v12149_v20  ;;  %6361 = vmatprep.subr.mxu1 %v12155_v52 }
0x1af9   :  { %6291 = vmatpush1.msra.mxu0 %v12161_v56  ;;  %6362 = vmatpush1.msra.mxu1 %v12167_v15 }
0x1afa   :  { %6292 = vmatprep.subr.mxu0 %v12173_v10  ;;  %6363 = vmatprep.subr.mxu1 %v12179_v50 }
0x1afb   :  { %6293 = vmatpush1.msra.mxu0 %v12185_v30  ;;  %6364 = vmatpush1.msra.mxu1 %v12191_v0 }
0x1afc   :  { %6294 = vmatprep.subr.mxu0 %v12197_v2  ;;  %6365 = vmatprep.subr.mxu1 %v12203_v14 }
0x1afd   :  { %6295 = vmatpush1.msra.mxu0 %v12209_v60  ;;  %6366 = vmatpush1.msra.mxu1 %v12215_v27 }
0x1afe   :  { %6296 = vmatprep.subr.mxu0 %v12221_v35  ;;  %6367 = vmatprep.subr.mxu1 %v12227_v32 }
0x1aff   :  { %6297 = vmatpush1.msra.mxu0 %v12233_v26  ;;  %6368 = vmatpush1.msra.mxu1 %v12239_v6 }
0x1b00   :  { %6298 = vmatprep.subr.mxu0 %v12245_v8  ;;  %6369 = vmatprep.subr.mxu1 %v12251_v11 }
0x1b01   :  { %6299 = vmatpush1.msra.mxu0 %v12257_v23  ;;  %6370 = vmatpush1.msra.mxu1 %v12263_v29 }
0x1b02   :  { %6300 = vmatprep.subr.mxu0 %v12269_v33  ;;  %6371 = vmatprep.subr.mxu1 %v12275_v31 }
0x1b03   :  { %6301 = vmatpush1.msra.mxu0 %v12281_v44  ;;  %6372 = vmatpush1.msra.mxu1 %v12287_v57 }
0x1b04   :  { %6302 = vmatprep.subr.mxu0 %v12293_v1  ;;  %6373 = vmatprep.subr.mxu1 %v12299_v34 }
0x1b05   :  { %6303 = vmatpush1.msra.mxu0 %v12305_v21  ;;  %6374 = vmatpush1.msra.mxu1 %v12311_v25 }
0x1b06   :  { %6304 = vmatprep.subr.mxu0 %v12317_v63  ;;  %6375 = vmatprep.subr.mxu1 %v12323_v7 }
0x1b07   :  { %6305 = vmatpush1.msra.mxu0 %v12329_v22  ;;  %6376 = vmatpush1.msra.mxu1 %v12335_v41  ;;  %v12359_v41 = vld [vmem:[%s12588_s4 + $0x50] sm:$0xff]  ;;  %v13785_v22 = vld [vmem:[#allocation35_spill] sm:$0xff] }
0x1b08   :  { %6306 = vmatprep.subr.mxu0 %v12341_v19  ;;  %6377 = vmatprep.subr.mxu1 %v12347_v43  ;;  %13782 = vst [vmem:[#allocation19_spill] sm:$0xff] %v12359_v41  ;;  %v12365_v19 = vld [vmem:[%s12588_s4 + $0x28] sm:$0xff]  ;;  %v12371_v43 = vld [vmem:[%s12588_s4 + $0x38] sm:$0xff] }
0x1b09   :  { %6307 = vmatpush1.msra.mxu0 %v12353_v37  ;;  %6378 = vmatpush1.msra.mxu1 %v12359_v41  ;;  %13783 = vst [vmem:[#allocation5_spill] sm:$0xff] %v12365_v19  ;;  %13784 = vst [vmem:[#allocation37_spill] sm:$0xff] %v12371_v43 }
0x1b0a   :  { %6308 = vmatprep.subr.mxu0 %v12365_v19  ;;  %6379 = vmatprep.subr.mxu1 %v12371_v43 }
0x1b0b   :  { %6309 = vmatpush1.msra.mxu0 %v13762_v3  ;;  %6380 = vmatpush1.msra.mxu1 %v13763_v4 }
0x1b0c   :  { %6310 = vmatprep.subr.mxu0 %v13764_v28  ;;  %6381 = vmatprep.subr.mxu1 %v13765_v24 }
0x1b0d   :  { %6311 = vmatpush1.msra.mxu0 %v13766_v40  ;;  %6344 = vmatprep.mubr.f32.mxu0 %v13767_v61 }
0x1b0e   :  { %6382 = vmatpush1.msra.mxu1 %v13768_v36  ;;  %6415 = vmatprep.mubr.f32.mxu1 %v13767_v61 }
0x1b0f   :  { %6464 = vmatprep.subr.mxu0 %v12022_v46  ;;  %6535 = vmatprep.subr.mxu1 %v12028_v54 }
0x1bae   :  { %v6162_v43 = vpop.f32.mrf.mxu0  ;;  %v6233_v3 = vpop.f32.mrf.mxu1 }
0x1bb0   :  { %v6164_v19 = vpop.f32.mrf.mxu0  ;;  %v6235_v4 = vpop.f32.mrf.mxu1 }
0x1bb1   :  { %v6242_v41 = vcombine.low %v6162_v43, %v6164_v19  ;;  %v6243_v28 = vcombine.low %v6233_v3, %v6235_v4 }
0x1bb3   :  { %v6250_v24 = vrot.slane %v6242_v41, %v7966_v53  ;;  %v6257_v40 = vrot.slane %v6243_v28, %v7966_v53  ;;  %v13797_v28 = vld [vmem:[#allocation5_spill] sm:$0xff] }
0x1bb5   :  { %v6258_v37 = vcombine.low %v6250_v24, %v6257_v40  ;;  %v13798_v24 = vld [vmem:[#allocation37_spill] sm:$0xff]  ;;  %v12450_v40 = vld [vmem:[%s12588_s4 + $0x20] sm:$0xff] }
0x1bb6   :  { %13799 = vst [vmem:[#allocation40_spill] sm:$0xff] %v12450_v40 }
0x1bb7   :  { %v6260_v7 = vadd.f32 %v6258_v37, %v13785_v22  ;;  %v13795_v22 = vld [vmem:[#allocation18_spill] sm:$0xff]  ;;  %v13796_v37 = vld [vmem:[#allocation19_spill] sm:$0xff] }
0x1bb9   :  { %v6261_v36 = vmul.f32 0.5, %v6260_v7  ;;  %v6266_v61 = vrot.slane %v6260_v7, 6  ;;  %v13794_v7 = vld [vmem:[#allocation41_spill] sm:$0xff] }
0x1bbb   :  { %7121 = vtanh.f32 %v6261_v36  ;;  %v12456_v36 = vld [vmem:[%s12588_s4 + $0x30] sm:$0xff] }
0x1bbc   :  { %7123 = vtanh.f32 %v6266_v61  ;;  %v13786_v61 = vld [vmem:[#allocation22_spill] sm:$0xff]  ;;  %13800 = vst [vmem:[#allocation33_spill] sm:$0xff] %v12456_v36 }
0x1bc8   :  { %v7122_v46 = vpop.eup %7121 }
0x1bc9   :  { %v6263_v63 = vmul.f32 0.5, %v7122_v46  ;;  %v7124_v21 = vpop.eup %7123  ;;  %v13787_v46 = vld [vmem:[#allocation23_spill] sm:$0xff] }
0x1bcb   :  { %v6264_v54 = vadd.f32 0.5, %v6263_v63  ;;  %v13793_v63 = vld [vmem:[#allocation7_spill] sm:$0xff] }
0x1bcd   :  { %v6270_v25 = vrot.slane %v6264_v54, 2  ;;  %v6273_v19 = vmul.f32 %v7124_v21, %v6264_v54  ;;  %v6276_v41 = vrot.slane %v6264_v54, 4  ;;  %v13788_v54 = vld [vmem:[#allocation24_spill] sm:$0xff]  ;;  %v13791_v21 = vld [vmem:[#allocation43_spill] sm:$0xff] }
0x1bcf   :  { %v6272_v34 = vmul.f32 %v6270_v25, %v12035_v9  ;;  %v13789_v9 = vld [vmem:[#allocation25_spill] sm:$0xff]  ;;  %v13792_v25 = vld [vmem:[#allocation28_spill] sm:$0xff] }
0x1bd1   :  { %v12388_v43 = vadd.f32 %v6273_v19, %v6272_v34  ;;  %v13790_v34 = vld [vmem:[#allocation42_spill] sm:$0xff]  ;;  %v12462_v19 = vld [vmem:[%s12588_s4 + $0x8] sm:$0xff] }
0x1bd2   :  { %13801 = vst [vmem:[#allocation34_spill] sm:$0xff] %v12462_v19 }
0x1bd3   :  { %7125 = vtanh.f32 %v12388_v43 }
0x1be0   :  { %v7126_v3 = vpop.eup %7125 }
0x1be1   :  { %v6278_v4 = vmul.f32 %v7126_v3, %v6276_v41  ;;  %v12468_v41 = vld [vmem:[%s12588_s4 + $0x18] sm:$0xff]  ;;  %v12474_v3 = vld [vmem:[%s12588_s4] sm:$0xff] }
0x1be2   :  { %13802 = vst [vmem:[#allocation38_spill] sm:$0xff] %v12468_v41  ;;  %13803 = vst [vmem:[#allocation39_spill] sm:$0xff] %v12474_v3 }
0x1be3   :  { %6345 = vmatmul.mubr.f32.vlgmr.msra.gmra.mxu0 %v6278_v4  ;;  %6416 = vmatmul.mubr.f32.vlgmr.msra.gmra.mxu1 %v6278_v4  ;;  %v13804_v4 = vmov 0.0  }
0x1be4   :  { %6465 = vmatpush1.msra.mxu0 %v12041_v5  ;;  %6536 = vmatpush1.msra.mxu1 %v12047_v38 }
0x1be5   :  { %6466 = vmatprep.subr.mxu0 %v12053_v39  ;;  %6537 = vmatprep.subr.mxu1 %v12059_v42 }
0x1be6   :  { %6467 = vmatpush1.msra.mxu0 %v12065_v45  ;;  %6538 = vmatpush1.msra.mxu1 %v12071_v12 }
0x1be7   :  { %6468 = vmatprep.subr.mxu0 %v12077_v17  ;;  %6539 = vmatprep.subr.mxu1 %v12083_v47 }
0x1be8   :  { %6469 = vmatpush1.msra.mxu0 %v12089_v18  ;;  %6540 = vmatpush1.msra.mxu1 %v12095_v55 }
0x1be9   :  { %6470 = vmatprep.subr.mxu0 %v12101_v48  ;;  %6541 = vmatprep.subr.mxu1 %v12107_v13 }
0x1bea   :  { %6471 = vmatpush1.msra.mxu0 %v12113_v16  ;;  %6542 = vmatpush1.msra.mxu1 %v12119_v59 }
0x1beb   :  { %6472 = vmatprep.subr.mxu0 %v12125_v58  ;;  %6543 = vmatprep.subr.mxu1 %v12131_v62 }
0x1bec   :  { %6473 = vmatpush1.msra.mxu0 %v12137_v49  ;;  %6544 = vmatpush1.msra.mxu1 %v12143_v51 }
0x1bed   :  { %6474 = vmatprep.subr.mxu0 %v12149_v20  ;;  %6545 = vmatprep.subr.mxu1 %v12155_v52 }
0x1bee   :  { %6475 = vmatpush1.msra.mxu0 %v12161_v56  ;;  %6546 = vmatpush1.msra.mxu1 %v12167_v15 }
0x1bef   :  { %6476 = vmatprep.subr.mxu0 %v12173_v10  ;;  %6547 = vmatprep.subr.mxu1 %v12179_v50 }
0x1bf0   :  { %6477 = vmatpush1.msra.mxu0 %v12185_v30  ;;  %6548 = vmatpush1.msra.mxu1 %v12191_v0 }
0x1bf1   :  { %6478 = vmatprep.subr.mxu0 %v12197_v2  ;;  %6549 = vmatprep.subr.mxu1 %v12203_v14 }
0x1bf2   :  { %6479 = vmatpush1.msra.mxu0 %v12209_v60  ;;  %6550 = vmatpush1.msra.mxu1 %v12215_v27 }
0x1bf3   :  { %6480 = vmatprep.subr.mxu0 %v12221_v35  ;;  %6551 = vmatprep.subr.mxu1 %v12227_v32 }
0x1bf4   :  { %6481 = vmatpush1.msra.mxu0 %v12233_v26  ;;  %6552 = vmatpush1.msra.mxu1 %v12239_v6 }
0x1bf5   :  { %6482 = vmatprep.subr.mxu0 %v12245_v8  ;;  %6553 = vmatprep.subr.mxu1 %v12251_v11 }
0x1bf6   :  { %6483 = vmatpush1.msra.mxu0 %v12257_v23  ;;  %6554 = vmatpush1.msra.mxu1 %v12263_v29 }
0x1bf7   :  { %6484 = vmatprep.subr.mxu0 %v12269_v33  ;;  %6555 = vmatprep.subr.mxu1 %v12275_v31 }
0x1bf8   :  { %6485 = vmatpush1.msra.mxu0 %v12281_v44  ;;  %6556 = vmatpush1.msra.mxu1 %v12287_v57 }
0x1bf9   :  { %6486 = vmatprep.subr.mxu0 %v12293_v1  ;;  %6557 = vmatprep.subr.mxu1 %v13786_v61 }
0x1bfa   :  { %6487 = vmatpush1.msra.mxu0 %v13787_v46  ;;  %6558 = vmatpush1.msra.mxu1 %v13788_v54 }
0x1bfb   :  { %6488 = vmatprep.subr.mxu0 %v13789_v9  ;;  %6559 = vmatprep.subr.mxu1 %v13790_v34 }
0x1bfc   :  { %6489 = vmatpush1.msra.mxu0 %v13791_v21  ;;  %6560 = vmatpush1.msra.mxu1 %v13792_v25  ;;  %v13808_v21 = vld [vmem:[#allocation44_spill] sm:$0xff] }
0x1bfd   :  { %6490 = vmatprep.subr.mxu0 %v13793_v63  ;;  %6561 = vmatprep.subr.mxu1 %v13794_v7 }
0x1bfe   :  { %6491 = vmatpush1.msra.mxu0 %v13795_v22  ;;  %6562 = vmatpush1.msra.mxu1 %v13796_v37 }
0x1bff   :  { %6492 = vmatprep.subr.mxu0 %v13797_v28  ;;  %6563 = vmatprep.subr.mxu1 %v13798_v24 }
0x1c00   :  { %6493 = vmatpush1.msra.mxu0 %v12450_v40  ;;  %6564 = vmatpush1.msra.mxu1 %v12456_v36  ;;  %v13806_v36 = vld [vmem:[#allocation20_spill] sm:$0xff] }
0x1c01   :  { %6494 = vmatprep.subr.mxu0 %v12462_v19  ;;  %6565 = vmatprep.subr.mxu1 %v12468_v41  ;;  %v12481_v19 = vld [vmem:[%s12588_s4 + $0x10] sm:$0xff] }
0x1c02   :  { %6495 = vmatpush1.msra.mxu0 %v12474_v3  ;;  %6528 = vmatprep.mubr.f32.mxu0 %v13804_v4  ;;  %13805 = vst [vmem:[#allocation10_spill] sm:$0xff] %v12481_v19  ;;  %v13807_v41 = vld [vmem:[#allocation21_spill] sm:$0xff] }
0x1c03   :  { %6566 = vmatpush1.msra.mxu1 %v12481_v19  ;;  %6599 = vmatprep.mubr.f32.mxu1 %v13804_v4 }
0x1c04   :  { %6648 = vmatprep.subr.mxu0 %v13806_v36  ;;  %6719 = vmatprep.subr.mxu1 %v13807_v41 }
0x1ca3   :  { %v6346_v40 = vpop.f32.mrf.mxu0  ;;  %v6417_v24 = vpop.f32.mrf.mxu1 }
0x1ca5   :  { %v6348_v28 = vpop.f32.mrf.mxu0  ;;  %v6419_v37 = vpop.f32.mrf.mxu1 }
0x1ca6   :  { %v6426_v3 = vcombine.low %v6346_v40, %v6348_v28  ;;  %v6427_v22 = vcombine.low %v6417_v24, %v6419_v37  ;;  %v13833_v24 = vld [vmem:[#allocation32_spill] sm:$0xff] }
0x1ca8   :  { %v6434_v7 = vrot.slane %v6426_v3, %v7966_v53  ;;  %v6441_v63 = vrot.slane %v6427_v22, %v7966_v53  ;;  %v5218_v3 = vpop.permute.xlu1 %5217 }
0x1caa   :  { %v6442_v25 = vcombine.low %v6434_v7, %v6441_v63 }
0x1cac   :  { %v6444_v34 = vadd.f32 %v6442_v25, %v13808_v21  ;;  %v13832_v21 = vld [vmem:[#allocation31_spill] sm:$0xff] }
0x1cae   :  { %v6445_v19 = vmul.f32 0.5, %v6444_v34  ;;  %v6450_v4 = vrot.slane %v6444_v34, 6 }
0x1cb0   :  { %7127 = vtanh.f32 %v6445_v19  ;;  %v5245_v19 = vld [vmem:[%s12592_s5] sm:$0xf] }
0x1cb1   :  { %7129 = vtanh.f32 %v6450_v4 }
0x1cbd   :  { %v7128_v36 = vpop.eup %7127 }
0x1cbe   :  { %v6447_v9 = vmul.f32 0.5, %v7128_v36  ;;  %v7130_v46 = vpop.eup %7129 }
0x1cc0   :  { %v6448_v41 = vadd.f32 0.5, %v6447_v9  ;;  %v13831_v9 = vld [vmem:[#allocation30_spill] sm:$0xff] }
0x1cc1   :  { %v5254_v36 = vrot.slane %v5245_v19, %v13831_v9 }
0x1cc2   :  { %v6454_v54 = vrot.slane %v6448_v41, 2  ;;  %v6457_v28 = vmul.f32 %v7130_v46, %v6448_v41  ;;  %v6460_v22 = vrot.slane %v6448_v41, 4  ;;  %v13830_v46 = vld [vmem:[#allocation29_spill] sm:$0xff]  ;;  %v5258_v41 = vrot.slane %v5245_v19, %v13832_v21 }
0x1cc3   :  { %v5250_v4 = vrot.slane %v5245_v19, %v13830_v46 }
0x1cc4   :  { %v6456_v61 = vmul.f32 %v6454_v54, %v12388_v43 }
0x1cc6   :  { %v12491_v37 = vadd.f32 %v6457_v28, %v6456_v61  ;;  %v5214_v61 = vld [vmem:[%s12591_s3] sm:$0xf]  ;;  %v5262_v28 = vrot.slane %v5245_v19, %v13833_v24 }
0x1cc7   :  { %v5224_v54 = vrot.slane %v5214_v61, %v13830_v46  ;;  %v5228_v34 = vrot.slane %v5214_v61, %v13831_v9  ;;  %v5232_v25 = vrot.slane %v5214_v61, %v13832_v21  ;;  %v5236_v40 = vrot.slane %v5214_v61, %v13833_v24 }
0x1cc8   :  { %7131 = vtanh.f32 %v12491_v37 }
0x1cd5   :  { %v7132_v63 = vpop.eup %7131 }
0x1cd6   :  { %v6462_v7 = vmul.f32 %v7132_v63, %v6460_v22  ;;  %v5242_v22 = vmul.f32 %v5228_v34, %v5218_v3  ;;  %v5243_v63 = vmul.f32 %v5232_v25, %v5218_v3 }
0x1cd8   :  { %6529 = vmatmul.mubr.f32.vlgmr.msra.gmra.mxu0 %v6462_v7  ;;  %6600 = vmatmul.mubr.f32.vlgmr.msra.gmra.mxu1 %v6462_v7  ;;  %v5244_v7 = vmul.f32 %v5236_v40, %v5218_v3 }
0x1cd9   :  { %6649 = vmatpush1.msra.mxu0 %v12041_v5  ;;  %6720 = vmatpush1.msra.mxu1 %v12047_v38  ;;  %v13809_v5 = vld [vmem:[#allocation22_spill] sm:$0xff]  ;;  %v13810_v38 = vld [vmem:[#allocation23_spill] sm:$0xff] }
0x1cda   :  { %6650 = vmatprep.subr.mxu0 %v12053_v39  ;;  %6721 = vmatprep.subr.mxu1 %v12059_v42  ;;  %v13811_v39 = vld [vmem:[#allocation24_spill] sm:$0xff]  ;;  %v13812_v42 = vld [vmem:[#allocation25_spill] sm:$0xff] }
0x1cdb   :  { %6651 = vmatpush1.msra.mxu0 %v12065_v45  ;;  %6722 = vmatpush1.msra.mxu1 %v12071_v12  ;;  %v13813_v45 = vld [vmem:[#allocation42_spill] sm:$0xff]  ;;  %v13814_v12 = vld [vmem:[#allocation43_spill] sm:$0xff] }
0x1cdc   :  { %6652 = vmatprep.subr.mxu0 %v12077_v17  ;;  %6723 = vmatprep.subr.mxu1 %v12083_v47  ;;  %v13815_v17 = vld [vmem:[#allocation28_spill] sm:$0xff]  ;;  %v13816_v47 = vld [vmem:[#allocation7_spill] sm:$0xff] }
0x1cdd   :  { %6653 = vmatpush1.msra.mxu0 %v12089_v18  ;;  %6724 = vmatpush1.msra.mxu1 %v12095_v55  ;;  %v13817_v18 = vld [vmem:[#allocation41_spill] sm:$0xff]  ;;  %v13818_v55 = vld [vmem:[#allocation18_spill] sm:$0xff] }
0x1cde   :  { %6654 = vmatprep.subr.mxu0 %v12101_v48  ;;  %6725 = vmatprep.subr.mxu1 %v12107_v13  ;;  %v13819_v48 = vld [vmem:[#allocation19_spill] sm:$0xff]  ;;  %v13820_v13 = vld [vmem:[#allocation5_spill] sm:$0xff] }
0x1cdf   :  { %6655 = vmatpush1.msra.mxu0 %v12113_v16  ;;  %6726 = vmatpush1.msra.mxu1 %v12119_v59  ;;  %v13821_v16 = vld [vmem:[#allocation37_spill] sm:$0xff]  ;;  %v13822_v59 = vld [vmem:[#allocation40_spill] sm:$0xff] }
0x1ce0   :  { %6656 = vmatprep.subr.mxu0 %v12125_v58  ;;  %6727 = vmatprep.subr.mxu1 %v12131_v62  ;;  %v13823_v58 = vld [vmem:[#allocation33_spill] sm:$0xff]  ;;  %v13824_v62 = vld [vmem:[#allocation34_spill] sm:$0xff] }
0x1ce1   :  { %6657 = vmatpush1.msra.mxu0 %v12137_v49  ;;  %6728 = vmatpush1.msra.mxu1 %v12143_v51  ;;  %v13825_v49 = vld [vmem:[#allocation38_spill] sm:$0xff]  ;;  %v13826_v51 = vld [vmem:[#allocation39_spill] sm:$0xff] }
0x1ce2   :  { %6658 = vmatprep.subr.mxu0 %v12149_v20  ;;  %6729 = vmatprep.subr.mxu1 %v12155_v52  ;;  %v13827_v20 = vmov 0.0   ;;  %v13828_v52 = vld [vmem:[#allocation10_spill] sm:$0xff] }
0x1ce3   :  { %6659 = vmatpush1.msra.mxu0 %v12161_v56  ;;  %6730 = vmatpush1.msra.mxu1 %v12167_v15 }
0x1ce4   :  { %6660 = vmatprep.subr.mxu0 %v12173_v10  ;;  %6731 = vmatprep.subr.mxu1 %v12179_v50 }
0x1ce5   :  { %6661 = vmatpush1.msra.mxu0 %v12185_v30  ;;  %6732 = vmatpush1.msra.mxu1 %v12191_v0 }
0x1ce6   :  { %6662 = vmatprep.subr.mxu0 %v12197_v2  ;;  %6733 = vmatprep.subr.mxu1 %v12203_v14 }
0x1ce7   :  { %6663 = vmatpush1.msra.mxu0 %v12209_v60  ;;  %6734 = vmatpush1.msra.mxu1 %v12215_v27  ;;  %v13829_v27 = vld [vmem:[#allocation17_spill] sm:$0xff] }
0x1ce8   :  { %6664 = vmatprep.subr.mxu0 %v12221_v35  ;;  %6735 = vmatprep.subr.mxu1 %v12227_v32 }
0x1ce9   :  { %6665 = vmatpush1.msra.mxu0 %v12233_v26  ;;  %6736 = vmatpush1.msra.mxu1 %v12239_v6 }
0x1cea   :  { %6666 = vmatprep.subr.mxu0 %v12245_v8  ;;  %6737 = vmatprep.subr.mxu1 %v12251_v11 }
0x1ceb   :  { %6667 = vmatpush1.msra.mxu0 %v12257_v23  ;;  %6738 = vmatpush1.msra.mxu1 %v12263_v29 }
0x1cec   :  { %6668 = vmatprep.subr.mxu0 %v12269_v33  ;;  %6739 = vmatprep.subr.mxu1 %v12275_v31 }
0x1ced   :  { %6669 = vmatpush1.msra.mxu0 %v12281_v44  ;;  %6740 = vmatpush1.msra.mxu1 %v12287_v57 }
0x1cee   :  { %6670 = vmatprep.subr.mxu0 %v12293_v1  ;;  %6741 = vmatprep.subr.mxu1 %v13809_v5 }
0x1cef   :  { %6671 = vmatpush1.msra.mxu0 %v13810_v38  ;;  %6742 = vmatpush1.msra.mxu1 %v13811_v39  ;;  %v5268_v38 = vadd.f32 %v5254_v36, %v5242_v22  ;;  %v5269_v39 = vadd.f32 %v5258_v41, %v5243_v63 }
0x1cf0   :  { %6672 = vmatprep.subr.mxu0 %v13812_v42  ;;  %6743 = vmatprep.subr.mxu1 %v13813_v45  ;;  %v5270_v42 = vadd.f32 %v5262_v28, %v5244_v7 }
0x1cf1   :  { %6673 = vmatpush1.msra.mxu0 %v13814_v12  ;;  %6744 = vmatpush1.msra.mxu1 %v13815_v17 }
0x1cf2   :  { %6674 = vmatprep.subr.mxu0 %v13816_v47  ;;  %6745 = vmatprep.subr.mxu1 %v13817_v18  ;;  %v5276_v12 = vcombine.low %v5269_v39, %v5270_v42 }
0x1cf3   :  { %6675 = vmatpush1.msra.mxu0 %v13818_v55  ;;  %6746 = vmatpush1.msra.mxu1 %v13819_v48 }
0x1cf4   :  { %6676 = vmatprep.subr.mxu0 %v13820_v13  ;;  %6747 = vmatprep.subr.mxu1 %v13821_v16  ;;  %v5290_v13 = vrot.slane %v5276_v12, %v7966_v53 }
0x1cf5   :  { %6677 = vmatpush1.msra.mxu0 %v13822_v59  ;;  %6748 = vmatpush1.msra.mxu1 %v13823_v58 }
0x1cf6   :  { %6678 = vmatprep.subr.mxu0 %v13824_v62  ;;  %6749 = vmatprep.subr.mxu1 %v13825_v49 }
0x1cf7   :  { %6679 = vmatpush1.msra.mxu0 %v13826_v51  ;;  %6712 = vmatprep.mubr.f32.mxu0 %v13827_v20 }
0x1cf8   :  { %6750 = vmatpush1.msra.mxu1 %v13828_v52  ;;  %6783 = vmatprep.mubr.f32.mxu1 %v13827_v20 }
0x1d98   :  { %v6530_v56 = vpop.f32.mrf.mxu0  ;;  %v6601_v15 = vpop.f32.mrf.mxu1 }
0x1d9a   :  { %v6532_v10 = vpop.f32.mrf.mxu0  ;;  %v6603_v50 = vpop.f32.mrf.mxu1 }
0x1d9b   :  { %v6610_v30 = vcombine.low %v6530_v56, %v6532_v10  ;;  %v6611_v0 = vcombine.low %v6601_v15, %v6603_v50 }
0x1d9d   :  { %v6618_v2 = vrot.slane %v6610_v30, %v7966_v53  ;;  %v6625_v14 = vrot.slane %v6611_v0, %v7966_v53 }
0x1d9f   :  { %v6626_v60 = vcombine.low %v6618_v2, %v6625_v14 }
0x1da1   :  { %v6628_v35 = vadd.f32 %v6626_v60, %v13829_v27 }
0x1da3   :  { %v6629_v32 = vmul.f32 0.5, %v6628_v35  ;;  %v6634_v26 = vrot.slane %v6628_v35, 6 }
0x1da5   :  { %7133 = vtanh.f32 %v6629_v32 }
0x1da6   :  { %7135 = vtanh.f32 %v6634_v26 }
0x1db2   :  { %v7134_v6 = vpop.eup %7133 }
0x1db3   :  { %v6631_v8 = vmul.f32 0.5, %v7134_v6  ;;  %v7136_v29 = vpop.eup %7135 }
0x1db5   :  { %v6632_v11 = vadd.f32 0.5, %v6631_v8  ;;  %v6946_v8 = vld [vmem:[#allocation3] ss:$0 sm:$0xff] }
0x1db7   :  { %v6638_v23 = vrot.slane %v6632_v11, 2  ;;  %v6641_v31 = vmul.f32 %v7136_v29, %v6632_v11  ;;  %v6644_v57 = vrot.slane %v6632_v11, 4 }
0x1db9   :  { %v6640_v33 = vmul.f32 %v6638_v23, %v12491_v37  ;;  %v5241_v37 = vmul.f32 %v5224_v54, %v5218_v3 }
0x1dbb   :  { %v6642_v44 = vadd.f32 %v6641_v31, %v6640_v33  ;;  %v5267_v5 = vadd.f32 %v5250_v4, %v5241_v37 }
0x1dbd   :  { %7137 = vtanh.f32 %v6642_v44  ;;  %v5275_v45 = vcombine.low %v5267_v5, %v5268_v38 }
0x1dbf   :  { %v5283_v48 = vrot.slane %v5275_v45, %v7966_v53 }
0x1dc1   :  { %v5291_v49 = vcombine.low %v5283_v48, %v5290_v13 }
0x1dca   :  { %v7138_v1 = vpop.eup %7137 }
0x1dcb   :  { %v6646_v43 = vmul.f32 %v7138_v1, %v6644_v57 }
0x1dcd   :  { %6713 = vmatmul.mubr.f32.vlgmr.msra.gmra.mxu0 %v6646_v43  ;;  %6784 = vmatmul.mubr.f32.vlgmr.msra.gmra.mxu1 %v6646_v43 }
0x1e8d   :  { %v6714_v17 = vpop.f32.mrf.mxu0  ;;  %v6785_v47 = vpop.f32.mrf.mxu1 }
0x1e8f   :  { %v6716_v18 = vpop.f32.mrf.mxu0  ;;  %v6787_v55 = vpop.f32.mrf.mxu1 }
0x1e90   :  { %v6794_v16 = vcombine.low %v6714_v17, %v6716_v18  ;;  %v6795_v59 = vcombine.low %v6785_v47, %v6787_v55 }
0x1e92   :  { %v6802_v58 = vrot.slane %v6794_v16, %v7966_v53  ;;  %v6809_v62 = vrot.slane %v6795_v59, %v7966_v53  ;;  %v6945_v53 = vld [vmem:[%s12595_s6] ss:$0 sm:$0xff] }
0x1e94   :  { %v6810_v51 = vcombine.low %v6802_v58, %v6809_v62 }
0x1e96   :  { %v6812_v20 = vadd.f32 %v6810_v51, %v5291_v49 }
0x1e98   :  { %v6813_v52 = vmul.f32 0.5, %v6812_v20  ;;  %v6818_v56 = vrot.slane %v6812_v20, 6 }
0x1e9a   :  { %7139 = vtanh.f32 %v6813_v52 }
0x1e9b   :  { %7141 = vtanh.f32 %v6818_v56 }
0x1ea7   :  { %v7140_v15 = vpop.eup %7139 }
0x1ea8   :  { %v6815_v10 = vmul.f32 0.5, %v7140_v15  ;;  %v7142_v0 = vpop.eup %7141 }
0x1eaa   :  { %v6816_v50 = vadd.f32 0.5, %v6815_v10 }
0x1eac   :  { %v6822_v30 = vrot.slane %v6816_v50, 2  ;;  %v6825_v14 = vmul.f32 %v7142_v0, %v6816_v50  ;;  %v6828_v27 = vrot.slane %v6816_v50, 4 }
0x1eae   :  { %v6824_v2 = vmul.f32 %v6822_v30, %v6642_v44 }
0x1eb0   :  { %v6826_v60 = vadd.f32 %v6825_v14, %v6824_v2 }
0x1eb2   :  { %7143 = vtanh.f32 %v6826_v60 }
0x1ebf   :  { %v7144_v35 = vpop.eup %7143 }
0x1ec0   :  { %v6830_v32 = vmul.f32 %v7144_v35, %v6828_v27 }
0x1ec2   :  { %v6838_v26 = vmul.f32 %v6945_v53, %v6830_v32 }
0x1ec4   :  { %v6839_v6 = vsel %vm1924_vm0, %v6838_v26, 0.0 }
0x1ec5   :  { %6840 = vadd.xlane.f32.xlu0 %v6839_v6 }
0x1f4e   :  { %v6841_v11 = vpop.xlane.xlu0 %6840 }
0x1f4f   :  { %v6849_v23 = vadd.f32 %v6946_v8, %v6841_v11 }
0x1f51   :  { %6947 = vst.msk [vmem:[%s12596_s8 + $0x6] sm:$0x3] %vm1936_vm1, %v6849_v23 }

</bundles_post_ra>
